<compile_context>
chip_gen: v6e
topology: v6e:2x2x1
jax: 0.10.0
libtpu: 0.0.40
codegen_flags: <defaults>
</compile_context>

<pallas_src>
import functools

import jax
import jax.numpy as jnp
from jax.experimental import pallas as pl
from jax.experimental.pallas import tpu as pltpu

LANE = 128
BN_EPS = 1e-5


def _pick_row_chunk(h, w):
    """Rows per inner chunk so the flattened matmul M dim is ~128.

    The (TH, W, Cin) -> (TH*W, Cin) collapse is layout-free only when W is a
    multiple of the packed bf16 sublane tile (16); otherwise fall back to
    per-row dots (TH == 1, the previous behaviour)."""
    if w % 16 != 0:
        return 1
    cap = max(1, 128 // w)
    th = 1
    for t in range(1, min(h, cap) + 1):
        if h % t == 0:
            th = t
    return th


# -----------------------------------------------------------------------------
# Pallas kernel: fused conv3x3 -> BatchNorm(train) -> ReLU
# -----------------------------------------------------------------------------
def _conv_bn_relu_kernel(x_ref, w_ref, g_ref, b_ref, o_ref,
                         conv_ref, sum_ref, ssq_ref,
                         *, H, W, TH, Cp, out_c, inv_m):
    """Grid = (phase, N); one whole padded image per step.

    phase 0: 3x3 conv (9 shifted-slice matmuls, M = TH*W per dot) written once
             to the VMEM conv scratch + global per-channel sum / sum-of-squares.
    phase 1: folded BN affine + ReLU applied to the VMEM-resident conv output
             (pure VPU epilogue; no conv recompute, no extra input DMA)."""
    p = pl.program_id(0)
    n = pl.program_id(1)
    M = TH * W
    n_chunks = H // TH

    @pl.when((p == 0) & (n == 0))
    def _init():
        sum_ref[...] = jnp.zeros_like(sum_ref)
        ssq_ref[...] = jnp.zeros_like(ssq_ref)

    @pl.when(p == 0)
    def _conv_and_stats():
        for c in range(n_chunks):
            h0 = c * TH
            acc = jnp.zeros((M, Cp), jnp.float32)
            for di in range(3):
                if TH == 1:
                    row = x_ref[0, h0 + di, :, :]                  # (W+2, Cin)
                    for dj in range(3):
                        acc += jnp.dot(row[dj:dj + W, :], w_ref[3 * di + dj],
                                       preferred_element_type=jnp.float32)
                else:
                    for dj in range(3):
                        xs = x_ref[0, h0 + di:h0 + di + TH, dj:dj + W, :]
                        acc += jnp.dot(xs.reshape(M, xs.shape[-1]),
                                       w_ref[3 * di + dj],
                                       preferred_element_type=jnp.float32)
            conv_ref[n, pl.ds(h0 * W, M), :] = acc
            sum_ref[...] += jnp.sum(acc, axis=0, keepdims=True)
            ssq_ref[...] += jnp.sum(acc * acc, axis=0, keepdims=True)
            # Defensive: keep the phase-0 output buffer holding defined data;
            # phase 1 overwrites this block before it is ever written back.
            o_ref[0, pl.ds(h0 * W, M), :] = acc[:, :out_c].astype(o_ref.dtype)

    @pl.when(p == 1)
    def _bn_relu_apply():
        mean = sum_ref[...] * inv_m
        # TODO(synk): use a shifted sum-of-squares / Welford accumulation if
        # activation magnitudes grow (E[x^2]-E[x]^2 cancels when |mean|>>std).
        var = jnp.maximum(ssq_ref[...] * inv_m - mean * mean, 0.0)  # biased var
        scale = g_ref[...] * jax.lax.rsqrt(var + BN_EPS)
        shift = b_ref[...] - mean * scale
        for c in range(n_chunks):
            r0 = c * TH * W
            y = conv_ref[n, pl.ds(r0, M), :] * scale + shift
            o_ref[0, pl.ds(r0, M), :] = (
                jnp.maximum(y, 0.0)[:, :out_c].astype(o_ref.dtype))


def conv3x3_bn_relu(x_nhwc, w_hwio, gamma, beta, *, out_channels=None,
                    out_dtype=jnp.float32):
    """Fused Conv2d(3x3, pad=1, bias=False) -> BatchNorm2d(train) -> ReLU.

    x_nhwc: (N, H, W, Cin).  w_hwio: (3, 3, Ci_w, Cout) with Ci_w <= Cin (extra
    input channels of x must be zero; they meet zero weights).  Returns
    (N, H, W, out_c) where out_c = out_channels, or Cout padded up to 128 lanes
    (padded channels exactly zero) when out_channels is None."""
    N, H, W, Cin = x_nhwc.shape
    kh, kw, ci_w, Cout = w_hwio.shape
    assert (kh, kw) == (3, 3)
    Cp = max(LANE, ((Cout + LANE - 1) // LANE) * LANE)
    out_c = Cp if out_channels is None else int(out_channels)
    assert 0 < out_c <= Cp

    # Spatial 'same' padding; bf16 activations for the MXU.
    x_pad = jnp.pad(x_nhwc, ((0, 0), (1, 1), (1, 1), (0, 0))).astype(jnp.bfloat16)

    # Weights -> (9, Cin, Cp), zero-padded in both channel dims, bf16.
    w = w_hwio
    if ci_w != Cin:
        w = jnp.pad(w, ((0, 0), (0, 0), (0, Cin - ci_w), (0, 0)))
    w = jnp.pad(w.reshape(9, Cin, Cout), ((0, 0), (0, 0), (0, Cp - Cout)))
    w = w.astype(jnp.bfloat16)

    g = jnp.pad(gamma.astype(jnp.float32), (0, Cp - Cout)).reshape(1, Cp)
    b = jnp.pad(beta.astype(jnp.float32), (0, Cp - Cout)).reshape(1, Cp)

    TH = _pick_row_chunk(H, W)
    kernel = functools.partial(_conv_bn_relu_kernel, H=H, W=W, TH=TH, Cp=Cp,
                               out_c=out_c, inv_m=1.0 / float(N * H * W))

    out_isz = jnp.dtype(out_dtype).itemsize
    vmem_bytes = (
        2 * (H + 2) * (W + 2) * Cin * 2        # double-buffered bf16 input slab
        + 9 * Cin * Cp * 2 + 4 * Cp * 4        # weights + gamma/beta
        + 2 * H * W * out_c * out_isz          # double-buffered output block
        + N * H * W * Cp * 4 + 2 * Cp * 4      # conv scratch + sum/ssq scratch
    )
    vmem_limit = int(min(100 << 20, max(32 << 20, 2 * vmem_bytes + (4 << 20))))

    out = pl.pallas_call(
        kernel,
        out_shape=jax.ShapeDtypeStruct((N, H * W, out_c), out_dtype),
        grid=(2, N),
        in_specs=[
            # One halo slab per image; phase 1 pins the index so the unused
            # input is not re-fetched for every image.
            pl.BlockSpec((1, H + 2, W + 2, Cin),
                         lambda p, n: ((1 - p) * n, 0, 0, 0)),
            # Weights and BN affine params: constant index => resident in VMEM.
            pl.BlockSpec((9, Cin, Cp), lambda p, n: (0, 0, 0)),
            pl.BlockSpec((1, Cp), lambda p, n: (0, 0)),
            pl.BlockSpec((1, Cp), lambda p, n: (0, 0)),
        ],
        # Phase 0 maps every step onto block 0, which the first phase-1 step
        # (n == 0) reuses and overwrites before any writeback can occur.
        out_specs=pl.BlockSpec((1, H * W, out_c), lambda p, n: (p * n, 0, 0)),
        scratch_shapes=[
            pltpu.VMEM((N, H * W, Cp), jnp.float32),   # resident conv output
            pltpu.VMEM((1, Cp), jnp.float32),          # per-channel sum
            pltpu.VMEM((1, Cp), jnp.float32),          # per-channel sum of squares
        ],
        compiler_params=pltpu.CompilerParams(
            # BN statistics carry scratch state across both grid axes, so both
            # must stay "arbitrary" (parallel => per-core partial statistics).
            dimension_semantics=("arbitrary", "arbitrary"),
            vmem_limit_bytes=vmem_limit),
    )(x_pad, w, g, b)

    return out.reshape(N, H, W, out_c)


# -----------------------------------------------------------------------------
# JAX glue: upsample / pad / concat (layout plumbing, no hot compute)
# -----------------------------------------------------------------------------
def bilinear_upsample_x2_align_corners(x):
    """x: (N, H, W, C) -> (N, 2H, 2W, C); matches
    nn.Upsample(scale_factor=2, mode='bilinear', align_corners=True)."""
    N, H, W, C = x.shape
    Ho, Wo = 2 * H, 2 * W

    def src_coords(n_in, n_out):
        if n_in == 1 or n_out == 1:
            return jnp.zeros((n_out,), jnp.float32)
        return jnp.arange(n_out, dtype=jnp.float32) * ((n_in - 1) / (n_out - 1))

    ys = src_coords(H, Ho)
    xs = src_coords(W, Wo)
    y0 = jnp.floor(ys).astype(jnp.int32)
    y1 = jnp.minimum(y0 + 1, H - 1)
    x0 = jnp.floor(xs).astype(jnp.int32)
    x1 = jnp.minimum(x0 + 1, W - 1)
    wy = (ys - y0.astype(jnp.float32))[None, :, None, None]
    wx = (xs - x0.astype(jnp.float32))[None, None, :, None]

    top = x[:, y0, :, :]
    bot = x[:, y1, :, :]
    xh = top * (1.0 - wy) + bot * wy          # (N, Ho, W, C)
    left = xh[:, :, x0, :]
    right = xh[:, :, x1, :]
    return left * (1.0 - wx) + right * wx     # (N, Ho, Wo, C)


# -----------------------------------------------------------------------------
# Full `Up.forward`
# -----------------------------------------------------------------------------
@jax.jit
def up_forward(x1_nchw, x2_nchw, w1, g1, b1, w2, g2, b2):
    """w1: (3,3,Cin,Cmid) HWIO, w2: (3,3,Cmid,Cout) HWIO.  Returns NCHW."""
    x1 = jnp.transpose(x1_nchw, (0, 2, 3, 1))   # NCHW -> NHWC
    x2 = jnp.transpose(x2_nchw, (0, 2, 3, 1))

    x1u = bilinear_upsample_x2_align_corners(x1)
    diffY = x2.shape[1] - x1u.shape[1]
    diffX = x2.shape[2] - x1u.shape[2]
    x1p = jnp.pad(
        x1u,
        ((0, 0),
         (diffY // 2, diffY - diffY // 2),
         (diffX // 2, diffX - diffX // 2),
         (0, 0)),
    )
    # bf16 before the concat halves the glue HBM traffic feeding conv1.
    x = jnp.concatenate([x2.astype(jnp.bfloat16), x1p.astype(jnp.bfloat16)],
                        axis=-1)                # (N, H, W, Cin)

    cout = w2.shape[-1]
    # conv1 emits a bf16, 128-lane-padded block that feeds conv2 directly
    # (its zero-padded channels meet zero-padded weight rows).
    h = conv3x3_bn_relu(x, w1, g1, b1, out_dtype=jnp.bfloat16)
    # conv2 stores only the real output channels (no 16x padded f32 HBM write).
    y = conv3x3_bn_relu(h, w2, g2, b2, out_channels=cout, out_dtype=jnp.float32)
    return jnp.transpose(y, (0, 3, 1, 2))       # NHWC -> NCHW


# -----------------------------------------------------------------------------
# Pure-JAX f32 reference (sanity check of the Pallas kernels)
# -----------------------------------------------------------------------------
def up_forward_ref(x1_nchw, x2_nchw, w1, g1, b1, w2, g2, b2):
    x1 = jnp.transpose(x1_nchw, (0, 2, 3, 1))
    x2 = jnp.transpose(x2_nchw, (0, 2, 3, 1))
    x1u = bilinear_upsample_x2_align_corners(x1)
    diffY = x2.shape[1] - x1u.shape[1]
    diffX = x2.shape[2] - x1u.shape[2]
    x1p = jnp.pad(x1u, ((0, 0),
                        (diffY // 2, diffY - diffY // 2),
                        (diffX // 2, diffX - diffX // 2),
                        (0, 0)))
    x = jnp.concatenate([x2, x1p], axis=-1)

    def conv_bn_relu(x, w, g, b):
        y = jax.lax.conv_general_dilated(
            x, w, (1, 1), "SAME",
            dimension_numbers=("NHWC", "HWIO", "NHWC"))
        mean = jnp.mean(y, axis=(0, 1, 2), keepdims=True)
        var = jnp.mean((y - mean) ** 2, axis=(0, 1, 2), keepdims=True)
        yn = (y - mean) * jax.lax.rsqrt(var + BN_EPS) * g + b
        return jnp.maximum(yn, 0.0)

    h = conv_bn_relu(x, w1, g1, b1)
    y = conv_bn_relu(h, w2, g2, b2)
    return jnp.transpose(y, (0, 3, 1, 2))


# -----------------------------------------------------------------------------
# Main
# -----------------------------------------------------------------------------
if __name__ == "__main__":
    key = jax.random.PRNGKey(0)
    k1, k2, k3, k4, k5, k6, k7, k8 = jax.random.split(key, 8)

    # Up(in_channels=16, out_channels=8, bilinear=True)
    #   x1: deep feature (in_channels//2 ch, half spatial), x2: skip connection.
    N = 2
    in_channels = 16
    out_channels = 8
    mid_channels = in_channels // 2          # ConvBlock mid = in_channels // 2
    c1 = in_channels // 2                    # x1 channels
    c2 = in_channels - c1                    # x2 channels

    x1 = jax.random.normal(k1, (N, c1, 8, 8), jnp.float32)     # NCHW
    x2 = jax.random.normal(k2, (N, c2, 16, 16), jnp.float32)   # NCHW

    # Deterministic synthetic parameters (shapes from the module __init__).
    # Conv weights stored directly in HWIO; Conv2d has bias=False.
    w1 = jax.random.normal(k3, (3, 3, in_channels, mid_channels), jnp.float32) * 0.1
    w2 = jax.random.normal(k4, (3, 3, mid_channels, out_channels), jnp.float32) * 0.1
    g1 = 1.0 + 0.1 * jax.random.normal(k5, (mid_channels,), jnp.float32)
    b1 = 0.1 * jax.random.normal(k6, (mid_channels,), jnp.float32)
    g2 = 1.0 + 0.1 * jax.random.normal(k7, (out_channels,), jnp.float32)
    b2 = 0.1 * jax.random.normal(k8, (out_channels,), jnp.float32)

    out = up_forward(x1, x2, w1, g1, b1, w2, g2, b2)
    out = jax.block_until_ready(out)
    assert out.shape == (N, out_channels, 16, 16), out.shape

    ref = jax.block_until_ready(up_forward_ref(x1, x2, w1, g1, b1, w2, g2, b2))
    # bf16 MXU operands (activations + weights) vs. an all-f32 reference:
    # expected max abs error is ~1e-2; 1e-1 still catches any real bug.
    max_err = float(jnp.max(jnp.abs(out - ref)))
    assert max_err < 1e-1, f"mismatch vs reference: {max_err}"

    print("KERNEL_OK")
</pallas_src>

<mosaic_0001>
module attributes {stable_mosaic.version = 11 : i64} {
  func.func @_conv_bn_relu_kernel(%arg0: i32, %arg1: i32, %arg2: memref<1x18x18x16xbf16, #tpu.memory_space<vmem>>, %arg3: memref<9x16x128xbf16, #tpu.memory_space<vmem>>, %arg4: memref<1x128xf32, #tpu.memory_space<vmem>>, %arg5: memref<1x128xf32, #tpu.memory_space<vmem>>, %arg6: memref<1x256x128xbf16, #tpu.memory_space<vmem>>, %arg7: memref<2x256x128xf32, #tpu.memory_space<vmem>>, %arg8: memref<1x128xf32, #tpu.memory_space<vmem>>, %arg9: memref<1x128xf32, #tpu.memory_space<vmem>>) attributes {dimension_semantics = [#tpu.dimension_semantics<arbitrary>, #tpu.dimension_semantics<arbitrary>], iteration_bounds = array<i64: 2, 2>, scalar_prefetch = 0 : i64, scratch_operands = 3 : i64, tpu.core_type = #tpu.core_type<tc>, window_params = [{transform_indices = @transform_0, window_bounds = array<i64: 1, 18, 18, 16>}, {pipeline_mode = #tpu.pipeline_mode<synchronous>, transform_indices = @transform_1, window_bounds = array<i64: 9, 16, 128>}, {pipeline_mode = #tpu.pipeline_mode<synchronous>, transform_indices = @transform_2, window_bounds = array<i64: 1, 128>}, {pipeline_mode = #tpu.pipeline_mode<synchronous>, transform_indices = @transform_3, window_bounds = array<i64: 1, 128>}, {transform_indices = @transform_4, window_bounds = array<i64: 1, 256, 128>}]} {
    %c0_i32 = arith.constant 0 : i32
    %0 = arith.cmpi eq, %arg0, %c0_i32 : i32
    %c0_i32_0 = arith.constant 0 : i32
    %1 = arith.cmpi eq, %arg1, %c0_i32_0 : i32
    %2 = arith.andi %0, %1 : i1
    %3 = arith.extui %2 : i1 to i32
    %c0_i32_1 = arith.constant 0 : i32
    %4 = arith.cmpi ne, %3, %c0_i32_1 : i32
    scf.if %4 {
      %cst = arith.constant 0.000000e+00 : f32
      %11 = vector.broadcast %cst : f32 to vector<1x128xf32>
      %c0 = arith.constant 0 : index
      %c0_5 = arith.constant 0 : index
      %12 = vector.load %arg8[%c0, %c0_5] : memref<1x128xf32, #tpu.memory_space<vmem>>, vector<1x128xf32>
      tpu.vector_store %arg8[%c0, %c0_5], %11 {strides = array<i32>} : memref<1x128xf32, #tpu.memory_space<vmem>>, vector<1x128xf32>,
      %cst_6 = arith.constant 0.000000e+00 : f32
      %13 = vector.broadcast %cst_6 : f32 to vector<1x128xf32>
      %c0_7 = arith.constant 0 : index
      %c0_8 = arith.constant 0 : index
      %14 = vector.load %arg9[%c0_7, %c0_8] : memref<1x128xf32, #tpu.memory_space<vmem>>, vector<1x128xf32>
      tpu.vector_store %arg9[%c0_7, %c0_8], %13 {strides = array<i32>} : memref<1x128xf32, #tpu.memory_space<vmem>>, vector<1x128xf32>,
    } else {
    }
    %c0_i32_2 = arith.constant 0 : i32
    %5 = arith.cmpi eq, %arg0, %c0_i32_2 : i32
    %6 = arith.extui %5 : i1 to i32
    %c0_i32_3 = arith.constant 0 : i32
    %7 = arith.cmpi ne, %6, %c0_i32_3 : i32
    scf.if %7 {
      %cst = arith.constant 0.000000e+00 : f32
      %11 = vector.broadcast %cst : f32 to vector<128x128xf32>
      %c0 = arith.constant 0 : index
      %c0_5 = arith.constant 0 : index
      %c0_6 = arith.constant 0 : index
      %c0_7 = arith.constant 0 : index
      %12 = vector.load %arg2[%c0, %c0_5, %c0_6, %c0_7] : memref<1x18x18x16xbf16, #tpu.memory_space<vmem>>, vector<1x8x16x16xbf16>
      %13 = vector.shape_cast %12 : vector<1x8x16x16xbf16> to vector<8x16x16xbf16>
      %14 = vector.shape_cast %13 : vector<8x16x16xbf16> to vector<128x16xbf16>
      %c0_8 = arith.constant 0 : index
      %c0_9 = arith.constant 0 : index
      %c0_10 = arith.constant 0 : index
      %15 = vector.load %arg3[%c0_8, %c0_9, %c0_10] : memref<9x16x128xbf16, #tpu.memory_space<vmem>>, vector<1x16x128xbf16>
      %16 = vector.shape_cast %15 : vector<1x16x128xbf16> to vector<16x128xbf16>
      %cst_11 = arith.constant dense<0.000000e+00> : vector<128x128xf32>
      %17 = tpu.matmul %14, %16, %cst_11 {dimension_numbers = #tpu.dot_dimension_numbers<[1], [0], [0], [1], [0, 0, 1, 1], [], []>} : vector<128x16xbf16>, vector<16x128xbf16>, vector<128x128xf32> -> vector<128x128xf32>
      %18 = arith.addf %11, %17 : vector<128x128xf32>
      %c0_12 = arith.constant 0 : index
      %c0_13 = arith.constant 0 : index
      %c1 = arith.constant 1 : index
      %c0_14 = arith.constant 0 : index
      %19 = vector.load %arg2[%c0_12, %c0_13, %c1, %c0_14] : memref<1x18x18x16xbf16, #tpu.memory_space<vmem>>, vector<1x8x16x16xbf16>
      %20 = vector.shape_cast %19 : vector<1x8x16x16xbf16> to vector<8x16x16xbf16>
      %21 = vector.shape_cast %20 : vector<8x16x16xbf16> to vector<128x16xbf16>
      %c1_15 = arith.constant 1 : index
      %c0_16 = arith.constant 0 : index
      %c0_17 = arith.constant 0 : index
      %22 = vector.load %arg3[%c1_15, %c0_16, %c0_17] : memref<9x16x128xbf16, #tpu.memory_space<vmem>>, vector<1x16x128xbf16>
      %23 = vector.shape_cast %22 : vector<1x16x128xbf16> to vector<16x128xbf16>
      %cst_18 = arith.constant dense<0.000000e+00> : vector<128x128xf32>
      %24 = tpu.matmul %21, %23, %cst_18 {dimension_numbers = #tpu.dot_dimension_numbers<[1], [0], [0], [1], [0, 0, 1, 1], [], []>} : vector<128x16xbf16>, vector<16x128xbf16>, vector<128x128xf32> -> vector<128x128xf32>
      %25 = arith.addf %18, %24 : vector<128x128xf32>
      %c0_19 = arith.constant 0 : index
      %c0_20 = arith.constant 0 : index
      %c2 = arith.constant 2 : index
      %c0_21 = arith.constant 0 : index
      %26 = vector.load %arg2[%c0_19, %c0_20, %c2, %c0_21] : memref<1x18x18x16xbf16, #tpu.memory_space<vmem>>, vector<1x8x16x16xbf16>
      %27 = vector.shape_cast %26 : vector<1x8x16x16xbf16> to vector<8x16x16xbf16>
      %28 = vector.shape_cast %27 : vector<8x16x16xbf16> to vector<128x16xbf16>
      %c2_22 = arith.constant 2 : index
      %c0_23 = arith.constant 0 : index
      %c0_24 = arith.constant 0 : index
      %29 = vector.load %arg3[%c2_22, %c0_23, %c0_24] : memref<9x16x128xbf16, #tpu.memory_space<vmem>>, vector<1x16x128xbf16>
      %30 = vector.shape_cast %29 : vector<1x16x128xbf16> to vector<16x128xbf16>
      %cst_25 = arith.constant dense<0.000000e+00> : vector<128x128xf32>
      %31 = tpu.matmul %28, %30, %cst_25 {dimension_numbers = #tpu.dot_dimension_numbers<[1], [0], [0], [1], [0, 0, 1, 1], [], []>} : vector<128x16xbf16>, vector<16x128xbf16>, vector<128x128xf32> -> vector<128x128xf32>
      %32 = arith.addf %25, %31 : vector<128x128xf32>
      %c0_26 = arith.constant 0 : index
      %c1_27 = arith.constant 1 : index
      %c0_28 = arith.constant 0 : index
      %c0_29 = arith.constant 0 : index
      %33 = vector.load %arg2[%c0_26, %c1_27, %c0_28, %c0_29] : memref<1x18x18x16xbf16, #tpu.memory_space<vmem>>, vector<1x8x16x16xbf16>
      %34 = vector.shape_cast %33 : vector<1x8x16x16xbf16> to vector<8x16x16xbf16>
      %35 = vector.shape_cast %34 : vector<8x16x16xbf16> to vector<128x16xbf16>
      %c3 = arith.constant 3 : index
      %c0_30 = arith.constant 0 : index
      %c0_31 = arith.constant 0 : index
      %36 = vector.load %arg3[%c3, %c0_30, %c0_31] : memref<9x16x128xbf16, #tpu.memory_space<vmem>>, vector<1x16x128xbf16>
      %37 = vector.shape_cast %36 : vector<1x16x128xbf16> to vector<16x128xbf16>
      %cst_32 = arith.constant dense<0.000000e+00> : vector<128x128xf32>
      %38 = tpu.matmul %35, %37, %cst_32 {dimension_numbers = #tpu.dot_dimension_numbers<[1], [0], [0], [1], [0, 0, 1, 1], [], []>} : vector<128x16xbf16>, vector<16x128xbf16>, vector<128x128xf32> -> vector<128x128xf32>
      %39 = arith.addf %32, %38 : vector<128x128xf32>
      %c0_33 = arith.constant 0 : index
      %c1_34 = arith.constant 1 : index
      %c1_35 = arith.constant 1 : index
      %c0_36 = arith.constant 0 : index
      %40 = vector.load %arg2[%c0_33, %c1_34, %c1_35, %c0_36] : memref<1x18x18x16xbf16, #tpu.memory_space<vmem>>, vector<1x8x16x16xbf16>
      %41 = vector.shape_cast %40 : vector<1x8x16x16xbf16> to vector<8x16x16xbf16>
      %42 = vector.shape_cast %41 : vector<8x16x16xbf16> to vector<128x16xbf16>
      %c4 = arith.constant 4 : index
      %c0_37 = arith.constant 0 : index
      %c0_38 = arith.constant 0 : index
      %43 = vector.load %arg3[%c4, %c0_37, %c0_38] : memref<9x16x128xbf16, #tpu.memory_space<vmem>>, vector<1x16x128xbf16>
      %44 = vector.shape_cast %43 : vector<1x16x128xbf16> to vector<16x128xbf16>
      %cst_39 = arith.constant dense<0.000000e+00> : vector<128x128xf32>
      %45 = tpu.matmul %42, %44, %cst_39 {dimension_numbers = #tpu.dot_dimension_numbers<[1], [0], [0], [1], [0, 0, 1, 1], [], []>} : vector<128x16xbf16>, vector<16x128xbf16>, vector<128x128xf32> -> vector<128x128xf32>
      %46 = arith.addf %39, %45 : vector<128x128xf32>
      %c0_40 = arith.constant 0 : index
      %c1_41 = arith.constant 1 : index
      %c2_42 = arith.constant 2 : index
      %c0_43 = arith.constant 0 : index
      %47 = vector.load %arg2[%c0_40, %c1_41, %c2_42, %c0_43] : memref<1x18x18x16xbf16, #tpu.memory_space<vmem>>, vector<1x8x16x16xbf16>
      %48 = vector.shape_cast %47 : vector<1x8x16x16xbf16> to vector<8x16x16xbf16>
      %49 = vector.shape_cast %48 : vector<8x16x16xbf16> to vector<128x16xbf16>
      %c5 = arith.constant 5 : index
      %c0_44 = arith.constant 0 : index
      %c0_45 = arith.constant 0 : index
      %50 = vector.load %arg3[%c5, %c0_44, %c0_45] : memref<9x16x128xbf16, #tpu.memory_space<vmem>>, vector<1x16x128xbf16>
      %51 = vector.shape_cast %50 : vector<1x16x128xbf16> to vector<16x128xbf16>
      %cst_46 = arith.constant dense<0.000000e+00> : vector<128x128xf32>
      %52 = tpu.matmul %49, %51, %cst_46 {dimension_numbers = #tpu.dot_dimension_numbers<[1], [0], [0], [1], [0, 0, 1, 1], [], []>} : vector<128x16xbf16>, vector<16x128xbf16>, vector<128x128xf32> -> vector<128x128xf32>
      %53 = arith.addf %46, %52 : vector<128x128xf32>
      %c0_47 = arith.constant 0 : index
      %c2_48 = arith.constant 2 : index
      %c0_49 = arith.constant 0 : index
      %c0_50 = arith.constant 0 : index
      %54 = vector.load %arg2[%c0_47, %c2_48, %c0_49, %c0_50] : memref<1x18x18x16xbf16, #tpu.memory_space<vmem>>, vector<1x8x16x16xbf16>
      %55 = vector.shape_cast %54 : vector<1x8x16x16xbf16> to vector<8x16x16xbf16>
      %56 = vector.shape_cast %55 : vector<8x16x16xbf16> to vector<128x16xbf16>
      %c6 = arith.constant 6 : index
      %c0_51 = arith.constant 0 : index
      %c0_52 = arith.constant 0 : index
      %57 = vector.load %arg3[%c6, %c0_51, %c0_52] : memref<9x16x128xbf16, #tpu.memory_space<vmem>>, vector<1x16x128xbf16>
      %58 = vector.shape_cast %57 : vector<1x16x128xbf16> to vector<16x128xbf16>
      %cst_53 = arith.constant dense<0.000000e+00> : vector<128x128xf32>
      %59 = tpu.matmul %56, %58, %cst_53 {dimension_numbers = #tpu.dot_dimension_numbers<[1], [0], [0], [1], [0, 0, 1, 1], [], []>} : vector<128x16xbf16>, vector<16x128xbf16>, vector<128x128xf32> -> vector<128x128xf32>
      %60 = arith.addf %53, %59 : vector<128x128xf32>
      %c0_54 = arith.constant 0 : index
      %c2_55 = arith.constant 2 : index
      %c1_56 = arith.constant 1 : index
      %c0_57 = arith.constant 0 : index
      %61 = vector.load %arg2[%c0_54, %c2_55, %c1_56, %c0_57] : memref<1x18x18x16xbf16, #tpu.memory_space<vmem>>, vector<1x8x16x16xbf16>
      %62 = vector.shape_cast %61 : vector<1x8x16x16xbf16> to vector<8x16x16xbf16>
      %63 = vector.shape_cast %62 : vector<8x16x16xbf16> to vector<128x16xbf16>
      %c7 = arith.constant 7 : index
      %c0_58 = arith.constant 0 : index
      %c0_59 = arith.constant 0 : index
      %64 = vector.load %arg3[%c7, %c0_58, %c0_59] : memref<9x16x128xbf16, #tpu.memory_space<vmem>>, vector<1x16x128xbf16>
      %65 = vector.shape_cast %64 : vector<1x16x128xbf16> to vector<16x128xbf16>
      %cst_60 = arith.constant dense<0.000000e+00> : vector<128x128xf32>
      %66 = tpu.matmul %63, %65, %cst_60 {dimension_numbers = #tpu.dot_dimension_numbers<[1], [0], [0], [1], [0, 0, 1, 1], [], []>} : vector<128x16xbf16>, vector<16x128xbf16>, vector<128x128xf32> -> vector<128x128xf32>
      %67 = arith.addf %60, %66 : vector<128x128xf32>
      %c0_61 = arith.constant 0 : index
      %c2_62 = arith.constant 2 : index
      %c2_63 = arith.constant 2 : index
      %c0_64 = arith.constant 0 : index
      %68 = vector.load %arg2[%c0_61, %c2_62, %c2_63, %c0_64] : memref<1x18x18x16xbf16, #tpu.memory_space<vmem>>, vector<1x8x16x16xbf16>
      %69 = vector.shape_cast %68 : vector<1x8x16x16xbf16> to vector<8x16x16xbf16>
      %70 = vector.shape_cast %69 : vector<8x16x16xbf16> to vector<128x16xbf16>
      %c8 = arith.constant 8 : index
      %c0_65 = arith.constant 0 : index
      %c0_66 = arith.constant 0 : index
      %71 = vector.load %arg3[%c8, %c0_65, %c0_66] : memref<9x16x128xbf16, #tpu.memory_space<vmem>>, vector<1x16x128xbf16>
      %72 = vector.shape_cast %71 : vector<1x16x128xbf16> to vector<16x128xbf16>
      %cst_67 = arith.constant dense<0.000000e+00> : vector<128x128xf32>
      %73 = tpu.matmul %70, %72, %cst_67 {dimension_numbers = #tpu.dot_dimension_numbers<[1], [0], [0], [1], [0, 0, 1, 1], [], []>} : vector<128x16xbf16>, vector<16x128xbf16>, vector<128x128xf32> -> vector<128x128xf32>
      %74 = arith.addf %67, %73 : vector<128x128xf32>
      %75 = arith.index_cast %arg1 : i32 to index
      %c0_68 = arith.constant 0 : index
      %c0_69 = arith.constant 0 : index
      %76 = vector.load %arg7[%75, %c0_68, %c0_69] : memref<2x256x128xf32, #tpu.memory_space<vmem>>, vector<1x128x128xf32>
      %77 = vector.shape_cast %76 : vector<1x128x128xf32> to vector<128x128xf32>
      %78 = vector.shape_cast %74 : vector<128x128xf32> to vector<1x128x128xf32>
      tpu.vector_store %arg7[%75, %c0_68, %c0_69], %78 {strides = array<i32>} : memref<2x256x128xf32, #tpu.memory_space<vmem>>, vector<1x128x128xf32>,
      %c0_70 = arith.constant 0 : index
      %c0_71 = arith.constant 0 : index
      %79 = vector.load %arg8[%c0_70, %c0_71] : memref<1x128xf32, #tpu.memory_space<vmem>>, vector<1x128xf32>
      %cst_72 = arith.constant dense<0.000000e+00> : vector<128xf32>
      %80 = vector.multi_reduction <add>, %74, %cst_72 [0] : vector<128x128xf32> to vector<128xf32>
      %81 = vector.shape_cast %80 : vector<128xf32> to vector<1x128xf32>
      %82 = arith.addf %79, %81 : vector<1x128xf32>
      %c0_73 = arith.constant 0 : index
      %c0_74 = arith.constant 0 : index
      %83 = vector.load %arg8[%c0_73, %c0_74] : memref<1x128xf32, #tpu.memory_space<vmem>>, vector<1x128xf32>
      tpu.vector_store %arg8[%c0_73, %c0_74], %82 {strides = array<i32>} : memref<1x128xf32, #tpu.memory_space<vmem>>, vector<1x128xf32>,
      %c0_75 = arith.constant 0 : index
      %c0_76 = arith.constant 0 : index
      %84 = vector.load %arg9[%c0_75, %c0_76] : memref<1x128xf32, #tpu.memory_space<vmem>>, vector<1x128xf32>
      %85 = arith.mulf %74, %74 : vector<128x128xf32>
      %cst_77 = arith.constant dense<0.000000e+00> : vector<128xf32>
      %86 = vector.multi_reduction <add>, %85, %cst_77 [0] : vector<128x128xf32> to vector<128xf32>
      %87 = vector.shape_cast %86 : vector<128xf32> to vector<1x128xf32>
      %88 = arith.addf %84, %87 : vector<1x128xf32>
      %c0_78 = arith.constant 0 : index
      %c0_79 = arith.constant 0 : index
      %89 = vector.load %arg9[%c0_78, %c0_79] : memref<1x128xf32, #tpu.memory_space<vmem>>, vector<1x128xf32>
      tpu.vector_store %arg9[%c0_78, %c0_79], %88 {strides = array<i32>} : memref<1x128xf32, #tpu.memory_space<vmem>>, vector<1x128xf32>,
      %90 = arith.truncf %74 : vector<128x128xf32> to vector<128x128xbf16>
      %c0_80 = arith.constant 0 : index
      %c0_81 = arith.constant 0 : index
      %c0_82 = arith.constant 0 : index
      %91 = vector.load %arg6[%c0_80, %c0_81, %c0_82] : memref<1x256x128xbf16, #tpu.memory_space<vmem>>, vector<1x128x128xbf16>
      %92 = vector.shape_cast %91 : vector<1x128x128xbf16> to vector<128x128xbf16>
      %93 = vector.shape_cast %90 : vector<128x128xbf16> to vector<1x128x128xbf16>
      tpu.vector_store %arg6[%c0_80, %c0_81, %c0_82], %93 {strides = array<i32>} : memref<1x256x128xbf16, #tpu.memory_space<vmem>>, vector<1x128x128xbf16>,
      %cst_83 = arith.constant 0.000000e+00 : f32
      %94 = vector.broadcast %cst_83 : f32 to vector<128x128xf32>
      %c0_84 = arith.constant 0 : index
      %c8_85 = arith.constant 8 : index
      %c0_86 = arith.constant 0 : index
      %c0_87 = arith.constant 0 : index
      %95 = vector.load %arg2[%c0_84, %c8_85, %c0_86, %c0_87] : memref<1x18x18x16xbf16, #tpu.memory_space<vmem>>, vector<1x8x16x16xbf16>
      %96 = vector.shape_cast %95 : vector<1x8x16x16xbf16> to vector<8x16x16xbf16>
      %97 = vector.shape_cast %96 : vector<8x16x16xbf16> to vector<128x16xbf16>
      %c0_88 = arith.constant 0 : index
      %c0_89 = arith.constant 0 : index
      %c0_90 = arith.constant 0 : index
      %98 = vector.load %arg3[%c0_88, %c0_89, %c0_90] : memref<9x16x128xbf16, #tpu.memory_space<vmem>>, vector<1x16x128xbf16>
      %99 = vector.shape_cast %98 : vector<1x16x128xbf16> to vector<16x128xbf16>
      %cst_91 = arith.constant dense<0.000000e+00> : vector<128x128xf32>
      %100 = tpu.matmul %97, %99, %cst_91 {dimension_numbers = #tpu.dot_dimension_numbers<[1], [0], [0], [1], [0, 0, 1, 1], [], []>} : vector<128x16xbf16>, vector<16x128xbf16>, vector<128x128xf32> -> vector<128x128xf32>
      %101 = arith.addf %94, %100 : vector<128x128xf32>
      %c0_92 = arith.constant 0 : index
      %c8_93 = arith.constant 8 : index
      %c1_94 = arith.constant 1 : index
      %c0_95 = arith.constant 0 : index
      %102 = vector.load %arg2[%c0_92, %c8_93, %c1_94, %c0_95] : memref<1x18x18x16xbf16, #tpu.memory_space<vmem>>, vector<1x8x16x16xbf16>
      %103 = vector.shape_cast %102 : vector<1x8x16x16xbf16> to vector<8x16x16xbf16>
      %104 = vector.shape_cast %103 : vector<8x16x16xbf16> to vector<128x16xbf16>
      %c1_96 = arith.constant 1 : index
      %c0_97 = arith.constant 0 : index
      %c0_98 = arith.constant 0 : index
      %105 = vector.load %arg3[%c1_96, %c0_97, %c0_98] : memref<9x16x128xbf16, #tpu.memory_space<vmem>>, vector<1x16x128xbf16>
      %106 = vector.shape_cast %105 : vector<1x16x128xbf16> to vector<16x128xbf16>
      %cst_99 = arith.constant dense<0.000000e+00> : vector<128x128xf32>
      %107 = tpu.matmul %104, %106, %cst_99 {dimension_numbers = #tpu.dot_dimension_numbers<[1], [0], [0], [1], [0, 0, 1, 1], [], []>} : vector<128x16xbf16>, vector<16x128xbf16>, vector<128x128xf32> -> vector<128x128xf32>
      %108 = arith.addf %101, %107 : vector<128x128xf32>
      %c0_100 = arith.constant 0 : index
      %c8_101 = arith.constant 8 : index
      %c2_102 = arith.constant 2 : index
      %c0_103 = arith.constant 0 : index
      %109 = vector.load %arg2[%c0_100, %c8_101, %c2_102, %c0_103] : memref<1x18x18x16xbf16, #tpu.memory_space<vmem>>, vector<1x8x16x16xbf16>
      %110 = vector.shape_cast %109 : vector<1x8x16x16xbf16> to vector<8x16x16xbf16>
      %111 = vector.shape_cast %110 : vector<8x16x16xbf16> to vector<128x16xbf16>
      %c2_104 = arith.constant 2 : index
      %c0_105 = arith.constant 0 : index
      %c0_106 = arith.constant 0 : index
      %112 = vector.load %arg3[%c2_104, %c0_105, %c0_106] : memref<9x16x128xbf16, #tpu.memory_space<vmem>>, vector<1x16x128xbf16>
      %113 = vector.shape_cast %112 : vector<1x16x128xbf16> to vector<16x128xbf16>
      %cst_107 = arith.constant dense<0.000000e+00> : vector<128x128xf32>
      %114 = tpu.matmul %111, %113, %cst_107 {dimension_numbers = #tpu.dot_dimension_numbers<[1], [0], [0], [1], [0, 0, 1, 1], [], []>} : vector<128x16xbf16>, vector<16x128xbf16>, vector<128x128xf32> -> vector<128x128xf32>
      %115 = arith.addf %108, %114 : vector<128x128xf32>
      %c0_108 = arith.constant 0 : index
      %c9 = arith.constant 9 : index
      %c0_109 = arith.constant 0 : index
      %c0_110 = arith.constant 0 : index
      %116 = vector.load %arg2[%c0_108, %c9, %c0_109, %c0_110] : memref<1x18x18x16xbf16, #tpu.memory_space<vmem>>, vector<1x8x16x16xbf16>
      %117 = vector.shape_cast %116 : vector<1x8x16x16xbf16> to vector<8x16x16xbf16>
      %118 = vector.shape_cast %117 : vector<8x16x16xbf16> to vector<128x16xbf16>
      %c3_111 = arith.constant 3 : index
      %c0_112 = arith.constant 0 : index
      %c0_113 = arith.constant 0 : index
      %119 = vector.load %arg3[%c3_111, %c0_112, %c0_113] : memref<9x16x128xbf16, #tpu.memory_space<vmem>>, vector<1x16x128xbf16>
      %120 = vector.shape_cast %119 : vector<1x16x128xbf16> to vector<16x128xbf16>
      %cst_114 = arith.constant dense<0.000000e+00> : vector<128x128xf32>
      %121 = tpu.matmul %118, %120, %cst_114 {dimension_numbers = #tpu.dot_dimension_numbers<[1], [0], [0], [1], [0, 0, 1, 1], [], []>} : vector<128x16xbf16>, vector<16x128xbf16>, vector<128x128xf32> -> vector<128x128xf32>
      %122 = arith.addf %115, %121 : vector<128x128xf32>
      %c0_115 = arith.constant 0 : index
      %c9_116 = arith.constant 9 : index
      %c1_117 = arith.constant 1 : index
      %c0_118 = arith.constant 0 : index
      %123 = vector.load %arg2[%c0_115, %c9_116, %c1_117, %c0_118] : memref<1x18x18x16xbf16, #tpu.memory_space<vmem>>, vector<1x8x16x16xbf16>
      %124 = vector.shape_cast %123 : vector<1x8x16x16xbf16> to vector<8x16x16xbf16>
      %125 = vector.shape_cast %124 : vector<8x16x16xbf16> to vector<128x16xbf16>
      %c4_119 = arith.constant 4 : index
      %c0_120 = arith.constant 0 : index
      %c0_121 = arith.constant 0 : index
      %126 = vector.load %arg3[%c4_119, %c0_120, %c0_121] : memref<9x16x128xbf16, #tpu.memory_space<vmem>>, vector<1x16x128xbf16>
      %127 = vector.shape_cast %126 : vector<1x16x128xbf16> to vector<16x128xbf16>
      %cst_122 = arith.constant dense<0.000000e+00> : vector<128x128xf32>
      %128 = tpu.matmul %125, %127, %cst_122 {dimension_numbers = #tpu.dot_dimension_numbers<[1], [0], [0], [1], [0, 0, 1, 1], [], []>} : vector<128x16xbf16>, vector<16x128xbf16>, vector<128x128xf32> -> vector<128x128xf32>
      %129 = arith.addf %122, %128 : vector<128x128xf32>
      %c0_123 = arith.constant 0 : index
      %c9_124 = arith.constant 9 : index
      %c2_125 = arith.constant 2 : index
      %c0_126 = arith.constant 0 : index
      %130 = vector.load %arg2[%c0_123, %c9_124, %c2_125, %c0_126] : memref<1x18x18x16xbf16, #tpu.memory_space<vmem>>, vector<1x8x16x16xbf16>
      %131 = vector.shape_cast %130 : vector<1x8x16x16xbf16> to vector<8x16x16xbf16>
      %132 = vector.shape_cast %131 : vector<8x16x16xbf16> to vector<128x16xbf16>
      %c5_127 = arith.constant 5 : index
      %c0_128 = arith.constant 0 : index
      %c0_129 = arith.constant 0 : index
      %133 = vector.load %arg3[%c5_127, %c0_128, %c0_129] : memref<9x16x128xbf16, #tpu.memory_space<vmem>>, vector<1x16x128xbf16>
      %134 = vector.shape_cast %133 : vector<1x16x128xbf16> to vector<16x128xbf16>
      %cst_130 = arith.constant dense<0.000000e+00> : vector<128x128xf32>
      %135 = tpu.matmul %132, %134, %cst_130 {dimension_numbers = #tpu.dot_dimension_numbers<[1], [0], [0], [1], [0, 0, 1, 1], [], []>} : vector<128x16xbf16>, vector<16x128xbf16>, vector<128x128xf32> -> vector<128x128xf32>
      %136 = arith.addf %129, %135 : vector<128x128xf32>
      %c0_131 = arith.constant 0 : index
      %c10 = arith.constant 10 : index
      %c0_132 = arith.constant 0 : index
      %c0_133 = arith.constant 0 : index
      %137 = vector.load %arg2[%c0_131, %c10, %c0_132, %c0_133] : memref<1x18x18x16xbf16, #tpu.memory_space<vmem>>, vector<1x8x16x16xbf16>
      %138 = vector.shape_cast %137 : vector<1x8x16x16xbf16> to vector<8x16x16xbf16>
      %139 = vector.shape_cast %138 : vector<8x16x16xbf16> to vector<128x16xbf16>
      %c6_134 = arith.constant 6 : index
      %c0_135 = arith.constant 0 : index
      %c0_136 = arith.constant 0 : index
      %140 = vector.load %arg3[%c6_134, %c0_135, %c0_136] : memref<9x16x128xbf16, #tpu.memory_space<vmem>>, vector<1x16x128xbf16>
      %141 = vector.shape_cast %140 : vector<1x16x128xbf16> to vector<16x128xbf16>
      %cst_137 = arith.constant dense<0.000000e+00> : vector<128x128xf32>
      %142 = tpu.matmul %139, %141, %cst_137 {dimension_numbers = #tpu.dot_dimension_numbers<[1], [0], [0], [1], [0, 0, 1, 1], [], []>} : vector<128x16xbf16>, vector<16x128xbf16>, vector<128x128xf32> -> vector<128x128xf32>
      %143 = arith.addf %136, %142 : vector<128x128xf32>
      %c0_138 = arith.constant 0 : index
      %c10_139 = arith.constant 10 : index
      %c1_140 = arith.constant 1 : index
      %c0_141 = arith.constant 0 : index
      %144 = vector.load %arg2[%c0_138, %c10_139, %c1_140, %c0_141] : memref<1x18x18x16xbf16, #tpu.memory_space<vmem>>, vector<1x8x16x16xbf16>
      %145 = vector.shape_cast %144 : vector<1x8x16x16xbf16> to vector<8x16x16xbf16>
      %146 = vector.shape_cast %145 : vector<8x16x16xbf16> to vector<128x16xbf16>
      %c7_142 = arith.constant 7 : index
      %c0_143 = arith.constant 0 : index
      %c0_144 = arith.constant 0 : index
      %147 = vector.load %arg3[%c7_142, %c0_143, %c0_144] : memref<9x16x128xbf16, #tpu.memory_space<vmem>>, vector<1x16x128xbf16>
      %148 = vector.shape_cast %147 : vector<1x16x128xbf16> to vector<16x128xbf16>
      %cst_145 = arith.constant dense<0.000000e+00> : vector<128x128xf32>
      %149 = tpu.matmul %146, %148, %cst_145 {dimension_numbers = #tpu.dot_dimension_numbers<[1], [0], [0], [1], [0, 0, 1, 1], [], []>} : vector<128x16xbf16>, vector<16x128xbf16>, vector<128x128xf32> -> vector<128x128xf32>
      %150 = arith.addf %143, %149 : vector<128x128xf32>
      %c0_146 = arith.constant 0 : index
      %c10_147 = arith.constant 10 : index
      %c2_148 = arith.constant 2 : index
      %c0_149 = arith.constant 0 : index
      %151 = vector.load %arg2[%c0_146, %c10_147, %c2_148, %c0_149] : memref<1x18x18x16xbf16, #tpu.memory_space<vmem>>, vector<1x8x16x16xbf16>
      %152 = vector.shape_cast %151 : vector<1x8x16x16xbf16> to vector<8x16x16xbf16>
      %153 = vector.shape_cast %152 : vector<8x16x16xbf16> to vector<128x16xbf16>
      %c8_150 = arith.constant 8 : index
      %c0_151 = arith.constant 0 : index
      %c0_152 = arith.constant 0 : index
      %154 = vector.load %arg3[%c8_150, %c0_151, %c0_152] : memref<9x16x128xbf16, #tpu.memory_space<vmem>>, vector<1x16x128xbf16>
      %155 = vector.shape_cast %154 : vector<1x16x128xbf16> to vector<16x128xbf16>
      %cst_153 = arith.constant dense<0.000000e+00> : vector<128x128xf32>
      %156 = tpu.matmul %153, %155, %cst_153 {dimension_numbers = #tpu.dot_dimension_numbers<[1], [0], [0], [1], [0, 0, 1, 1], [], []>} : vector<128x16xbf16>, vector<16x128xbf16>, vector<128x128xf32> -> vector<128x128xf32>
      %157 = arith.addf %150, %156 : vector<128x128xf32>
      %158 = arith.index_cast %arg1 : i32 to index
      %c128 = arith.constant 128 : index
      %c0_154 = arith.constant 0 : index
      %159 = vector.load %arg7[%158, %c128, %c0_154] : memref<2x256x128xf32, #tpu.memory_space<vmem>>, vector<1x128x128xf32>
      %160 = vector.shape_cast %159 : vector<1x128x128xf32> to vector<128x128xf32>
      %161 = vector.shape_cast %157 : vector<128x128xf32> to vector<1x128x128xf32>
      tpu.vector_store %arg7[%158, %c128, %c0_154], %161 {strides = array<i32>} : memref<2x256x128xf32, #tpu.memory_space<vmem>>, vector<1x128x128xf32>,
      %c0_155 = arith.constant 0 : index
      %c0_156 = arith.constant 0 : index
      %162 = vector.load %arg8[%c0_155, %c0_156] : memref<1x128xf32, #tpu.memory_space<vmem>>, vector<1x128xf32>
      %cst_157 = arith.constant dense<0.000000e+00> : vector<128xf32>
      %163 = vector.multi_reduction <add>, %157, %cst_157 [0] : vector<128x128xf32> to vector<128xf32>
      %164 = vector.shape_cast %163 : vector<128xf32> to vector<1x128xf32>
      %165 = arith.addf %162, %164 : vector<1x128xf32>
      %c0_158 = arith.constant 0 : index
      %c0_159 = arith.constant 0 : index
      %166 = vector.load %arg8[%c0_158, %c0_159] : memref<1x128xf32, #tpu.memory_space<vmem>>, vector<1x128xf32>
      tpu.vector_store %arg8[%c0_158, %c0_159], %165 {strides = array<i32>} : memref<1x128xf32, #tpu.memory_space<vmem>>, vector<1x128xf32>,
      %c0_160 = arith.constant 0 : index
      %c0_161 = arith.constant 0 : index
      %167 = vector.load %arg9[%c0_160, %c0_161] : memref<1x128xf32, #tpu.memory_space<vmem>>, vector<1x128xf32>
      %168 = arith.mulf %157, %157 : vector<128x128xf32>
      %cst_162 = arith.constant dense<0.000000e+00> : vector<128xf32>
      %169 = vector.multi_reduction <add>, %168, %cst_162 [0] : vector<128x128xf32> to vector<128xf32>
      %170 = vector.shape_cast %169 : vector<128xf32> to vector<1x128xf32>
      %171 = arith.addf %167, %170 : vector<1x128xf32>
      %c0_163 = arith.constant 0 : index
      %c0_164 = arith.constant 0 : index
      %172 = vector.load %arg9[%c0_163, %c0_164] : memref<1x128xf32, #tpu.memory_space<vmem>>, vector<1x128xf32>
      tpu.vector_store %arg9[%c0_163, %c0_164], %171 {strides = array<i32>} : memref<1x128xf32, #tpu.memory_space<vmem>>, vector<1x128xf32>,
      %173 = arith.truncf %157 : vector<128x128xf32> to vector<128x128xbf16>
      %c0_165 = arith.constant 0 : index
      %c128_166 = arith.constant 128 : index
      %c0_167 = arith.constant 0 : index
      %174 = vector.load %arg6[%c0_165, %c128_166, %c0_167] : memref<1x256x128xbf16, #tpu.memory_space<vmem>>, vector<1x128x128xbf16>
      %175 = vector.shape_cast %174 : vector<1x128x128xbf16> to vector<128x128xbf16>
      %176 = vector.shape_cast %173 : vector<128x128xbf16> to vector<1x128x128xbf16>
      tpu.vector_store %arg6[%c0_165, %c128_166, %c0_167], %176 {strides = array<i32>} : memref<1x256x128xbf16, #tpu.memory_space<vmem>>, vector<1x128x128xbf16>,
    } else {
    }
    %c1_i32 = arith.constant 1 : i32
    %8 = arith.cmpi eq, %arg0, %c1_i32 : i32
    %9 = arith.extui %8 : i1 to i32
    %c0_i32_4 = arith.constant 0 : i32
    %10 = arith.cmpi ne, %9, %c0_i32_4 : i32
    scf.if %10 {
      %c0 = arith.constant 0 : index
      %c0_5 = arith.constant 0 : index
      %11 = vector.load %arg8[%c0, %c0_5] : memref<1x128xf32, #tpu.memory_space<vmem>>, vector<1x128xf32>
      %cst = arith.constant 0.001953125 : f32
      %12 = vector.broadcast %cst : f32 to vector<1x128xf32>
      %13 = arith.mulf %11, %12 : vector<1x128xf32>
      %c0_6 = arith.constant 0 : index
      %c0_7 = arith.constant 0 : index
      %14 = vector.load %arg9[%c0_6, %c0_7] : memref<1x128xf32, #tpu.memory_space<vmem>>, vector<1x128xf32>
      %cst_8 = arith.constant 0.001953125 : f32
      %15 = vector.broadcast %cst_8 : f32 to vector<1x128xf32>
      %16 = arith.mulf %14, %15 : vector<1x128xf32>
      %17 = arith.mulf %13, %13 : vector<1x128xf32>
      %18 = arith.subf %16, %17 : vector<1x128xf32>
      %cst_9 = arith.constant 0.000000e+00 : f32
      %19 = vector.broadcast %cst_9 : f32 to vector<1x128xf32>
      %20 = arith.maximumf %18, %19 : vector<1x128xf32>
      %c0_10 = arith.constant 0 : index
      %c0_11 = arith.constant 0 : index
      %21 = vector.load %arg4[%c0_10, %c0_11] : memref<1x128xf32, #tpu.memory_space<vmem>>, vector<1x128xf32>
      %cst_12 = arith.constant 9.99999974E-6 : f32
      %22 = vector.broadcast %cst_12 : f32 to vector<1x128xf32>
      %23 = arith.addf %20, %22 : vector<1x128xf32>
      %24 = math.rsqrt %23 : vector<1x128xf32>
      %25 = arith.mulf %21, %24 : vector<1x128xf32>
      %c0_13 = arith.constant 0 : index
      %c0_14 = arith.constant 0 : index
      %26 = vector.load %arg5[%c0_13, %c0_14] : memref<1x128xf32, #tpu.memory_space<vmem>>, vector<1x128xf32>
      %27 = arith.mulf %13, %25 : vector<1x128xf32>
      %28 = arith.subf %26, %27 : vector<1x128xf32>
      %29 = arith.index_cast %arg1 : i32 to index
      %c0_15 = arith.constant 0 : index
      %c0_16 = arith.constant 0 : index
      %30 = vector.load %arg7[%29, %c0_15, %c0_16] : memref<2x256x128xf32, #tpu.memory_space<vmem>>, vector<1x128x128xf32>
      %31 = vector.shape_cast %30 : vector<1x128x128xf32> to vector<128x128xf32>
      %32 = vector.broadcast %25 : vector<1x128xf32> to vector<128x128xf32>
      %33 = arith.mulf %31, %32 : vector<128x128xf32>
      %34 = vector.broadcast %28 : vector<1x128xf32> to vector<128x128xf32>
      %35 = arith.addf %33, %34 : vector<128x128xf32>
      %cst_17 = arith.constant 0.000000e+00 : f32
      %36 = vector.broadcast %cst_17 : f32 to vector<128x128xf32>
      %37 = arith.maximumf %35, %36 : vector<128x128xf32>
      %38 = arith.truncf %37 : vector<128x128xf32> to vector<128x128xbf16>
      %c0_18 = arith.constant 0 : index
      %c0_19 = arith.constant 0 : index
      %c0_20 = arith.constant 0 : index
      %39 = vector.load %arg6[%c0_18, %c0_19, %c0_20] : memref<1x256x128xbf16, #tpu.memory_space<vmem>>, vector<1x128x128xbf16>
      %40 = vector.shape_cast %39 : vector<1x128x128xbf16> to vector<128x128xbf16>
      %41 = vector.shape_cast %38 : vector<128x128xbf16> to vector<1x128x128xbf16>
      tpu.vector_store %arg6[%c0_18, %c0_19, %c0_20], %41 {strides = array<i32>} : memref<1x256x128xbf16, #tpu.memory_space<vmem>>, vector<1x128x128xbf16>,
      %42 = arith.index_cast %arg1 : i32 to index
      %c128 = arith.constant 128 : index
      %c0_21 = arith.constant 0 : index
      %43 = vector.load %arg7[%42, %c128, %c0_21] : memref<2x256x128xf32, #tpu.memory_space<vmem>>, vector<1x128x128xf32>
      %44 = vector.shape_cast %43 : vector<1x128x128xf32> to vector<128x128xf32>
      %45 = vector.broadcast %25 : vector<1x128xf32> to vector<128x128xf32>
      %46 = arith.mulf %44, %45 : vector<128x128xf32>
      %47 = vector.broadcast %28 : vector<1x128xf32> to vector<128x128xf32>
      %48 = arith.addf %46, %47 : vector<128x128xf32>
      %cst_22 = arith.constant 0.000000e+00 : f32
      %49 = vector.broadcast %cst_22 : f32 to vector<128x128xf32>
      %50 = arith.maximumf %48, %49 : vector<128x128xf32>
      %51 = arith.truncf %50 : vector<128x128xf32> to vector<128x128xbf16>
      %c0_23 = arith.constant 0 : index
      %c128_24 = arith.constant 128 : index
      %c0_25 = arith.constant 0 : index
      %52 = vector.load %arg6[%c0_23, %c128_24, %c0_25] : memref<1x256x128xbf16, #tpu.memory_space<vmem>>, vector<1x128x128xbf16>
      %53 = vector.shape_cast %52 : vector<1x128x128xbf16> to vector<128x128xbf16>
      %54 = vector.shape_cast %51 : vector<128x128xbf16> to vector<1x128x128xbf16>
      tpu.vector_store %arg6[%c0_23, %c128_24, %c0_25], %54 {strides = array<i32>} : memref<1x256x128xbf16, #tpu.memory_space<vmem>>, vector<1x128x128xbf16>,
    } else {
    }
    return
  }
  func.func @transform_0(%arg0: i32, %arg1: i32) -> (i32, i32, i32, i32) {
    %c1_i32 = arith.constant 1 : i32
    %0 = arith.subi %c1_i32, %arg0 : i32
    %1 = arith.muli %0, %arg1 : i32
    %c0_i32 = arith.constant 0 : i32
    %c0_i32_0 = arith.constant 0 : i32
    %c0_i32_1 = arith.constant 0 : i32
    %c0_i32_2 = arith.constant 0 : i32
    return %1, %c0_i32, %c0_i32_0, %c0_i32_1 : i32, i32, i32, i32
  }
  func.func @transform_1(%arg0: i32, %arg1: i32) -> (i32, i32, i32) {
    %c0_i32 = arith.constant 0 : i32
    %c0_i32_0 = arith.constant 0 : i32
    %c0_i32_1 = arith.constant 0 : i32
    %c0_i32_2 = arith.constant 0 : i32
    return %c0_i32, %c0_i32_0, %c0_i32_1 : i32, i32, i32
  }
  func.func @transform_2(%arg0: i32, %arg1: i32) -> (i32, i32) {
    %c0_i32 = arith.constant 0 : i32
    %c0_i32_0 = arith.constant 0 : i32
    %c0_i32_1 = arith.constant 0 : i32
    return %c0_i32, %c0_i32_0 : i32, i32
  }
  func.func @transform_3(%arg0: i32, %arg1: i32) -> (i32, i32) {
    %c0_i32 = arith.constant 0 : i32
    %c0_i32_0 = arith.constant 0 : i32
    %c0_i32_1 = arith.constant 0 : i32
    return %c0_i32, %c0_i32_0 : i32, i32
  }
  func.func @transform_4(%arg0: i32, %arg1: i32) -> (i32, i32, i32) {
    %0 = arith.muli %arg0, %arg1 : i32
    %c0_i32 = arith.constant 0 : i32
    %c0_i32_0 = arith.constant 0 : i32
    %c0_i32_1 = arith.constant 0 : i32
    return %0, %c0_i32, %c0_i32_0 : i32, i32, i32
  }
}

module attributes {stable_mosaic.version = 11 : i64} {
  func.func @_conv_bn_relu_kernel(%arg0: i32, %arg1: i32, %arg2: memref<1x18x18x128xbf16, #tpu.memory_space<vmem>>, %arg3: memref<9x128x128xbf16, #tpu.memory_space<vmem>>, %arg4: memref<1x128xf32, #tpu.memory_space<vmem>>, %arg5: memref<1x128xf32, #tpu.memory_space<vmem>>, %arg6: memref<1x256x8xf32, #tpu.memory_space<vmem>>, %arg7: memref<2x256x128xf32, #tpu.memory_space<vmem>>, %arg8: memref<1x128xf32, #tpu.memory_space<vmem>>, %arg9: memref<1x128xf32, #tpu.memory_space<vmem>>) attributes {dimension_semantics = [#tpu.dimension_semantics<arbitrary>, #tpu.dimension_semantics<arbitrary>], iteration_bounds = array<i64: 2, 2>, scalar_prefetch = 0 : i64, scratch_operands = 3 : i64, tpu.core_type = #tpu.core_type<tc>, window_params = [{transform_indices = @transform_0, window_bounds = array<i64: 1, 18, 18, 128>}, {pipeline_mode = #tpu.pipeline_mode<synchronous>, transform_indices = @transform_1, window_bounds = array<i64: 9, 128, 128>}, {pipeline_mode = #tpu.pipeline_mode<synchronous>, transform_indices = @transform_2, window_bounds = array<i64: 1, 128>}, {pipeline_mode = #tpu.pipeline_mode<synchronous>, transform_indices = @transform_3, window_bounds = array<i64: 1, 128>}, {transform_indices = @transform_4, window_bounds = array<i64: 1, 256, 8>}]} {
    %c0_i32 = arith.constant 0 : i32
    %0 = arith.cmpi eq, %arg0, %c0_i32 : i32
    %c0_i32_0 = arith.constant 0 : i32
    %1 = arith.cmpi eq, %arg1, %c0_i32_0 : i32
    %2 = arith.andi %0, %1 : i1
    %3 = arith.extui %2 : i1 to i32
    %c0_i32_1 = arith.constant 0 : i32
    %4 = arith.cmpi ne, %3, %c0_i32_1 : i32
    scf.if %4 {
      %cst = arith.constant 0.000000e+00 : f32
      %11 = vector.broadcast %cst : f32 to vector<1x128xf32>
      %c0 = arith.constant 0 : index
      %c0_5 = arith.constant 0 : index
      %12 = vector.load %arg8[%c0, %c0_5] : memref<1x128xf32, #tpu.memory_space<vmem>>, vector<1x128xf32>
      tpu.vector_store %arg8[%c0, %c0_5], %11 {strides = array<i32>} : memref<1x128xf32, #tpu.memory_space<vmem>>, vector<1x128xf32>,
      %cst_6 = arith.constant 0.000000e+00 : f32
      %13 = vector.broadcast %cst_6 : f32 to vector<1x128xf32>
      %c0_7 = arith.constant 0 : index
      %c0_8 = arith.constant 0 : index
      %14 = vector.load %arg9[%c0_7, %c0_8] : memref<1x128xf32, #tpu.memory_space<vmem>>, vector<1x128xf32>
      tpu.vector_store %arg9[%c0_7, %c0_8], %13 {strides = array<i32>} : memref<1x128xf32, #tpu.memory_space<vmem>>, vector<1x128xf32>,
    } else {
    }
    %c0_i32_2 = arith.constant 0 : i32
    %5 = arith.cmpi eq, %arg0, %c0_i32_2 : i32
    %6 = arith.extui %5 : i1 to i32
    %c0_i32_3 = arith.constant 0 : i32
    %7 = arith.cmpi ne, %6, %c0_i32_3 : i32
    scf.if %7 {
      %cst = arith.constant 0.000000e+00 : f32
      %11 = vector.broadcast %cst : f32 to vector<128x128xf32>
      %c0 = arith.constant 0 : index
      %c0_5 = arith.constant 0 : index
      %c0_6 = arith.constant 0 : index
      %c0_7 = arith.constant 0 : index
      %12 = vector.load %arg2[%c0, %c0_5, %c0_6, %c0_7] : memref<1x18x18x128xbf16, #tpu.memory_space<vmem>>, vector<1x8x16x128xbf16>
      %13 = vector.shape_cast %12 : vector<1x8x16x128xbf16> to vector<8x16x128xbf16>
      %14 = vector.shape_cast %13 : vector<8x16x128xbf16> to vector<128x128xbf16>
      %c0_8 = arith.constant 0 : index
      %c0_9 = arith.constant 0 : index
      %c0_10 = arith.constant 0 : index
      %15 = vector.load %arg3[%c0_8, %c0_9, %c0_10] : memref<9x128x128xbf16, #tpu.memory_space<vmem>>, vector<1x128x128xbf16>
      %16 = vector.shape_cast %15 : vector<1x128x128xbf16> to vector<128x128xbf16>
      %cst_11 = arith.constant dense<0.000000e+00> : vector<128x128xf32>
      %17 = tpu.matmul %14, %16, %cst_11 {dimension_numbers = #tpu.dot_dimension_numbers<[1], [0], [0], [1], [0, 0, 1, 1], [], []>} : vector<128x128xbf16>, vector<128x128xbf16>, vector<128x128xf32> -> vector<128x128xf32>
      %18 = arith.addf %11, %17 : vector<128x128xf32>
      %c0_12 = arith.constant 0 : index
      %c0_13 = arith.constant 0 : index
      %c1 = arith.constant 1 : index
      %c0_14 = arith.constant 0 : index
      %19 = vector.load %arg2[%c0_12, %c0_13, %c1, %c0_14] : memref<1x18x18x128xbf16, #tpu.memory_space<vmem>>, vector<1x8x16x128xbf16>
      %20 = vector.shape_cast %19 : vector<1x8x16x128xbf16> to vector<8x16x128xbf16>
      %21 = vector.shape_cast %20 : vector<8x16x128xbf16> to vector<128x128xbf16>
      %c1_15 = arith.constant 1 : index
      %c0_16 = arith.constant 0 : index
      %c0_17 = arith.constant 0 : index
      %22 = vector.load %arg3[%c1_15, %c0_16, %c0_17] : memref<9x128x128xbf16, #tpu.memory_space<vmem>>, vector<1x128x128xbf16>
      %23 = vector.shape_cast %22 : vector<1x128x128xbf16> to vector<128x128xbf16>
      %cst_18 = arith.constant dense<0.000000e+00> : vector<128x128xf32>
      %24 = tpu.matmul %21, %23, %cst_18 {dimension_numbers = #tpu.dot_dimension_numbers<[1], [0], [0], [1], [0, 0, 1, 1], [], []>} : vector<128x128xbf16>, vector<128x128xbf16>, vector<128x128xf32> -> vector<128x128xf32>
      %25 = arith.addf %18, %24 : vector<128x128xf32>
      %c0_19 = arith.constant 0 : index
      %c0_20 = arith.constant 0 : index
      %c2 = arith.constant 2 : index
      %c0_21 = arith.constant 0 : index
      %26 = vector.load %arg2[%c0_19, %c0_20, %c2, %c0_21] : memref<1x18x18x128xbf16, #tpu.memory_space<vmem>>, vector<1x8x16x128xbf16>
      %27 = vector.shape_cast %26 : vector<1x8x16x128xbf16> to vector<8x16x128xbf16>
      %28 = vector.shape_cast %27 : vector<8x16x128xbf16> to vector<128x128xbf16>
      %c2_22 = arith.constant 2 : index
      %c0_23 = arith.constant 0 : index
      %c0_24 = arith.constant 0 : index
      %29 = vector.load %arg3[%c2_22, %c0_23, %c0_24] : memref<9x128x128xbf16, #tpu.memory_space<vmem>>, vector<1x128x128xbf16>
      %30 = vector.shape_cast %29 : vector<1x128x128xbf16> to vector<128x128xbf16>
      %cst_25 = arith.constant dense<0.000000e+00> : vector<128x128xf32>
      %31 = tpu.matmul %28, %30, %cst_25 {dimension_numbers = #tpu.dot_dimension_numbers<[1], [0], [0], [1], [0, 0, 1, 1], [], []>} : vector<128x128xbf16>, vector<128x128xbf16>, vector<128x128xf32> -> vector<128x128xf32>
      %32 = arith.addf %25, %31 : vector<128x128xf32>
      %c0_26 = arith.constant 0 : index
      %c1_27 = arith.constant 1 : index
      %c0_28 = arith.constant 0 : index
      %c0_29 = arith.constant 0 : index
      %33 = vector.load %arg2[%c0_26, %c1_27, %c0_28, %c0_29] : memref<1x18x18x128xbf16, #tpu.memory_space<vmem>>, vector<1x8x16x128xbf16>
      %34 = vector.shape_cast %33 : vector<1x8x16x128xbf16> to vector<8x16x128xbf16>
      %35 = vector.shape_cast %34 : vector<8x16x128xbf16> to vector<128x128xbf16>
      %c3 = arith.constant 3 : index
      %c0_30 = arith.constant 0 : index
      %c0_31 = arith.constant 0 : index
      %36 = vector.load %arg3[%c3, %c0_30, %c0_31] : memref<9x128x128xbf16, #tpu.memory_space<vmem>>, vector<1x128x128xbf16>
      %37 = vector.shape_cast %36 : vector<1x128x128xbf16> to vector<128x128xbf16>
      %cst_32 = arith.constant dense<0.000000e+00> : vector<128x128xf32>
      %38 = tpu.matmul %35, %37, %cst_32 {dimension_numbers = #tpu.dot_dimension_numbers<[1], [0], [0], [1], [0, 0, 1, 1], [], []>} : vector<128x128xbf16>, vector<128x128xbf16>, vector<128x128xf32> -> vector<128x128xf32>
      %39 = arith.addf %32, %38 : vector<128x128xf32>
      %c0_33 = arith.constant 0 : index
      %c1_34 = arith.constant 1 : index
      %c1_35 = arith.constant 1 : index
      %c0_36 = arith.constant 0 : index
      %40 = vector.load %arg2[%c0_33, %c1_34, %c1_35, %c0_36] : memref<1x18x18x128xbf16, #tpu.memory_space<vmem>>, vector<1x8x16x128xbf16>
      %41 = vector.shape_cast %40 : vector<1x8x16x128xbf16> to vector<8x16x128xbf16>
      %42 = vector.shape_cast %41 : vector<8x16x128xbf16> to vector<128x128xbf16>
      %c4 = arith.constant 4 : index
      %c0_37 = arith.constant 0 : index
      %c0_38 = arith.constant 0 : index
      %43 = vector.load %arg3[%c4, %c0_37, %c0_38] : memref<9x128x128xbf16, #tpu.memory_space<vmem>>, vector<1x128x128xbf16>
      %44 = vector.shape_cast %43 : vector<1x128x128xbf16> to vector<128x128xbf16>
      %cst_39 = arith.constant dense<0.000000e+00> : vector<128x128xf32>
      %45 = tpu.matmul %42, %44, %cst_39 {dimension_numbers = #tpu.dot_dimension_numbers<[1], [0], [0], [1], [0, 0, 1, 1], [], []>} : vector<128x128xbf16>, vector<128x128xbf16>, vector<128x128xf32> -> vector<128x128xf32>
      %46 = arith.addf %39, %45 : vector<128x128xf32>
      %c0_40 = arith.constant 0 : index
      %c1_41 = arith.constant 1 : index
      %c2_42 = arith.constant 2 : index
      %c0_43 = arith.constant 0 : index
      %47 = vector.load %arg2[%c0_40, %c1_41, %c2_42, %c0_43] : memref<1x18x18x128xbf16, #tpu.memory_space<vmem>>, vector<1x8x16x128xbf16>
      %48 = vector.shape_cast %47 : vector<1x8x16x128xbf16> to vector<8x16x128xbf16>
      %49 = vector.shape_cast %48 : vector<8x16x128xbf16> to vector<128x128xbf16>
      %c5 = arith.constant 5 : index
      %c0_44 = arith.constant 0 : index
      %c0_45 = arith.constant 0 : index
      %50 = vector.load %arg3[%c5, %c0_44, %c0_45] : memref<9x128x128xbf16, #tpu.memory_space<vmem>>, vector<1x128x128xbf16>
      %51 = vector.shape_cast %50 : vector<1x128x128xbf16> to vector<128x128xbf16>
      %cst_46 = arith.constant dense<0.000000e+00> : vector<128x128xf32>
      %52 = tpu.matmul %49, %51, %cst_46 {dimension_numbers = #tpu.dot_dimension_numbers<[1], [0], [0], [1], [0, 0, 1, 1], [], []>} : vector<128x128xbf16>, vector<128x128xbf16>, vector<128x128xf32> -> vector<128x128xf32>
      %53 = arith.addf %46, %52 : vector<128x128xf32>
      %c0_47 = arith.constant 0 : index
      %c2_48 = arith.constant 2 : index
      %c0_49 = arith.constant 0 : index
      %c0_50 = arith.constant 0 : index
      %54 = vector.load %arg2[%c0_47, %c2_48, %c0_49, %c0_50] : memref<1x18x18x128xbf16, #tpu.memory_space<vmem>>, vector<1x8x16x128xbf16>
      %55 = vector.shape_cast %54 : vector<1x8x16x128xbf16> to vector<8x16x128xbf16>
      %56 = vector.shape_cast %55 : vector<8x16x128xbf16> to vector<128x128xbf16>
      %c6 = arith.constant 6 : index
      %c0_51 = arith.constant 0 : index
      %c0_52 = arith.constant 0 : index
      %57 = vector.load %arg3[%c6, %c0_51, %c0_52] : memref<9x128x128xbf16, #tpu.memory_space<vmem>>, vector<1x128x128xbf16>
      %58 = vector.shape_cast %57 : vector<1x128x128xbf16> to vector<128x128xbf16>
      %cst_53 = arith.constant dense<0.000000e+00> : vector<128x128xf32>
      %59 = tpu.matmul %56, %58, %cst_53 {dimension_numbers = #tpu.dot_dimension_numbers<[1], [0], [0], [1], [0, 0, 1, 1], [], []>} : vector<128x128xbf16>, vector<128x128xbf16>, vector<128x128xf32> -> vector<128x128xf32>
      %60 = arith.addf %53, %59 : vector<128x128xf32>
      %c0_54 = arith.constant 0 : index
      %c2_55 = arith.constant 2 : index
      %c1_56 = arith.constant 1 : index
      %c0_57 = arith.constant 0 : index
      %61 = vector.load %arg2[%c0_54, %c2_55, %c1_56, %c0_57] : memref<1x18x18x128xbf16, #tpu.memory_space<vmem>>, vector<1x8x16x128xbf16>
      %62 = vector.shape_cast %61 : vector<1x8x16x128xbf16> to vector<8x16x128xbf16>
      %63 = vector.shape_cast %62 : vector<8x16x128xbf16> to vector<128x128xbf16>
      %c7 = arith.constant 7 : index
      %c0_58 = arith.constant 0 : index
      %c0_59 = arith.constant 0 : index
      %64 = vector.load %arg3[%c7, %c0_58, %c0_59] : memref<9x128x128xbf16, #tpu.memory_space<vmem>>, vector<1x128x128xbf16>
      %65 = vector.shape_cast %64 : vector<1x128x128xbf16> to vector<128x128xbf16>
      %cst_60 = arith.constant dense<0.000000e+00> : vector<128x128xf32>
      %66 = tpu.matmul %63, %65, %cst_60 {dimension_numbers = #tpu.dot_dimension_numbers<[1], [0], [0], [1], [0, 0, 1, 1], [], []>} : vector<128x128xbf16>, vector<128x128xbf16>, vector<128x128xf32> -> vector<128x128xf32>
      %67 = arith.addf %60, %66 : vector<128x128xf32>
      %c0_61 = arith.constant 0 : index
      %c2_62 = arith.constant 2 : index
      %c2_63 = arith.constant 2 : index
      %c0_64 = arith.constant 0 : index
      %68 = vector.load %arg2[%c0_61, %c2_62, %c2_63, %c0_64] : memref<1x18x18x128xbf16, #tpu.memory_space<vmem>>, vector<1x8x16x128xbf16>
      %69 = vector.shape_cast %68 : vector<1x8x16x128xbf16> to vector<8x16x128xbf16>
      %70 = vector.shape_cast %69 : vector<8x16x128xbf16> to vector<128x128xbf16>
      %c8 = arith.constant 8 : index
      %c0_65 = arith.constant 0 : index
      %c0_66 = arith.constant 0 : index
      %71 = vector.load %arg3[%c8, %c0_65, %c0_66] : memref<9x128x128xbf16, #tpu.memory_space<vmem>>, vector<1x128x128xbf16>
      %72 = vector.shape_cast %71 : vector<1x128x128xbf16> to vector<128x128xbf16>
      %cst_67 = arith.constant dense<0.000000e+00> : vector<128x128xf32>
      %73 = tpu.matmul %70, %72, %cst_67 {dimension_numbers = #tpu.dot_dimension_numbers<[1], [0], [0], [1], [0, 0, 1, 1], [], []>} : vector<128x128xbf16>, vector<128x128xbf16>, vector<128x128xf32> -> vector<128x128xf32>
      %74 = arith.addf %67, %73 : vector<128x128xf32>
      %75 = arith.index_cast %arg1 : i32 to index
      %c0_68 = arith.constant 0 : index
      %c0_69 = arith.constant 0 : index
      %76 = vector.load %arg7[%75, %c0_68, %c0_69] : memref<2x256x128xf32, #tpu.memory_space<vmem>>, vector<1x128x128xf32>
      %77 = vector.shape_cast %76 : vector<1x128x128xf32> to vector<128x128xf32>
      %78 = vector.shape_cast %74 : vector<128x128xf32> to vector<1x128x128xf32>
      tpu.vector_store %arg7[%75, %c0_68, %c0_69], %78 {strides = array<i32>} : memref<2x256x128xf32, #tpu.memory_space<vmem>>, vector<1x128x128xf32>,
      %c0_70 = arith.constant 0 : index
      %c0_71 = arith.constant 0 : index
      %79 = vector.load %arg8[%c0_70, %c0_71] : memref<1x128xf32, #tpu.memory_space<vmem>>, vector<1x128xf32>
      %cst_72 = arith.constant dense<0.000000e+00> : vector<128xf32>
      %80 = vector.multi_reduction <add>, %74, %cst_72 [0] : vector<128x128xf32> to vector<128xf32>
      %81 = vector.shape_cast %80 : vector<128xf32> to vector<1x128xf32>
      %82 = arith.addf %79, %81 : vector<1x128xf32>
      %c0_73 = arith.constant 0 : index
      %c0_74 = arith.constant 0 : index
      %83 = vector.load %arg8[%c0_73, %c0_74] : memref<1x128xf32, #tpu.memory_space<vmem>>, vector<1x128xf32>
      tpu.vector_store %arg8[%c0_73, %c0_74], %82 {strides = array<i32>} : memref<1x128xf32, #tpu.memory_space<vmem>>, vector<1x128xf32>,
      %c0_75 = arith.constant 0 : index
      %c0_76 = arith.constant 0 : index
      %84 = vector.load %arg9[%c0_75, %c0_76] : memref<1x128xf32, #tpu.memory_space<vmem>>, vector<1x128xf32>
      %85 = arith.mulf %74, %74 : vector<128x128xf32>
      %cst_77 = arith.constant dense<0.000000e+00> : vector<128xf32>
      %86 = vector.multi_reduction <add>, %85, %cst_77 [0] : vector<128x128xf32> to vector<128xf32>
      %87 = vector.shape_cast %86 : vector<128xf32> to vector<1x128xf32>
      %88 = arith.addf %84, %87 : vector<1x128xf32>
      %c0_78 = arith.constant 0 : index
      %c0_79 = arith.constant 0 : index
      %89 = vector.load %arg9[%c0_78, %c0_79] : memref<1x128xf32, #tpu.memory_space<vmem>>, vector<1x128xf32>
      tpu.vector_store %arg9[%c0_78, %c0_79], %88 {strides = array<i32>} : memref<1x128xf32, #tpu.memory_space<vmem>>, vector<1x128xf32>,
      %90 = vector.extract_strided_slice %74 {offsets = [0, 0], sizes = [128, 8], strides = [1, 1]} : vector<128x128xf32> to vector<128x8xf32>
      %c0_80 = arith.constant 0 : index
      %c0_81 = arith.constant 0 : index
      %c0_82 = arith.constant 0 : index
      %91 = vector.load %arg6[%c0_80, %c0_81, %c0_82] : memref<1x256x8xf32, #tpu.memory_space<vmem>>, vector<1x128x8xf32>
      %92 = vector.shape_cast %91 : vector<1x128x8xf32> to vector<128x8xf32>
      %93 = vector.shape_cast %90 : vector<128x8xf32> to vector<1x128x8xf32>
      tpu.vector_store %arg6[%c0_80, %c0_81, %c0_82], %93 {strides = array<i32>} : memref<1x256x8xf32, #tpu.memory_space<vmem>>, vector<1x128x8xf32>,
      %cst_83 = arith.constant 0.000000e+00 : f32
      %94 = vector.broadcast %cst_83 : f32 to vector<128x128xf32>
      %c0_84 = arith.constant 0 : index
      %c8_85 = arith.constant 8 : index
      %c0_86 = arith.constant 0 : index
      %c0_87 = arith.constant 0 : index
      %95 = vector.load %arg2[%c0_84, %c8_85, %c0_86, %c0_87] : memref<1x18x18x128xbf16, #tpu.memory_space<vmem>>, vector<1x8x16x128xbf16>
      %96 = vector.shape_cast %95 : vector<1x8x16x128xbf16> to vector<8x16x128xbf16>
      %97 = vector.shape_cast %96 : vector<8x16x128xbf16> to vector<128x128xbf16>
      %c0_88 = arith.constant 0 : index
      %c0_89 = arith.constant 0 : index
      %c0_90 = arith.constant 0 : index
      %98 = vector.load %arg3[%c0_88, %c0_89, %c0_90] : memref<9x128x128xbf16, #tpu.memory_space<vmem>>, vector<1x128x128xbf16>
      %99 = vector.shape_cast %98 : vector<1x128x128xbf16> to vector<128x128xbf16>
      %cst_91 = arith.constant dense<0.000000e+00> : vector<128x128xf32>
      %100 = tpu.matmul %97, %99, %cst_91 {dimension_numbers = #tpu.dot_dimension_numbers<[1], [0], [0], [1], [0, 0, 1, 1], [], []>} : vector<128x128xbf16>, vector<128x128xbf16>, vector<128x128xf32> -> vector<128x128xf32>
      %101 = arith.addf %94, %100 : vector<128x128xf32>
      %c0_92 = arith.constant 0 : index
      %c8_93 = arith.constant 8 : index
      %c1_94 = arith.constant 1 : index
      %c0_95 = arith.constant 0 : index
      %102 = vector.load %arg2[%c0_92, %c8_93, %c1_94, %c0_95] : memref<1x18x18x128xbf16, #tpu.memory_space<vmem>>, vector<1x8x16x128xbf16>
      %103 = vector.shape_cast %102 : vector<1x8x16x128xbf16> to vector<8x16x128xbf16>
      %104 = vector.shape_cast %103 : vector<8x16x128xbf16> to vector<128x128xbf16>
      %c1_96 = arith.constant 1 : index
      %c0_97 = arith.constant 0 : index
      %c0_98 = arith.constant 0 : index
      %105 = vector.load %arg3[%c1_96, %c0_97, %c0_98] : memref<9x128x128xbf16, #tpu.memory_space<vmem>>, vector<1x128x128xbf16>
      %106 = vector.shape_cast %105 : vector<1x128x128xbf16> to vector<128x128xbf16>
      %cst_99 = arith.constant dense<0.000000e+00> : vector<128x128xf32>
      %107 = tpu.matmul %104, %106, %cst_99 {dimension_numbers = #tpu.dot_dimension_numbers<[1], [0], [0], [1], [0, 0, 1, 1], [], []>} : vector<128x128xbf16>, vector<128x128xbf16>, vector<128x128xf32> -> vector<128x128xf32>
      %108 = arith.addf %101, %107 : vector<128x128xf32>
      %c0_100 = arith.constant 0 : index
      %c8_101 = arith.constant 8 : index
      %c2_102 = arith.constant 2 : index
      %c0_103 = arith.constant 0 : index
      %109 = vector.load %arg2[%c0_100, %c8_101, %c2_102, %c0_103] : memref<1x18x18x128xbf16, #tpu.memory_space<vmem>>, vector<1x8x16x128xbf16>
      %110 = vector.shape_cast %109 : vector<1x8x16x128xbf16> to vector<8x16x128xbf16>
      %111 = vector.shape_cast %110 : vector<8x16x128xbf16> to vector<128x128xbf16>
      %c2_104 = arith.constant 2 : index
      %c0_105 = arith.constant 0 : index
      %c0_106 = arith.constant 0 : index
      %112 = vector.load %arg3[%c2_104, %c0_105, %c0_106] : memref<9x128x128xbf16, #tpu.memory_space<vmem>>, vector<1x128x128xbf16>
      %113 = vector.shape_cast %112 : vector<1x128x128xbf16> to vector<128x128xbf16>
      %cst_107 = arith.constant dense<0.000000e+00> : vector<128x128xf32>
      %114 = tpu.matmul %111, %113, %cst_107 {dimension_numbers = #tpu.dot_dimension_numbers<[1], [0], [0], [1], [0, 0, 1, 1], [], []>} : vector<128x128xbf16>, vector<128x128xbf16>, vector<128x128xf32> -> vector<128x128xf32>
      %115 = arith.addf %108, %114 : vector<128x128xf32>
      %c0_108 = arith.constant 0 : index
      %c9 = arith.constant 9 : index
      %c0_109 = arith.constant 0 : index
      %c0_110 = arith.constant 0 : index
      %116 = vector.load %arg2[%c0_108, %c9, %c0_109, %c0_110] : memref<1x18x18x128xbf16, #tpu.memory_space<vmem>>, vector<1x8x16x128xbf16>
      %117 = vector.shape_cast %116 : vector<1x8x16x128xbf16> to vector<8x16x128xbf16>
      %118 = vector.shape_cast %117 : vector<8x16x128xbf16> to vector<128x128xbf16>
      %c3_111 = arith.constant 3 : index
      %c0_112 = arith.constant 0 : index
      %c0_113 = arith.constant 0 : index
      %119 = vector.load %arg3[%c3_111, %c0_112, %c0_113] : memref<9x128x128xbf16, #tpu.memory_space<vmem>>, vector<1x128x128xbf16>
      %120 = vector.shape_cast %119 : vector<1x128x128xbf16> to vector<128x128xbf16>
      %cst_114 = arith.constant dense<0.000000e+00> : vector<128x128xf32>
      %121 = tpu.matmul %118, %120, %cst_114 {dimension_numbers = #tpu.dot_dimension_numbers<[1], [0], [0], [1], [0, 0, 1, 1], [], []>} : vector<128x128xbf16>, vector<128x128xbf16>, vector<128x128xf32> -> vector<128x128xf32>
      %122 = arith.addf %115, %121 : vector<128x128xf32>
      %c0_115 = arith.constant 0 : index
      %c9_116 = arith.constant 9 : index
      %c1_117 = arith.constant 1 : index
      %c0_118 = arith.constant 0 : index
      %123 = vector.load %arg2[%c0_115, %c9_116, %c1_117, %c0_118] : memref<1x18x18x128xbf16, #tpu.memory_space<vmem>>, vector<1x8x16x128xbf16>
      %124 = vector.shape_cast %123 : vector<1x8x16x128xbf16> to vector<8x16x128xbf16>
      %125 = vector.shape_cast %124 : vector<8x16x128xbf16> to vector<128x128xbf16>
      %c4_119 = arith.constant 4 : index
      %c0_120 = arith.constant 0 : index
      %c0_121 = arith.constant 0 : index
      %126 = vector.load %arg3[%c4_119, %c0_120, %c0_121] : memref<9x128x128xbf16, #tpu.memory_space<vmem>>, vector<1x128x128xbf16>
      %127 = vector.shape_cast %126 : vector<1x128x128xbf16> to vector<128x128xbf16>
      %cst_122 = arith.constant dense<0.000000e+00> : vector<128x128xf32>
      %128 = tpu.matmul %125, %127, %cst_122 {dimension_numbers = #tpu.dot_dimension_numbers<[1], [0], [0], [1], [0, 0, 1, 1], [], []>} : vector<128x128xbf16>, vector<128x128xbf16>, vector<128x128xf32> -> vector<128x128xf32>
      %129 = arith.addf %122, %128 : vector<128x128xf32>
      %c0_123 = arith.constant 0 : index
      %c9_124 = arith.constant 9 : index
      %c2_125 = arith.constant 2 : index
      %c0_126 = arith.constant 0 : index
      %130 = vector.load %arg2[%c0_123, %c9_124, %c2_125, %c0_126] : memref<1x18x18x128xbf16, #tpu.memory_space<vmem>>, vector<1x8x16x128xbf16>
      %131 = vector.shape_cast %130 : vector<1x8x16x128xbf16> to vector<8x16x128xbf16>
      %132 = vector.shape_cast %131 : vector<8x16x128xbf16> to vector<128x128xbf16>
      %c5_127 = arith.constant 5 : index
      %c0_128 = arith.constant 0 : index
      %c0_129 = arith.constant 0 : index
      %133 = vector.load %arg3[%c5_127, %c0_128, %c0_129] : memref<9x128x128xbf16, #tpu.memory_space<vmem>>, vector<1x128x128xbf16>
      %134 = vector.shape_cast %133 : vector<1x128x128xbf16> to vector<128x128xbf16>
      %cst_130 = arith.constant dense<0.000000e+00> : vector<128x128xf32>
      %135 = tpu.matmul %132, %134, %cst_130 {dimension_numbers = #tpu.dot_dimension_numbers<[1], [0], [0], [1], [0, 0, 1, 1], [], []>} : vector<128x128xbf16>, vector<128x128xbf16>, vector<128x128xf32> -> vector<128x128xf32>
      %136 = arith.addf %129, %135 : vector<128x128xf32>
      %c0_131 = arith.constant 0 : index
      %c10 = arith.constant 10 : index
      %c0_132 = arith.constant 0 : index
      %c0_133 = arith.constant 0 : index
      %137 = vector.load %arg2[%c0_131, %c10, %c0_132, %c0_133] : memref<1x18x18x128xbf16, #tpu.memory_space<vmem>>, vector<1x8x16x128xbf16>
      %138 = vector.shape_cast %137 : vector<1x8x16x128xbf16> to vector<8x16x128xbf16>
      %139 = vector.shape_cast %138 : vector<8x16x128xbf16> to vector<128x128xbf16>
      %c6_134 = arith.constant 6 : index
      %c0_135 = arith.constant 0 : index
      %c0_136 = arith.constant 0 : index
      %140 = vector.load %arg3[%c6_134, %c0_135, %c0_136] : memref<9x128x128xbf16, #tpu.memory_space<vmem>>, vector<1x128x128xbf16>
      %141 = vector.shape_cast %140 : vector<1x128x128xbf16> to vector<128x128xbf16>
      %cst_137 = arith.constant dense<0.000000e+00> : vector<128x128xf32>
      %142 = tpu.matmul %139, %141, %cst_137 {dimension_numbers = #tpu.dot_dimension_numbers<[1], [0], [0], [1], [0, 0, 1, 1], [], []>} : vector<128x128xbf16>, vector<128x128xbf16>, vector<128x128xf32> -> vector<128x128xf32>
      %143 = arith.addf %136, %142 : vector<128x128xf32>
      %c0_138 = arith.constant 0 : index
      %c10_139 = arith.constant 10 : index
      %c1_140 = arith.constant 1 : index
      %c0_141 = arith.constant 0 : index
      %144 = vector.load %arg2[%c0_138, %c10_139, %c1_140, %c0_141] : memref<1x18x18x128xbf16, #tpu.memory_space<vmem>>, vector<1x8x16x128xbf16>
      %145 = vector.shape_cast %144 : vector<1x8x16x128xbf16> to vector<8x16x128xbf16>
      %146 = vector.shape_cast %145 : vector<8x16x128xbf16> to vector<128x128xbf16>
      %c7_142 = arith.constant 7 : index
      %c0_143 = arith.constant 0 : index
      %c0_144 = arith.constant 0 : index
      %147 = vector.load %arg3[%c7_142, %c0_143, %c0_144] : memref<9x128x128xbf16, #tpu.memory_space<vmem>>, vector<1x128x128xbf16>
      %148 = vector.shape_cast %147 : vector<1x128x128xbf16> to vector<128x128xbf16>
      %cst_145 = arith.constant dense<0.000000e+00> : vector<128x128xf32>
      %149 = tpu.matmul %146, %148, %cst_145 {dimension_numbers = #tpu.dot_dimension_numbers<[1], [0], [0], [1], [0, 0, 1, 1], [], []>} : vector<128x128xbf16>, vector<128x128xbf16>, vector<128x128xf32> -> vector<128x128xf32>
      %150 = arith.addf %143, %149 : vector<128x128xf32>
      %c0_146 = arith.constant 0 : index
      %c10_147 = arith.constant 10 : index
      %c2_148 = arith.constant 2 : index
      %c0_149 = arith.constant 0 : index
      %151 = vector.load %arg2[%c0_146, %c10_147, %c2_148, %c0_149] : memref<1x18x18x128xbf16, #tpu.memory_space<vmem>>, vector<1x8x16x128xbf16>
      %152 = vector.shape_cast %151 : vector<1x8x16x128xbf16> to vector<8x16x128xbf16>
      %153 = vector.shape_cast %152 : vector<8x16x128xbf16> to vector<128x128xbf16>
      %c8_150 = arith.constant 8 : index
      %c0_151 = arith.constant 0 : index
      %c0_152 = arith.constant 0 : index
      %154 = vector.load %arg3[%c8_150, %c0_151, %c0_152] : memref<9x128x128xbf16, #tpu.memory_space<vmem>>, vector<1x128x128xbf16>
      %155 = vector.shape_cast %154 : vector<1x128x128xbf16> to vector<128x128xbf16>
      %cst_153 = arith.constant dense<0.000000e+00> : vector<128x128xf32>
      %156 = tpu.matmul %153, %155, %cst_153 {dimension_numbers = #tpu.dot_dimension_numbers<[1], [0], [0], [1], [0, 0, 1, 1], [], []>} : vector<128x128xbf16>, vector<128x128xbf16>, vector<128x128xf32> -> vector<128x128xf32>
      %157 = arith.addf %150, %156 : vector<128x128xf32>
      %158 = arith.index_cast %arg1 : i32 to index
      %c128 = arith.constant 128 : index
      %c0_154 = arith.constant 0 : index
      %159 = vector.load %arg7[%158, %c128, %c0_154] : memref<2x256x128xf32, #tpu.memory_space<vmem>>, vector<1x128x128xf32>
      %160 = vector.shape_cast %159 : vector<1x128x128xf32> to vector<128x128xf32>
      %161 = vector.shape_cast %157 : vector<128x128xf32> to vector<1x128x128xf32>
      tpu.vector_store %arg7[%158, %c128, %c0_154], %161 {strides = array<i32>} : memref<2x256x128xf32, #tpu.memory_space<vmem>>, vector<1x128x128xf32>,
      %c0_155 = arith.constant 0 : index
      %c0_156 = arith.constant 0 : index
      %162 = vector.load %arg8[%c0_155, %c0_156] : memref<1x128xf32, #tpu.memory_space<vmem>>, vector<1x128xf32>
      %cst_157 = arith.constant dense<0.000000e+00> : vector<128xf32>
      %163 = vector.multi_reduction <add>, %157, %cst_157 [0] : vector<128x128xf32> to vector<128xf32>
      %164 = vector.shape_cast %163 : vector<128xf32> to vector<1x128xf32>
      %165 = arith.addf %162, %164 : vector<1x128xf32>
      %c0_158 = arith.constant 0 : index
      %c0_159 = arith.constant 0 : index
      %166 = vector.load %arg8[%c0_158, %c0_159] : memref<1x128xf32, #tpu.memory_space<vmem>>, vector<1x128xf32>
      tpu.vector_store %arg8[%c0_158, %c0_159], %165 {strides = array<i32>} : memref<1x128xf32, #tpu.memory_space<vmem>>, vector<1x128xf32>,
      %c0_160 = arith.constant 0 : index
      %c0_161 = arith.constant 0 : index
      %167 = vector.load %arg9[%c0_160, %c0_161] : memref<1x128xf32, #tpu.memory_space<vmem>>, vector<1x128xf32>
      %168 = arith.mulf %157, %157 : vector<128x128xf32>
      %cst_162 = arith.constant dense<0.000000e+00> : vector<128xf32>
      %169 = vector.multi_reduction <add>, %168, %cst_162 [0] : vector<128x128xf32> to vector<128xf32>
      %170 = vector.shape_cast %169 : vector<128xf32> to vector<1x128xf32>
      %171 = arith.addf %167, %170 : vector<1x128xf32>
      %c0_163 = arith.constant 0 : index
      %c0_164 = arith.constant 0 : index
      %172 = vector.load %arg9[%c0_163, %c0_164] : memref<1x128xf32, #tpu.memory_space<vmem>>, vector<1x128xf32>
      tpu.vector_store %arg9[%c0_163, %c0_164], %171 {strides = array<i32>} : memref<1x128xf32, #tpu.memory_space<vmem>>, vector<1x128xf32>,
      %173 = vector.extract_strided_slice %157 {offsets = [0, 0], sizes = [128, 8], strides = [1, 1]} : vector<128x128xf32> to vector<128x8xf32>
      %c0_165 = arith.constant 0 : index
      %c128_166 = arith.constant 128 : index
      %c0_167 = arith.constant 0 : index
      %174 = vector.load %arg6[%c0_165, %c128_166, %c0_167] : memref<1x256x8xf32, #tpu.memory_space<vmem>>, vector<1x128x8xf32>
      %175 = vector.shape_cast %174 : vector<1x128x8xf32> to vector<128x8xf32>
      %176 = vector.shape_cast %173 : vector<128x8xf32> to vector<1x128x8xf32>
      tpu.vector_store %arg6[%c0_165, %c128_166, %c0_167], %176 {strides = array<i32>} : memref<1x256x8xf32, #tpu.memory_space<vmem>>, vector<1x128x8xf32>,
    } else {
    }
    %c1_i32 = arith.constant 1 : i32
    %8 = arith.cmpi eq, %arg0, %c1_i32 : i32
    %9 = arith.extui %8 : i1 to i32
    %c0_i32_4 = arith.constant 0 : i32
    %10 = arith.cmpi ne, %9, %c0_i32_4 : i32
    scf.if %10 {
      %c0 = arith.constant 0 : index
      %c0_5 = arith.constant 0 : index
      %11 = vector.load %arg8[%c0, %c0_5] : memref<1x128xf32, #tpu.memory_space<vmem>>, vector<1x128xf32>
      %cst = arith.constant 0.001953125 : f32
      %12 = vector.broadcast %cst : f32 to vector<1x128xf32>
      %13 = arith.mulf %11, %12 : vector<1x128xf32>
      %c0_6 = arith.constant 0 : index
      %c0_7 = arith.constant 0 : index
      %14 = vector.load %arg9[%c0_6, %c0_7] : memref<1x128xf32, #tpu.memory_space<vmem>>, vector<1x128xf32>
      %cst_8 = arith.constant 0.001953125 : f32
      %15 = vector.broadcast %cst_8 : f32 to vector<1x128xf32>
      %16 = arith.mulf %14, %15 : vector<1x128xf32>
      %17 = arith.mulf %13, %13 : vector<1x128xf32>
      %18 = arith.subf %16, %17 : vector<1x128xf32>
      %cst_9 = arith.constant 0.000000e+00 : f32
      %19 = vector.broadcast %cst_9 : f32 to vector<1x128xf32>
      %20 = arith.maximumf %18, %19 : vector<1x128xf32>
      %c0_10 = arith.constant 0 : index
      %c0_11 = arith.constant 0 : index
      %21 = vector.load %arg4[%c0_10, %c0_11] : memref<1x128xf32, #tpu.memory_space<vmem>>, vector<1x128xf32>
      %cst_12 = arith.constant 9.99999974E-6 : f32
      %22 = vector.broadcast %cst_12 : f32 to vector<1x128xf32>
      %23 = arith.addf %20, %22 : vector<1x128xf32>
      %24 = math.rsqrt %23 : vector<1x128xf32>
      %25 = arith.mulf %21, %24 : vector<1x128xf32>
      %c0_13 = arith.constant 0 : index
      %c0_14 = arith.constant 0 : index
      %26 = vector.load %arg5[%c0_13, %c0_14] : memref<1x128xf32, #tpu.memory_space<vmem>>, vector<1x128xf32>
      %27 = arith.mulf %13, %25 : vector<1x128xf32>
      %28 = arith.subf %26, %27 : vector<1x128xf32>
      %29 = arith.index_cast %arg1 : i32 to index
      %c0_15 = arith.constant 0 : index
      %c0_16 = arith.constant 0 : index
      %30 = vector.load %arg7[%29, %c0_15, %c0_16] : memref<2x256x128xf32, #tpu.memory_space<vmem>>, vector<1x128x128xf32>
      %31 = vector.shape_cast %30 : vector<1x128x128xf32> to vector<128x128xf32>
      %32 = vector.broadcast %25 : vector<1x128xf32> to vector<128x128xf32>
      %33 = arith.mulf %31, %32 : vector<128x128xf32>
      %34 = vector.broadcast %28 : vector<1x128xf32> to vector<128x128xf32>
      %35 = arith.addf %33, %34 : vector<128x128xf32>
      %cst_17 = arith.constant 0.000000e+00 : f32
      %36 = vector.broadcast %cst_17 : f32 to vector<128x128xf32>
      %37 = arith.maximumf %35, %36 : vector<128x128xf32>
      %38 = vector.extract_strided_slice %37 {offsets = [0, 0], sizes = [128, 8], strides = [1, 1]} : vector<128x128xf32> to vector<128x8xf32>
      %c0_18 = arith.constant 0 : index
      %c0_19 = arith.constant 0 : index
      %c0_20 = arith.constant 0 : index
      %39 = vector.load %arg6[%c0_18, %c0_19, %c0_20] : memref<1x256x8xf32, #tpu.memory_space<vmem>>, vector<1x128x8xf32>
      %40 = vector.shape_cast %39 : vector<1x128x8xf32> to vector<128x8xf32>
      %41 = vector.shape_cast %38 : vector<128x8xf32> to vector<1x128x8xf32>
      tpu.vector_store %arg6[%c0_18, %c0_19, %c0_20], %41 {strides = array<i32>} : memref<1x256x8xf32, #tpu.memory_space<vmem>>, vector<1x128x8xf32>,
      %42 = arith.index_cast %arg1 : i32 to index
      %c128 = arith.constant 128 : index
      %c0_21 = arith.constant 0 : index
      %43 = vector.load %arg7[%42, %c128, %c0_21] : memref<2x256x128xf32, #tpu.memory_space<vmem>>, vector<1x128x128xf32>
      %44 = vector.shape_cast %43 : vector<1x128x128xf32> to vector<128x128xf32>
      %45 = vector.broadcast %25 : vector<1x128xf32> to vector<128x128xf32>
      %46 = arith.mulf %44, %45 : vector<128x128xf32>
      %47 = vector.broadcast %28 : vector<1x128xf32> to vector<128x128xf32>
      %48 = arith.addf %46, %47 : vector<128x128xf32>
      %cst_22 = arith.constant 0.000000e+00 : f32
      %49 = vector.broadcast %cst_22 : f32 to vector<128x128xf32>
      %50 = arith.maximumf %48, %49 : vector<128x128xf32>
      %51 = vector.extract_strided_slice %50 {offsets = [0, 0], sizes = [128, 8], strides = [1, 1]} : vector<128x128xf32> to vector<128x8xf32>
      %c0_23 = arith.constant 0 : index
      %c128_24 = arith.constant 128 : index
      %c0_25 = arith.constant 0 : index
      %52 = vector.load %arg6[%c0_23, %c128_24, %c0_25] : memref<1x256x8xf32, #tpu.memory_space<vmem>>, vector<1x128x8xf32>
      %53 = vector.shape_cast %52 : vector<1x128x8xf32> to vector<128x8xf32>
      %54 = vector.shape_cast %51 : vector<128x8xf32> to vector<1x128x8xf32>
      tpu.vector_store %arg6[%c0_23, %c128_24, %c0_25], %54 {strides = array<i32>} : memref<1x256x8xf32, #tpu.memory_space<vmem>>, vector<1x128x8xf32>,
    } else {
    }
    return
  }
  func.func @transform_0(%arg0: i32, %arg1: i32) -> (i32, i32, i32, i32) {
    %c1_i32 = arith.constant 1 : i32
    %0 = arith.subi %c1_i32, %arg0 : i32
    %1 = arith.muli %0, %arg1 : i32
    %c0_i32 = arith.constant 0 : i32
    %c0_i32_0 = arith.constant 0 : i32
    %c0_i32_1 = arith.constant 0 : i32
    %c0_i32_2 = arith.constant 0 : i32
    return %1, %c0_i32, %c0_i32_0, %c0_i32_1 : i32, i32, i32, i32
  }
  func.func @transform_1(%arg0: i32, %arg1: i32) -> (i32, i32, i32) {
    %c0_i32 = arith.constant 0 : i32
    %c0_i32_0 = arith.constant 0 : i32
    %c0_i32_1 = arith.constant 0 : i32
    %c0_i32_2 = arith.constant 0 : i32
    return %c0_i32, %c0_i32_0, %c0_i32_1 : i32, i32, i32
  }
  func.func @transform_2(%arg0: i32, %arg1: i32) -> (i32, i32) {
    %c0_i32 = arith.constant 0 : i32
    %c0_i32_0 = arith.constant 0 : i32
    %c0_i32_1 = arith.constant 0 : i32
    return %c0_i32, %c0_i32_0 : i32, i32
  }
  func.func @transform_3(%arg0: i32, %arg1: i32) -> (i32, i32) {
    %c0_i32 = arith.constant 0 : i32
    %c0_i32_0 = arith.constant 0 : i32
    %c0_i32_1 = arith.constant 0 : i32
    return %c0_i32, %c0_i32_0 : i32, i32
  }
  func.func @transform_4(%arg0: i32, %arg1: i32) -> (i32, i32, i32) {
    %0 = arith.muli %arg0, %arg1 : i32
    %c0_i32 = arith.constant 0 : i32
    %c0_i32_0 = arith.constant 0 : i32
    %c0_i32_1 = arith.constant 0 : i32
    return %0, %c0_i32, %c0_i32_0 : i32, i32, i32
  }
}

</mosaic_0001>

<bundles_post_ra>
// kernel: up_forward.2
= control target key start
LH: loop header
LB: loop body
LE: loop exit
PB: predicated region body
PF: predicated region fallthrough
CT: control target
= control target key end

     0   :  { %s7528_s15 = smov 0   ;;  %s7530_s16 = smov 0   ;;  %s10060_s0 = inlined_call_operand.vmem [shape: bf16[2,18,18,16], index: 0, kind: input, shape index: {}]   ;;  %s10061_s1 = inlined_call_operand.vmem [shape: bf16[9,16,128], index: 1, kind: input, shape index: {}]   ;;  %s10062_s2 = inlined_call_operand.vmem [shape: f32[1,128], index: 2, kind: input, shape index: {}]   ;;  %s10063_s3 = inlined_call_operand.vmem [shape: f32[1,128], index: 3, kind: input, shape index: {}]   ;;  %s10064_s4 = inlined_call_operand.vmem [shape: bf16[2,256,128], index: 4, kind: output, shape index: {}]  }
   0x1   :  { %s7532_s17 = smov 0   ;;  %s7534_s18 = smov 0  }
   0x2   :  { %s7536_s19 = smov 0  }
   0x3 LB: > { %s23_s20 = sadd.s32 1, %s7492_s17  ;;  %s26_s21 = sadd.s32 1, %s7496_s18  ;;  %s7500_s19 = sphi %s7536_s19, %s14_s19   ;;  %s7496_s18 = sphi %s7534_s18, %s10184_s18   ;;  %s7492_s17 = sphi %s7532_s17, %s10183_s17   ;;  %s7488_s16 = sphi %s7530_s16, %s10182_s16   ;;  %s7484_s15 = sphi %s7528_s15, %s10181_s15  }
   0x4   : > { %p24_p0 = scmp.ge.s32.totalorder %s23_s20, 2  ;;  %p5927_p1 = scmp.ge.s32.totalorder %s7500_s19, 1 }
   0x5   : > { %p184_p2 = scmp.lt.s32.totalorder %s7500_s19, 5 }
   0x6   : > { %s10186_s20 = smov (%p24_p0, %s23_s20), 0  ;;  %s10188_s21 = smov (!%p24_p0, %s26_s21), %s7496_s18 }
   0x7   : > { %p185_p3 = pnand %p5927_p1, %p184_p2  ;;  %p28_p4 = scmp.ge.s32.totalorder %s10188_s21, 2 }
   0x8   : > { %s213_s22 = ssub.s32 (!%p185_p3), 1, %s7488_s16  ;;  %s222_s23 = smul.u32 (!%p185_p3), %s7484_s15, %s7488_s16 }
   0x9   : > { %s10190_s21 = smov (%p28_p4, %s10188_s21), 0  ;;  %188 = sbr.rel (%p185_p3) target bundleno = 644 (0x284), region = 36 }
   0xa   : > { %s214_s24 = smul.u32 (!%p185_p3), %s7484_s15, %s213_s22  ;;  %p230_p5 = scmp.eq.s32.totalorder (!%p185_p3), %s7488_s16, 0 }
   0xb   : > { %p223_p6 = scmp.lt.s32.totalorder (!%p185_p3), %s222_s23, 1  ;;  %p231_p7 = scmp.eq.s32.totalorder (!%p185_p3), %s7484_s15, 0 }
   0xc   : > { %p215_p8 = scmp.lt.s32.totalorder (!%p185_p3), %s214_s24, 1 }
   0xd   : > { %p232_p9 = pnand (!%p185_p3), %p231_p7, %p230_p5 }
   0xe   : > { %s10192_s23 = smov (!%p223_p6, %s222_s23), 1  ;;  %s10194_s24 = smov (!%p215_p8, %s214_s24), 1 }
   0xf   : > { %s6611_s25 = sshll.u32 %s10192_s23, 7  ;;  %s7352_s26 = smul.u32 216, %s10194_s24 }
  0x10   : > { %s7571_s29 = scalar_lea.vmem %s10064_s4, %s6611_s25  ;;  %235 = sbr.rel (%p232_p9) target bundleno = 23 (0x17), region = 40 }
  0x11   : > { %s7576_s6 = scalar_lea.vmem %s10060_s0, %s7352_s26 }
  0x15   : > { %v7502_v0 = vmov 0.0  }
  0x16   : > { %236 = vst [vmem:[#allocation3] sm:$0x1] %v7502_v0  ;;  %237 = vst [vmem:[#allocation4] sm:$0x1] %v7502_v0 }
  0x17 PF: > { %p5931_p10 = scmp.ne.s32.totalorder %s7488_s16, 0 }
  0x19   : > { %240 = sbr.rel (%p5931_p10) target bundleno = 574 (0x23e), region = 44 }
  0x1e   : > { %v7394_v1 = vld [vmem:[%s10061_s1] sm:$0xff]   ;;  %v7395_v2 = vld [vmem:[%s10061_s1 + $0x8] sm:$0xff]   ;;  %vm495_vm0 = vcmask 130048   ;;  %v7593_v10 = vld [vmem:[%s7576_s6 + $0x10] sm:$0xf]  ;;  %vm808_vm4 = vcmask 1042432  }
  0x1f   : > { %7046 = vmatprep.subr.bf16.mxu1 %v7394_v1  ;;  %v241_v3 = vld [vmem:[%s7576_s6] sm:$0xf]  ;;  %v7587_v4 = vld [vmem:[%s7576_s6 + $0x4] sm:$0xf]  ;;  %v243_v5 = vld [vmem:[%s7576_s6 + $0xc] sm:$0xf]  ;;  %7028 = vmatprep.subr.bf16.mxu0 %v7395_v2 }
  0x20   : > { %7047 = vmatpush3.bf16.msra.mxu1 %v7394_v1  ;;  %v271_v6 = vshrl.u32 %v241_v3, 16  ;;  %v274_v7 = vshll.u32 %v241_v3, 16  ;;  %v284_v8 = vshrl.u32 %v7587_v4, 16  ;;  %v5951_v9 = vcombine.low %v241_v3, %v7587_v4  ;;  %v7598_v11 = vld [vmem:[%s10061_s1 + $0x10] sm:$0xff]   ;;  %7029 = vmatpush3.bf16.msra.mxu0 %v7395_v2  ;;  %v7603_v16 = vld [vmem:[%s7576_s6 + $0x8] sm:$0x1] }
  0x21   : > { %v813_v12 = vrot.slane %v7587_v4, 5  ;;  %v295_v13 = vshrl.u32 %v243_v5, 16  ;;  %v298_v14 = vshll.u32 %v243_v5, 16  ;;  %v308_v15 = vshrl.u32 %v7593_v10, 16  ;;  %7064 = vmatprep.subr.bf16.mxu0 %v7598_v11  ;;  %v7399_v21 = vld [vmem:[%s10061_s1 + $0x18] sm:$0xff]  }
  0x22   : > { %v273_v17 = vrot.slane %v271_v6, 4  ;;  %v276_v18 = vrot.slane %v274_v7, 5  ;;  %7048 = vmatprep.mubr.msk.bf16.mxu1 %vm495_vm0, %v5951_v9  ;;  %v5952_v19 = vcombine.low %v243_v5, %v7593_v10  ;;  %v820_v20 = vrot.slane %v7593_v10, 5  ;;  %7082 = vmatprep.subr.bf16.mxu1 %v7399_v21  ;;  %v7628_v31 = vld [vmem:[%s7576_s6 + $0x14] sm:$0x1] }
  0x23   : > { %v297_v22 = vrot.slane %v295_v13, 4  ;;  %v300_v23 = vrot.slane %v298_v14, 5  ;;  %vm267_vm1 = vsmask.f32 3328  ;;  %v7614_v24 = vrot.slane %v813_v12, 4 }
  0x24   : > { %7049 = vmatmul.mubr.msk.bf16.vlgmr.msra.gmra.mxu1 %vm495_vm0, %v5952_v19  ;;  %vm268_vm2 = vsmask.f32 7440  ;;  %v277_v25 = vor.u32 %v276_v18, %v273_v17  ;;  %v280_v26 = vshll.u32 %v7587_v4, 16  ;;  %v7620_v27 = vrot.slane %v820_v20, 4  ;;  %v245_v45 = vld [vmem:[%s7576_s6 + $0x18] sm:$0xf] }
  0x25   : > { %vm7622_vm3 = vmor %vm267_vm1, %vm268_vm2  ;;  %v286_v29 = vrot.slane %v284_v8, 4  ;;  %v290_v30 = vshll.u32 %v7603_v16, 16  ;;  %v301_v32 = vor.u32 %v300_v23, %v297_v22  ;;  %7083 = vmatpush3.bf16.msra.mxu1 %v7399_v21  ;;  %v304_v35 = vshll.u32 %v7593_v10, 16  ;;  %v7638_v46 = vld [vmem:[%s7576_s6 + $0x1c] sm:$0xf]  ;;  %v7668_v17 = vld [vmem:[%s10061_s1 + $0x28] sm:$0xff]  }
  0x26   : > { %v278_v33 = vrot.slane %v277_v25, 4  ;;  %v282_v34 = vrot.slane %v280_v26, 5  ;;  %v310_v36 = vrot.slane %v308_v15, 4  ;;  %v816_v38 = vrot.slane %v7603_v16, 5  ;;  %v247_v51 = vld [vmem:[%s7576_s6 + $0x24] sm:$0xf]  ;;  %7118 = vmatprep.subr.bf16.mxu1 %v7668_v17 }
  0x27   : > { %v292_v37 = vrot.slane %v290_v30, 5  ;;  %v302_v39 = vrot.slane %v301_v32, 4  ;;  %v314_v40 = vshll.u32 %v7628_v31, 16  ;;  %v306_v43 = vrot.slane %v304_v35, 5  ;;  %v7646_v56 = vld [vmem:[%s7576_s6 + $0x28] sm:$0xf] }
  0x28   : > { %v283_v41 = vsel %vm7622_vm3, %v278_v33, %v282_v34  ;;  %v287_v42 = vor.u32 %v286_v29, %v282_v34  ;;  %v823_v44 = vrot.slane %v7628_v31, 5  ;;  %v319_v48 = vshrl.u32 %v245_v45, 16  ;;  %v7649_v61 = vld [vmem:[%s7576_s6 + $0x20] sm:$0x1]  ;;  %v7657_v7 = vld [vmem:[%s7576_s6 + $0x2c] sm:$0x1] }
  0x29   : > { %v316_v47 = vrot.slane %v314_v40, 5  ;;  %v322_v49 = vshll.u32 %v245_v45, 16  ;;  %v332_v50 = vshrl.u32 %v7638_v46, 16  ;;  %v307_v53 = vsel %vm7622_vm3, %v302_v39, %v306_v43  ;;  %v249_v15 = vld [vmem:[%s7576_s6 + $0x30] sm:$0xf]  ;;  %v7678_v25 = vld [vmem:[%s10061_s1 + $0x20] sm:$0xff]  }
  0x2a   : > { %v288_v52 = vrot.slane %v287_v42, 4  ;;  %v311_v54 = vor.u32 %v310_v36, %v306_v43  ;;  %v5953_v55 = vcombine.low %v245_v45, %v7638_v46  ;;  %v321_v57 = vrot.slane %v319_v48, 4  ;;  %v7673_v23 = vld [vmem:[%s7576_s6 + $0x34] sm:$0xf]  ;;  %v7689_v43 = vld [vmem:[%s7576_s6 + $0x40] sm:$0xf] }
  0x2b   : > { %v324_v58 = vrot.slane %v322_v49, 5  ;;  %v343_v59 = vshrl.u32 %v247_v51, 16  ;;  %v346_v60 = vshll.u32 %v247_v51, 16  ;;  %v356_v0 = vshrl.u32 %v7646_v56, 16  ;;  %v788_v10 = vld [vmem:[%s7576_s6 + $0x30] sm:$0xe] }
  0x2c   : > { %v293_v62 = vsel %vm7622_vm3, %v288_v52, %v292_v37  ;;  %v312_v63 = vrot.slane %v311_v54, 4  ;;  %7052 = vmatprep.mubr.msk.bf16.mxu1 %vm495_vm0, %v5953_v55  ;;  %v5954_v1 = vcombine.low %v247_v51, %v7646_v56  ;;  %v328_v9 = vshll.u32 %v7638_v46, 16  ;;  %v251_v37 = vld [vmem:[%s7576_s6 + $0x3c] sm:$0xf]  ;;  %v7699_v54 = vld [vmem:[%s7576_s6 + $0x44] sm:$0x1] }
  0x2d   : > { %v5934_v2 = vcombine.low %v283_v41, %v293_v62  ;;  %v345_v3 = vrot.slane %v343_v59, 4  ;;  %v348_v5 = vrot.slane %v346_v60, 5  ;;  %v325_v6 = vor.u32 %v324_v58, %v321_v57 }
  0x2e   : > { %v317_v8 = vsel %vm7622_vm3, %v312_v63, %v316_v47  ;;  %7053 = vmatmul.mubr.msk.bf16.gmra.mxu1 %vm495_vm0, %v5954_v1  ;;  %v334_v13 = vrot.slane %v332_v50, 4  ;;  %v338_v14 = vshll.u32 %v7649_v61, 16  ;;  %v352_v22 = vshll.u32 %v7646_v56, 16  ;;  %v7694_v50 = vld [vmem:[%s7576_s6 + $0x38] sm:$0x1] }
  0x2f   : > { %7030 = vmatprep.mubr.msk.bf16.mxu0 %vm495_vm0, %v5934_v2  ;;  %v5935_v18 = vcombine.low %v307_v53, %v317_v8  ;;  %v326_v19 = vrot.slane %v325_v6, 4  ;;  %v349_v21 = vor.u32 %v348_v5, %v345_v3  ;;  %v330_v26 = vrot.slane %v328_v9, 5  ;;  %v253_v1 = vld [vmem:[%s7576_s6 + $0x48] sm:$0xf]  ;;  %v7712_v8 = vld [vmem:[%s7576_s6 + $0x4c] sm:$0xf] }
  0x30   : > { %v340_v29 = vrot.slane %v338_v14, 5  ;;  %v358_v30 = vrot.slane %v356_v0, 4  ;;  %v362_v32 = vshll.u32 %v7657_v7, 16  ;;  %v354_v34 = vrot.slane %v352_v22, 5 }
  0x31   : > { %7031 = vmatmul.mubr.msk.bf16.vlgmr.msra.gmra.mxu0 %vm495_vm0, %v5935_v18  ;;  %v350_v33 = vrot.slane %v349_v21, 4  ;;  %v367_v35 = vshrl.u32 %v249_v15, 16  ;;  %v370_v36 = vshll.u32 %v249_v15, 16  ;;  %v331_v39 = vsel %vm7622_vm3, %v326_v19, %v330_v26  ;;  %v255_v18 = vld [vmem:[%s7576_s6 + $0x54] sm:$0xf] }
  0x32   : > { %7065 = vmatpush3.bf16.msra.mxu0 %v7598_v11  ;;  %v335_v40 = vor.u32 %v334_v13, %v330_v26  ;;  %v364_v41 = vrot.slane %v362_v32, 5  ;;  %v380_v42 = vshrl.u32 %v7673_v23, 16  ;;  %v359_v47 = vor.u32 %v358_v30, %v354_v34 }
  0x33   : > { %v355_v45 = vsel %vm7622_vm3, %v350_v33, %v354_v34  ;;  %v369_v48 = vrot.slane %v367_v35, 4  ;;  %v372_v49 = vrot.slane %v370_v36, 5  ;;  %7100 = vmatprep.subr.bf16.mxu0 %v7678_v25  ;;  %v5955_v51 = vcombine.low %v249_v15, %v7673_v23 }
  0x34   : > { %v336_v11 = vrot.slane %v335_v40, 4  ;;  %v391_v52 = vshrl.u32 %v251_v37, 16  ;;  %v394_v53 = vshll.u32 %v251_v37, 16  ;;  %v360_v55 = vrot.slane %v359_v47, 4 }
  0x35   : > { %v404_v57 = vshrl.u32 %v7689_v43, 16  ;;  %v5956_v58 = vcombine.low %v251_v37, %v7689_v43  ;;  %v373_v59 = vor.u32 %v372_v49, %v369_v48  ;;  %vm809_vm5 = vcmask 1046532   ;;  %7056 = vmatprep.mubr.msk.bf16.mxu1 %vm495_vm0, %v5955_v51  ;;  %v7730_v51 = vld [vmem:[%s7576_s6 + $0x50] sm:$0x1] }
  0x36   : > { %v341_v60 = vsel %vm7622_vm3, %v336_v11, %v340_v29  ;;  %v393_v62 = vrot.slane %v391_v52, 4  ;;  %v396_v63 = vrot.slane %v394_v53, 5  ;;  %v376_v0 = vshll.u32 %v7673_v23, 16  ;;  %v7720_v29 = vld [vmem:[%s7576_s6 + $0x58] sm:$0xf]  ;;  %v7406_v52 = vld [vmem:[%s7576_s6 + $0xc] sm:$0xff]   ;;  %vm7748_vm6 = vmor %vm808_vm4, %vm809_vm5 }
  0x37   : > { %v5936_v2 = vcombine.low %v331_v39, %v341_v60  ;;  %v365_v3 = vsel %vm7622_vm3, %v360_v55, %v364_v41  ;;  %7057 = vmatmul.mubr.msk.bf16.gmra.mxu1 %vm495_vm0, %v5956_v58  ;;  %v374_v5 = vrot.slane %v373_v59, 4  ;;  %v382_v6 = vrot.slane %v380_v42, 4  ;;  %v7739_v59 = vld [vmem:[%s7576_s6 + $0x5c] sm:$0x1] }
  0x38   : > { %v5937_v9 = vcombine.low %v355_v45, %v365_v3  ;;  %v378_v13 = vrot.slane %v376_v0, 5  ;;  %v386_v14 = vshll.u32 %v7694_v50, 16  ;;  %v397_v15 = vor.u32 %v396_v63, %v393_v62 }
  0x39   : > { %7034 = vmatprep.mubr.msk.bf16.mxu0 %vm495_vm0, %v5936_v2  ;;  %v400_v19 = vshll.u32 %v7689_v43, 16  ;;  %v406_v21 = vrot.slane %v404_v57, 4  ;;  %v410_v22 = vshll.u32 %v7699_v54, 16  ;;  %v415_v26 = vshrl.u32 %v253_v1, 16 }
  0x3a   : > { %7035 = vmatmul.mubr.msk.bf16.gmra.mxu0 %vm495_vm0, %v5937_v9  ;;  %v379_v30 = vsel %vm7622_vm3, %v374_v5, %v378_v13  ;;  %v383_v32 = vor.u32 %v382_v6, %v378_v13  ;;  %v388_v33 = vrot.slane %v386_v14, 5  ;;  %v398_v34 = vrot.slane %v397_v15, 4  ;;  %v784_v6 = vld [vmem:[%s7576_s6] sm:$0xe] }
  0x3b   : > { %v402_v35 = vrot.slane %v400_v19, 5  ;;  %v412_v36 = vrot.slane %v410_v22, 5  ;;  %v417_v37 = vrot.slane %v415_v26, 4  ;;  %v418_v39 = vshll.u32 %v253_v1, 16  ;;  %v785_v19 = vld [vmem:[%s7576_s6 + $0xc] sm:$0xe] }
  0x3c   : > { %v384_v40 = vrot.slane %v383_v32, 4  ;;  %v428_v41 = vshrl.u32 %v7712_v8, 16  ;;  %v5957_v42 = vcombine.low %v253_v1, %v7712_v8  ;;  %v439_v45 = vshrl.u32 %v255_v18, 16  ;;  %v786_v32 = vld [vmem:[%s7576_s6 + $0x18] sm:$0xe] }
  0x3d   : > { %v403_v47 = vsel %vm7622_vm3, %v398_v34, %v402_v35  ;;  %v407_v48 = vor.u32 %v406_v21, %v402_v35  ;;  %v420_v49 = vrot.slane %v418_v39, 5  ;;  %v442_v11 = vshll.u32 %v255_v18, 16 }
  0x3e   : > { %v389_v53 = vsel %vm7622_vm3, %v384_v40, %v388_v33  ;;  %7060 = vmatprep.mubr.msk.bf16.mxu1 %vm495_vm0, %v5957_v42  ;;  %v441_v55 = vrot.slane %v439_v45, 4  ;;  %v452_v57 = vshrl.u32 %v7720_v29, 16  ;;  %v5958_v58 = vcombine.low %v255_v18, %v7720_v29 }
  0x3f   : > { %v5938_v60 = vcombine.low %v379_v30, %v389_v53  ;;  %v408_v62 = vrot.slane %v407_v48, 4  ;;  %v444_v63 = vrot.slane %v442_v11, 5  ;;  %v421_v0 = vor.u32 %v420_v49, %v417_v37  ;;  %v787_v48 = vld [vmem:[%s7576_s6 + $0x24] sm:$0xe] }
  0x40   : > { %7061 = vmatmul.mubr.msk.bf16.gmra.mxu1 %vm495_vm0, %v5958_v58  ;;  %v424_v1 = vshll.u32 %v7712_v8, 16  ;;  %v430_v2 = vrot.slane %v428_v41, 4  ;;  %v434_v3 = vshll.u32 %v7730_v51, 16  ;;  %v448_v5 = vshll.u32 %v7720_v29, 16  ;;  %v7407_v41 = vld [vmem:[%s7576_s6 + $0x18] sm:$0xff]  }
  0x41   : > { %7038 = vmatprep.mubr.msk.bf16.mxu0 %vm495_vm0, %v5938_v60  ;;  %v413_v13 = vsel %vm7622_vm3, %v408_v62, %v412_v36  ;;  %v422_v14 = vrot.slane %v421_v0, 4  ;;  %v445_v15 = vor.u32 %v444_v63, %v441_v55  ;;  %v454_v18 = vrot.slane %v452_v57, 4  ;;  %7084 = vmatprep.mubr.msk.bf16.mxu1 %vm495_vm0, %v7406_v52  ;;  %v789_v60 = vld [vmem:[%s7576_s6 + $0x3c] sm:$0xe]  ;;  %v790_v0 = vld [vmem:[%s7576_s6 + $0x48] sm:$0xe] }
  0x42   : > { %v5939_v21 = vcombine.low %v403_v47, %v413_v13  ;;  %v426_v22 = vrot.slane %v424_v1, 5  ;;  %v436_v26 = vrot.slane %v434_v3, 5  ;;  %v450_v30 = vrot.slane %v448_v5, 5  ;;  %v7411_v1 = vld [vmem:[%s7576_s6 + $0x30] sm:$0xff]  }
  0x43   : > { %v446_v33 = vrot.slane %v445_v15, 4  ;;  %v458_v34 = vshll.u32 %v7739_v59, 16  ;;  %v5968_v35 = vrot.slane %v784_v6, 9  ;;  %v817_v36 = vsel %vm7748_vm6, %v7614_v24, %v816_v38  ;;  %v7410_v38 = vld [vmem:[%s7576_s6 + $0x24] sm:$0xff]   ;;  %v7412_v6 = vld [vmem:[%s7576_s6 + $0x3c] sm:$0xff]  }
  0x44   : > { %7039 = vmatmul.mubr.msk.bf16.gmra.mxu0 %vm495_vm0, %v5939_v21  ;;  %v427_v37 = vsel %vm7622_vm3, %v422_v14, %v426_v22  ;;  %v431_v39 = vor.u32 %v430_v2, %v426_v22  ;;  %v455_v40 = vor.u32 %v454_v18, %v450_v30  ;;  %v5969_v42 = vrot.slane %v785_v19, 9  ;;  %v791_v22 = vld [vmem:[%s7576_s6 + $0x54] sm:$0xe] }
  0x45   : > { %v451_v45 = vsel %vm7622_vm3, %v446_v33, %v450_v30  ;;  %v460_v47 = vrot.slane %v458_v34, 5  ;;  %v814_v16 = vsel %vm7748_vm6, %v5968_v35, %v813_v12  ;;  %v7779_v24 = vsel %vm7748_vm6, %v7620_v27, %v823_v44  ;;  %v7792_v12 = vld [vmem:[%s10061_s1 + $0x38] sm:$0xff]   ;;  %v6032_v33 = vld [vmem:[%s7576_s6 + $0x14] sm:$0x1] }
  0x46   : > { %v432_v49 = vrot.slane %v431_v39, 4  ;;  %v456_v11 = vrot.slane %v455_v40, 4  ;;  %v5978_v52 = vcombine.low %v814_v16, %v817_v36  ;;  %v7787_v4 = vsel %vm7748_vm6, %v5969_v42, %v820_v20  ;;  %v6073_v36 = vld [vmem:[%s7576_s6 + $0xc] sm:$0xe]  ;;  %v6074_v42 = vld [vmem:[%s7576_s6 + $0x18] sm:$0xe] }
  0x47   : > { %v5979_v27 = vcombine.low %v7787_v4, %v7779_v24  ;;  %v5970_v31 = vrot.slane %v786_v32, 9  ;;  %v827_v44 = vrot.slane %v7638_v46, 5  ;;  %v830_v53 = vrot.slane %v7649_v61, 5  ;;  %v6031_v32 = vld [vmem:[%s7576_s6 + $0x10] sm:$0xf] }
  0x48   : > { %v437_v20 = vsel %vm7622_vm3, %v432_v49, %v436_v26  ;;  %v461_v55 = vsel %vm7622_vm3, %v456_v11, %v460_v47  ;;  %7085 = vmatmul.mubr.msk.bf16.vlgmr.msra.gmra.mxu1 %vm495_vm0, %v7407_v41  ;;  %v5971_v57 = vrot.slane %v787_v48, 9  ;;  %v834_v58 = vrot.slane %v7646_v56, 5  ;;  %v6034_v16 = vld [vmem:[%s7576_s6 + $0x1c] sm:$0xf]  ;;  %v6030_v11 = vld [vmem:[%s7576_s6 + $0xc] sm:$0xf] }
  0x49   : > { %v5940_v62 = vcombine.low %v427_v37, %v437_v20  ;;  %v5941_v63 = vcombine.low %v451_v45, %v461_v55  ;;  %7119 = vmatpush3.bf16.msra.mxu1 %v7668_v17  ;;  %7088 = vmatprep.mubr.msk.bf16.mxu1 %vm495_vm0, %v7410_v38  ;;  %v7810_v46 = vsel %vm7748_vm6, %v5970_v31, %v827_v44  ;;  %v829_v61 = vrot.slane %v827_v44, 4  ;;  %v7871_v38 = vld [vmem:[%s7576_s6 + $0x20] sm:$0x1] }
  0x4a   : > { %v7816_v2 = vsel %vm7748_vm6, %v5971_v57, %v834_v58  ;;  %v836_v56 = vrot.slane %v834_v58, 4  ;;  %v837_v3 = vrot.slane %v7657_v7, 5  ;;  %v5972_v5 = vrot.slane %v788_v10, 9  ;;  %7154 = vmatprep.subr.bf16.mxu1 %v7792_v12  ;;  %v7888_v10 = vld [vmem:[%s10061_s1 + $0x30] sm:$0xff]  }
  0x4b   : > { %7042 = vmatprep.mubr.msk.bf16.mxu0 %vm495_vm0, %v5940_v62  ;;  %v831_v17 = vsel %vm7748_vm6, %v829_v61, %v830_v53  ;;  %v841_v13 = vrot.slane %v7673_v23, 5  ;;  %v844_v14 = vrot.slane %v7694_v50, 5  ;;  %v5973_v15 = vrot.slane %v789_v60, 9  ;;  %v7413_v60 = vld [vmem:[%s7576_s6 + $0x48] sm:$0xff]  }
  0x4c   : > { %7043 = vmatmul.mubr.msk.bf16.gmra.mxu0 %vm495_vm0, %v5941_v63  ;;  %v5980_v7 = vcombine.low %v7810_v46, %v831_v17  ;;  %v7830_v18 = vsel %vm7748_vm6, %v836_v56, %v837_v3  ;;  %v848_v19 = vrot.slane %v7689_v43, 5  ;;  %v851_v21 = vrot.slane %v7699_v54, 5  ;;  %v6033_v56 = vld [vmem:[%s7576_s6 + $0x18] sm:$0xf] }
  0x4d   : > { %7066 = vmatprep.mubr.msk.bf16.mxu0 %vm495_vm0, %v5978_v52  ;;  %v5981_v23 = vcombine.low %v7816_v2, %v7830_v18  ;;  %v7840_v50 = vsel %vm7748_vm6, %v5972_v5, %v841_v13  ;;  %v843_v26 = vrot.slane %v841_v13, 4  ;;  %v5974_v30 = vrot.slane %v790_v0, 9  ;;  %v7414_v0 = vld [vmem:[%s7576_s6 + $0x54] sm:$0xff]   ;;  %v6036_v18 = vld [vmem:[%s7576_s6 + $0x24] sm:$0xf] }
  0x4e   : > { %v7846_v43 = vsel %vm7748_vm6, %v5973_v15, %v848_v19  ;;  %v850_v54 = vrot.slane %v848_v19, 4  ;;  %v855_v34 = vrot.slane %v7712_v8, 5  ;;  %v858_v35 = vrot.slane %v7730_v51, 5 }
  0x4f   : > { %v7853_v37 = vsel %vm7748_vm6, %v843_v26, %v844_v14  ;;  %v5975_v39 = vrot.slane %v791_v22, 9  ;;  %v862_v40 = vrot.slane %v7720_v29, 5  ;;  %v865_v41 = vrot.slane %v7739_v59, 5 }
  0x50   : > { %7089 = vmatmul.mubr.msk.bf16.gmra.mxu1 %vm495_vm0, %v7411_v1  ;;  %v5982_v45 = vcombine.low %v7840_v50, %v7853_v37  ;;  %v7863_v8 = vsel %vm7748_vm6, %v850_v54, %v851_v21  ;;  %v7867_v51 = vsel %vm7748_vm6, %v5974_v30, %v855_v34  ;;  %v857_v47 = vrot.slane %v855_v34, 4  ;;  %v7929_v30 = vld [vmem:[%s7576_s6 + $0x28] sm:$0xf] }
  0x51   : > { %7092 = vmatprep.mubr.msk.bf16.mxu1 %vm495_vm0, %v7412_v6  ;;  %v5983_v29 = vcombine.low %v7846_v43, %v7863_v8  ;;  %v7878_v59 = vsel %vm7748_vm6, %v5975_v39, %v862_v40  ;;  %v864_v48 = vrot.slane %v862_v40, 4  ;;  %v6081_v49 = vrot.slane %v6073_v36, 9  ;;  %v7415_v36 = vld [vmem:[%s7576_s6 + $0x60] sm:$0xff]   ;;  %v8005_v8 = vld [vmem:[%s7576_s6 + $0x4c] sm:$0xf] }
  0x52   : > { %v7883_v52 = vsel %vm7748_vm6, %v857_v47, %v858_v35  ;;  %v1660_v31 = vrot.slane %v6031_v32, 5  ;;  %v1663_v44 = vrot.slane %v6032_v33, 5  ;;  %v6082_v53 = vrot.slane %v6074_v42, 9  ;;  %v7933_v35 = vld [vmem:[%s7576_s6 + $0x2c] sm:$0x1] }
  0x53   : > { %v5984_v20 = vcombine.low %v7867_v51, %v7883_v52  ;;  %v7894_v55 = vsel %vm7748_vm6, %v864_v48, %v865_v41  ;;  %v1667_v57 = vrot.slane %v6034_v16, 5  ;;  %v1670_v58 = vrot.slane %v7871_v38, 5  ;;  %v6076_v47 = vld [vmem:[%s7576_s6 + $0x30] sm:$0xe]  ;;  %v6042_v51 = vld [vmem:[%s7576_s6 + $0x3c] sm:$0xf] }
  0x54   : > { %7067 = vmatmul.mubr.msk.bf16.vlgmr.msra.gmra.mxu0 %vm495_vm0, %v5979_v27  ;;  %v5985_v62 = vcombine.low %v7878_v59, %v7894_v55  ;;  %v7906_v63 = vsel %vm7748_vm6, %v6081_v49, %v1660_v31  ;;  %v1662_v46 = vrot.slane %v1660_v31, 4  ;;  %v1265_v61 = vshrl.u32 %v6030_v11, 16 }
  0x55   : > { %7101 = vmatpush3.bf16.msra.mxu0 %v7678_v25  ;;  %7070 = vmatprep.mubr.msk.bf16.mxu0 %vm495_vm0, %v5980_v7  ;;  %v7913_v24 = vsel %vm7748_vm6, %v6082_v53, %v1667_v57  ;;  %v1669_v4 = vrot.slane %v1667_v57, 4  ;;  %v1268_v27 = vshll.u32 %v6030_v11, 16  ;;  %v1274_v1 = vshll.u32 %v6031_v32, 16  ;;  %v6075_v7 = vld [vmem:[%s7576_s6 + $0x24] sm:$0xe] }
  0x56   : > { %v1664_v3 = vsel %vm7748_vm6, %v1662_v46, %v1663_v44  ;;  %v1267_v5 = vrot.slane %v1265_v61, 4  ;;  %v1278_v17 = vshrl.u32 %v6031_v32, 16  ;;  %v1284_v6 = vshll.u32 %v6032_v33, 16  ;;  %7136 = vmatprep.subr.bf16.mxu0 %v7888_v10  ;;  %v7939_v44 = vld [vmem:[%s7576_s6 + $0x34] sm:$0xf] }
  0x57   : > { %v6091_v25 = vcombine.low %v7906_v63, %v1664_v3  ;;  %v7922_v13 = vsel %vm7748_vm6, %v1669_v4, %v1670_v58  ;;  %v1270_v14 = vrot.slane %v1268_v27, 5  ;;  %v1276_v15 = vrot.slane %v1274_v1, 5  ;;  %v6041_v58 = vld [vmem:[%s7576_s6 + $0x38] sm:$0x1] }
  0x58   : > { %7093 = vmatmul.mubr.msk.bf16.gmra.mxu1 %vm495_vm0, %v7413_v60  ;;  %v6092_v19 = vcombine.low %v7913_v24, %v7922_v13  ;;  %v1280_v21 = vrot.slane %v1278_v17, 4  ;;  %v1286_v22 = vrot.slane %v1284_v6, 5  ;;  %v1289_v26 = vshrl.u32 %v6033_v56, 16 }
  0x59   : > { %7096 = vmatprep.mubr.msk.bf16.mxu1 %vm495_vm0, %v7414_v0  ;;  %v1271_v32 = vor.u32 %v1270_v14, %v1267_v5  ;;  %v1292_v33 = vshll.u32 %v6033_v56, 16  ;;  %v1298_v54 = vshll.u32 %v6034_v16, 16  ;;  %v1302_v34 = vshrl.u32 %v6034_v16, 16 }
  0x5a   : > { %v1281_v39 = vor.u32 %v1280_v21, %v1276_v15  ;;  %v1291_v40 = vrot.slane %v1289_v26, 4  ;;  %v1308_v41 = vshll.u32 %v7871_v38, 16  ;;  %v6083_v42 = vrot.slane %v6075_v7, 9  ;;  %v6039_v7 = vld [vmem:[%s7576_s6 + $0x30] sm:$0xf] }
  0x5b   : > { %v1272_v48 = vrot.slane %v1271_v32, 4  ;;  %v1294_v49 = vrot.slane %v1292_v33, 5  ;;  %v1300_v11 = vrot.slane %v1298_v54, 5  ;;  %v1304_v31 = vrot.slane %v1302_v34, 4  ;;  %v6077_v32 = vld [vmem:[%s7576_s6 + $0x3c] sm:$0xe] }
  0x5c   : > { %7071 = vmatmul.mubr.msk.bf16.gmra.mxu0 %vm495_vm0, %v5981_v23  ;;  %v1282_v16 = vrot.slane %v1281_v39, 4  ;;  %v1310_v53 = vrot.slane %v1308_v41, 5  ;;  %v1674_v57 = vrot.slane %v7929_v30, 5  ;;  %v1677_v38 = vrot.slane %v7933_v35, 5  ;;  %v7988_v39 = vld [vmem:[%s7576_s6 + $0x40] sm:$0xf] }
  0x5d   : > { %7074 = vmatprep.mubr.msk.bf16.mxu0 %vm495_vm0, %v5982_v45  ;;  %v1277_v60 = vsel %vm7622_vm3, %v1272_v48, %v1276_v15  ;;  %v1295_v63 = vor.u32 %v1294_v49, %v1291_v40  ;;  %v1305_v46 = vor.u32 %v1304_v31, %v1300_v11  ;;  %v6084_v2 = vrot.slane %v6076_v47, 9  ;;  %v7991_v40 = vld [vmem:[%s7576_s6 + $0x44] sm:$0x1]  ;;  %v6078_v49 = vld [vmem:[%s7576_s6 + $0x48] sm:$0xe] }
  0x5e   : > { %v1287_v23 = vsel %vm7622_vm3, %v1282_v16, %v1286_v22  ;;  %v1675_v61 = vsel %vm7748_vm6, %v6083_v42, %v1674_v57  ;;  %v1676_v0 = vrot.slane %v1674_v57, 4  ;;  %v1681_v4 = vrot.slane %v7939_v44, 5 }
  0x5f   : > { %v7960_v50 = vcombine.low %v1277_v60, %v1287_v23  ;;  %v1296_v37 = vrot.slane %v1295_v63, 4  ;;  %v1306_v45 = vrot.slane %v1305_v46, 4  ;;  %v1684_v27 = vrot.slane %v6041_v58, 5 }
  0x60   : > { %7097 = vmatmul.mubr.msk.bf16.gmra.mxu1 %vm495_vm0, %v7415_v36  ;;  %v1678_v1 = vsel %vm7748_vm6, %v1676_v0, %v1677_v38  ;;  %v7967_v56 = vsel %vm7748_vm6, %v6084_v2, %v1681_v4  ;;  %v1683_v3 = vrot.slane %v1681_v4, 4  ;;  %v1313_v5 = vshrl.u32 %v6036_v18, 16  ;;  %v8013_v38 = vld [vmem:[%s7576_s6 + $0x50] sm:$0x1] }
  0x61   : > { %7120 = vmatprep.mubr.msk.bf16.mxu1 %vm495_vm0, %v6091_v25  ;;  %v1301_v17 = vsel %vm7622_vm3, %v1296_v37, %v1300_v11  ;;  %v1311_v6 = vsel %vm7622_vm3, %v1306_v45, %v1310_v53  ;;  %v6093_v14 = vcombine.low %v1675_v61, %v1678_v1  ;;  %v1316_v15 = vshll.u32 %v6036_v18, 16 }
  0x62   : > { %v7975_v21 = vcombine.low %v1301_v17, %v1311_v6  ;;  %v7979_v22 = vsel %vm7748_vm6, %v1683_v3, %v1684_v27  ;;  %v1315_v26 = vrot.slane %v1313_v5, 4  ;;  %v1322_v25 = vshll.u32 %v7929_v30, 16  ;;  %v6045_v6 = vld [vmem:[%s7576_s6 + $0x48] sm:$0xf] }
  0x63   : > { %v6094_v33 = vcombine.low %v7967_v56, %v7979_v22  ;;  %v1318_v54 = vrot.slane %v1316_v15, 5  ;;  %v1326_v34 = vshrl.u32 %v7929_v30, 16  ;;  %v1332_v36 = vshll.u32 %v7933_v35, 16 }
  0x64   : > { %7075 = vmatmul.mubr.msk.bf16.gmra.mxu0 %vm495_vm0, %v5983_v29  ;;  %v1324_v41 = vrot.slane %v1322_v25, 5  ;;  %v1337_v42 = vshrl.u32 %v6039_v7, 16  ;;  %v1340_v47 = vshll.u32 %v6039_v7, 16  ;;  %v1346_v48 = vshll.u32 %v7939_v44, 16  ;;  %v8010_v29 = vld [vmem:[%s10061_s1 + $0x8] sm:$0xff]  }
  0x65   : > { %7078 = vmatprep.mubr.msk.bf16.mxu0 %vm495_vm0, %v5984_v20  ;;  %v1319_v30 = vor.u32 %v1318_v54, %v1315_v26  ;;  %v1328_v35 = vrot.slane %v1326_v34, 4  ;;  %v1334_v11 = vrot.slane %v1332_v36, 5  ;;  %v1350_v43 = vshrl.u32 %v7939_v44, 16  ;;  %v8056_v36 = vld [vmem:[%s7576_s6 + $0x58] sm:$0xf] }
  0x66   : > { %v1339_v31 = vrot.slane %v1337_v42, 4  ;;  %v1342_v16 = vrot.slane %v1340_v47, 5  ;;  %v1348_v53 = vrot.slane %v1346_v48, 5  ;;  %v1356_v57 = vshll.u32 %v6041_v58, 16  ;;  %v6079_v48 = vld [vmem:[%s7576_s6 + $0x54] sm:$0xe] }
  0x67   : > { %v1320_v52 = vrot.slane %v1319_v30, 4  ;;  %v1329_v20 = vor.u32 %v1328_v35, %v1324_v41  ;;  %v1352_v60 = vrot.slane %v1350_v43, 4  ;;  %v6085_v63 = vrot.slane %v6077_v32, 9  ;;  %v6050_v30 = vld [vmem:[%s7576_s6 + $0x5c] sm:$0x1] }
  0x68   : > { %7121 = vmatmul.mubr.msk.bf16.vlgmr.msra.gmra.mxu1 %vm495_vm0, %v6092_v19  ;;  %v1343_v44 = vor.u32 %v1342_v16, %v1339_v31  ;;  %v1358_v46 = vrot.slane %v1356_v57, 5  ;;  %v1688_v2 = vrot.slane %v7988_v39, 5  ;;  %v1691_v18 = vrot.slane %v7991_v40, 5  ;;  %v8074_v16 = vld [vmem:[%s7576_s6 + $0x64] sm:$0xf] }
  0x69   : > { %7155 = vmatpush3.bf16.msra.mxu1 %v7792_v12  ;;  %7124 = vmatprep.mubr.msk.bf16.mxu1 %vm495_vm0, %v6093_v14  ;;  %v1325_v58 = vsel %vm7622_vm3, %v1320_v52, %v1324_v41  ;;  %v1330_v23 = vrot.slane %v1329_v20, 4  ;;  %v1353_v61 = vor.u32 %v1352_v60, %v1348_v53  ;;  %v6086_v0 = vrot.slane %v6078_v49, 9  ;;  %v8079_v60 = vld [vmem:[%s7576_s6 + $0x68] sm:$0x1] }
  0x6a   : > { %v1344_v24 = vrot.slane %v1343_v44, 4  ;;  %v1689_v13 = vsel %vm7748_vm6, %v6085_v63, %v1688_v2  ;;  %v1690_v19 = vrot.slane %v1688_v2, 4  ;;  %v1695_v4 = vrot.slane %v8005_v8, 5  ;;  %7190 = vmatprep.subr.bf16.mxu1 %v8010_v29  ;;  %v6048_v63 = vld [vmem:[%s7576_s6 + $0x54] sm:$0xf] }
  0x6b   : > { %v1335_v12 = vsel %vm7622_vm3, %v1330_v23, %v1334_v11  ;;  %v1354_v37 = vrot.slane %v1353_v61, 4  ;;  %v1698_v45 = vrot.slane %v8013_v38, 5  ;;  %v1361_v27 = vshrl.u32 %v6042_v51, 16 }
  0x6c   : > { %7079 = vmatmul.mubr.msk.bf16.gmra.mxu0 %vm495_vm0, %v5985_v62  ;;  %v6058_v1 = vcombine.low %v1325_v58, %v1335_v12  ;;  %v1349_v3 = vsel %vm7622_vm3, %v1344_v24, %v1348_v53  ;;  %v1692_v5 = vsel %vm7748_vm6, %v1690_v19, %v1691_v18  ;;  %v1696_v17 = vsel %vm7748_vm6, %v6086_v0, %v1695_v4  ;;  %v6080_v53 = vld [vmem:[%s7576_s6 + $0x60] sm:$0xe] }
  0x6d   : > { %7102 = vmatprep.mubr.msk.bf16.mxu0 %vm495_vm0, %v7960_v50  ;;  %v1359_v59 = vsel %vm7622_vm3, %v1354_v37, %v1358_v46  ;;  %v6095_v55 = vcombine.low %v1689_v13, %v1692_v5  ;;  %v1697_v62 = vrot.slane %v1695_v4, 4  ;;  %v1363_v14 = vrot.slane %v1361_v27, 4 }
  0x6e   : > { %v8048_v15 = vcombine.low %v1349_v3, %v1359_v59  ;;  %v1364_v7 = vshll.u32 %v6042_v51, 16  ;;  %v1370_v26 = vshll.u32 %v7988_v39, 16  ;;  %v1374_v25 = vshrl.u32 %v7988_v39, 16 }
  0x6f   : > { %v1699_v32 = vsel %vm7748_vm6, %v1697_v62, %v1698_v45  ;;  %v1380_v54 = vshll.u32 %v7991_v40, 16  ;;  %v1385_v50 = vshrl.u32 %v6045_v6, 16  ;;  %v1388_v34 = vshll.u32 %v6045_v6, 16  ;;  %v8066_v40 = vld [vmem:[%s10061_s1 + $0x40] sm:$0xff]  }
  0x70   : > { %7125 = vmatmul.mubr.msk.bf16.gmra.mxu1 %vm495_vm0, %v6094_v33  ;;  %v6096_v41 = vcombine.low %v1696_v17, %v1699_v32  ;;  %v1366_v42 = vrot.slane %v1364_v7, 5  ;;  %v1372_v39 = vrot.slane %v1370_v26, 5  ;;  %v1376_v47 = vrot.slane %v1374_v25, 4  ;;  %v6051_v6 = vld [vmem:[%s7576_s6 + $0x60] sm:$0xf] }
  0x71   : > { %7128 = vmatprep.mubr.msk.bf16.mxu1 %vm495_vm0, %v6095_v55  ;;  %v1382_v49 = vrot.slane %v1380_v54, 5  ;;  %v1387_v56 = vrot.slane %v1385_v50, 4  ;;  %v1390_v22 = vrot.slane %v1388_v34, 5  ;;  %v1394_v33 = vshll.u32 %v8005_v8, 16  ;;  %v6143_v54 = vld [vmem:[%s7576_s6 + $0x18] sm:$0xf] }
  0x72   : > { %v1367_v35 = vor.u32 %v1366_v42, %v1363_v14  ;;  %v1377_v11 = vor.u32 %v1376_v47, %v1372_v39  ;;  %v1398_v43 = vshrl.u32 %v8005_v8, 16  ;;  %v1404_v31 = vshll.u32 %v8013_v38, 16 }
  0x73   : > { %v1391_v57 = vor.u32 %v1390_v22, %v1387_v56  ;;  %v1396_v51 = vrot.slane %v1394_v33, 5  ;;  %v6087_v52 = vrot.slane %v6079_v48, 9  ;;  %v1702_v20 = vrot.slane %v8056_v36, 5 }
  0x74   : > { %7103 = vmatmul.mubr.msk.bf16.vlgmr.msra.gmra.mxu0 %vm495_vm0, %v7975_v21  ;;  %v1368_v44 = vrot.slane %v1367_v35, 4  ;;  %v1378_v46 = vrot.slane %v1377_v11, 4  ;;  %v1400_v2 = vrot.slane %v1398_v43, 4  ;;  %v1406_v8 = vrot.slane %v1404_v31, 5  ;;  %v8121_v31 = vld [vmem:[%s7576_s6 + $0x20] sm:$0x1] }
  0x75   : > { %7137 = vmatpush3.bf16.msra.mxu0 %v7888_v10  ;;  %7106 = vmatprep.mubr.msk.bf16.mxu0 %vm495_vm0, %v6058_v1  ;;  %v1392_v38 = vrot.slane %v1391_v57, 4  ;;  %v1703_v18 = vsel %vm7748_vm6, %v6087_v52, %v1702_v20  ;;  %v1704_v58 = vrot.slane %v1702_v20, 4  ;;  %v1705_v23 = vrot.slane %v6050_v30, 5 }
  0x76   : > { %v1373_v61 = vsel %vm7622_vm3, %v1368_v44, %v1372_v39  ;;  %v1383_v21 = vsel %vm7622_vm3, %v1378_v46, %v1382_v49  ;;  %v1401_v0 = vor.u32 %v1400_v2, %v1396_v51  ;;  %v6088_v24 = vrot.slane %v6080_v53, 9  ;;  %7172 = vmatprep.subr.bf16.mxu0 %v8066_v40  ;;  %v8114_v39 = vld [vmem:[%s7576_s6 + $0x1c] sm:$0xf]  ;;  %v6146_v44 = vld [vmem:[%s7576_s6 + $0x24] sm:$0xf] }
  0x77   : > { %v6060_v10 = vcombine.low %v1373_v61, %v1383_v21  ;;  %v1397_v13 = vsel %vm7622_vm3, %v1392_v38, %v1396_v51  ;;  %v1706_v19 = vsel %vm7748_vm6, %v1704_v58, %v1705_v23  ;;  %v1709_v4 = vrot.slane %v8074_v16, 5 }
  0x78   : > { %7129 = vmatmul.mubr.msk.bf16.gmra.mxu1 %vm495_vm0, %v6096_v41  ;;  %v1402_v12 = vrot.slane %v1401_v0, 4  ;;  %v6097_v37 = vcombine.low %v1703_v18, %v1706_v19  ;;  %v1712_v45 = vrot.slane %v8079_v60, 5  ;;  %v1409_v27 = vshrl.u32 %v6048_v63, 16  ;;  %v8133_v18 = vld [vmem:[%s7576_s6 + $0x28] sm:$0xf] }
  0x79   : > { %v1710_v1 = vsel %vm7748_vm6, %v6088_v24, %v1709_v4  ;;  %v1711_v3 = vrot.slane %v1709_v4, 4  ;;  %v1412_v5 = vshll.u32 %v6048_v63, 16  ;;  %v1418_v17 = vshll.u32 %v8056_v36, 16  ;;  %v8136_v0 = vld [vmem:[%s7576_s6 + $0x2c] sm:$0x1] }
  0x7a   : > { %v1407_v59 = vsel %vm7622_vm3, %v1402_v12, %v1406_v8  ;;  %7132 = vmatprep.mubr.msk.bf16.mxu1 %vm495_vm0, %v6097_v37  ;;  %v1411_v55 = vrot.slane %v1409_v27, 4  ;;  %v1422_v62 = vshrl.u32 %v8056_v36, 16  ;;  %v1428_v14 = vshll.u32 %v6050_v30, 16  ;;  %v6149_v4 = vld [vmem:[%s7576_s6 + $0x30] sm:$0xf] }
  0x7b   : > { %v6061_v7 = vcombine.low %v1397_v13, %v1407_v59  ;;  %v1713_v26 = vsel %vm7748_vm6, %v1711_v3, %v1712_v45  ;;  %v1414_v25 = vrot.slane %v1412_v5, 5  ;;  %v1420_v32 = vrot.slane %v1418_v17, 5 }
  0x7c   : > { %7107 = vmatmul.mubr.msk.bf16.gmra.mxu0 %vm495_vm0, %v8048_v15  ;;  %v6098_v50 = vcombine.low %v1710_v1, %v1713_v26  ;;  %v1424_v34 = vrot.slane %v1422_v62, 4  ;;  %v1430_v41 = vrot.slane %v1428_v14, 5  ;;  %v1433_v42 = vshrl.u32 %v6051_v6, 16 }
  0x7d   : > { %7110 = vmatprep.mubr.msk.bf16.mxu0 %vm495_vm0, %v6060_v10  ;;  %v1415_v36 = vor.u32 %v1414_v25, %v1411_v55  ;;  %v1436_v47 = vshll.u32 %v6051_v6, 16  ;;  %v1442_v48 = vshll.u32 %v8074_v16, 16  ;;  %v1446_v49 = vshrl.u32 %v8074_v16, 16  ;;  %v8147_v6 = vld [vmem:[%s7576_s6 + $0x34] sm:$0xf] }
  0x7e   : > { %v1425_v56 = vor.u32 %v1424_v34, %v1420_v32  ;;  %v1435_v22 = vrot.slane %v1433_v42, 4  ;;  %v1452_v33 = vshll.u32 %v8079_v60, 16  ;;  %v2112_v15 = vshrl.u32 %v6143_v54, 16  ;;  %v8154_v25 = vld [vmem:[%s7576_s6 + $0x38] sm:$0x1] }
  0x7f   : > { %v1416_v30 = vrot.slane %v1415_v36, 4  ;;  %v1438_v35 = vrot.slane %v1436_v47, 5  ;;  %v1444_v11 = vrot.slane %v1442_v48, 5  ;;  %v1448_v43 = vrot.slane %v1446_v49, 4  ;;  %v7418_v42 = vld [vmem:[%s7576_s6 + $0x18] sm:$0xff]  }
  0x80   : > { %7133 = vmatmul.mubr.msk.bf16.gmra.mxu1 %vm495_vm0, %v6098_v50  ;;  %v1426_v53 = vrot.slane %v1425_v56, 4  ;;  %v1454_v57 = vrot.slane %v1452_v33, 5  ;;  %v2114_v51 = vrot.slane %v2112_v15, 4  ;;  %v2115_v16 = vshll.u32 %v6143_v54, 16  ;;  %v6152_v47 = vld [vmem:[%s7576_s6 + $0x3c] sm:$0xf] }
  0x81   : > { %v1421_v52 = vsel %vm7622_vm3, %v1416_v30, %v1420_v32  ;;  %v1439_v20 = vor.u32 %v1438_v35, %v1435_v22  ;;  %v1449_v60 = vor.u32 %v1448_v43, %v1444_v11  ;;  %v2121_v63 = vshll.u32 %v8114_v39, 16  ;;  %v8163_v33 = vld [vmem:[%s7576_s6 + $0x40] sm:$0xf] }
  0x82   : > { %v1431_v46 = vsel %vm7622_vm3, %v1426_v53, %v1430_v41  ;;  %v2117_v2 = vrot.slane %v2115_v16, 5  ;;  %v2125_v8 = vshrl.u32 %v8114_v39, 16  ;;  %v2131_v38 = vshll.u32 %v8121_v31, 16 }
  0x83   : > { %v6062_v58 = vcombine.low %v1421_v52, %v1431_v46  ;;  %v1440_v23 = vrot.slane %v1439_v20, 4  ;;  %v1450_v61 = vrot.slane %v1449_v60, 4  ;;  %v2123_v21 = vrot.slane %v2121_v63, 5  ;;  %v8172_v20 = vld [vmem:[%s7576_s6 + $0x44] sm:$0x1] }
  0x84   : > { %7111 = vmatmul.mubr.msk.bf16.gmra.mxu0 %vm495_vm0, %v6061_v7  ;;  %v2118_v24 = vor.u32 %v2117_v2, %v2114_v51  ;;  %v2127_v10 = vrot.slane %v2125_v8, 4  ;;  %v2133_v13 = vrot.slane %v2131_v38, 5  ;;  %v2136_v19 = vshrl.u32 %v6146_v44, 16  ;;  %v6155_v38 = vld [vmem:[%s7576_s6 + $0x48] sm:$0xf] }
  0x85   : > { %7114 = vmatprep.mubr.msk.bf16.mxu0 %vm495_vm0, %v6062_v58  ;;  %v1445_v12 = vsel %vm7622_vm3, %v1440_v23, %v1444_v11  ;;  %v1455_v37 = vsel %vm7622_vm3, %v1450_v61, %v1454_v57  ;;  %v2139_v45 = vshll.u32 %v6146_v44, 16  ;;  %v2145_v27 = vshll.u32 %v8133_v18, 16 }
  0x86   : > { %v6063_v1 = vcombine.low %v1445_v12, %v1455_v37  ;;  %v2119_v3 = vrot.slane %v2118_v24, 4  ;;  %v2128_v5 = vor.u32 %v2127_v10, %v2123_v21  ;;  %v2138_v17 = vrot.slane %v2136_v19, 4  ;;  %v8180_v24 = vld [vmem:[%s7576_s6 + $0x4c] sm:$0xf]  ;;  %v8189_v37 = vld [vmem:[%s10061_s1 + $0x10] sm:$0xff]  }
  0x87   : > { %v2141_v59 = vrot.slane %v2139_v45, 5  ;;  %v2147_v55 = vrot.slane %v2145_v27, 5  ;;  %v2149_v62 = vshrl.u32 %v8133_v18, 16  ;;  %v2155_v14 = vshll.u32 %v8136_v0, 16 }
  0x88   : > { %v2124_v7 = vsel %vm7622_vm3, %v2119_v3, %v2123_v21  ;;  %v2129_v26 = vrot.slane %v2128_v5, 4  ;;  %v2160_v32 = vshrl.u32 %v6149_v4, 16  ;;  %v2163_v54 = vshll.u32 %v6149_v4, 16  ;;  %v8193_v3 = vld [vmem:[%s7576_s6 + $0x50] sm:$0x1] }
  0x89   : > { %v2142_v50 = vor.u32 %v2141_v59, %v2138_v17  ;;  %v2151_v34 = vrot.slane %v2149_v62, 4  ;;  %v2157_v41 = vrot.slane %v2155_v14, 5  ;;  %v2169_v36 = vshll.u32 %v8147_v6, 16 }
  0x8a   : > { %v2134_v48 = vsel %vm7622_vm3, %v2129_v26, %v2133_v13  ;;  %v2162_v49 = vrot.slane %v2160_v32, 4  ;;  %v2165_v56 = vrot.slane %v2163_v54, 5  ;;  %v2173_v22 = vshrl.u32 %v8147_v6, 16  ;;  %v7420_v13 = vld [vmem:[%s7576_s6 + $0x24] sm:$0xff]  }
  0x8b   : > { %v6169_v15 = vcombine.low %v2124_v7, %v2134_v48  ;;  %v2143_v30 = vrot.slane %v2142_v50, 4  ;;  %v2152_v35 = vor.u32 %v2151_v34, %v2147_v55  ;;  %v2171_v11 = vrot.slane %v2169_v36, 5  ;;  %v6158_v7 = vld [vmem:[%s7576_s6 + $0x54] sm:$0xf]  ;;  %v8204_v26 = vld [vmem:[%s10061_s1] sm:$0xff]  }
  0x8c   : > { %7115 = vmatmul.mubr.msk.bf16.gmra.mxu0 %vm495_vm0, %v6063_v1  ;;  %v2166_v43 = vor.u32 %v2165_v56, %v2162_v49  ;;  %v2175_v53 = vrot.slane %v2173_v22, 4  ;;  %v2179_v57 = vshll.u32 %v8154_v25, 16  ;;  %v2184_v51 = vshrl.u32 %v6152_v47, 16  ;;  %v7422_v1 = vld [vmem:[%s7576_s6 + $0x30] sm:$0xff]  }
  0x8d   : > { %7156 = vmatprep.mubr.msk.bf16.mxu1 %vm495_vm0, %v6169_v15  ;;  %v2148_v16 = vsel %vm7622_vm3, %v2143_v30, %v2147_v55  ;;  %v2153_v52 = vrot.slane %v2152_v35, 4  ;;  %7138 = vmatprep.mubr.msk.bf16.mxu0 %vm495_vm0, %v7418_v42  ;;  %v2187_v60 = vshll.u32 %v6152_v47, 16  ;;  %v2193_v63 = vshll.u32 %v8163_v33, 16 }
  0x8e   : > { %v2167_v44 = vrot.slane %v2166_v43, 4  ;;  %v2176_v46 = vor.u32 %v2175_v53, %v2171_v11  ;;  %v2181_v2 = vrot.slane %v2179_v57, 5  ;;  %v2186_v8 = vrot.slane %v2184_v51, 4 }
  0x8f   : > { %v2158_v58 = vsel %vm7622_vm3, %v2153_v52, %v2157_v41  ;;  %v2189_v23 = vrot.slane %v2187_v60, 5  ;;  %v2195_v61 = vrot.slane %v2193_v63, 5  ;;  %v2197_v21 = vshrl.u32 %v8163_v33, 16  ;;  %v8208_v41 = vld [vmem:[%s7576_s6 + $0x58] sm:$0xf]  ;;  %v7423_v63 = vld [vmem:[%s7576_s6 + $0x3c] sm:$0xff]  }
  0x90   : > { %v6170_v10 = vcombine.low %v2148_v16, %v2158_v58  ;;  %v2172_v19 = vsel %vm7622_vm3, %v2167_v44, %v2171_v11  ;;  %v2177_v4 = vrot.slane %v2176_v46, 4  ;;  %v2203_v12 = vshll.u32 %v8172_v20, 16  ;;  %v8219_v11 = vld [vmem:[%s7576_s6 + $0x5c] sm:$0x1]  ;;  %v8228_v52 = vld [vmem:[%s7576_s6 + $0x64] sm:$0xf] }
  0x91   : > { %v2190_v45 = vor.u32 %v2189_v23, %v2186_v8  ;;  %v2199_v27 = vrot.slane %v2197_v21, 4  ;;  %v2208_v5 = vshrl.u32 %v6155_v38, 16  ;;  %v2211_v17 = vshll.u32 %v6155_v38, 16  ;;  %v7424_v23 = vld [vmem:[%s7576_s6 + $0x48] sm:$0xff]  }
  0x92   : > { %7157 = vmatmul.mubr.msk.bf16.vlgmr.msra.gmra.mxu1 %vm495_vm0, %v6170_v10  ;;  %v2182_v59 = vsel %vm7622_vm3, %v2177_v4, %v2181_v2  ;;  %v2205_v55 = vrot.slane %v2203_v12, 5  ;;  %v2217_v62 = vshll.u32 %v8180_v24, 16  ;;  %v2221_v14 = vshrl.u32 %v8180_v24, 16  ;;  %v6164_v12 = vld [vmem:[%s7576_s6 + $0x6c] sm:$0xf] }
  0x93   : > { %7191 = vmatpush3.bf16.msra.mxu1 %v8010_v29  ;;  %v6171_v32 = vcombine.low %v2172_v19, %v2182_v59  ;;  %v2191_v54 = vrot.slane %v2190_v45, 4  ;;  %v2200_v50 = vor.u32 %v2199_v27, %v2195_v61  ;;  %v2210_v34 = vrot.slane %v2208_v5, 4 }
  0x94   : > { %7139 = vmatmul.mubr.msk.bf16.vlgmr.msra.gmra.mxu0 %vm495_vm0, %v7420_v13  ;;  %v2213_v42 = vrot.slane %v2211_v17, 5  ;;  %v2219_v36 = vrot.slane %v2217_v62, 5  ;;  %v2223_v47 = vrot.slane %v2221_v14, 4  ;;  %v2227_v48 = vshll.u32 %v8193_v3, 16  ;;  %7226 = vmatprep.subr.bf16.mxu1 %v8189_v37  ;;  %v8239_v13 = vld [vmem:[%s7576_s6 + $0x68] sm:$0x1] }
  0x95   : > { %7173 = vmatpush3.bf16.msra.mxu0 %v8066_v40  ;;  %7160 = vmatprep.mubr.msk.bf16.mxu1 %vm495_vm0, %v6171_v32  ;;  %v2196_v29 = vsel %vm7622_vm3, %v2191_v54, %v2195_v61  ;;  %v2201_v49 = vrot.slane %v2200_v50, 4  ;;  %v2232_v56 = vshrl.u32 %v6158_v7, 16  ;;  %v2235_v22 = vshll.u32 %v6158_v7, 16  ;;  %v6161_v40 = vld [vmem:[%s7576_s6 + $0x60] sm:$0xf] }
  0x96   : > { %7142 = vmatprep.mubr.msk.bf16.mxu0 %vm495_vm0, %v7422_v1  ;;  %v2214_v15 = vor.u32 %v2213_v42, %v2210_v34  ;;  %v2224_v30 = vor.u32 %v2223_v47, %v2219_v36  ;;  %v2229_v35 = vrot.slane %v2227_v48, 5  ;;  %v2241_v43 = vshll.u32 %v8208_v41, 16  ;;  %7208 = vmatprep.subr.bf16.mxu0 %v8204_v26  ;;  %v8244_v17 = vld [vmem:[%s7576_s6 + $0x70] sm:$0xf]  ;;  %v8249_v7 = vld [vmem:[%s7576_s6 + $0x74] sm:$0x1] }
  0x97   : > { %v2206_v53 = vsel %vm7622_vm3, %v2201_v49, %v2205_v55  ;;  %v2234_v57 = vrot.slane %v2232_v56, 4  ;;  %v2237_v51 = vrot.slane %v2235_v22, 5  ;;  %v2245_v16 = vshrl.u32 %v8208_v41, 16  ;;  %v8252_v32 = vld [vmem:[%s7576_s6 + $0x60] sm:$0xf] }
  0x98   : > { %v6172_v60 = vcombine.low %v2196_v29, %v2206_v53  ;;  %v2215_v44 = vrot.slane %v2214_v15, 4  ;;  %v2225_v46 = vrot.slane %v2224_v30, 4  ;;  %v2243_v2 = vrot.slane %v2241_v43, 5 }
  0x99   : > { %v2238_v8 = vor.u32 %v2237_v51, %v2234_v57  ;;  %v2247_v38 = vrot.slane %v2245_v16, 4  ;;  %v2251_v58 = vshll.u32 %v8219_v11, 16  ;;  %v2256_v61 = vshrl.u32 %v6161_v40, 16  ;;  %v8265_v57 = vld [vmem:[%s7576_s6 + $0x64] sm:$0xf] }
  0x9a   : > { %7161 = vmatmul.mubr.msk.bf16.gmra.mxu1 %vm495_vm0, %v6172_v60  ;;  %v2220_v21 = vsel %vm7622_vm3, %v2215_v44, %v2219_v36  ;;  %v2230_v10 = vsel %vm7622_vm3, %v2225_v46, %v2229_v35  ;;  %v2259_v19 = vshll.u32 %v6161_v40, 16  ;;  %v2265_v4 = vshll.u32 %v8228_v52, 16  ;;  %v7425_v35 = vld [vmem:[%s7576_s6 + $0x54] sm:$0xff]  }
  0x9b   : > { %v6173_v45 = vcombine.low %v2220_v21, %v2230_v10  ;;  %v2239_v27 = vrot.slane %v2238_v8, 4  ;;  %v2248_v1 = vor.u32 %v2247_v38, %v2243_v2  ;;  %v2253_v5 = vrot.slane %v2251_v58, 5  ;;  %v8274_v38 = vld [vmem:[%s7576_s6 + $0x68] sm:$0x1] }
  0x9c   : > { %7143 = vmatmul.mubr.msk.bf16.gmra.mxu0 %vm495_vm0, %v7423_v63  ;;  %v2258_v59 = vrot.slane %v2256_v61, 4  ;;  %v2261_v55 = vrot.slane %v2259_v19, 5  ;;  %v2267_v62 = vrot.slane %v2265_v4, 5  ;;  %v2269_v14 = vshrl.u32 %v8228_v52, 16  ;;  %v7426_v63 = vld [vmem:[%s7576_s6 + $0x60] sm:$0xff]  }
  0x9d   : > { %7164 = vmatprep.mubr.msk.bf16.mxu1 %vm495_vm0, %v6173_v45  ;;  %v2244_v54 = vsel %vm7622_vm3, %v2239_v27, %v2243_v2  ;;  %v2249_v50 = vrot.slane %v2248_v1, 4  ;;  %7146 = vmatprep.mubr.msk.bf16.mxu0 %vm495_vm0, %v7424_v23  ;;  %v2275_v34 = vshll.u32 %v8239_v13, 16  ;;  %v2280_v42 = vshrl.u32 %v6164_v12, 16  ;;  %v8279_v19 = vld [vmem:[%s7576_s6 + $0x6c] sm:$0xf] }
  0x9e   : > { %v2262_v36 = vor.u32 %v2261_v55, %v2258_v59  ;;  %v2271_v47 = vrot.slane %v2269_v14, 4  ;;  %v2283_v48 = vshll.u32 %v6164_v12, 16  ;;  %v2289_v29 = vshll.u32 %v8244_v17, 16  ;;  %v8286_v1 = vld [vmem:[%s7576_s6 + $0x70] sm:$0xf] }
  0x9f   : > { %v2254_v49 = vsel %vm7622_vm3, %v2249_v50, %v2253_v5  ;;  %v2277_v56 = vrot.slane %v2275_v34, 5  ;;  %v2282_v22 = vrot.slane %v2280_v42, 4  ;;  %v2293_v15 = vshrl.u32 %v8244_v17, 16  ;;  %v8293_v34 = vld [vmem:[%s7576_s6 + $0x74] sm:$0x1] }
  0xa0   : > { %v6174_v30 = vcombine.low %v2244_v54, %v2254_v49  ;;  %v2263_v43 = vrot.slane %v2262_v36, 4  ;;  %v2272_v40 = vor.u32 %v2271_v47, %v2267_v62  ;;  %v2285_v53 = vrot.slane %v2283_v48, 5  ;;  %v7427_v47 = vld [vmem:[%s7576_s6 + $0x6c] sm:$0xff]  }
  0xa1   : > { %v2291_v51 = vrot.slane %v2289_v29, 5  ;;  %v2295_v16 = vrot.slane %v2293_v15, 4  ;;  %v2299_v60 = vshll.u32 %v8249_v7, 16  ;;  %v2921_v44 = vshrl.u32 %v8252_v32, 16 }
  0xa2   : > { %7165 = vmatmul.mubr.msk.bf16.gmra.mxu1 %vm495_vm0, %v6174_v30  ;;  %v2268_v46 = vsel %vm7622_vm3, %v2263_v43, %v2267_v62  ;;  %v2273_v2 = vrot.slane %v2272_v40, 4  ;;  %v2286_v8 = vor.u32 %v2285_v53, %v2282_v22  ;;  %v2924_v58 = vshll.u32 %v8252_v32, 16  ;;  %v6187_v43 = vld [vmem:[%s7576_s6 + $0x24] sm:$0xe] }
  0xa3   : > { %v2296_v23 = vor.u32 %v2295_v16, %v2291_v51  ;;  %v2301_v61 = vrot.slane %v2299_v60, 5  ;;  %v2923_v21 = vrot.slane %v2921_v44, 4  ;;  %v2930_v10 = vshll.u32 %v8265_v57, 16  ;;  %v8307_v60 = vld [vmem:[%s7576_s6 + $0x78] sm:$0xf] }
  0xa4   : > { %7147 = vmatmul.mubr.msk.bf16.gmra.mxu0 %vm495_vm0, %v7425_v35  ;;  %v2278_v4 = vsel %vm7622_vm3, %v2273_v2, %v2277_v56  ;;  %v2287_v12 = vrot.slane %v2286_v8, 4  ;;  %v2926_v45 = vrot.slane %v2924_v58, 5  ;;  %v2934_v27 = vshrl.u32 %v8265_v57, 16  ;;  %v6186_v56 = vld [vmem:[%s7576_s6 + $0x18] sm:$0xe] }
  0xa5   : > { %v6175_v5 = vcombine.low %v2268_v46, %v2278_v4  ;;  %v2297_v59 = vrot.slane %v2296_v23, 4  ;;  %7150 = vmatprep.mubr.msk.bf16.mxu0 %vm495_vm0, %v7426_v63  ;;  %v2932_v55 = vrot.slane %v2930_v10, 5  ;;  %v2940_v62 = vshll.u32 %v8274_v38, 16 }
  0xa6   : > { %v2292_v14 = vsel %vm7622_vm3, %v2287_v12, %v2291_v51  ;;  %v2927_v54 = vor.u32 %v2926_v45, %v2923_v21  ;;  %v2936_v50 = vrot.slane %v2934_v27, 4  ;;  %v2945_v42 = vshrl.u32 %v8279_v19, 16  ;;  %v8315_v21 = vld [vmem:[%s7576_s6 + $0x7c] sm:$0xf]  ;;  %v8323_v27 = vld [vmem:[%s7576_s6 + $0x80] sm:$0x1] }
  0xa7   : > { %7168 = vmatprep.mubr.msk.bf16.mxu1 %vm495_vm0, %v6175_v5  ;;  %v2302_v36 = vsel %vm7622_vm3, %v2297_v59, %v2301_v61  ;;  %v2942_v48 = vrot.slane %v2940_v62, 5  ;;  %v2948_v29 = vshll.u32 %v8279_v19, 16  ;;  %v2954_v49 = vshll.u32 %v8286_v1, 16 }
  0xa8   : > { %v6176_v22 = vcombine.low %v2292_v14, %v2302_v36  ;;  %v2928_v15 = vrot.slane %v2927_v54, 4  ;;  %v2937_v30 = vor.u32 %v2936_v50, %v2932_v55  ;;  %v2947_v35 = vrot.slane %v2945_v42, 4  ;;  %v8332_v50 = vld [vmem:[%s7576_s6 + $0x84] sm:$0xf] }
  0xa9   : > { %v2950_v40 = vrot.slane %v2948_v29, 5  ;;  %v2956_v53 = vrot.slane %v2954_v49, 5  ;;  %v2958_v51 = vshrl.u32 %v8286_v1, 16  ;;  %v2964_v16 = vshll.u32 %v8293_v34, 16 }
  0xaa   : > { %7169 = vmatmul.mubr.msk.bf16.gmra.mxu1 %vm495_vm0, %v6176_v22  ;;  %v2933_v63 = vsel %vm7622_vm3, %v2928_v15, %v2932_v55  ;;  %v2938_v44 = vrot.slane %v2937_v30, 4  ;;  %v6194_v46 = vrot.slane %v6186_v56, 9  ;;  %v2507_v2 = vrot.slane %v8114_v39, 5  ;;  %v8341_v56 = vld [vmem:[%s7576_s6 + $0x88] sm:$0xf] }
  0xab   : > { %v2951_v8 = vor.u32 %v2950_v40, %v2947_v35  ;;  %v2960_v58 = vrot.slane %v2958_v51, 4  ;;  %v2966_v23 = vrot.slane %v2964_v16, 5  ;;  %v2510_v61 = vrot.slane %v8121_v31, 5  ;;  %v8349_v35 = vld [vmem:[%s7576_s6 + $0x8c] sm:$0x1] }
  0xac   : > { %7151 = vmatmul.mubr.msk.bf16.gmra.mxu0 %vm495_vm0, %v7427_v47  ;;  %v2943_v10 = vsel %vm7622_vm3, %v2938_v44, %v2942_v48  ;;  %v2508_v4 = vsel %vm7748_vm6, %v6194_v46, %v2507_v2  ;;  %v2509_v12 = vrot.slane %v2507_v2, 4  ;;  %v6195_v45 = vrot.slane %v6187_v43, 9  ;;  %v8358_v44 = vld [vmem:[%s10061_s1 + $0x20] sm:$0xff]  }
  0xad   : > { %v6264_v39 = vcombine.low %v2933_v63, %v2943_v10  ;;  %v2952_v5 = vrot.slane %v2951_v8, 4  ;;  %v2961_v59 = vor.u32 %v2960_v58, %v2956_v53  ;;  %v2514_v31 = vrot.slane %v8133_v18, 5  ;;  %v6188_v63 = vld [vmem:[%s7576_s6 + $0x30] sm:$0xe] }
  0xae   : > { %v2511_v55 = vsel %vm7748_vm6, %v2509_v12, %v2510_v61  ;;  %v2517_v62 = vrot.slane %v8136_v0, 5  ;;  %v2969_v14 = vshrl.u32 %v8307_v60, 16  ;;  %v2972_v54 = vshll.u32 %v8307_v60, 16  ;;  %v8364_v61 = vld [vmem:[%s10061_s1 + $0x18] sm:$0xff]  }
  0xaf   : > { %7192 = vmatprep.mubr.msk.bf16.mxu1 %vm495_vm0, %v6264_v39  ;;  %v2957_v42 = vsel %vm7622_vm3, %v2952_v5, %v2956_v53  ;;  %v2962_v36 = vrot.slane %v2961_v59, 4  ;;  %v6204_v47 = vcombine.low %v2508_v4, %v2511_v55  ;;  %v2515_v18 = vsel %vm7748_vm6, %v6195_v45, %v2514_v31 }
  0xb0   : > { %v2516_v48 = vrot.slane %v2514_v31, 4  ;;  %v2971_v0 = vrot.slane %v2969_v14, 4  ;;  %v2974_v29 = vrot.slane %v2972_v54, 5  ;;  %v2978_v49 = vshll.u32 %v8315_v21, 16 }
  0xb1   : > { %v2967_v22 = vsel %vm7622_vm3, %v2962_v36, %v2966_v23  ;;  %7174 = vmatprep.mubr.msk.bf16.mxu0 %vm495_vm0, %v6204_v47  ;;  %v2982_v15 = vshrl.u32 %v8315_v21, 16  ;;  %v2988_v30 = vshll.u32 %v8323_v27, 16  ;;  %v2993_v43 = vshrl.u32 %v8332_v50, 16  ;;  %v6189_v23 = vld [vmem:[%s7576_s6 + $0x3c] sm:$0xe] }
  0xb2   : > { %v6265_v40 = vcombine.low %v2957_v42, %v2967_v22  ;;  %v2518_v53 = vsel %vm7748_vm6, %v2516_v48, %v2517_v62  ;;  %v2975_v51 = vor.u32 %v2974_v29, %v2971_v0  ;;  %v2980_v16 = vrot.slane %v2978_v49, 5  ;;  %v8378_v42 = vld [vmem:[%s7576_s6 + $0x90] sm:$0xf]  ;;  %v8386_v29 = vld [vmem:[%s7576_s6 + $0x94] sm:$0xf] }
  0xb3   : > { %v6205_v46 = vcombine.low %v2515_v18, %v2518_v53  ;;  %v2984_v2 = vrot.slane %v2982_v15, 4  ;;  %v2990_v8 = vrot.slane %v2988_v30, 5  ;;  %v2995_v58 = vrot.slane %v2993_v43, 4  ;;  %v8393_v30 = vld [vmem:[%s7576_s6 + $0x98] sm:$0x1] }
  0xb4   : > { %7193 = vmatmul.mubr.msk.bf16.vlgmr.msra.gmra.mxu1 %vm495_vm0, %v6265_v40  ;;  %v2976_v10 = vrot.slane %v2975_v51, 4  ;;  %v2996_v4 = vshll.u32 %v8332_v50, 16  ;;  %v3002_v12 = vshll.u32 %v8341_v56, 16  ;;  %v3006_v45 = vshrl.u32 %v8341_v56, 16 }
  0xb5   : > { %7175 = vmatmul.mubr.msk.bf16.vlgmr.msra.gmra.mxu0 %vm495_vm0, %v6205_v46  ;;  %7227 = vmatpush3.bf16.msra.mxu1 %v8189_v37  ;;  %v2985_v39 = vor.u32 %v2984_v2, %v2980_v16  ;;  %v3012_v5 = vshll.u32 %v8349_v35, 16  ;;  %v6196_v59 = vrot.slane %v6188_v63, 9  ;;  %v2521_v31 = vrot.slane %v8147_v6, 5 }
  0xb6   : > { %7209 = vmatpush3.bf16.msra.mxu0 %v8204_v26  ;;  %v2981_v55 = vsel %vm7622_vm3, %v2976_v10, %v2980_v16  ;;  %v2998_v62 = vrot.slane %v2996_v4, 5  ;;  %v3004_v14 = vrot.slane %v3002_v12, 5  ;;  %v3008_v54 = vrot.slane %v3006_v45, 4  ;;  %7262 = vmatprep.subr.bf16.mxu1 %v8358_v44  ;;  %v8399_v16 = vld [vmem:[%s7576_s6 + $0x9c] sm:$0xf] }
  0xb7   : > { %v2986_v37 = vrot.slane %v2985_v39, 4  ;;  %v3014_v36 = vrot.slane %v3012_v5, 5  ;;  %v2522_v47 = vsel %vm7748_vm6, %v6196_v59, %v2521_v31  ;;  %v2523_v6 = vrot.slane %v2521_v31, 4  ;;  %7244 = vmatprep.subr.bf16.mxu0 %v8364_v61  ;;  %v8411_v10 = vld [vmem:[%s7576_s6 + $0xa0] sm:$0xf] }
  0xb8   : > { %v2999_v26 = vor.u32 %v2998_v62, %v2995_v58  ;;  %v3009_v18 = vor.u32 %v3008_v54, %v3004_v14  ;;  %v2524_v48 = vrot.slane %v8154_v25, 5  ;;  %v6197_v0 = vrot.slane %v6189_v23, 9  ;;  %v8419_v5 = vld [vmem:[%s7576_s6 + $0xa4] sm:$0x1] }
  0xb9   : > { %v2991_v49 = vsel %vm7622_vm3, %v2986_v37, %v2990_v8  ;;  %v2528_v22 = vrot.slane %v8163_v33, 5  ;;  %v2531_v15 = vrot.slane %v8172_v20, 5  ;;  %v3017_v43 = vshrl.u32 %v8378_v42, 16 }
  0xba   : > { %v6266_v40 = vcombine.low %v2981_v55, %v2991_v49  ;;  %v3000_v53 = vrot.slane %v2999_v26, 4  ;;  %v3010_v51 = vrot.slane %v3009_v18, 4  ;;  %v2525_v25 = vsel %vm7748_vm6, %v2523_v6, %v2524_v48 }
  0xbb   : > { %v6206_v63 = vcombine.low %v2522_v47, %v2525_v25  ;;  %v2529_v33 = vsel %vm7748_vm6, %v6197_v0, %v2528_v22  ;;  %v2530_v46 = vrot.slane %v2528_v22, 4  ;;  %v3019_v20 = vrot.slane %v3017_v43, 4  ;;  %v6191_v0 = vld [vmem:[%s7576_s6 + $0x54] sm:$0xe] }
  0xbc   : > { %7196 = vmatprep.mubr.msk.bf16.mxu1 %vm495_vm0, %v6266_v40  ;;  %v3005_v2 = vsel %vm7622_vm3, %v3000_v53, %v3004_v14  ;;  %v3015_v8 = vsel %vm7622_vm3, %v3010_v51, %v3014_v36  ;;  %v3020_v58 = vshll.u32 %v8378_v42, 16  ;;  %v3026_v23 = vshll.u32 %v8386_v29, 16  ;;  %v6190_v14 = vld [vmem:[%s7576_s6 + $0x48] sm:$0xe] }
  0xbd   : > { %v6267_v4 = vcombine.low %v3005_v2, %v3015_v8  ;;  %7178 = vmatprep.mubr.msk.bf16.mxu0 %vm495_vm0, %v6206_v63  ;;  %v2532_v12 = vsel %vm7748_vm6, %v2530_v46, %v2531_v15  ;;  %v3030_v45 = vshrl.u32 %v8386_v29, 16  ;;  %v3036_v39 = vshll.u32 %v8393_v30, 16  ;;  %v8431_v40 = vld [vmem:[%s7576_s6 + $0xa8] sm:$0xf]  ;;  %v8436_v8 = vld [vmem:[%s7576_s6 + $0xac] sm:$0xf] }
  0xbe   : > { %v6207_v59 = vcombine.low %v2529_v33, %v2532_v12  ;;  %v3022_v31 = vrot.slane %v3020_v58, 5  ;;  %v3028_v55 = vrot.slane %v3026_v23, 5  ;;  %v3041_v62 = vshrl.u32 %v8399_v16, 16 }
  0xbf   : > { %7197 = vmatmul.mubr.msk.bf16.gmra.mxu1 %vm495_vm0, %v6267_v4  ;;  %v3032_v54 = vrot.slane %v3030_v45, 4  ;;  %v3038_v37 = vrot.slane %v3036_v39, 5  ;;  %v3044_v36 = vshll.u32 %v8399_v16, 16  ;;  %v3050_v47 = vshll.u32 %v8411_v10, 16  ;;  %v8443_v45 = vld [vmem:[%s7576_s6 + $0xb0] sm:$0x1] }
  0xc0   : > { %7179 = vmatmul.mubr.msk.bf16.gmra.mxu0 %vm495_vm0, %v6207_v59  ;;  %v3023_v6 = vor.u32 %v3022_v31, %v3019_v20  ;;  %v3043_v26 = vrot.slane %v3041_v62, 4  ;;  %v3054_v18 = vshrl.u32 %v8411_v10, 16  ;;  %v3060_v48 = vshll.u32 %v8419_v5, 16  ;;  %v8450_v31 = vld [vmem:[%s7576_s6 + $0xb4] sm:$0xf] }
  0xc1   : > { %v3033_v49 = vor.u32 %v3032_v54, %v3028_v55  ;;  %v3046_v22 = vrot.slane %v3044_v36, 5  ;;  %v3052_v15 = vrot.slane %v3050_v47, 5  ;;  %v6198_v43 = vrot.slane %v6190_v14, 9  ;;  %v8456_v36 = vld [vmem:[%s7576_s6 + $0xb8] sm:$0xf] }
  0xc2   : > { %v3024_v53 = vrot.slane %v3023_v6, 4  ;;  %v3056_v51 = vrot.slane %v3054_v18, 4  ;;  %v3062_v25 = vrot.slane %v3060_v48, 5  ;;  %v2535_v63 = vrot.slane %v8180_v24, 5  ;;  %v8463_v6 = vld [vmem:[%s7576_s6 + $0xbc] sm:$0x1] }
  0xc3   : > { %v3034_v33 = vrot.slane %v3033_v49, 4  ;;  %v3047_v46 = vor.u32 %v3046_v22, %v3043_v26  ;;  %v2538_v20 = vrot.slane %v8193_v3, 5  ;;  %v6199_v2 = vrot.slane %v6191_v0, 9 }
  0xc4   : > { %v3029_v58 = vsel %vm7622_vm3, %v3024_v53, %v3028_v55  ;;  %v3057_v23 = vor.u32 %v3056_v51, %v3052_v15  ;;  %v2536_v4 = vsel %vm7748_vm6, %v6198_v43, %v2535_v63  ;;  %v2537_v12 = vrot.slane %v2535_v63, 4  ;;  %v6192_v53 = vld [vmem:[%s7576_s6 + $0x60] sm:$0xe] }
  0xc5   : > { %v3039_v24 = vsel %vm7622_vm3, %v3034_v33, %v3038_v37  ;;  %v3048_v39 = vrot.slane %v3047_v46, 4  ;;  %v2542_v3 = vrot.slane %v8208_v41, 5  ;;  %v2545_v59 = vrot.slane %v8219_v11, 5  ;;  %v6193_v46 = vld [vmem:[%s7576_s6 + $0x6c] sm:$0xe] }
  0xc6   : > { %v6268_v62 = vcombine.low %v3029_v58, %v3039_v24  ;;  %v3058_v55 = vrot.slane %v3057_v23, 4  ;;  %v2539_v14 = vsel %vm7748_vm6, %v2537_v12, %v2538_v20  ;;  %v3065_v54 = vshrl.u32 %v8431_v40, 16 }
  0xc7   : > { %v3053_v37 = vsel %vm7622_vm3, %v3048_v39, %v3052_v15  ;;  %v6208_v47 = vcombine.low %v2536_v4, %v2539_v14  ;;  %v2543_v41 = vsel %vm7748_vm6, %v6199_v2, %v2542_v3  ;;  %v2544_v11 = vrot.slane %v2542_v3, 4 }
  0xc8   : > { %7200 = vmatprep.mubr.msk.bf16.mxu1 %vm495_vm0, %v6268_v62  ;;  %v3063_v26 = vsel %vm7622_vm3, %v3058_v55, %v3062_v25  ;;  %v3067_v18 = vrot.slane %v3065_v54, 4  ;;  %v3068_v48 = vshll.u32 %v8431_v40, 16  ;;  %v3074_v0 = vshll.u32 %v8436_v8, 16 }
  0xc9   : > { %v6269_v49 = vcombine.low %v3053_v37, %v3063_v26  ;;  %7182 = vmatprep.mubr.msk.bf16.mxu0 %vm495_vm0, %v6208_v47  ;;  %v2546_v22 = vsel %vm7748_vm6, %v2544_v11, %v2545_v59  ;;  %v3078_v15 = vshrl.u32 %v8436_v8, 16  ;;  %v3084_v43 = vshll.u32 %v8443_v45, 16 }
  0xca   : > { %v6209_v51 = vcombine.low %v2543_v41, %v2546_v22  ;;  %v3070_v63 = vrot.slane %v3068_v48, 5  ;;  %v3076_v33 = vrot.slane %v3074_v0, 5  ;;  %v3089_v25 = vshrl.u32 %v8450_v31, 16  ;;  %v6298_v48 = vld [vmem:[%s7576_s6 + $0x60] sm:$0xe] }
  0xcb   : > { %7201 = vmatmul.mubr.msk.bf16.gmra.mxu1 %vm495_vm0, %v6269_v49  ;;  %v3080_v20 = vrot.slane %v3078_v15, 4  ;;  %v3086_v2 = vrot.slane %v3084_v43, 5  ;;  %v3092_v58 = vshll.u32 %v8450_v31, 16  ;;  %v3098_v23 = vshll.u32 %v8456_v36, 16  ;;  %v6299_v43 = vld [vmem:[%s7576_s6 + $0x6c] sm:$0xe] }
  0xcc   : > { %7183 = vmatmul.mubr.msk.bf16.gmra.mxu0 %vm495_vm0, %v6209_v51  ;;  %v3071_v4 = vor.u32 %v3070_v63, %v3067_v18  ;;  %v3091_v12 = vrot.slane %v3089_v25, 4  ;;  %v3102_v24 = vshrl.u32 %v8456_v36, 16  ;;  %v3108_v39 = vshll.u32 %v8463_v6, 16 }
  0xcd   : > { %v3081_v3 = vor.u32 %v3080_v20, %v3076_v33  ;;  %v3094_v59 = vrot.slane %v3092_v58, 5  ;;  %v3100_v62 = vrot.slane %v3098_v23, 5  ;;  %v6200_v55 = vrot.slane %v6192_v53, 9 }
  0xce   : > { %v3072_v14 = vrot.slane %v3071_v4, 4  ;;  %v3104_v54 = vrot.slane %v3102_v24, 4  ;;  %v3110_v37 = vrot.slane %v3108_v39, 5  ;;  %v2549_v47 = vrot.slane %v8228_v52, 5 }
  0xcf   : > { %v3082_v41 = vrot.slane %v3081_v3, 4  ;;  %v3095_v11 = vor.u32 %v3094_v59, %v3091_v12  ;;  %v2552_v26 = vrot.slane %v8239_v13, 5  ;;  %v6201_v18 = vrot.slane %v6193_v46, 9 }
  0xd0   : > { %v3077_v0 = vsel %vm7622_vm3, %v3072_v14, %v3076_v33  ;;  %v3105_v49 = vor.u32 %v3104_v54, %v3100_v62  ;;  %v2550_v22 = vsel %vm7748_vm6, %v6200_v55, %v2549_v47  ;;  %v2551_v15 = vrot.slane %v2549_v47, 4 }
  0xd1   : > { %v3087_v53 = vsel %vm7622_vm3, %v3082_v41, %v3086_v2  ;;  %v3096_v52 = vrot.slane %v3095_v11, 4  ;;  %v2556_v51 = vrot.slane %v8244_v17, 5  ;;  %v2559_v13 = vrot.slane %v8249_v7, 5  ;;  %v6300_v2 = vld [vmem:[%s7576_s6 + $0x78] sm:$0xe] }
  0xd2   : > { %v6270_v63 = vcombine.low %v3077_v0, %v3087_v53  ;;  %v3106_v25 = vrot.slane %v3105_v49, 4  ;;  %v2553_v33 = vsel %vm7748_vm6, %v2551_v15, %v2552_v26  ;;  %v6306_v46 = vrot.slane %v6298_v48, 9  ;;  %v6301_v41 = vld [vmem:[%s7576_s6 + $0x84] sm:$0xe]  ;;  %v6302_v48 = vld [vmem:[%s7576_s6 + $0x90] sm:$0xe] }
  0xd3   : > { %v3101_v20 = vsel %vm7622_vm3, %v3096_v52, %v3100_v62  ;;  %v6210_v58 = vcombine.low %v2550_v22, %v2553_v33  ;;  %v2557_v23 = vsel %vm7748_vm6, %v6201_v18, %v2556_v51  ;;  %v2558_v4 = vrot.slane %v2556_v51, 4  ;;  %v6303_v49 = vld [vmem:[%s7576_s6 + $0x9c] sm:$0xe] }
  0xd4   : > { %7204 = vmatprep.mubr.msk.bf16.mxu1 %vm495_vm0, %v6270_v63  ;;  %v3111_v17 = vsel %vm7622_vm3, %v3106_v25, %v3110_v37  ;;  %v3458_v7 = vrot.slane %v8265_v57, 5  ;;  %v3461_v12 = vrot.slane %v8274_v38, 5  ;;  %v6307_v24 = vrot.slane %v6299_v43, 9 }
  0xd5   : > { %v6271_v39 = vcombine.low %v3101_v20, %v3111_v17  ;;  %7186 = vmatprep.mubr.msk.bf16.mxu0 %vm495_vm0, %v6210_v58  ;;  %v2560_v3 = vsel %vm7748_vm6, %v2558_v4, %v2559_v13  ;;  %v3465_v59 = vrot.slane %v8286_v1, 5  ;;  %v3468_v62 = vrot.slane %v8293_v34, 5 }
  0xd6   : > { %v6211_v55 = vcombine.low %v2557_v23, %v2560_v3  ;;  %v3459_v14 = vsel %vm7748_vm6, %v6306_v46, %v3458_v7  ;;  %v3460_v54 = vrot.slane %v3458_v7, 4  ;;  %v6281_v38 = vcombine.low %v8252_v32, %v8265_v57  ;;  %v6305_v7 = vld [vmem:[%s7576_s6 + $0xb4] sm:$0xe]  ;;  %v6368_v3 = vld [vmem:[%s7576_s6 + $0x6c] sm:$0xf] }
  0xd7   : > { %7205 = vmatmul.mubr.msk.bf16.gmra.mxu1 %vm495_vm0, %v6271_v39  ;;  %v3467_v37 = vrot.slane %v3465_v59, 4  ;;  %v6308_v47 = vrot.slane %v6300_v2, 9  ;;  %v3466_v34 = vsel %vm7748_vm6, %v6307_v24, %v3465_v59  ;;  %v3472_v26 = vrot.slane %v8315_v21, 5  ;;  %v6304_v2 = vld [vmem:[%s7576_s6 + $0xa8] sm:$0xe] }
  0xd8   : > { %7187 = vmatmul.mubr.msk.bf16.gmra.mxu0 %vm495_vm0, %v6211_v55  ;;  %v3462_v11 = vsel %vm7748_vm6, %v3460_v54, %v3461_v12  ;;  %v3475_v18 = vrot.slane %v8323_v27, 5  ;;  %v3479_v57 = vrot.slane %v8341_v56, 5  ;;  %v6309_v43 = vrot.slane %v6301_v41, 9  ;;  %v8563_v12 = vld [vmem:[%s10061_s1 + $0x30] sm:$0xff]   ;;  %v6371_v41 = vld [vmem:[%s7576_s6 + $0x78] sm:$0xf] }
  0xd9   : > { %v6316_v0 = vcombine.low %v3459_v14, %v3462_v11  ;;  %v3469_v32 = vsel %vm7748_vm6, %v3467_v37, %v3468_v62  ;;  %7210 = vmatprep.mubr.msk.bf16.mxu0 %vm495_vm0, %v6281_v38  ;;  %v3473_v22 = vsel %vm7748_vm6, %v6308_v47, %v3472_v26  ;;  %v3474_v15 = vrot.slane %v3472_v26, 4  ;;  %v8586_v62 = vld [vmem:[%s7576_s6 + $0x70] sm:$0xf]  ;;  %v8593_v38 = vld [vmem:[%s7576_s6 + $0x74] sm:$0x1] }
  0xda   : > { %v3482_v53 = vrot.slane %v8349_v35, 5  ;;  %v6317_v27 = vcombine.low %v3466_v34, %v3469_v32  ;;  %v6282_v52 = vcombine.low %v8279_v19, %v8286_v1  ;;  %v3481_v51 = vrot.slane %v3479_v57, 4 }
  0xdb   : > { %7228 = vmatprep.mubr.msk.bf16.mxu1 %vm495_vm0, %v6316_v0  ;;  %v6310_v13 = vrot.slane %v6302_v48, 9  ;;  %v3476_v63 = vsel %vm7748_vm6, %v3474_v15, %v3475_v18  ;;  %v3486_v25 = vrot.slane %v8386_v29, 5  ;;  %v3489_v33 = vrot.slane %v8393_v30, 5  ;;  %v8554_v30 = vld [vmem:[%s10061_s1 + $0x28] sm:$0xff]   ;;  %v8607_v48 = vld [vmem:[%s7576_s6 + $0x7c] sm:$0xf] }
  0xdc   : > { %v6311_v46 = vrot.slane %v6303_v49, 9  ;;  %v6318_v20 = vcombine.low %v3473_v22, %v3476_v63  ;;  %v3493_v35 = vrot.slane %v8411_v10, 5  ;;  %v3496_v58 = vrot.slane %v8419_v5, 5 }
  0xdd   : > { %v3480_v23 = vsel %vm7748_vm6, %v6309_v43, %v3479_v57  ;;  %v3483_v19 = vsel %vm7748_vm6, %v3481_v51, %v3482_v53  ;;  %v6283_v1 = vcombine.low %v8307_v60, %v8315_v21  ;;  %v3488_v4 = vrot.slane %v3486_v25, 4 }
  0xde   : > { %v3487_v5 = vsel %vm7748_vm6, %v6310_v13, %v3486_v25  ;;  %v3495_v17 = vrot.slane %v3493_v35, 4  ;;  %v6284_v60 = vcombine.low %v8332_v50, %v8341_v56  ;;  %v8573_v24 = vsel %vm7748_vm6, %v6311_v46, %v3493_v35  ;;  %v8627_v46 = vld [vmem:[%s7576_s6 + $0x80] sm:$0x1] }
  0xdf   : > { %7229 = vmatmul.mubr.msk.bf16.vlgmr.msra.gmra.mxu1 %vm495_vm0, %v6317_v27  ;;  %v3490_v21 = vsel %vm7748_vm6, %v3488_v4, %v3489_v33  ;;  %v3500_v39 = vrot.slane %v8436_v8, 5  ;;  %v6319_v59 = vcombine.low %v3480_v23, %v3483_v19  ;;  %v6285_v56 = vcombine.low %v8378_v42, %v8386_v29 }
  0xe0   : > { %7211 = vmatmul.mubr.msk.bf16.vlgmr.msra.gmra.mxu0 %vm495_vm0, %v6282_v52  ;;  %7263 = vmatpush3.bf16.msra.mxu1 %v8358_v44  ;;  %v8581_v50 = vsel %vm7748_vm6, %v3495_v17, %v3496_v58  ;;  %v6312_v44 = vrot.slane %v6304_v2, 9  ;;  %v6320_v55 = vcombine.low %v3487_v5, %v3490_v21  ;;  %v3503_v14 = vrot.slane %v8443_v45, 5  ;;  %v6374_v58 = vld [vmem:[%s7576_s6 + $0x84] sm:$0xf]  ;;  %v8637_v2 = vld [vmem:[%s7576_s6 + $0x88] sm:$0xf] }
  0xe1   : > { %7245 = vmatpush3.bf16.msra.mxu0 %v8364_v61  ;;  %7232 = vmatprep.mubr.msk.bf16.mxu1 %vm495_vm0, %v6318_v20  ;;  %v6286_v61 = vcombine.low %v8399_v16, %v8411_v10  ;;  %v6313_v54 = vrot.slane %v6305_v7, 9  ;;  %v6321_v42 = vcombine.low %v8573_v24, %v8581_v50  ;;  %v3507_v29 = vrot.slane %v8456_v36, 5  ;;  %v8681_v24 = vld [vmem:[%s7576_s6 + $0x98] sm:$0x1] }
  0xe2   : > { %7214 = vmatprep.mubr.msk.bf16.mxu0 %vm495_vm0, %v6283_v1  ;;  %7280 = vmatprep.subr.bf16.mxu0 %v8554_v30  ;;  %v3510_v37 = vrot.slane %v8463_v6, 5  ;;  %v3908_v47 = vshrl.u32 %v6368_v3, 16  ;;  %v3502_v11 = vrot.slane %v3500_v39, 4  ;;  %v3911_v34 = vshll.u32 %v6368_v3, 16 }
  0xe3   : > { %7298 = vmatprep.subr.bf16.mxu1 %v8563_v12  ;;  %v3917_v45 = vshll.u32 %v8586_v62, 16  ;;  %v3921_v26 = vshrl.u32 %v8586_v62, 16  ;;  %v3501_v0 = vsel %vm7748_vm6, %v6312_v44, %v3500_v39  ;;  %v6287_v6 = vcombine.low %v8431_v40, %v8436_v8  ;;  %v8701_v40 = vld [vmem:[%s7576_s6 + $0xa0] sm:$0xf] }
  0xe4   : > { %v8604_v18 = vpop.f32.mrf.mxu1  ;;  %v3910_v32 = vrot.slane %v3908_v47, 4  ;;  %v3927_v57 = vshll.u32 %v8593_v38, 16  ;;  %v8616_v49 = vsel %vm7748_vm6, %v6313_v54, %v3507_v29  ;;  %v3913_v22 = vrot.slane %v3911_v34, 5  ;;  %v8651_v54 = vld [vmem:[%s7576_s6 + $0x8c] sm:$0x1] }
  0xe5   : > { %v3919_v15 = vrot.slane %v3917_v45, 5  ;;  %v3923_v43 = vrot.slane %v3921_v26, 4  ;;  %v3509_v27 = vrot.slane %v3507_v29, 4  ;;  %v3932_v52 = vshrl.u32 %v6371_v41, 16  ;;  %v6377_v47 = vld [vmem:[%s7576_s6 + $0x90] sm:$0xf] }
  0xe6   : > { %v8618_v53 = vpop.f32.mrf.mxu1  ;;  %v3935_v51 = vshll.u32 %v6371_v41, 16  ;;  %v3941_v13 = vshll.u32 %v8607_v48, 16  ;;  %v3504_v63 = vsel %vm7748_vm6, %v3502_v11, %v3503_v14  ;;  %v3914_v25 = vor.u32 %v3913_v22, %v3910_v32  ;;  %v8659_v45 = vld [vmem:[%s7576_s6 + $0x94] sm:$0xf] }
  0xe7   : > { %7233 = vmatmul.mubr.msk.bf16.gmra.mxu1 %vm495_vm0, %v6319_v59  ;;  %v3924_v33 = vor.u32 %v3923_v43, %v3919_v15  ;;  %v3945_v20 = vshrl.u32 %v8607_v48, 16  ;;  %v3929_v23 = vrot.slane %v3927_v57, 5  ;;  %v3934_v19 = vrot.slane %v3932_v52, 4 }
  0xe8   : > { %7215 = vmatmul.mubr.msk.bf16.gmra.mxu0 %vm495_vm0, %v6284_v60  ;;  %7236 = vmatprep.mubr.msk.bf16.mxu1 %vm495_vm0, %v6320_v55  ;;  %v8630_v35 = vpop.f32.mrf.mxu1  ;;  %v3937_v1 = vrot.slane %v3935_v51, 5  ;;  %v8634_v4 = vrot.slane %v3941_v13, 5  ;;  %v6288_v5 = vcombine.low %v8450_v31, %v8456_v36  ;;  %v3915_v17 = vrot.slane %v3914_v25, 4 }
  0xe9   : > { %7218 = vmatprep.mubr.msk.bf16.mxu0 %vm495_vm0, %v6285_v56  ;;  %v3925_v7 = vrot.slane %v3924_v33, 4  ;;  %v3947_v60 = vrot.slane %v3945_v20, 4  ;;  %v8645_v39 = vsel %vm7748_vm6, %v3509_v27, %v3510_v37  ;;  %v3956_v59 = vshrl.u32 %v6374_v58, 16  ;;  %v6380_v33 = vld [vmem:[%s7576_s6 + $0x9c] sm:$0xf] }
  0xea   : > { %v8641_v21 = vpop.f32.mrf.mxu1  ;;  %v3938_v3 = vor.u32 %v3937_v1, %v3934_v19  ;;  %v3959_v56 = vshll.u32 %v6374_v58, 16  ;;  %v6322_v44 = vcombine.low %v3501_v0, %v3504_v63  ;;  %v3920_v55 = vsel %vm7622_vm3, %v3915_v17, %v3919_v15 }
  0xeb   : > { %v3951_v14 = vshll.u32 %v8627_v46, 16  ;;  %v3965_v29 = vshll.u32 %v8637_v2, 16  ;;  %v3930_v41 = vsel %vm7622_vm3, %v3925_v7, %v3929_v23  ;;  %v3948_v37 = vor.u32 %v3947_v60, %v8634_v4 }
  0xec   : > { %v3958_v11 = vrot.slane %v3956_v59, 4  ;;  %v3961_v34 = vrot.slane %v3959_v56, 5  ;;  %v6323_v26 = vcombine.low %v8616_v49, %v8645_v39  ;;  %v8663_v0 = vrot.slane %v3938_v3, 4 }
  0xed   : > { %v8665_v32 = vrot.slane %v3965_v29, 5  ;;  %v3969_v57 = vshrl.u32 %v8637_v2, 16  ;;  %v3975_v43 = vshll.u32 %v8651_v54, 16  ;;  %v3980_v27 = vshrl.u32 %v6377_v47, 16  ;;  %v8720_v29 = vld [vmem:[%s7576_s6 + $0xa4] sm:$0x1] }
  0xee   : > { %v8668_v22 = vpop.f32.mrf.mxu1  ;;  %v3962_v15 = vor.u32 %v3961_v34, %v3958_v11  ;;  %v3983_v52 = vshll.u32 %v6377_v47, 16  ;;  %v6394_v49 = vcombine.low %v3920_v55, %v3930_v41  ;;  %v3953_v51 = vrot.slane %v3951_v14, 5  ;;  %v7440_v55 = vld [vmem:[%s7576_s6 + $0x6c] sm:$0xff]  }
  0xef   : > { %7237 = vmatmul.mubr.msk.bf16.gmra.mxu1 %vm495_vm0, %v6321_v42  ;;  %v3971_v13 = vrot.slane %v3969_v57, 4  ;;  %v3989_v50 = vshll.u32 %v8659_v45, 16  ;;  %v3949_v16 = vrot.slane %v3948_v37, 4  ;;  %v3982_v63 = vrot.slane %v3980_v27, 4  ;;  %v8731_v57 = vld [vmem:[%s7576_s6 + $0xac] sm:$0xf] }
  0xf0   : > { %7219 = vmatmul.mubr.msk.bf16.gmra.mxu0 %vm495_vm0, %v6286_v61  ;;  %7240 = vmatprep.mubr.msk.bf16.mxu1 %vm495_vm0, %v6322_v44  ;;  %v8684_v42 = vpop.f32.mrf.mxu1  ;;  %v3963_v61 = vrot.slane %v3962_v15, 4  ;;  %v3985_v25 = vrot.slane %v3983_v52, 5  ;;  %v3993_v19 = vshrl.u32 %v8659_v45, 16  ;;  %v3944_v8 = vsel %vm7622_vm3, %v8663_v0, %v8634_v4  ;;  %v6383_v0 = vld [vmem:[%s7576_s6 + $0xa8] sm:$0xf] }
  0xf1   : > { %7222 = vmatprep.mubr.msk.bf16.mxu0 %vm495_vm0, %v6287_v6  ;;  %v7032_v10 = vpop.f32.mrf.mxu0  ;;  %v3972_v58 = vor.u32 %v3971_v13, %v8665_v32  ;;  %v8695_v23 = vrot.slane %v3989_v50, 5  ;;  %v3999_v7 = vshll.u32 %v8681_v24, 16  ;;  %v4004_v56 = vshrl.u32 %v6380_v33, 16 }
  0xf2   : > { %v8692_v20 = vadd.f32 %v8604_v18, %v7032_v10  ;;  %v8698_v1 = vpop.f32.mrf.mxu1  ;;  %v3977_v18 = vrot.slane %v3975_v43, 5  ;;  %v3986_v17 = vor.u32 %v3985_v25, %v3982_v63  ;;  %v3995_v3 = vrot.slane %v3993_v19, 4  ;;  %v8755_v25 = vld [vmem:[%s7576_s6 + $0xb0] sm:$0x1] }
  0xf3   : > { %v554_v6 = vpop.f32.mrf.mxu0  ;;  %v3973_v39 = vrot.slane %v3972_v58, 4  ;;  %v3954_v44 = vsel %vm7622_vm3, %v3949_v16, %v3953_v51  ;;  %v3968_v4 = vsel %vm7622_vm3, %v3963_v61, %v8665_v32  ;;  %v4013_v47 = vshll.u32 %v8701_v40, 16 }
  0xf4   : > { %v8709_v60 = vadd.f32 %v8618_v53, %v554_v6  ;;  %v8711_v59 = vpop.f32.mrf.mxu1  ;;  %v4007_v53 = vshll.u32 %v6380_v33, 16  ;;  %v8726_v37 = vrot.slane %v3986_v17, 4  ;;  %v3996_v11 = vor.u32 %v3995_v3, %v8695_v23 }
  0xf5   : > { %v7033_v14 = vpop.f32.mrf.mxu0  ;;  %v4006_v34 = vrot.slane %v4004_v56, 4  ;;  %v3978_v32 = vsel %vm7622_vm3, %v3973_v39, %v3977_v18  ;;  %v4001_v15 = vrot.slane %v3999_v7, 5  ;;  %v8736_v52 = vrot.slane %v4013_v47, 5  ;;  %v6386_v7 = vld [vmem:[%s7576_s6 + $0xb4] sm:$0xf]  ;;  %v7442_v39 = vld [vmem:[%s7576_s6 + $0x78] sm:$0xff]  }
  0xf6   : > { %v8724_v41 = vadd.f32 %v8630_v35, %v7033_v14  ;;  %v4009_v27 = vrot.slane %v4007_v53, 5  ;;  %v3997_v51 = vrot.slane %v3996_v11, 4  ;;  %v4017_v13 = vshrl.u32 %v8701_v40, 16 }
  0xf7   : > { %7241 = vmatmul.mubr.msk.bf16.gmra.mxu1 %vm495_vm0, %v6323_v26  ;;  %v557_v43 = vpop.f32.mrf.mxu0  ;;  %v8738_v35 = vpop.f32.mrf.mxu1  ;;  %v4023_v50 = vshll.u32 %v8720_v29, 16  ;;  %v4028_v10 = vshrl.u32 %v6383_v0, 16  ;;  %v4031_v31 = vshll.u32 %v6383_v0, 16  ;;  %v4037_v36 = vshll.u32 %v8731_v57, 16 }
  0xf8   : > { %7223 = vmatmul.mubr.msk.bf16.gmra.mxu0 %vm495_vm0, %v6288_v5  ;;  %7264 = vmatprep.mubr.msk.bf16.mxu1 %vm495_vm0, %v6394_v49  ;;  %v8746_v26 = vadd.f32 %v8641_v21, %v557_v43  ;;  %v4010_v16 = vor.u32 %v4009_v27, %v4006_v34  ;;  %v6395_v49 = vcombine.low %v3944_v8, %v3954_v44  ;;  %v4019_v21 = vrot.slane %v4017_v13, 4  ;;  %v7444_v34 = vld [vmem:[%s7576_s6 + $0x84] sm:$0xff]  }
  0xf9   : > { %7246 = vmatprep.mubr.msk.bf16.mxu0 %vm495_vm0, %v7440_v55  ;;  %v8752_v5 = vpop.f32.mrf.mxu1  ;;  %v6396_v61 = vcombine.low %v3968_v4, %v3978_v32  ;;  %v4041_v33 = vshrl.u32 %v8731_v57, 16  ;;  %v4025_v6 = vrot.slane %v4023_v50, 5  ;;  %v4030_v18 = vrot.slane %v4028_v10, 4  ;;  %v8769_v4 = vld [vmem:[%s7576_s6 + $0xb8] sm:$0xf]  ;;  %v8801_v50 = vld [vmem:[%s10061_s1 + $0x40] sm:$0xff]  }
  0xfa   : > { %v7036_v63 = vpop.f32.mrf.mxu0  ;;  %v4011_v19 = vrot.slane %v4010_v16, 4  ;;  %v4020_v3 = vor.u32 %v4019_v21, %v8736_v52  ;;  %v4033_v56 = vrot.slane %v4031_v31, 5  ;;  %v8766_v44 = vrot.slane %v4037_v36, 5 }
  0xfb   : > { %v8759_v58 = vadd.f32 %v8668_v22, %v7036_v63  ;;  %v8761_v17 = vpop.f32.mrf.mxu1  ;;  %v4043_v55 = vrot.slane %v4041_v33, 4  ;;  %v3992_v22 = vsel %vm7622_vm3, %v8726_v37, %v8695_v23  ;;  %v4002_v14 = vsel %vm7622_vm3, %v3997_v51, %v4001_v15  ;;  %v8788_v23 = vld [vmem:[%s10061_s1 + $0x38] sm:$0xff]   ;;  %v6389_v63 = vld [vmem:[%s7576_s6 + $0xc0] sm:$0xf] }
  0xfc   : > { %v570_v8 = vpop.f32.mrf.mxu0  ;;  %v4047_v47 = vshll.u32 %v8755_v25, 16  ;;  %v4021_v0 = vrot.slane %v4020_v3, 4  ;;  %v4034_v43 = vor.u32 %v4033_v56, %v4030_v18  ;;  %v4052_v13 = vshrl.u32 %v6386_v7, 16  ;;  %v8795_v37 = vld [vmem:[%s7576_s6 + $0xbc] sm:$0x1] }
  0xfd   : > { %v8778_v53 = vadd.f32 %v8684_v42, %v570_v8  ;;  %v8781_v11 = vpop.f32.mrf.mxu1  ;;  %v4044_v27 = vor.u32 %v4043_v55, %v8766_v44  ;;  %v4055_v15 = vshll.u32 %v6386_v7, 16  ;;  %v4061_v51 = vshll.u32 %v8769_v4, 16  ;;  %v8832_v8 = vld [vmem:[%s7576_s6 + $0xc8] sm:$0x1]  ;;  %v7445_v55 = vld [vmem:[%s7576_s6 + $0x90] sm:$0xff]  }
  0xfe   : > { %v7037_v32 = vpop.f32.mrf.mxu0  ;;  %v6397_v16 = vcombine.low %v3992_v22, %v4002_v14  ;;  %v4026_v10 = vsel %vm7622_vm3, %v4021_v0, %v4025_v6  ;;  %v4054_v36 = vrot.slane %v4052_v13, 4  ;;  %v8815_v21 = vrot.slane %v4034_v43, 4  ;;  %v7446_v43 = vld [vmem:[%s7576_s6 + $0x9c] sm:$0xff]  }
  0xff   : > { %7265 = vmatmul.mubr.msk.bf16.vlgmr.msra.gmra.mxu1 %vm495_vm0, %v6395_v49  ;;  %v8792_v42 = vadd.f32 %v8698_v1, %v7037_v32  ;;  %v4016_v1 = vsel %vm7622_vm3, %v4011_v19, %v8736_v52  ;;  %v4057_v52 = vrot.slane %v4055_v15, 5  ;;  %v8821_v19 = vld [vmem:[%s7576_s6 + $0xc4] sm:$0xf]  ;;  %v4045_v6 = vrot.slane %v4044_v27, 4 }
 0x100   : > { %7247 = vmatmul.mubr.msk.bf16.vlgmr.msra.gmra.mxu0 %vm495_vm0, %v7442_v39  ;;  %7299 = vmatpush3.bf16.msra.mxu1 %v8563_v12  ;;  %v573_v31 = vpop.f32.mrf.mxu0  ;;  %v8810_v49 = vpop.f32.mrf.mxu1  ;;  %v4049_v12 = vrot.slane %v4047_v47, 5  ;;  %v8824_v18 = vrot.slane %v4061_v51, 5  ;;  %v4071_v7 = vshll.u32 %v8795_v37, 16  ;;  %v4076_v3 = vshrl.u32 %v6389_v63, 16 }
 0x101   : > { %7281 = vmatpush3.bf16.msra.mxu0 %v8554_v30  ;;  %7268 = vmatprep.mubr.msk.bf16.mxu1 %vm495_vm0, %v6396_v61  ;;  %v8818_v33 = vadd.f32 %v8711_v59, %v573_v31  ;;  %v4065_v30 = vshrl.u32 %v8769_v4, 16  ;;  %v6398_v59 = vcombine.low %v4016_v1, %v4026_v10  ;;  %v4058_v39 = vor.u32 %v4057_v52, %v4054_v36 }
 0x102   : > { %7250 = vmatprep.mubr.msk.bf16.mxu0 %vm495_vm0, %v7444_v34  ;;  %v8828_v61 = vpop.f32.mrf.mxu1  ;;  %7316 = vmatprep.subr.bf16.mxu0 %v8788_v23  ;;  %v4079_v56 = vshll.u32 %v6389_v63, 16  ;;  %v4073_v47 = vrot.slane %v4071_v7, 5  ;;  %v4085_v34 = vshll.u32 %v8821_v19, 16  ;;  %v4089_v0 = vshrl.u32 %v8821_v19, 16 }
 0x103   : > { %7334 = vmatprep.subr.bf16.mxu1 %v8801_v50  ;;  %v4067_v14 = vrot.slane %v4065_v30, 4  ;;  %v4059_v13 = vrot.slane %v4058_v39, 4  ;;  %v4078_v15 = vrot.slane %v4076_v3, 4  ;;  %v4095_v63 = vshll.u32 %v8832_v8, 16  ;;  %v6411_v39 = vld [vmem:[%s7576_s6 + $0x6c] sm:$0xe] }
 0x104   : > { %v7040_v22 = vpop.f32.mrf.mxu0  ;;  %v8838_v32 = vpop.f32.mrf.mxu1  ;;  %v4081_v51 = vrot.slane %v4079_v56, 5  ;;  %v8845_v31 = vrot.slane %v4085_v34, 5  ;;  %v4091_v36 = vrot.slane %v4089_v0, 4  ;;  %v4309_v30 = vrot.slane %v8607_v48, 5 }
 0x105   : > { %v8842_v27 = vadd.f32 %v8738_v35, %v7040_v22  ;;  %v4068_v10 = vor.u32 %v4067_v14, %v8824_v18  ;;  %v4040_v3 = vsel %vm7622_vm3, %v8815_v21, %v8766_v44  ;;  %v4050_v56 = vsel %vm7622_vm3, %v4045_v6, %v4049_v12 }
 0x106   : > { %v586_v1 = vpop.f32.mrf.mxu0  ;;  %v8848_v52 = vpop.f32.mrf.mxu1  ;;  %v4082_v7 = vor.u32 %v4081_v51, %v4078_v15  ;;  %v4302_v21 = vrot.slane %v8586_v62, 5  ;;  %v4097_v34 = vrot.slane %v4095_v63, 5  ;;  %v6419_v15 = vrot.slane %v6411_v39, 9  ;;  %v6412_v51 = vld [vmem:[%s7576_s6 + $0x78] sm:$0xe] }
 0x107   : > { %7269 = vmatmul.mubr.msk.bf16.gmra.mxu1 %vm495_vm0, %v6397_v16  ;;  %v8853_v35 = vadd.f32 %v8752_v5, %v586_v1  ;;  %v4069_v22 = vrot.slane %v4068_v10, 4  ;;  %v4092_v5 = vor.u32 %v4091_v36, %v8845_v31  ;;  %v4305_v62 = vrot.slane %v8593_v38, 5  ;;  %v6413_v1 = vld [vmem:[%s7576_s6 + $0x84] sm:$0xe]  ;;  %v7447_v36 = vld [vmem:[%s7576_s6 + $0xa8] sm:$0xff]  }
 0x108   : > { %7251 = vmatmul.mubr.msk.bf16.gmra.mxu0 %vm495_vm0, %v7445_v55  ;;  %7272 = vmatprep.mubr.msk.bf16.mxu1 %vm495_vm0, %v6398_v59  ;;  %v7041_v16 = vpop.f32.mrf.mxu0  ;;  %v8865_v14 = vpop.f32.mrf.mxu1  ;;  %v4064_v59 = vsel %vm7622_vm3, %v4059_v13, %v8824_v18  ;;  %v4083_v44 = vrot.slane %v4082_v7, 4  ;;  %v4312_v18 = vrot.slane %v8627_v46, 5  ;;  %v6399_v13 = vcombine.low %v4040_v3, %v4050_v56  ;;  %v7448_v7 = vld [vmem:[%s7576_s6 + $0xb4] sm:$0xff]   ;;  %v6414_v3 = vld [vmem:[%s7576_s6 + $0x90] sm:$0xe] }
 0x109   : > { %7254 = vmatprep.mubr.msk.bf16.mxu0 %vm495_vm0, %v7446_v43  ;;  %v8872_v55 = vadd.f32 %v8761_v17, %v7041_v16  ;;  %v4074_v12 = vsel %vm7622_vm3, %v4069_v22, %v4073_v47  ;;  %v4093_v6 = vrot.slane %v4092_v5, 4  ;;  %v4326_v47 = vrot.slane %v8681_v24, 5  ;;  %v6415_v56 = vld [vmem:[%s7576_s6 + $0x9c] sm:$0xe] }
 0x10a   : > { %v589_v0 = vpop.f32.mrf.mxu0  ;;  %v8877_v43 = vpop.f32.mrf.mxu1  ;;  %v4340_v10 = vrot.slane %v8755_v25, 5  ;;  %v6400_v63 = vcombine.low %v4064_v59, %v4074_v12  ;;  %v4304_v22 = vrot.slane %v4302_v21, 4  ;;  %v4088_v46 = vsel %vm7622_vm3, %v4083_v44, %v8845_v31 }
 0x10b   : > { %v8882_v17 = vadd.f32 %v8781_v11, %v589_v0  ;;  %v6420_v38 = vrot.slane %v6412_v51, 9  ;;  %v4311_v24 = vrot.slane %v4309_v30, 4  ;;  %v4098_v5 = vsel %vm7622_vm3, %v4093_v6, %v4097_v34 }
 0x10c   : > { %v7044_v39 = vpop.f32.mrf.mxu0  ;;  %v8890_v16 = vpop.f32.mrf.mxu1  ;;  %v8906_v12 = vsel %vm7748_vm6, %v6419_v15, %v4302_v21  ;;  %v6421_v31 = vrot.slane %v6413_v1, 9  ;;  %v8917_v51 = vsel %vm7748_vm6, %v4304_v22, %v4305_v62  ;;  %v4319_v6 = vrot.slane %v8651_v54, 5  ;;  %v6416_v21 = vld [vmem:[%s7576_s6 + $0xa8] sm:$0xe] }
 0x10d   : > { %v8896_v11 = vadd.f32 %v8810_v49, %v7044_v39  ;;  %v4316_v49 = vrot.slane %v8637_v2, 5  ;;  %v4323_v34 = vrot.slane %v8659_v45, 5  ;;  %v6423_v1 = vrot.slane %v6415_v56, 9 }
 0x10e   : > { %v602_v59 = vpop.f32.mrf.mxu0  ;;  %v8908_v0 = vpop.f32.mrf.mxu1  ;;  %v4330_v39 = vrot.slane %v8701_v40, 5  ;;  %v8935_v45 = vsel %vm7748_vm6, %v6420_v38, %v4309_v30  ;;  %v8939_v62 = vsel %vm7748_vm6, %v4311_v24, %v4312_v18  ;;  %v4333_v22 = vrot.slane %v8720_v29, 5  ;;  %v7449_v24 = vld [vmem:[%s7576_s6 + $0xc0] sm:$0xff]  }
 0x10f   : > { %7273 = vmatmul.mubr.msk.bf16.gmra.mxu1 %vm495_vm0, %v6399_v13  ;;  %v8913_v44 = vadd.f32 %v8828_v61, %v602_v59  ;;  %v4318_v13 = vrot.slane %v4316_v49, 4  ;;  %v6422_v61 = vrot.slane %v6414_v3, 9  ;;  %v4337_v48 = vrot.slane %v8731_v57, 5  ;;  %v6417_v3 = vld [vmem:[%s7576_s6 + $0xb4] sm:$0xe]  ;;  %v7450_v59 = vld [vmem:[%s7576_s6 + $0x78] sm:$0xff]  }
 0x110   : > { %7255 = vmatmul.mubr.msk.bf16.gmra.mxu0 %vm495_vm0, %v7447_v36  ;;  %7276 = vmatprep.mubr.msk.bf16.mxu1 %vm495_vm0, %v6400_v63  ;;  %v7045_v15 = vpop.f32.mrf.mxu0  ;;  %v8924_v2 = vpop.f32.mrf.mxu1  ;;  %v4325_v36 = vrot.slane %v4323_v34, 4  ;;  %v6401_v56 = vcombine.low %v4088_v46, %v4098_v5  ;;  %v6429_v18 = vcombine.low %v8906_v12, %v8917_v51  ;;  %v8953_v38 = vsel %vm7748_vm6, %v6421_v31, %v4316_v49  ;;  %v6418_v12 = vld [vmem:[%s7576_s6 + $0xc0] sm:$0xe] }
 0x111   : > { %7258 = vmatprep.mubr.msk.bf16.mxu0 %vm495_vm0, %v7448_v7  ;;  %v8929_v54 = vadd.f32 %v8838_v32, %v7045_v15  ;;  %v4332_v7 = vrot.slane %v4330_v39, 4  ;;  %v6424_v32 = vrot.slane %v6416_v21, 9  ;;  %v8959_v29 = vsel %vm7748_vm6, %v4318_v13, %v4319_v6 }
 0x112   : > { %v605_v63 = vpop.f32.mrf.mxu0  ;;  %v8941_v40 = vpop.f32.mrf.mxu1  ;;  %v8969_v46 = vsel %vm7748_vm6, %v6423_v1, %v4330_v39  ;;  %v4339_v5 = vrot.slane %v4337_v48, 4  ;;  %v8977_v49 = vsel %vm7748_vm6, %v4325_v36, %v4326_v47  ;;  %v6425_v51 = vrot.slane %v6417_v3, 9  ;;  %v8993_v1 = vld [vmem:[%s7576_s6 + $0x78] sm:$0xe]  ;;  %v9033_v3 = vld [vmem:[%s7576_s6 + $0x84] sm:$0xe] }
 0x113   : > { %v8947_v30 = vadd.f32 %v8848_v52, %v605_v63  ;;  %v8965_v52 = vsel %vm7748_vm6, %v6422_v61, %v4323_v34  ;;  %v4344_v6 = vrot.slane %v8769_v4, 5  ;;  %v8984_v13 = vsel %vm7748_vm6, %v4332_v7, %v4333_v22  ;;  %v9018_v22 = vld [vmem:[%s7576_s6 + $0x80] sm:$0x1] }
 0x114   : > { %v7068_v15 = vpop.f32.mrf.mxu0  ;;  %v8961_v57 = vpop.f32.mrf.mxu1  ;;  %v8988_v61 = vsel %vm7748_vm6, %v6424_v32, %v4337_v48  ;;  %v4351_v47 = vrot.slane %v8821_v19, 5  ;;  %v9003_v39 = vsel %vm7748_vm6, %v4339_v5, %v4340_v10  ;;  %v6426_v63 = vrot.slane %v6418_v12, 9  ;;  %v9021_v32 = vld [vmem:[%s7576_s6 + $0x88] sm:$0xf]  ;;  %v7454_v48 = vld [vmem:[%s7576_s6 + $0x90] sm:$0xff]  }
 0x115   : > { %v8973_v31 = vadd.f32 %v7068_v15, %v8692_v20  ;;  %v4347_v20 = vrot.slane %v8795_v37, 5  ;;  %v4346_v36 = vrot.slane %v4344_v6, 4  ;;  %v9006_v37 = vld [vmem:[%s7576_s6 + $0x7c] sm:$0xf]  ;;  %v4354_v19 = vrot.slane %v8832_v8, 5 }
 0x116   : > { %v958_v21 = vpop.f32.mrf.mxu0  ;;  %v8980_v34 = vpop.f32.mrf.mxu1  ;;  %v6431_v10 = vcombine.low %v8953_v38, %v8959_v29  ;;  %v4353_v15 = vrot.slane %v4351_v47, 4  ;;  %v7451_v29 = vld [vmem:[%s7576_s6 + $0x84] sm:$0xff]   ;;  %v9054_v12 = vsel %vm7748_vm6, %v6426_v63, %v4351_v47  ;;  %v4761_v63 = vshll.u32 %v9006_v37, 16 }
 0x117   : > { %7277 = vmatmul.mubr.msk.bf16.gmra.mxu1 %vm495_vm0, %v6401_v56  ;;  %v8997_v4 = vadd.f32 %v958_v21, %v8709_v60  ;;  %v6430_v60 = vcombine.low %v8935_v45, %v8939_v62  ;;  %v6481_v56 = vld [vmem:[%s7576_s6 + $0x78] sm:$0xf]  ;;  %v10074_v47 = vrot.slane %v9006_v37, 5 }
 0x118   : > { %7259 = vmatmul.mubr.msk.bf16.gmra.mxu0 %vm495_vm0, %v7449_v24  ;;  %7300 = vmatprep.mubr.msk.bf16.mxu1 %vm495_vm0, %v7450_v59  ;;  %v7069_v25 = vpop.f32.mrf.mxu0  ;;  %v9015_v7 = vpop.f32.mrf.mxu1  ;;  %v9046_v59 = vsel %vm7748_vm6, %v4346_v36, %v4347_v20  ;;  %v4755_v45 = vshll.u32 %v6481_v56, 16  ;;  %v9075_v20 = vsel %vm7748_vm6, %v4353_v15, %v4354_v19 }
 0x119   : > { %10070 = vst [vmem:[#allocation5_spill] sm:$0xff] %v9015_v7  ;;  %7282 = vmatprep.mubr.msk.bf16.mxu0 %vm495_vm0, %v6429_v18  ;;  %v9025_v8 = vadd.f32 %v7069_v25, %v8724_v41  ;;  %v9042_v41 = vsel %vm7748_vm6, %v6425_v51, %v4344_v6  ;;  %v4752_v18 = vshrl.u32 %v6481_v56, 16  ;;  %v6484_v25 = vld [vmem:[%s7576_s6 + $0x84] sm:$0xf] }
 0x11a   : > { %v961_v38 = vpop.f32.mrf.mxu0  ;;  %v9036_v24 = vpop.f32.mrf.mxu1  ;;  %v4757_v36 = vrot.slane %v4755_v45, 5 }
 0x11b   : > { %10071 = vst [vmem:[#allocation6_spill] sm:$0xff] %v9036_v24  ;;  %v9050_v5 = vadd.f32 %v961_v38, %v8746_v26  ;;  %v4765_v38 = vshrl.u32 %v9006_v37, 16  ;;  %v4754_v56 = vrot.slane %v4752_v18, 4  ;;  %v9084_v24 = vrot.slane %v4761_v63, 5 }
 0x11c   : > { %v7072_v51 = vpop.f32.mrf.mxu0  ;;  %v9058_v6 = vpop.f32.mrf.mxu1  ;;  %v10076_v18 = vrot.slane %v9021_v32, 5  ;;  %v4779_v63 = vshll.u32 %v6484_v25, 16 }
 0x11d   : > { %10072 = vst [vmem:[#allocation7_spill] sm:$0xff] %v9058_v6  ;;  %v9064_v26 = vadd.f32 %v7072_v51, %v8759_v58  ;;  %v4771_v58 = vshll.u32 %v9018_v22, 16  ;;  %v5148_v6 = vrot.slane %v10074_v47, 4 }
 0x11e   : > { %v974_v62 = vpop.f32.mrf.mxu0  ;;  %v9071_v21 = vpop.f32.mrf.mxu1  ;;  %v5155_v15 = vrot.slane %v10076_v18, 4  ;;  %v4781_v18 = vrot.slane %v4779_v63, 5  ;;  %v6490_v63 = vld [vmem:[%s7576_s6 + $0x9c] sm:$0xf] }
 0x11f   : > { %10073 = vst [vmem:[#allocation8_spill] sm:$0xff] %v9071_v21  ;;  %7301 = vmatmul.mubr.msk.bf16.vlgmr.msra.gmra.mxu1 %vm495_vm0, %v7451_v29  ;;  %v9080_v51 = vadd.f32 %v974_v62, %v8778_v53  ;;  %v4767_v21 = vrot.slane %v4765_v38, 4  ;;  %v4758_v29 = vor.u32 %v4757_v36, %v4754_v56  ;;  %v9094_v53 = vadd.f32 %v8865_v14, %v8973_v31  ;;  %v7455_v56 = vld [vmem:[%s7576_s6 + $0x9c] sm:$0xff]  }
 0x120   : > { %7283 = vmatmul.mubr.msk.bf16.vlgmr.msra.gmra.mxu0 %vm495_vm0, %v6430_v60  ;;  %7335 = vmatpush3.bf16.msra.mxu1 %v8801_v50  ;;  %v7073_v19 = vpop.f32.mrf.mxu0  ;;  %v9088_v45 = vpop.f32.mrf.mxu1  ;;  %v4776_v62 = vshrl.u32 %v6484_v25, 16  ;;  %v6486_v50 = vld [vmem:[%s7576_s6 + $0x8c] sm:$0x1]  ;;  %v4785_v36 = vshll.u32 %v9021_v32, 16 }
 0x121   : > { %10075 = vst [vmem:[#allocation9_spill] sm:$0xff] %v9088_v45  ;;  %10077 = vst [vmem:[#allocation10_spill] sm:$0xff] %v9094_v53  ;;  %7317 = vmatpush3.bf16.msra.mxu0 %v8788_v23  ;;  %7304 = vmatprep.mubr.msk.bf16.mxu1 %vm495_vm0, %v7454_v48  ;;  %v9099_v60 = vadd.f32 %v7073_v19, %v8792_v42  ;;  %v4768_v47 = vor.u32 %v4767_v21, %v9084_v24  ;;  %v4759_v38 = vrot.slane %v4758_v29, 4  ;;  %v9115_v53 = vld [vmem:[%s7576_s6 + $0x94] sm:$0xf] }
 0x122   : > { %7286 = vmatprep.mubr.msk.bf16.mxu0 %vm495_vm0, %v6431_v10  ;;  %v977_v14 = vpop.f32.mrf.mxu0  ;;  %v9105_v31 = vpop.f32.mrf.mxu1  ;;  %v4773_v23 = vrot.slane %v4771_v58, 5  ;;  %v4778_v48 = vrot.slane %v4776_v62, 4  ;;  %v4789_v42 = vshrl.u32 %v9021_v32, 16  ;;  %v9112_v25 = vrot.slane %v4785_v36, 5  ;;  %v7456_v10 = vld [vmem:[%s7576_s6 + $0xa8] sm:$0xff]  }
 0x123   : > { %10078 = vst [vmem:[#allocation11_spill] sm:$0xff] %v9105_v31  ;;  %v9110_v19 = vadd.f32 %v977_v14, %v8818_v33  ;;  %v4769_v21 = vrot.slane %v4768_v47, 4  ;;  %v5156_v58 = vrot.slane %v6486_v50, 5  ;;  %v4795_v62 = vshll.u32 %v6486_v50, 16  ;;  %v6526_v33 = vld [vmem:[%s7576_s6 + $0x90] sm:$0xe] }
 0x124   : > { %v7076_v45 = vpop.f32.mrf.mxu0  ;;  %v9118_v7 = vpop.f32.mrf.mxu1  ;;  %v4791_v29 = vrot.slane %v4789_v42, 4  ;;  %v9122_v31 = vadd.f32 %v8877_v43, %v8997_v4  ;;  %v10079_v36 = vrot.slane %v9006_v37, 5  ;;  %v10080_v14 = vrot.slane %v8993_v1, 9 }
 0x125   : > { %v9126_v47 = vadd.f32 %v7076_v45, %v8842_v27  ;;  %v10081_v42 = vrot.slane %v9018_v22, 5  ;;  %v4764_v37 = vsel %vm7622_vm3, %v4759_v38, %v9084_v24  ;;  %v4774_v1 = vsel %vm7622_vm3, %v4769_v21, %v4773_v23  ;;  %v9168_v23 = vld [vmem:[%s7576_s6 + $0x9c] sm:$0xe] }
 0x126   : > { %v9136_v50 = vsel %vm7748_vm6, %v10080_v14, %v10079_v36  ;;  %v990_v27 = vpop.f32.mrf.mxu0  ;;  %v9144_v4 = vpop.f32.mrf.mxu1  ;;  %v4782_v45 = vor.u32 %v4781_v18, %v4778_v48  ;;  %v4792_v36 = vor.u32 %v4791_v29, %v9112_v25  ;;  %v9153_v14 = vld [vmem:[%s7576_s6 + $0xa0] sm:$0xf]  ;;  %v5160_v24 = vrot.slane %v9115_v53, 5 }
 0x127   : > { %v9142_v43 = vsel %vm7748_vm6, %v5148_v6, %v10081_v42  ;;  %7305 = vmatmul.mubr.msk.bf16.gmra.mxu1 %vm495_vm0, %v7455_v56  ;;  %v9157_v22 = vadd.f32 %v990_v27, %v8853_v35  ;;  %v9160_v6 = vld [vmem:[%s7576_s6 + $0x98] sm:$0x1]  ;;  %v6534_v42 = vrot.slane %v6526_v33, 9  ;;  %v9165_v38 = vadd.f32 %v8890_v16, %v9025_v8  ;;  %v9204_v33 = vld [vmem:[%s7576_s6 + $0xa4] sm:$0x1] }
 0x128   : > { %v10082_v48 = vcombine.low %v8965_v52, %v8977_v49  ;;  %7308 = vmatprep.mubr.msk.bf16.mxu1 %vm495_vm0, %v7456_v10  ;;  %v7077_v35 = vpop.f32.mrf.mxu0  ;;  %v9177_v21 = vpop.f32.mrf.mxu1  ;;  %v10084_v18 = vrot.slane %v9021_v32, 5  ;;  %v10085_v16 = vrot.slane %v9033_v3, 9  ;;  %v9189_v52 = vsel %vm7748_vm6, %v5155_v15, %v5156_v58  ;;  %v6487_v10 = vld [vmem:[%s7576_s6 + $0x90] sm:$0xf] }
 0x129   : > { %10083 = vst [vmem:[#allocation12_spill] sm:$0xff] %v9177_v21  ;;  %v9191_v49 = vrot.slane %v4795_v62, 5  ;;  %v10086_v29 = vcombine.low %v8969_v46, %v8984_v13  ;;  %v9199_v32 = vadd.f32 %v7077_v35, %v8872_v55  ;;  %v9201_v3 = vcombine.low %v4764_v37, %v4774_v1  ;;  %v7457_v37 = vld [vmem:[%s7576_s6 + $0xb4] sm:$0xff]   ;;  %v7458_v1 = vld [vmem:[%s7576_s6 + $0xc0] sm:$0xff]  }
 0x12a   : > { %7287 = vmatmul.mubr.msk.bf16.gmra.mxu0 %vm495_vm0, %v10082_v48  ;;  %v9185_v8 = vsel %vm7748_vm6, %v10085_v16, %v10084_v18  ;;  %v10065_v27 = vrot.slane %v9153_v14, 5  ;;  %v9209_v15 = vadd.f32 %v8908_v0, %v9050_v5  ;;  %v993_v58 = vpop.f32.mrf.mxu0  ;;  %v9211_v62 = vpop.f32.mrf.mxu1  ;;  %v9213_v48 = vrot.slane %v4782_v45, 4 }
 0x12b   : > { %7290 = vmatprep.mubr.msk.bf16.mxu0 %vm495_vm0, %v10086_v29  ;;  %10088 = vst [vmem:[#allocation14_spill] sm:$0xff] %v9211_v62  ;;  %v9215_v46 = vrot.slane %v4792_v36, 4  ;;  %v5163_v55 = vrot.slane %v9160_v6, 5  ;;  %v6535_v13 = vrot.slane %v9168_v23, 9  ;;  %v9222_v35 = vadd.f32 %v993_v58, %v8882_v17 }
 0x12c   : > { %10087 = vst [vmem:[#allocation13_spill] sm:$0xff] %v9209_v15  ;;  %v9226_v0 = vsel %vm7748_vm6, %v6534_v42, %v5160_v24  ;;  %v5162_v5 = vrot.slane %v5160_v24, 4  ;;  %v4800_v18 = vshrl.u32 %v6487_v10, 16  ;;  %v7080_v45 = vpop.f32.mrf.mxu0  ;;  %v9228_v16 = vpop.f32.mrf.mxu1  ;;  %v5170_v36 = vrot.slane %v9204_v33, 5 }
 0x12d   : > { %10089 = vst [vmem:[#allocation15_spill] sm:$0xff] %v9228_v16  ;;  %v4803_v29 = vshll.u32 %v6487_v10, 16  ;;  %v4809_v56 = vshll.u32 %v9115_v53, 16  ;;  %v4813_v23 = vshrl.u32 %v9115_v53, 16  ;;  %v9235_v17 = vadd.f32 %v7080_v45, %v8896_v11 }
 0x12e   : > { %v5169_v42 = vrot.slane %v10065_v27, 4  ;;  %v4802_v58 = vrot.slane %v4800_v18, 4  ;;  %v4819_v24 = vshll.u32 %v9160_v6, 16  ;;  %v1006_v62 = vpop.f32.mrf.mxu0  ;;  %v9240_v15 = vpop.f32.mrf.mxu1  ;;  %v9246_v53 = vadd.f32 %v8924_v2, %v9064_v26 }
 0x12f   : > { %v4805_v16 = vrot.slane %v4803_v29, 5  ;;  %v9242_v21 = vrot.slane %v4809_v56, 5  ;;  %v4815_v10 = vrot.slane %v4813_v23, 4  ;;  %7309 = vmatmul.mubr.msk.bf16.gmra.mxu1 %vm495_vm0, %v7457_v37  ;;  %v9250_v11 = vadd.f32 %v1006_v62, %v8913_v44 }
 0x130   : > { %v4821_v45 = vrot.slane %v4819_v24, 5  ;;  %v4824_v18 = vshrl.u32 %v6490_v63, 16  ;;  %v4827_v27 = vshll.u32 %v6490_v63, 16  ;;  %v10090_v6 = vcombine.low %v8988_v61, %v9003_v39  ;;  %7312 = vmatprep.mubr.msk.bf16.mxu1 %vm495_vm0, %v7458_v1  ;;  %v7081_v56 = vpop.f32.mrf.mxu0  ;;  %v9257_v29 = vpop.f32.mrf.mxu1 }
 0x131   : > { %v4806_v2 = vor.u32 %v4805_v16, %v4802_v58  ;;  %v4816_v26 = vor.u32 %v4815_v10, %v9242_v21  ;;  %v4833_v44 = vshll.u32 %v9153_v14, 16  ;;  %v4837_v62 = vshrl.u32 %v9153_v14, 16 }
 0x132   : > { %7291 = vmatmul.mubr.msk.bf16.gmra.mxu0 %vm495_vm0, %v10090_v6  ;;  %v10091_v63 = vcombine.low %v9042_v41, %v9046_v59  ;;  %v9267_v61 = vadd.f32 %v7081_v56, %v8929_v54  ;;  %v4826_v39 = vrot.slane %v4824_v18, 4  ;;  %v4829_v37 = vrot.slane %v4827_v27, 5  ;;  %v1009_v16 = vpop.f32.mrf.mxu0  ;;  %v9270_v23 = vpop.f32.mrf.mxu1  ;;  %v7459_v41 = vld [vmem:[%s7576_s6 + $0xcc] sm:$0xff]  }
 0x133   : > { %v4843_v1 = vshll.u32 %v9204_v33, 16  ;;  %v4807_v58 = vrot.slane %v4806_v2, 4  ;;  %v4817_v24 = vrot.slane %v4816_v26, 4  ;;  %v9272_v10 = vrot.slane %v4833_v44, 5  ;;  %v6494_v18 = vld [vmem:[%s7576_s6 + $0xac] sm:$0xf] }
 0x134   : > { %7294 = vmatprep.mubr.msk.bf16.mxu0 %vm495_vm0, %v10091_v63  ;;  %v4839_v6 = vrot.slane %v4837_v62, 4  ;;  %v9276_v59 = vadd.f32 %v1009_v16, %v8947_v30  ;;  %v4788_v54 = vsel %vm7622_vm3, %v9213_v48, %v9112_v25  ;;  %v4830_v33 = vor.u32 %v4829_v37, %v4826_v39  ;;  %v9287_v56 = vpop.f32.mrf.mxu0  ;;  %v6528_v26 = vld [vmem:[%s7576_s6 + $0xa8] sm:$0xe] }
 0x135   : > { %v9284_v27 = vadd.f32 %v8941_v40, %v9080_v51  ;;  %v4798_v30 = vsel %vm7622_vm3, %v9215_v46, %v9191_v49  ;;  %v9295_v2 = vsel %vm7748_vm6, %v5162_v5, %v5163_v55  ;;  %v10092_v25 = vrot.slane %v9153_v14, 5  ;;  %v9303_v40 = vpop.f32.mrf.mxu1  ;;  %v6495_v55 = vld [vmem:[%s7576_s6 + $0xb0] sm:$0x1] }
 0x136   : > { %v4840_v51 = vor.u32 %v4839_v6, %v9272_v10  ;;  %v9309_v44 = vsel %vm7748_vm6, %v5169_v42, %v5170_v36  ;;  %v4812_v49 = vsel %vm7622_vm3, %v4807_v58, %v9242_v21  ;;  %v4822_v14 = vsel %vm7622_vm3, %v4817_v24, %v4821_v45  ;;  %v9320_v5 = vpop.f32.mrf.mxu0  ;;  %v6493_v21 = vld [vmem:[%s7576_s6 + $0xa8] sm:$0xf] }
 0x137   : > { %v9301_v48 = vsel %vm7748_vm6, %v6535_v13, %v10092_v25  ;;  %v4845_v46 = vrot.slane %v4843_v1, 5  ;;  %v9318_v13 = vld [vmem:[%s7576_s6 + $0xb4] sm:$0xe]  ;;  %v4831_v62 = vrot.slane %v4830_v33, 4  ;;  %v9322_v39 = vpop.f32.mrf.mxu1  ;;  %v5174_v37 = vrot.slane %v6494_v18, 5  ;;  %7313 = vmatmul.mubr.msk.bf16.gmra.mxu1 %vm495_vm0, %v7459_v41 }
 0x138   : > { %v4841_v63 = vrot.slane %v4840_v51, 4  ;;  %v9326_v36 = vadd.f32 %v8961_v57, %v9099_v60  ;;  %v6543_v42 = vcombine.low %v9185_v8, %v9189_v52  ;;  %v6508_v45 = vcombine.low %v4788_v54, %v4798_v30  ;;  %v9342_v60 = vpop.f32.mrf.mxu0  ;;  %v9364_v54 = vld [vmem:[%s7576_s6 + $0xbc] sm:$0x1] }
 0x139   : > { %v6536_v1 = vrot.slane %v6528_v26, 9  ;;  %v10093_v16 = vcombine.low %v9054_v12, %v9075_v20  ;;  %v10094_v58 = vcombine.low %v9136_v50, %v9142_v43  ;;  %v6544_v57 = vcombine.low %v9226_v0, %v9295_v2  ;;  %v9346_v52 = vpop.f32.mrf.mxu1  ;;  %v6497_v43 = vld [vmem:[%s7576_s6 + $0xb8] sm:$0xf]  ;;  %v6496_v26 = vld [vmem:[%s7576_s6 + $0xb4] sm:$0xf] }
 0x13a   : > { %10095 = vst [vmem:[#allocation16_spill] sm:$0xff] %v9346_v52  ;;  %v9350_v12 = vadd.f32 %v8980_v34, %v9110_v19  ;;  %v6509_v20 = vcombine.low %v4812_v49, %v4822_v14  ;;  %v5177_v50 = vrot.slane %v6495_v55, 5  ;;  %v6537_v0 = vrot.slane %v9318_v13, 9  ;;  %v9356_v6 = vpop.f32.mrf.mxu0 }
 0x13b   : > { %7295 = vmatmul.mubr.msk.bf16.gmra.mxu0 %vm495_vm0, %v10093_v16  ;;  %7336 = vmatprep.mubr.msk.bf16.mxu1 %vm495_vm0, %v10094_v58  ;;  %v4848_v24 = vshrl.u32 %v6493_v21, 16  ;;  %v4836_v41 = vsel %vm7622_vm3, %v4831_v62, %v9272_v10  ;;  %v4846_v34 = vsel %vm7622_vm3, %v4841_v63, %v4845_v46  ;;  %v5176_v19 = vrot.slane %v5174_v37, 4  ;;  %v10097_v46 = vld [vmem:[#allocation5_spill] sm:$0xff] }
 0x13c   : > { %7318 = vmatprep.mubr.msk.bf16.mxu0 %vm495_vm0, %v9201_v3  ;;  %v9366_v3 = vpop.f32.mrf.mxu1  ;;  %v4851_v33 = vshll.u32 %v6493_v21, 16  ;;  %v9370_v30 = vsel %vm7748_vm6, %v6536_v1, %v5174_v37  ;;  %v4857_v25 = vshll.u32 %v6494_v18, 16  ;;  %v4861_v51 = vshrl.u32 %v6494_v18, 16  ;;  %v9373_v49 = vpop.f32.mrf.mxu0 }
 0x13d   : > { %10096 = vst [vmem:[#allocation17_spill] sm:$0xff] %v9366_v3  ;;  %v4850_v2 = vrot.slane %v4848_v24, 4  ;;  %v5181_v10 = vrot.slane %v6497_v43, 5  ;;  %v4867_v13 = vshll.u32 %v6495_v55, 16  ;;  %v9377_v62 = vadd.f32 %v10097_v46, %v9126_v47 }
 0x13e   : > { %v4853_v14 = vrot.slane %v4851_v33, 5  ;;  %v9379_v63 = vpop.f32.mrf.mxu1  ;;  %v9381_v21 = vcombine.low %v4836_v41, %v4846_v34  ;;  %v5184_v37 = vrot.slane %v9364_v54, 5  ;;  %v4859_v1 = vrot.slane %v4857_v25, 5  ;;  %v9384_v18 = vpop.f32.mrf.mxu0  ;;  %v9392_v25 = vld [vmem:[%s7576_s6 + $0xc4] sm:$0xf] }
 0x13f   : > { %10098 = vst [vmem:[#allocation5_spill] sm:$0xff] %v9379_v63  ;;  %v4863_v16 = vrot.slane %v4861_v51, 4  ;;  %v5178_v58 = vsel %vm7748_vm6, %v5176_v19, %v5177_v50  ;;  %v4872_v55 = vshrl.u32 %v6496_v26, 16  ;;  %v4875_v33 = vshll.u32 %v6496_v26, 16  ;;  %7337 = vmatmul.mubr.msk.bf16.vlgmr.msra.gmra.mxu1 %vm495_vm0, %v6543_v42  ;;  %v6531_v63 = vld [vmem:[%s7576_s6 + $0xcc] sm:$0xe] }
 0x140   : > { %v4854_v24 = vor.u32 %v4853_v14, %v4850_v2  ;;  %v9388_v47 = vpop.f32.mrf.mxu1  ;;  %v4869_v41 = vrot.slane %v4867_v13, 5  ;;  %v4881_v34 = vshll.u32 %v6497_v43, 16  ;;  %v4885_v8 = vshrl.u32 %v6497_v43, 16  ;;  %7340 = vmatprep.mubr.msk.bf16.mxu1 %vm495_vm0, %v6544_v57  ;;  %v9396_v50 = vpop.f32.mrf.mxu0  ;;  %v9400_v14 = vld [vmem:[%s7576_s6 + $0xc8] sm:$0x1] }
 0x141   : > { %10099 = vst [vmem:[#allocation18_spill] sm:$0xff] %v9388_v47  ;;  %v4864_v46 = vor.u32 %v4863_v16, %v4859_v1  ;;  %v4874_v2 = vrot.slane %v4872_v55, 4  ;;  %v4877_v51 = vrot.slane %v4875_v33, 5  ;;  %v4891_v26 = vshll.u32 %v9364_v54, 16  ;;  %v10100_v55 = vld [vmem:[#allocation6_spill] sm:$0xff] }
 0x142   : > { %v4855_v19 = vrot.slane %v4854_v24, 4  ;;  %v5183_v42 = vrot.slane %v5181_v10, 4  ;;  %v4883_v13 = vrot.slane %v4881_v34, 5  ;;  %v4887_v16 = vrot.slane %v4885_v8, 4  ;;  %v9405_v47 = vpop.f32.mrf.mxu0  ;;  %v9422_v34 = vld [vmem:[%s7576_s6 + $0xd0] sm:$0xf] }
 0x143   : > { %7319 = vmatmul.mubr.msk.bf16.vlgmr.msra.gmra.mxu0 %vm495_vm0, %v6508_v45  ;;  %v4865_v43 = vrot.slane %v4864_v46, 4  ;;  %v6530_v45 = vld [vmem:[%s7576_s6 + $0xc0] sm:$0xe]  ;;  %v6546_v57 = vcombine.low %v9370_v30, %v5178_v58  ;;  %v4878_v54 = vor.u32 %v4877_v51, %v4874_v2  ;;  %v9411_v33 = vadd.f32 %v10100_v55, %v9157_v22  ;;  %v9430_v55 = vld [vmem:[%s7576_s6 + $0xd4] sm:$0x1] }
 0x144   : > { %7322 = vmatprep.mubr.msk.bf16.mxu0 %vm495_vm0, %v6509_v20  ;;  %v4860_v24 = vsel %vm7622_vm3, %v4855_v19, %v4859_v1  ;;  %v9413_v20 = vpop.f32.mrf.mxu1  ;;  %v9417_v46 = vsel %vm7748_vm6, %v6537_v0, %v5181_v10  ;;  %v4888_v30 = vor.u32 %v4887_v16, %v4883_v13  ;;  %v4893_v58 = vrot.slane %v4891_v26, 5  ;;  %v9425_v1 = vpop.f32.mrf.mxu0  ;;  %v10103_v26 = vld [vmem:[#allocation7_spill] sm:$0xff] }
 0x145   : > { %10101 = vst [vmem:[#allocation6_spill] sm:$0xff] %v9411_v33  ;;  %10102 = vst [vmem:[#allocation19_spill] sm:$0xff] %v9413_v20  ;;  %v4870_v8 = vsel %vm7622_vm3, %v4865_v43, %v4869_v41  ;;  %v4879_v19 = vrot.slane %v4878_v54, 4  ;;  %v6538_v22 = vrot.slane %v6530_v45, 9  ;;  %v5188_v2 = vrot.slane %v9392_v25, 5 }
 0x146   : > { %v5191_v51 = vrot.slane %v9400_v14, 5  ;;  %v5185_v0 = vsel %vm7748_vm6, %v5183_v42, %v5184_v37  ;;  %v6511_v10 = vcombine.low %v4860_v24, %v4870_v8  ;;  %v4889_v41 = vrot.slane %v4888_v30, 4  ;;  %v9440_v54 = vpop.f32.mrf.mxu0  ;;  %v9443_v52 = vpop.f32.mrf.mxu1  ;;  %v6499_v33 = vld [vmem:[%s7576_s6 + $0xc0] sm:$0xf] }
 0x147   : > { %v9436_v43 = vadd.f32 %v10103_v26, %v9199_v32  ;;  %v4884_v16 = vsel %vm7622_vm3, %v4879_v19, %v4883_v13  ;;  %v5190_v45 = vrot.slane %v5188_v2, 4  ;;  %v6539_v20 = vrot.slane %v6531_v63, 9  ;;  %10104 = vst [vmem:[#allocation7_spill] sm:$0xff] %v9443_v52  ;;  %v10106_v13 = vld [vmem:[#allocation8_spill] sm:$0xff]  ;;  %v6502_v26 = vld [vmem:[%s7576_s6 + $0xcc] sm:$0xf] }
 0x148   : > { %v5195_v3 = vrot.slane %v9422_v34, 5  ;;  %v10105_v37 = vcombine.low %v9301_v48, %v9309_v44  ;;  %v4894_v32 = vsel %vm7622_vm3, %v4889_v41, %v4893_v58  ;;  %v5198_v42 = vrot.slane %v9430_v55, 5  ;;  %v9464_v63 = vpop.f32.mrf.mxu0  ;;  %v9475_v41 = vpop.f32.mrf.mxu1  ;;  %s6221_s6 = sshll.u32 %s7484_s15, 8 }
 0x149   : > { %v9455_v24 = vadd.f32 %v10106_v13, %v9222_v35  ;;  %v5189_v48 = vsel %vm7748_vm6, %v6538_v22, %v5188_v2  ;;  %v5192_v44 = vsel %vm7748_vm6, %v5190_v45, %v5191_v51  ;;  %v6547_v30 = vcombine.low %v9417_v46, %v5185_v0  ;;  %10108 = vst [vmem:[#allocation20_spill] sm:$0xff] %v9475_v41  ;;  %s9580_s9 = scalar_lea.vmem [#allocation2], %s6221_s6 }
 0x14a   : > { %7341 = vmatmul.mubr.msk.bf16.gmra.mxu1 %vm495_vm0, %v10105_v37  ;;  %v5197_v8 = vrot.slane %v5195_v3, 4  ;;  %v6512_v35 = vcombine.low %v4884_v16, %v4894_v32  ;;  %v4896_v58 = vshrl.u32 %v6499_v33, 16  ;;  %v4899_v19 = vshll.u32 %v6499_v33, 16 }
 0x14b   : > { %7323 = vmatmul.mubr.msk.bf16.gmra.mxu0 %vm495_vm0, %v9381_v21  ;;  %7344 = vmatprep.mubr.msk.bf16.mxu1 %vm495_vm0, %v6546_v57  ;;  %v5196_v21 = vsel %vm7748_vm6, %v6539_v20, %v5195_v3  ;;  %v9470_v57 = vpop.f32.mrf.mxu0  ;;  %v4905_v22 = vshll.u32 %v9392_v25, 16  ;;  %v4909_v2 = vshrl.u32 %v9392_v25, 16  ;;  %v4915_v51 = vshll.u32 %v9400_v14, 16  ;;  %v10109_v20 = vld [vmem:[#allocation9_spill] sm:$0xff] }
 0x14c   : > { %7326 = vmatprep.mubr.msk.bf16.mxu0 %vm495_vm0, %v6511_v10  ;;  %10107 = vst [vmem:[#allocation8_spill] sm:$0xff] %v9470_v57  ;;  %v6548_v46 = vcombine.low %v5189_v48, %v5192_v44  ;;  %v5199_v0 = vsel %vm7748_vm6, %v5197_v8, %v5198_v42  ;;  %v4898_v10 = vrot.slane %v4896_v58, 4  ;;  %v4901_v33 = vrot.slane %v4899_v19, 5  ;;  %v9487_v44 = vpop.f32.mrf.mxu1 }
 0x14d   : > { %v4907_v16 = vrot.slane %v4905_v22, 5  ;;  %v4911_v45 = vrot.slane %v4909_v2, 4  ;;  %v4917_v3 = vrot.slane %v4915_v51, 5  ;;  %v1238_v37 = vadd.f32 %v10109_v20, %v9235_v17  ;;  %v7116_v32 = vpop.f32.mrf.mxu0  ;;  %10110 = vst [vmem:[#allocation9_spill] sm:$0xff] %v9487_v44 }
 0x14e   : > { %v4902_v13 = vor.u32 %v4901_v33, %v4898_v10  ;;  %v4920_v25 = vshrl.u32 %v6502_v26, 16  ;;  %v4923_v52 = vshll.u32 %v6502_v26, 16  ;;  %v4929_v14 = vshll.u32 %v9422_v34, 16 }
 0x14f   : > { %v4912_v41 = vor.u32 %v4911_v45, %v4907_v16  ;;  %v9483_v57 = vadd.f32 %v7116_v32, %v1238_v37  ;;  %v4933_v9 = vshrl.u32 %v9422_v34, 16  ;;  %v4939_v42 = vshll.u32 %v9430_v55, 16  ;;  %v1595_v48 = vpop.f32.mrf.mxu0  ;;  %v10111_v34 = vld [vmem:[#allocation11_spill] sm:$0xff] }
 0x150   : > { %v4903_v8 = vrot.slane %v4902_v13, 4  ;;  %v4922_v17 = vrot.slane %v4920_v25, 4  ;;  %v4925_v58 = vrot.slane %v4923_v52, 5  ;;  %v4931_v19 = vrot.slane %v4929_v14, 5 }
 0x151   : > { %v6549_v22 = vcombine.low %v5196_v21, %v5199_v0  ;;  %v4913_v2 = vrot.slane %v4912_v41, 4  ;;  %v4935_v51 = vrot.slane %v4933_v9, 4  ;;  %v1236_v26 = vadd.f32 %v10111_v34, %v9250_v11  ;;  %v7117_v55 = vpop.f32.mrf.mxu0 }
 0x152   : > { %7345 = vmatmul.mubr.msk.bf16.gmra.mxu1 %vm495_vm0, %v6547_v30  ;;  %v4908_v10 = vsel %vm7622_vm3, %v4903_v8, %v4907_v16  ;;  %v4926_v33 = vor.u32 %v4925_v58, %v4922_v17  ;;  %v1239_v30 = vadd.f32 %v9118_v7, %v9267_v61  ;;  %v1237_v52 = vadd.f32 %v9144_v4, %v9276_v59  ;;  %v7158_v0 = vpop.f32.mrf.mxu1 }
 0x153   : > { %7327 = vmatmul.mubr.msk.bf16.gmra.mxu0 %vm495_vm0, %v6512_v35  ;;  %7348 = vmatprep.mubr.msk.bf16.mxu1 %vm495_vm0, %v6548_v46  ;;  %v4918_v35 = vsel %vm7622_vm3, %v4913_v2, %v4917_v3  ;;  %v4936_v21 = vor.u32 %v4935_v51, %v4931_v19  ;;  %v4941_v41 = vrot.slane %v4939_v42, 5  ;;  %v9502_v46 = vadd.f32 %v1595_v48, %v1236_v26  ;;  %v1598_v11 = vpop.f32.mrf.mxu0 }
 0x154   : > { %v6513_v45 = vcombine.low %v4908_v10, %v4918_v35  ;;  %v4927_v20 = vrot.slane %v4926_v33, 4  ;;  %v9504_v37 = vadd.f32 %v7117_v55, %v1239_v30  ;;  %v9506_v16 = vadd.f32 %v1598_v11, %v1237_v52  ;;  %v2394_v7 = vpop.f32.mrf.mxu1  ;;  %v10115_v52 = vld [vmem:[#allocation10_spill] sm:$0xff] }
 0x155   : > { %10112 = vst [vmem:[#allocation11_spill] sm:$0xff] %v9502_v46  ;;  %v4937_v32 = vrot.slane %v4936_v21, 4  ;;  %v7140_v61 = vpop.f32.mrf.mxu0  ;;  %v1612_v35 = vadd.f32 %v9287_v56, %v10115_v52  ;;  %v1610_v11 = vadd.f32 %v9320_v5, %v9122_v31  ;;  %v10121_v52 = vld [vmem:[#allocation13_spill] sm:$0xff]  ;;  %v10123_v46 = vld [vmem:[#allocation15_spill] sm:$0xff] }
 0x156   : > { %10113 = vst [vmem:[#allocation21_spill] sm:$0xff] %v9504_v37  ;;  %10114 = vst [vmem:[#allocation22_spill] sm:$0xff] %v9506_v16  ;;  %7330 = vmatprep.mubr.msk.bf16.mxu0 %vm495_vm0, %v6513_v45  ;;  %v4932_v4 = vsel %vm7622_vm3, %v4927_v20, %v4931_v19  ;;  %v7159_v3 = vpop.f32.mrf.mxu1  ;;  %v10122_v16 = vld [vmem:[#allocation14_spill] sm:$0xff] }
 0x157   : > { %v4942_v59 = vsel %vm7622_vm3, %v4937_v32, %v4941_v41  ;;  %v2008_v13 = vpop.f32.mrf.mxu0  ;;  %v1613_v32 = vadd.f32 %v9342_v60, %v9165_v38  ;;  %v1868_v37 = vadd.f32 %v10122_v16, %v1610_v11 }
 0x158   : > { %v6514_v25 = vcombine.low %v4932_v4, %v4942_v59  ;;  %v2397_v14 = vpop.f32.mrf.mxu1  ;;  %v10119_v4 = vld [vmem:[#allocation12_spill] sm:$0xff] }
 0x159   : > { %v7141_v9 = vpop.f32.mrf.mxu0  ;;  %v1870_v59 = vadd.f32 %v10119_v4, %v1612_v35 }
 0x15a   : > { %7349 = vmatmul.mubr.msk.bf16.gmra.mxu1 %vm495_vm0, %v6549_v22  ;;  %v9515_v42 = vpop.f32.mrf.mxu1 }
 0x15b   : > { %7331 = vmatmul.mubr.msk.bf16.gmra.mxu0 %vm495_vm0, %v6514_v25  ;;  %v2011_v48 = vpop.f32.mrf.mxu0  ;;  %v2073_v44 = vadd.f32 %v7140_v61, %v1870_v59 }
 0x15c   : > { %v9517_v8 = vpop.f32.mrf.mxu1 }
 0x15d   : > { %v7144_v17 = vpop.f32.mrf.mxu0 }
 0x15e   : > { %v9519_v58 = vpop.f32.mrf.mxu1 }
 0x15f   : > { %v2024_v19 = vpop.f32.mrf.mxu0 }
 0x160   : > { %v9521_v28 = vpop.f32.mrf.mxu1 }
 0x161   : > { %v9523_v2 = vpop.f32.mrf.mxu0 }
 0x162   : > { %v9525_v51 = vpop.f32.mrf.mxu1 }
 0x163   : > { %v9527_v22 = vpop.f32.mrf.mxu0 }
 0x164   : > { %v9529_v34 = vpop.f32.mrf.mxu1 }
 0x165   : > { %v9531_v26 = vpop.f32.mrf.mxu0 }
 0x166   : > { %v9533_v55 = vpop.f32.mrf.mxu1 }
 0x167   : > { %v9535_v10 = vpop.f32.mrf.mxu0 }
 0x168   : > { %v9537_v33 = vpop.f32.mrf.mxu1 }
 0x169   : > { %v9539_v30 = vpop.f32.mrf.mxu0 }
 0x16a   : > { %v9543_v21 = vpop.f32.mrf.mxu1 }
 0x16b   : > { %10116 = vst [vmem:[#allocation10_spill] sm:$0xff] %v9543_v21  ;;  %v9545_v41 = vpop.f32.mrf.mxu0  ;;  %v1611_v21 = vadd.f32 %v9356_v6, %v10121_v52  ;;  %v1616_v6 = vadd.f32 %v9373_v49, %v9246_v53  ;;  %v1617_v49 = vadd.f32 %v9396_v50, %v9326_v36 }
 0x16c   : > { %v9549_v45 = vpop.f32.mrf.mxu1 }
 0x16d   : > { %10117 = vst [vmem:[#allocation23_spill] sm:$0xff] %v9549_v45  ;;  %v9551_v20 = vpop.f32.mrf.mxu0  ;;  %v2071_v45 = vadd.f32 %v2008_v13, %v1868_v37  ;;  %v1869_v35 = vadd.f32 %v9240_v15, %v1611_v21 }
 0x16e   : > { %10118 = vst [vmem:[#allocation24_spill] sm:$0xff] %v9551_v20  ;;  %v9556_v25 = vpop.f32.mrf.mxu1  ;;  %v1871_v20 = vadd.f32 %v10123_v46, %v1613_v32  ;;  %v1614_v46 = vadd.f32 %v9384_v18, %v9284_v27 }
 0x16f   : > { %10120 = vst [vmem:[#allocation12_spill] sm:$0xff] %v9556_v25  ;;  %v9558_v56 = vpop.f32.mrf.mxu0  ;;  %v2459_v25 = vadd.f32 %v7158_v0, %v2073_v44  ;;  %v2072_v61 = vadd.f32 %v2011_v48, %v1869_v35  ;;  %v2457_v37 = vadd.f32 %v2394_v7, %v2071_v45  ;;  %v1874_v0 = vadd.f32 %v9257_v29, %v1616_v6 }
 0x170   : > { %v9563_v31 = vpop.f32.mrf.mxu1  ;;  %v2074_v60 = vadd.f32 %v7141_v9, %v1871_v20  ;;  %v1615_v9 = vadd.f32 %v9405_v47, %v9350_v12  ;;  %v1872_v21 = vadd.f32 %v9270_v23, %v1614_v46  ;;  %v1875_v29 = vadd.f32 %v9303_v40, %v1617_v49  ;;  %v10125_v49 = vld [vmem:[#allocation16_spill] sm:$0xff] }
 0x171   : > { %v9565_v5 = vpop.f32.mrf.mxu0  ;;  %v2458_v18 = vadd.f32 %v2397_v14, %v2072_v61  ;;  %v2077_v48 = vadd.f32 %v7144_v17, %v1874_v0 }
 0x172   : > { %v2460_v53 = vadd.f32 %v7159_v3, %v2074_v60  ;;  %v2075_v50 = vadd.f32 %v2024_v19, %v1872_v21  ;;  %v2078_v12 = vadd.f32 %v9523_v2, %v1875_v29  ;;  %v1873_v23 = vadd.f32 %v9322_v39, %v1615_v9 }
 0x173   : > { %v9568_v38 = vpop.f32.mrf.mxu0  ;;  %v2463_v17 = vadd.f32 %v9515_v42, %v2077_v48  ;;  %v1620_v19 = vadd.f32 %v9425_v1, %v9377_v62  ;;  %v10126_v48 = vld [vmem:[#allocation8_spill] sm:$0xff] }
 0x174   : > { %v9572_v4 = vpop.f32.mrf.mxu1  ;;  %v2461_v39 = vadd.f32 %v9517_v8, %v2075_v50  ;;  %v1619_v21 = vadd.f32 %v10126_v48, %v9455_v24 }
 0x175   : > { %v7176_v16 = vpop.f32.mrf.mxu0  ;;  %v1878_v0 = vadd.f32 %v10125_v49, %v1620_v19 }
 0x176   : > { %v9576_v11 = vpop.f32.mrf.mxu1  ;;  %v2717_v59 = vadd.f32 %v7176_v16, %v2459_v25  ;;  %v2076_v16 = vadd.f32 %v9527_v22, %v1873_v23  ;;  %v1621_v22 = vadd.f32 %v9464_v63, %v9436_v43 }
 0x177   : > { %v2652_v13 = vpop.f32.mrf.mxu0 }
 0x178   : > { %2735 = vst [vmem:[%s9580_s9 + $0x10] sm:$0xff] %v2717_v59  ;;  %v9583_v15 = vpop.f32.mrf.mxu1  ;;  %v2715_v44 = vadd.f32 %v2652_v13, %v2457_v37  ;;  %v2776_v60 = vmul.f32 %v2717_v59, %v2717_v59  ;;  %v10124_v37 = vld [vmem:[#allocation6_spill] sm:$0xff]  ;;  %v2462_v9 = vadd.f32 %v9521_v28, %v2076_v16 }
 0x179   : > { %v7177_v7 = vpop.f32.mrf.mxu0  ;;  %v1618_v42 = vadd.f32 %v9440_v54, %v10124_v37 }
 0x17a   : > { %2733 = vst [vmem:[%s9580_s9] sm:$0xff] %v2715_v44  ;;  %v2718_v27 = vadd.f32 %v7177_v7, %v2460_v53  ;;  %v9592_v45 = vpop.f32.mrf.mxu1  ;;  %v2774_v32 = vmul.f32 %v2715_v44, %v2715_v44  ;;  %v2464_v53 = vadd.f32 %v9519_v58, %v2078_v12  ;;  %v2081_v58 = vadd.f32 %v9531_v26, %v1878_v0  ;;  %v10129_v26 = vld [vmem:[#allocation18_spill] sm:$0xff] }
 0x17b   : > { %v2655_v3 = vpop.f32.mrf.mxu0  ;;  %v1877_v12 = vadd.f32 %v10129_v26, %v1619_v21 }
 0x17c   : > { %2736 = vst [vmem:[%s9580_s9 + $0x18] sm:$0xff] %v2718_v27  ;;  %v6684_v20 = vpack.c.bf16 %v2718_v27, %v2717_v59  ;;  %v2716_v36 = vadd.f32 %v2655_v3, %v2458_v18  ;;  %v2777_v46 = vmul.f32 %v2718_v27, %v2718_v27  ;;  %v10127_v3 = vld [vmem:[#allocation17_spill] sm:$0xff]  ;;  %v2467_v23 = vadd.f32 %v9525_v51, %v2081_v58 }
 0x17e   : > { %6836 = vst [vmem:[%s7571_s29 + $0x8] sm:$0xff] %v6684_v20   ;;  %2734 = vst [vmem:[%s9580_s9 + $0x8] sm:$0xff] %v2716_v36  ;;  %v2750_v14 = vadd.f32 %v2716_v36, %v2715_v44  ;;  %v2775_v25 = vmul.f32 %v2716_v36, %v2716_v36  ;;  %v6679_v52 = vpack.c.bf16 %v2716_v36, %v2715_v44 }
 0x17f   : > { %v9600_v47 = vpop.f32.mrf.mxu1  ;;  %v1876_v20 = vadd.f32 %v10127_v3, %v1618_v42  ;;  %v10134_v3 = vld [vmem:[#allocation21_spill] sm:$0xff] }
 0x180   : > { %v2751_v40 = vadd.f32 %v2750_v14, %v2717_v59  ;;  %v2790_v35 = vadd.f32 %v2775_v25, %v2774_v32  ;;  %6680 = vst [vmem:[%s7571_s29] sm:$0xff] %v6679_v52   ;;  %v7180_v6 = vpop.f32.mrf.mxu0  ;;  %v10128_v14 = vld [vmem:[#allocation5_spill] sm:$0xff] }
 0x181   : > { %v9607_v61 = vpop.f32.mrf.mxu1  ;;  %v2721_v2 = vadd.f32 %v7180_v6, %v2463_v17  ;;  %v2079_v32 = vadd.f32 %v9535_v10, %v1876_v20  ;;  %v1879_v25 = vadd.f32 %v10128_v14, %v1621_v22  ;;  %v2080_v10 = vadd.f32 %v9545_v41, %v1877_v12  ;;  %v10130_v41 = vld [vmem:[#allocation19_spill] sm:$0xff]  ;;  %v10135_v20 = vld [vmem:[#allocation20_spill] sm:$0xff] }
 0x182   : > { %v2791_v13 = vadd.f32 %v2790_v35, %v2776_v60  ;;  %v2668_v44 = vpop.f32.mrf.mxu0  ;;  %v2752_v62 = vadd.f32 %v2751_v40, %v2718_v27 }
 0x183   : > { %2739 = vst [vmem:[%s9580_s9 + $0x30] sm:$0xff] %v2721_v2  ;;  %v9613_v1 = vpop.f32.mrf.mxu1  ;;  %v2719_v59 = vadd.f32 %v2668_v44, %v2461_v39  ;;  %v2082_v17 = vadd.f32 %v9539_v30, %v1879_v25  ;;  %v2780_v19 = vmul.f32 %v2721_v2, %v2721_v2  ;;  %v2465_v16 = vadd.f32 %v9529_v34, %v2079_v32  ;;  %v10137_v32 = vld [vmem:[#allocation9_spill] sm:$0xff]  ;;  %v10138_v25 = vld [vmem:[#allocation10_spill] sm:$0xff] }
 0x184   : > { %v2792_v8 = vadd.f32 %v2791_v13, %v2777_v46  ;;  %v7181_v7 = vpop.f32.mrf.mxu0  ;;  %v2466_v0 = vadd.f32 %v9537_v33, %v2080_v10 }
 0x185   : > { %2737 = vst [vmem:[%s9580_s9 + $0x20] sm:$0xff] %v2719_v59  ;;  %v2753_v54 = vadd.f32 %v2752_v62, %v2719_v59  ;;  %v2778_v18 = vmul.f32 %v2719_v59, %v2719_v59  ;;  %v2722_v27 = vadd.f32 %v7181_v7, %v2464_v53  ;;  %v9625_v36 = vpop.f32.mrf.mxu1  ;;  %v2468_v62 = vadd.f32 %v9533_v55, %v2082_v17 }
 0x186   : > { %v2671_v43 = vpop.f32.mrf.mxu0 }
 0x187   : > { %v2793_v63 = vadd.f32 %v2792_v8, %v2778_v18  ;;  %2740 = vst [vmem:[%s9580_s9 + $0x38] sm:$0xff] %v2722_v27  ;;  %v6694_v50 = vpack.c.bf16 %v2722_v27, %v2721_v2  ;;  %v2720_v29 = vadd.f32 %v2671_v43, %v2462_v9  ;;  %v2781_v39 = vmul.f32 %v2722_v27, %v2722_v27  ;;  %v10131_v8 = vld [vmem:[#allocation24_spill] sm:$0xff]  ;;  %v10133_v18 = vld [vmem:[#allocation7_spill] sm:$0xff] }
 0x188   : > { %v1883_v43 = vadd.f32 %v10135_v20, %v10134_v3 }
 0x189   : > { %6838 = vst [vmem:[%s7571_s29 + $0x18] sm:$0xff] %v6694_v50   ;;  %2738 = vst [vmem:[%s9580_s9 + $0x28] sm:$0xff] %v2720_v29  ;;  %v2754_v28 = vadd.f32 %v2753_v54, %v2720_v29  ;;  %v2779_v24 = vmul.f32 %v2720_v29, %v2720_v29  ;;  %v6689_v52 = vpack.c.bf16 %v2720_v29, %v2719_v59  ;;  %v10132_v54 = vld [vmem:[#allocation11_spill] sm:$0xff]  ;;  %v10136_v29 = vld [vmem:[#allocation22_spill] sm:$0xff] }
 0x18a   : > { %v1882_v59 = vadd.f32 %v10130_v41, %v9483_v57  ;;  %v1881_v14 = vadd.f32 %v10137_v32, %v10136_v29 }
 0x18b   : > { %v9635_v60 = vpop.f32.mrf.mxu1  ;;  %v2755_v40 = vadd.f32 %v2754_v28, %v2721_v2  ;;  %v2794_v35 = vadd.f32 %v2793_v63, %v2779_v24  ;;  %6837 = vst [vmem:[%s7571_s29 + $0x10] sm:$0xff] %v6689_v52   ;;  %v2086_v24 = vadd.f32 %v9565_v5, %v1883_v43 }
 0x18c   : > { %v7184_v6 = vpop.f32.mrf.mxu0  ;;  %v2085_v7 = vadd.f32 %v10131_v8, %v1882_v59 }
 0x18d   : > { %v2795_v37 = vadd.f32 %v2794_v35, %v2780_v19  ;;  %v9640_v42 = vpop.f32.mrf.mxu1  ;;  %v2725_v51 = vadd.f32 %v7184_v6, %v2467_v23  ;;  %v2756_v46 = vadd.f32 %v2755_v40, %v2722_v27  ;;  %v1880_v27 = vadd.f32 %v10133_v18, %v10132_v54  ;;  %v10139_v19 = vld [vmem:[#allocation23_spill] sm:$0xff] }
 0x18e   : > { %v2684_v13 = vpop.f32.mrf.mxu0  ;;  %v2471_v28 = vadd.f32 %v10138_v25, %v2085_v7  ;;  %v2084_v23 = vadd.f32 %v9568_v38, %v1881_v14 }
 0x18f   : > { %2743 = vst [vmem:[%s9580_s9 + $0x50] sm:$0xff] %v2725_v51  ;;  %v9643_v30 = vpop.f32.mrf.mxu1  ;;  %v2723_v2 = vadd.f32 %v2684_v13, %v2465_v16  ;;  %v2796_v44 = vadd.f32 %v2795_v37, %v2781_v39  ;;  %v2083_v58 = vadd.f32 %v9558_v56, %v1880_v27  ;;  %v2784_v52 = vmul.f32 %v2725_v51, %v2725_v51  ;;  %v10140_v13 = vld [vmem:[#allocation12_spill] sm:$0xff] }
 0x190   : > { %v7185_v53 = vpop.f32.mrf.mxu0 }
 0x191   : > { %2741 = vst [vmem:[%s9580_s9 + $0x40] sm:$0xff] %v2723_v2  ;;  %v2757_v34 = vadd.f32 %v2756_v46, %v2723_v2  ;;  %v2782_v22 = vmul.f32 %v2723_v2, %v2723_v2  ;;  %v2726_v49 = vadd.f32 %v7185_v53, %v2468_v62  ;;  %v9653_v55 = vpop.f32.mrf.mxu1  ;;  %v2469_v40 = vadd.f32 %v10139_v19, %v2083_v58 }
 0x192   : > { %v2687_v9 = vpop.f32.mrf.mxu0  ;;  %v2470_v53 = vadd.f32 %v9563_v31, %v2084_v23 }
 0x193   : > { %v2797_v48 = vadd.f32 %v2796_v44, %v2782_v22  ;;  %2744 = vst [vmem:[%s9580_s9 + $0x58] sm:$0xff] %v2726_v49  ;;  %v6704_v57 = vpack.c.bf16 %v2726_v49, %v2725_v51  ;;  %v2724_v21 = vadd.f32 %v2687_v9, %v2466_v0  ;;  %v2785_v35 = vmul.f32 %v2726_v49, %v2726_v49 }
 0x195   : > { %6840 = vst [vmem:[%s7571_s29 + $0x28] sm:$0xff] %v6704_v57   ;;  %2742 = vst [vmem:[%s9580_s9 + $0x48] sm:$0xff] %v2724_v21  ;;  %v2758_v33 = vadd.f32 %v2757_v34, %v2724_v21  ;;  %v2783_v63 = vmul.f32 %v2724_v21, %v2724_v21  ;;  %v6699_v50 = vpack.c.bf16 %v2724_v21, %v2723_v2 }
 0x196   : > { %v2472_v2 = vadd.f32 %v10140_v13, %v2086_v24 }
 0x197   : > { %v9665_v26 = vpop.f32.mrf.mxu1  ;;  %v2759_v56 = vadd.f32 %v2758_v33, %v2725_v51  ;;  %v2798_v12 = vadd.f32 %v2797_v48, %v2783_v63  ;;  %6839 = vst [vmem:[%s7571_s29 + $0x20] sm:$0xff] %v6699_v50  }
 0x198   : > { %v7188_v17 = vpop.f32.mrf.mxu0 }
 0x199   : > { %v2799_v10 = vadd.f32 %v2798_v12, %v2784_v52  ;;  %v9670_v6 = vpop.f32.mrf.mxu1  ;;  %v2729_v16 = vadd.f32 %v7188_v17, %v2471_v28  ;;  %v2760_v39 = vadd.f32 %v2759_v56, %v2726_v49 }
 0x19a   : > { %v2700_v5 = vpop.f32.mrf.mxu0 }
 0x19b   : > { %2747 = vst [vmem:[%s9580_s9 + $0x70] sm:$0xff] %v2729_v16  ;;  %v9673_v37 = vpop.f32.mrf.mxu1  ;;  %v2727_v51 = vadd.f32 %v2700_v5, %v2469_v40  ;;  %v2800_v46 = vadd.f32 %v2799_v10, %v2785_v35  ;;  %v2788_v57 = vmul.f32 %v2729_v16, %v2729_v16 }
 0x19c   : > { %v7189_v38 = vpop.f32.mrf.mxu0 }
 0x19d   : > { %2745 = vst [vmem:[%s9580_s9 + $0x60] sm:$0xff] %v2727_v51  ;;  %v2761_v44 = vadd.f32 %v2760_v39, %v2727_v51  ;;  %v2786_v62 = vmul.f32 %v2727_v51, %v2727_v51  ;;  %v9677_v41 = vpop.f32.mrf.mxu1  ;;  %v2730_v59 = vadd.f32 %v7189_v38, %v2472_v2 }
 0x19e   : > { %v2703_v34 = vpop.f32.mrf.mxu0 }
 0x19f   : > { %v2801_v22 = vadd.f32 %v2800_v46, %v2786_v62  ;;  %2748 = vst [vmem:[%s9580_s9 + $0x78] sm:$0xff] %v2730_v59  ;;  %v6714_v49 = vpack.c.bf16 %v2730_v59, %v2729_v16  ;;  %v7230_v0 = vpop.f32.mrf.mxu1  ;;  %v2728_v8 = vadd.f32 %v2703_v34, %v2470_v53  ;;  %v2789_v33 = vmul.f32 %v2730_v59, %v2730_v59 }
 0x1a0   : > { %v7212_v7 = vpop.f32.mrf.mxu0 }
 0x1a1   : > { %6842 = vst [vmem:[%s7571_s29 + $0x38] sm:$0xff] %v6714_v49   ;;  %2746 = vst [vmem:[%s9580_s9 + $0x68] sm:$0xff] %v2728_v8  ;;  %v2762_v54 = vadd.f32 %v2761_v44, %v2728_v8  ;;  %v2787_v18 = vmul.f32 %v2728_v8, %v2728_v8  ;;  %v6709_v27 = vpack.c.bf16 %v2728_v8, %v2727_v51  ;;  %v3602_v9 = vpop.f32.mrf.mxu1  ;;  %v2749_v49 = vld [vmem:[#allocation3] sm:$0x1] }
 0x1a2   : > { %v3378_v48 = vadd.f32 %v7212_v7, %v9572_v4  ;;  %v3369_v21 = vpop.f32.mrf.mxu0 }
 0x1a3   : > { %v2763_v58 = vadd.f32 %v2762_v54, %v2729_v16  ;;  %v2802_v31 = vadd.f32 %v2801_v22, %v2787_v18  ;;  %6841 = vst [vmem:[%s7571_s29 + $0x30] sm:$0xff] %v6709_v27   ;;  %v7231_v3 = vpop.f32.mrf.mxu1  ;;  %v3370_v20 = vadd.f32 %v3369_v21, %v9576_v11 }
 0x1a4   : > { %v9686_v43 = vadd.f32 %v7230_v0, %v3378_v48  ;;  %v7213_v63 = vpop.f32.mrf.mxu0 }
 0x1a5   : > { %v2764_v50 = vadd.f32 %v2763_v58, %v2730_v59  ;;  %v2803_v29 = vadd.f32 %v2802_v31, %v2788_v57  ;;  %v3605_v32 = vpop.f32.mrf.mxu1  ;;  %v3381_v14 = vadd.f32 %v7213_v63, %v9583_v15  ;;  %v9689_v25 = vadd.f32 %v3602_v9, %v3370_v20 }
 0x1a6   : > { %v3372_v4 = vpop.f32.mrf.mxu0 }
 0x1a7   : > { %v2765_v28 = vrot.slane %v2764_v50, 4  ;;  %v2804_v24 = vadd.f32 %v2803_v29, %v2789_v33  ;;  %v7234_v52 = vpop.f32.mrf.mxu1  ;;  %v3373_v56 = vadd.f32 %v3372_v4, %v9592_v45  ;;  %v9692_v12 = vadd.f32 %v7231_v3, %v3381_v14 }
 0x1a8   : > { %v7216_v11 = vpop.f32.mrf.mxu0 }
 0x1a9   : > { %v2766_v23 = vadd.f32 %v2765_v28, %v2764_v50  ;;  %v2805_v17 = vrot.slane %v2804_v24, 4  ;;  %v3618_v19 = vpop.f32.mrf.mxu1  ;;  %v3394_v40 = vadd.f32 %v7216_v11, %v9600_v47  ;;  %v9695_v35 = vadd.f32 %v3605_v32, %v3373_v56 }
 0x1aa   : > { %v3385_v10 = vpop.f32.mrf.mxu0 }
 0x1ab   : > { %v2767_v15 = vrot.slane %v2766_v23, 2  ;;  %v2806_v16 = vadd.f32 %v2805_v17, %v2804_v24  ;;  %v7235_v39 = vpop.f32.mrf.mxu1  ;;  %v3386_v5 = vadd.f32 %v3385_v10, %v9607_v61  ;;  %v9698_v51 = vadd.f32 %v7234_v52, %v3394_v40 }
 0x1ac   : > { %v7217_v46 = vpop.f32.mrf.mxu0 }
 0x1ad   : > { %v2768_v45 = vadd.f32 %v2767_v15, %v2766_v23  ;;  %v2807_v13 = vrot.slane %v2806_v16, 2  ;;  %v3621_v2 = vpop.f32.mrf.mxu1  ;;  %v3397_v38 = vadd.f32 %v7217_v46, %v9613_v1  ;;  %v9701_v44 = vadd.f32 %v3618_v19, %v3386_v5  ;;  %v2773_v1 = vld [vmem:[#allocation4] sm:$0x1] }
 0x1ae   : > { %v3388_v62 = vpop.f32.mrf.mxu0 }
 0x1af   : > { %v2769_v47 = vrot.slane %v2768_v45, 1  ;;  %v2808_v59 = vadd.f32 %v2807_v13, %v2806_v16  ;;  %v7238_v53 = vpop.f32.mrf.mxu1  ;;  %v3389_v34 = vadd.f32 %v3388_v62, %v9625_v36  ;;  %v9704_v22 = vadd.f32 %v7235_v39, %v3397_v38 }
 0x1b0   : > { %v7220_v61 = vpop.f32.mrf.mxu0 }
 0x1b1   : > { %v2770_v0 = vadd.f32 %v2769_v47, %v2768_v45  ;;  %v2809_v8 = vrot.slane %v2808_v59, 1  ;;  %v3634_v7 = vpop.f32.mrf.mxu1  ;;  %v3410_v54 = vadd.f32 %v7220_v61, %v9635_v60  ;;  %v9707_v18 = vadd.f32 %v3621_v2, %v3389_v34 }
 0x1b2   : > { %v3401_v27 = vpop.f32.mrf.mxu0 }
 0x1b3   : > { %v2771_v9 = vadd.f32 %v2770_v0, %v2749_v49  ;;  %v2810_v48 = vadd.f32 %v2809_v8, %v2808_v59  ;;  %v7239_v57 = vpop.f32.mrf.mxu1  ;;  %v3402_v21 = vadd.f32 %v3401_v27, %v9640_v42  ;;  %v9710_v58 = vadd.f32 %v7238_v53, %v3410_v54 }
 0x1b4   : > { %v7221_v36 = vpop.f32.mrf.mxu0 }
 0x1b5   : > { %2772 = vst [vmem:[#allocation3] sm:$0x1] %v2771_v9  ;;  %v2811_v31 = vadd.f32 %v2810_v48, %v2773_v1  ;;  %v3637_v3 = vpop.f32.mrf.mxu1  ;;  %v3413_v20 = vadd.f32 %v7221_v36, %v9643_v30  ;;  %v9713_v33 = vadd.f32 %v3634_v7, %v3402_v21 }
 0x1b6   : > { %v3404_v60 = vpop.f32.mrf.mxu0 }
 0x1b7   : > { %2812 = vst [vmem:[#allocation4] sm:$0x1] %v2811_v31  ;;  %v7242_v63 = vpop.f32.mrf.mxu1  ;;  %v3405_v50 = vadd.f32 %v3404_v60, %v9653_v55  ;;  %v9716_v29 = vadd.f32 %v7239_v57, %v3413_v20 }
 0x1b8   : > { %v7224_v32 = vpop.f32.mrf.mxu0 }
 0x1b9   : > { %v3650_v14 = vpop.f32.mrf.mxu1  ;;  %v3426_v42 = vadd.f32 %v7224_v32, %v9665_v26  ;;  %v9719_v4 = vadd.f32 %v3637_v3, %v3405_v50 }
 0x1ba   : > { %v3417_v28 = vpop.f32.mrf.mxu0 }
 0x1bb   : > { %v7243_v24 = vpop.f32.mrf.mxu1  ;;  %v3418_v52 = vadd.f32 %v3417_v28, %v9670_v6  ;;  %v9722_v30 = vadd.f32 %v7242_v63, %v3426_v42 }
 0x1bc   : > { %v7225_v56 = vpop.f32.mrf.mxu0 }
 0x1bd   : > { %v3653_v11 = vpop.f32.mrf.mxu1  ;;  %v3429_v23 = vadd.f32 %v7225_v56, %v9673_v37  ;;  %v9725_v17 = vadd.f32 %v3650_v14, %v3418_v52 }
 0x1be   : > { %v3420_v55 = vpop.f32.mrf.mxu0 }
 0x1bf   : > { %v9727_v19 = vpop.f32.mrf.mxu1  ;;  %v3421_v40 = vadd.f32 %v3420_v55, %v9677_v41  ;;  %v9730_v26 = vadd.f32 %v7243_v24, %v3429_v23 }
 0x1c0   : > { %v7248_v10 = vpop.f32.mrf.mxu0 }
 0x1c1   : > { %10141 = vst [vmem:[#allocation13_spill] sm:$0xff] %v9730_v26  ;;  %v9732_v15 = vpop.f32.mrf.mxu1  ;;  %v9734_v16 = vadd.f32 %v3653_v11, %v3421_v40  ;;  %v3869_v26 = vadd.f32 %v7248_v10, %v9686_v43 }
 0x1c2   : > { %v3804_v6 = vpop.f32.mrf.mxu0 }
 0x1c3   : > { %10142 = vst [vmem:[#allocation14_spill] sm:$0xff] %v9734_v16  ;;  %v9736_v39 = vpop.f32.mrf.mxu1 }
 0x1c4   : > { %v7249_v5 = vpop.f32.mrf.mxu0 }
 0x1c5   : > { %v9738_v46 = vpop.f32.mrf.mxu1 }
 0x1c6   : > { %v3807_v37 = vpop.f32.mrf.mxu0 }
 0x1c7   : > { %v9740_v45 = vpop.f32.mrf.mxu1  ;;  %v3868_v43 = vadd.f32 %v3807_v37, %v9695_v35 }
 0x1c8   : > { %v7252_v13 = vpop.f32.mrf.mxu0 }
 0x1c9   : > { %v9742_v2 = vpop.f32.mrf.mxu1 }
 0x1ca   : > { %v9744_v41 = vpop.f32.mrf.mxu0 }
 0x1cb   : > { %v9746_v38 = vpop.f32.mrf.mxu1 }
 0x1cc   : > { %v9748_v62 = vpop.f32.mrf.mxu0 }
 0x1cd   : > { %v9750_v47 = vpop.f32.mrf.mxu1 }
 0x1ce   : > { %v9752_v59 = vpop.f32.mrf.mxu0 }
 0x1cf   : > { %v9754_v53 = vpop.f32.mrf.mxu1 }
 0x1d0   : > { %v9756_v34 = vpop.f32.mrf.mxu0 }
 0x1d1   : > { %v9758_v49 = vpop.f32.mrf.mxu1 }
 0x1d2   : > { %v9760_v61 = vpop.f32.mrf.mxu0 }
 0x1d3   : > { %v9762_v0 = vpop.f32.mrf.mxu1 }
 0x1d4   : > { %v9764_v8 = vpop.f32.mrf.mxu0 }
 0x1d5   : > { %v9766_v7 = vpop.f32.mrf.mxu1 }
 0x1d6   : > { %v9768_v54 = vpop.f32.mrf.mxu0 }
 0x1d7   : > { %v9770_v1 = vpop.f32.mrf.mxu1 }
 0x1d8   : > { %10143 = vst [vmem:[#allocation15_spill] sm:$0xff] %v9770_v1  ;;  %v9772_v27 = vpop.f32.mrf.mxu0 }
 0x1d9   : > { %v9774_v9 = vpop.f32.mrf.mxu1 }
 0x1da   : > { %10144 = vst [vmem:[#allocation6_spill] sm:$0xff] %v9774_v9  ;;  %v9776_v48 = vpop.f32.mrf.mxu0 }
 0x1db   : > { %v9778_v57 = vpop.f32.mrf.mxu1 }
 0x1dc   : > { %10145 = vst [vmem:[#allocation16_spill] sm:$0xff] %v9778_v57  ;;  %v9780_v21 = vpop.f32.mrf.mxu0 }
 0x1dd   : > { %10146 = vst [vmem:[#allocation8_spill] sm:$0xff] %v9780_v21  ;;  %v9782_v36 = vpop.f32.mrf.mxu1 }
 0x1de   : > { %10147 = vst [vmem:[#allocation17_spill] sm:$0xff] %v9782_v36  ;;  %v9784_v31 = vpop.f32.mrf.mxu0 }
 0x1df   : > { %10148 = vst [vmem:[#allocation5_spill] sm:$0xff] %v9784_v31  ;;  %v7302_v3 = vpop.f32.mrf.mxu1 }
 0x1e0   : > { %v7284_v20 = vpop.f32.mrf.mxu0 }
 0x1e1   : > { %v4648_v60 = vpop.f32.mrf.mxu1 }
 0x1e2   : > { %v4446_v63 = vpop.f32.mrf.mxu0 }
 0x1e3   : > { %v7303_v50 = vpop.f32.mrf.mxu1 }
 0x1e4   : > { %v7285_v32 = vpop.f32.mrf.mxu0 }
 0x1e5   : > { %v9786_v14 = vpop.f32.mrf.mxu1 }
 0x1e6   : > { %v4449_v42 = vpop.f32.mrf.mxu0 }
 0x1e7   : > { %v9788_v28 = vpop.f32.mrf.mxu1 }
 0x1e9   : > { %v9790_v52 = vpop.f32.mrf.mxu1 }
 0x1ea   : > { %v7288_v24 = vpop.f32.mrf.mxu0  ;;  %10149 = vst [vmem:[#allocation18_spill] sm:$0xff] %v9790_v52 }
 0x1eb   : > { %v9792_v11 = vpop.f32.mrf.mxu1 }
 0x1ec   : > { %v4462_v56 = vpop.f32.mrf.mxu0  ;;  %10150 = vst [vmem:[#allocation19_spill] sm:$0xff] %v9792_v11 }
 0x1ed   : > { %v9794_v55 = vpop.f32.mrf.mxu1 }
 0x1ee   : > { %v7289_v23 = vpop.f32.mrf.mxu0  ;;  %10151 = vst [vmem:[#allocation24_spill] sm:$0xff] %v9794_v55  ;;  %v3867_v55 = vadd.f32 %v3804_v6, %v9689_v25  ;;  %v3873_v6 = vadd.f32 %v7252_v13, %v9698_v51 }
 0x1ef   : > { %v9798_v36 = vpop.f32.mrf.mxu1 }
 0x1f0   : > { %v9796_v40 = vpop.f32.mrf.mxu0  ;;  %10152 = vst [vmem:[#allocation11_spill] sm:$0xff] %v9798_v36  ;;  %v4258_v13 = vadd.f32 %v9740_v45, %v3873_v6  ;;  %v3878_v45 = vadd.f32 %v9764_v8, %v9716_v29 }
 0x1f1   : > { %v9802_v9 = vpop.f32.mrf.mxu1 }
 0x1f2   : > { %v9800_v57 = vpop.f32.mrf.mxu0  ;;  %10154 = vst [vmem:[#allocation21_spill] sm:$0xff] %v9802_v9  ;;  %v3870_v9 = vadd.f32 %v7249_v5, %v9692_v12 }
 0x1f3   : > { %10153 = vst [vmem:[#allocation7_spill] sm:$0xff] %v9800_v57  ;;  %v9806_v16 = vpop.f32.mrf.mxu1 }
 0x1f4   : > { %v9804_v31 = vpop.f32.mrf.mxu0  ;;  %10156 = vst [vmem:[#allocation22_spill] sm:$0xff] %v9806_v16  ;;  %v4255_v12 = vadd.f32 %v9736_v39, %v3870_v9 }
 0x1f5   : > { %10155 = vst [vmem:[#allocation20_spill] sm:$0xff] %v9804_v31  ;;  %v9811_v1 = vpop.f32.mrf.mxu1  ;;  %v4254_v31 = vadd.f32 %v9727_v19, %v3869_v26 }
 0x1f6   : > { %v9808_v21 = vpop.f32.mrf.mxu0  ;;  %10157 = vst [vmem:[#allocation9_spill] sm:$0xff] %v9811_v1  ;;  %v4252_v1 = vadd.f32 %v9732_v15, %v3867_v55  ;;  %v4512_v26 = vadd.f32 %v7285_v32, %v4255_v12  ;;  %v3871_v15 = vadd.f32 %v9744_v41, %v9701_v44  ;;  %v4515_v32 = vadd.f32 %v7288_v24, %v4258_v13 }
 0x1f7   : > { %v9816_v52 = vpop.f32.mrf.mxu1  ;;  %v4511_v10 = vadd.f32 %v7284_v20, %v4254_v31  ;;  %v3874_v31 = vadd.f32 %v9748_v62, %v9704_v22  ;;  %v3875_v62 = vadd.f32 %v9760_v61, %v9713_v33 }
 0x1f8   : > { %v9813_v11 = vpop.f32.mrf.mxu0  ;;  %10159 = vst [vmem:[#allocation23_spill] sm:$0xff] %v9816_v52  ;;  %v4509_v52 = vadd.f32 %v4446_v63, %v4252_v1  ;;  %v3872_v63 = vadd.f32 %v9752_v59, %v9707_v18  ;;  %v4714_v22 = vadd.f32 %v7303_v50, %v4512_v26 }
 0x1f9   : > { %10158 = vst [vmem:[#allocation10_spill] sm:$0xff] %v9813_v11  ;;  %v9822_v57 = vpop.f32.mrf.mxu1  ;;  %v4713_v37 = vadd.f32 %v7302_v3, %v4511_v10  ;;  %v4259_v18 = vadd.f32 %v9746_v38, %v3874_v31 }
 0x1fa   : > { %10160 = vst [vmem:[#allocation12_spill] sm:$0xff] %v9822_v57  ;;  %v4253_v57 = vadd.f32 %v9738_v46, %v3868_v43  ;;  %v4711_v9 = vadd.f32 %v4648_v60, %v4509_v52  ;;  %v3877_v46 = vadd.f32 %v9756_v34, %v9710_v58  ;;  %v3876_v58 = vadd.f32 %v9768_v54, %v9719_v4 }
 0x1fb   : > { %v9818_v36 = vpop.f32.mrf.mxu0  ;;  %v9828_v11 = vpop.f32.mrf.mxu1  ;;  %v4516_v33 = vadd.f32 %v7289_v23, %v4259_v18  ;;  %v4257_v61 = vadd.f32 %v9750_v47, %v3872_v63  ;;  %v4717_v4 = vadd.f32 %v9788_v28, %v4515_v32  ;;  %v3881_v54 = vadd.f32 %v9772_v27, %v9722_v30  ;;  %v10161_v27 = vld [vmem:[#allocation18_spill] sm:$0xff] }
 0x1fc   : > { %v4510_v51 = vadd.f32 %v4449_v42, %v4253_v57  ;;  %v4256_v57 = vadd.f32 %v9742_v2, %v3871_v15  ;;  %v4262_v2 = vadd.f32 %v9754_v53, %v3877_v46  ;;  %v4263_v47 = vadd.f32 %v9762_v0, %v3878_v45  ;;  %v10164_v13 = vld [vmem:[#allocation20_spill] sm:$0xff] }
 0x1fd   : > { %v9824_v16 = vpop.f32.mrf.mxu0  ;;  %v9834_v5 = vpop.f32.mrf.mxu1  ;;  %v4261_v53 = vadd.f32 %v9766_v7, %v3876_v58  ;;  %v3879_v28 = vadd.f32 %v9776_v48, %v9725_v17 }
 0x1fe   : > { %v4712_v50 = vadd.f32 %v9786_v14, %v4510_v51  ;;  %v4513_v24 = vadd.f32 %v4462_v56, %v4256_v57  ;;  %v4514_v14 = vadd.f32 %v9796_v40, %v4257_v61  ;;  %v4260_v56 = vadd.f32 %v9758_v49, %v3875_v62 }
 0x1ff   : > { %v9830_v25 = vpop.f32.mrf.mxu0  ;;  %v7338_v35 = vpop.f32.mrf.mxu1 }
 0x200   : > { %v4715_v26 = vadd.f32 %v10161_v27, %v4513_v24 }
 0x201   : > { %v9836_v19 = vpop.f32.mrf.mxu0  ;;  %v5290_v39 = vpop.f32.mrf.mxu1 }
 0x203   : > { %v7320_v20 = vpop.f32.mrf.mxu0  ;;  %v7339_v41 = vpop.f32.mrf.mxu1 }
 0x204   : > { %v5098_v1 = vadd.f32 %v7320_v20, %v4713_v37  ;;  %v10163_v20 = vld [vmem:[#allocation7_spill] sm:$0xff] }
 0x205   : > { %v5033_v3 = vpop.f32.mrf.mxu0  ;;  %v5293_v60 = vpop.f32.mrf.mxu1  ;;  %v4519_v51 = vadd.f32 %v10163_v20, %v4262_v2 }
 0x206   : > { %v5355_v44 = vadd.f32 %v7338_v35, %v5098_v1  ;;  %v5096_v55 = vadd.f32 %v5033_v3, %v4711_v9  ;;  %v10162_v35 = vld [vmem:[#allocation19_spill] sm:$0xff]  ;;  %v10165_v1 = vld [vmem:[#allocation24_spill] sm:$0xff] }
 0x207   : > { %v7321_v59 = vpop.f32.mrf.mxu0  ;;  %v4718_v37 = vadd.f32 %v10162_v35, %v4516_v33  ;;  %v4716_v9 = vadd.f32 %v10165_v1, %v4514_v14  ;;  %v10169_v33 = vld [vmem:[#allocation10_spill] sm:$0xff]  ;;  %v10177_v1 = vld [vmem:[#allocation16_spill] sm:$0xff] }
 0x208   : > { %5371 = vst [vmem:[%s9580_s9 + $0x90] sm:$0xff] %v5355_v44  ;;  %v5353_v34 = vadd.f32 %v5290_v39, %v5096_v55  ;;  %v5099_v42 = vadd.f32 %v7321_v59, %v4714_v22  ;;  %v4517_v39 = vadd.f32 %v10164_v13, %v4260_v56  ;;  %v5412_v63 = vmul.f32 %v5355_v44, %v5355_v44  ;;  %v10166_v22 = vld [vmem:[#allocation15_spill] sm:$0xff] }
 0x209   : > { %v5036_v29 = vpop.f32.mrf.mxu0  ;;  %v4520_v55 = vadd.f32 %v9808_v21, %v4263_v47  ;;  %v4266_v62 = vadd.f32 %v10166_v22, %v3881_v54  ;;  %v4518_v61 = vadd.f32 %v10169_v33, %v4261_v53  ;;  %v10172_v47 = vld [vmem:[#allocation14_spill] sm:$0xff]  ;;  %v10180_v33 = vld [vmem:[#allocation12_spill] sm:$0xff] }
 0x20a   : > { %5369 = vst [vmem:[%s9580_s9 + $0x80] sm:$0xff] %v5353_v34  ;;  %v5356_v38 = vadd.f32 %v7339_v41, %v5099_v42  ;;  %v7342_v8 = vpop.f32.mrf.mxu1  ;;  %v5097_v52 = vadd.f32 %v5036_v29, %v4712_v50  ;;  %v5410_v30 = vmul.f32 %v5353_v34, %v5353_v34  ;;  %v10168_v50 = vld [vmem:[#allocation8_spill] sm:$0xff]  ;;  %v10170_v29 = vld [vmem:[#allocation11_spill] sm:$0xff] }
 0x20b   : > { %v7324_v23 = vpop.f32.mrf.mxu0  ;;  %v4721_v2 = vadd.f32 %v10170_v29, %v4519_v51  ;;  %v4523_v27 = vadd.f32 %v9818_v36, %v4266_v62 }
 0x20c   : > { %5372 = vst [vmem:[%s9580_s9 + $0x98] sm:$0xff] %v5356_v38  ;;  %v6724_v43 = vpack.c.bf16 %v5356_v38, %v5355_v44  ;;  %v5354_v10 = vadd.f32 %v5293_v60, %v5097_v52  ;;  %v5306_v6 = vpop.f32.mrf.mxu1  ;;  %v5102_v12 = vadd.f32 %v7324_v23, %v4717_v4  ;;  %v5413_v45 = vmul.f32 %v5356_v38, %v5356_v38  ;;  %v10173_v23 = vld [vmem:[#allocation5_spill] sm:$0xff] }
 0x20d   : > { %v5049_v40 = vpop.f32.mrf.mxu0 }
 0x20e   : > { %6844 = vst [vmem:[%s7571_s29 + $0x48] sm:$0xff] %v6724_v43   ;;  %5370 = vst [vmem:[%s9580_s9 + $0x88] sm:$0xff] %v5354_v10  ;;  %v5386_v49 = vadd.f32 %v5354_v10, %v5353_v34  ;;  %v5411_v0 = vmul.f32 %v5354_v10, %v5354_v10  ;;  %v6719_v7 = vpack.c.bf16 %v5354_v10, %v5353_v34  ;;  %v7343_v31 = vpop.f32.mrf.mxu1  ;;  %v10174_v10 = vld [vmem:[#allocation6_spill] sm:$0xff] }
 0x20f   : > { %v5359_v15 = vadd.f32 %v7342_v8, %v5102_v12  ;;  %v5100_v17 = vadd.f32 %v5049_v40, %v4715_v26  ;;  %v7325_v48 = vpop.f32.mrf.mxu0  ;;  %v10171_v8 = vld [vmem:[#allocation21_spill] sm:$0xff]  ;;  %v3880_v43 = vadd.f32 %v10173_v23, %v10172_v47 }
 0x210   : > { %v5387_v46 = vadd.f32 %v5386_v49, %v5355_v44  ;;  %v5426_v3 = vadd.f32 %v5411_v0, %v5410_v30  ;;  %6843 = vst [vmem:[%s7571_s29 + $0x40] sm:$0xff] %v6719_v7   ;;  %v5309_v32 = vpop.f32.mrf.mxu1  ;;  %v5103_v41 = vadd.f32 %v7325_v48, %v4718_v37  ;;  %v10167_v44 = vld [vmem:[#allocation13_spill] sm:$0xff]  ;;  %v4719_v52 = vadd.f32 %v10171_v8, %v4517_v39  ;;  %v10175_v37 = vld [vmem:[#allocation22_spill] sm:$0xff] }
 0x211   : > { %5375 = vst [vmem:[%s9580_s9 + $0xb0] sm:$0xff] %v5359_v15  ;;  %v5357_v57 = vadd.f32 %v5306_v6, %v5100_v17  ;;  %v5052_v18 = vpop.f32.mrf.mxu0  ;;  %v3882_v24 = vadd.f32 %v10168_v50, %v10167_v44  ;;  %v4264_v6 = vadd.f32 %v10174_v10, %v3879_v28  ;;  %v4722_v49 = vadd.f32 %v10175_v37, %v4520_v55  ;;  %v10176_v17 = vld [vmem:[#allocation9_spill] sm:$0xff] }
 0x212   : > { %v5427_v59 = vadd.f32 %v5426_v3, %v5412_v63  ;;  %v5388_v58 = vadd.f32 %v5387_v46, %v5356_v38  ;;  %v5360_v34 = vadd.f32 %v7343_v31, %v5103_v41  ;;  %v7346_v60 = vpop.f32.mrf.mxu1  ;;  %v5101_v42 = vadd.f32 %v5052_v18, %v4716_v9  ;;  %v10178_v41 = vld [vmem:[#allocation17_spill] sm:$0xff] }
 0x213   : > { %5373 = vst [vmem:[%s9580_s9 + $0xa0] sm:$0xff] %v5357_v57  ;;  %v7328_v21 = vpop.f32.mrf.mxu0  ;;  %v5414_v54 = vmul.f32 %v5357_v57, %v5357_v57  ;;  %v4521_v51 = vadd.f32 %v9824_v16, %v4264_v6  ;;  %v4720_v48 = vadd.f32 %v10176_v17, %v4518_v61  ;;  %v4267_v9 = vadd.f32 %v10177_v1, %v3882_v24 }
 0x214   : > { %v5389_v4 = vadd.f32 %v5388_v58, %v5357_v57  ;;  %v5428_v14 = vadd.f32 %v5427_v59, %v5413_v45  ;;  %5376 = vst [vmem:[%s9580_s9 + $0xb8] sm:$0xff] %v5360_v34  ;;  %v6734_v38 = vpack.c.bf16 %v5360_v34, %v5359_v15  ;;  %v5322_v56 = vpop.f32.mrf.mxu1  ;;  %v5358_v53 = vadd.f32 %v5309_v32, %v5101_v42  ;;  %v10179_v45 = vld [vmem:[#allocation23_spill] sm:$0xff] }
 0x215   : > { %v5106_v12 = vadd.f32 %v7328_v21, %v4721_v2  ;;  %v5065_v30 = vpop.f32.mrf.mxu0  ;;  %v5416_v63 = vmul.f32 %v5359_v15, %v5359_v15  ;;  %v4265_v55 = vadd.f32 %v10178_v41, %v3880_v43  ;;  %v4524_v18 = vadd.f32 %v9830_v25, %v4267_v9 }
 0x216   : > { %v5429_v26 = vadd.f32 %v5428_v14, %v5414_v54  ;;  %6846 = vst [vmem:[%s7571_s29 + $0x58] sm:$0xff] %v6734_v38   ;;  %v7347_v40 = vpop.f32.mrf.mxu1  ;;  %v5104_v35 = vadd.f32 %v5065_v30, %v4719_v52  ;;  %5374 = vst [vmem:[%s9580_s9 + $0xa8] sm:$0xff] %v5358_v53  ;;  %v5390_v0 = vadd.f32 %v5389_v4, %v5358_v53 }
 0x217   : > { %v5415_v7 = vmul.f32 %v5358_v53, %v5358_v53  ;;  %v6729_v31 = vpack.c.bf16 %v5358_v53, %v5357_v57  ;;  %v5363_v20 = vadd.f32 %v7346_v60, %v5106_v12  ;;  %v7329_v28 = vpop.f32.mrf.mxu0  ;;  %v4725_v57 = vadd.f32 %v10179_v45, %v4523_v27 }
 0x218   : > { %v5361_v13 = vadd.f32 %v5322_v56, %v5104_v35  ;;  %v5325_v39 = vpop.f32.mrf.mxu1  ;;  %v5107_v36 = vadd.f32 %v7329_v28, %v4722_v49  ;;  %v5391_v46 = vadd.f32 %v5390_v0, %v5359_v15  ;;  %v5417_v59 = vmul.f32 %v5360_v34, %v5360_v34 }
 0x219   : > { %v5430_v3 = vadd.f32 %v5429_v26, %v5415_v7  ;;  %6845 = vst [vmem:[%s7571_s29 + $0x50] sm:$0xff] %v6729_v31   ;;  %5379 = vst [vmem:[%s9580_s9 + $0xd0] sm:$0xff] %v5363_v20  ;;  %v5068_v32 = vpop.f32.mrf.mxu0  ;;  %v4522_v60 = vadd.f32 %v9836_v19, %v4265_v55  ;;  %v4723_v61 = vadd.f32 %v10180_v33, %v4521_v51 }
 0x21a   : > { %5377 = vst [vmem:[%s9580_s9 + $0xc0] sm:$0xff] %v5361_v13  ;;  %v5364_v22 = vadd.f32 %v7347_v40, %v5107_v36  ;;  %v7350_v62 = vpop.f32.mrf.mxu1  ;;  %v5105_v16 = vadd.f32 %v5068_v32, %v4720_v48  ;;  %v5392_v15 = vadd.f32 %v5391_v46, %v5360_v34  ;;  %v5418_v2 = vmul.f32 %v5361_v13, %v5361_v13 }
 0x21b   : > { %v5431_v58 = vadd.f32 %v5430_v3, %v5416_v63  ;;  %v7332_v24 = vpop.f32.mrf.mxu0  ;;  %v4726_v56 = vadd.f32 %v9828_v11, %v4524_v18  ;;  %v4724_v23 = vadd.f32 %v9834_v5, %v4522_v60  ;;  %v5420_v43 = vmul.f32 %v5363_v20, %v5363_v20  ;;  %v5409_v60 = vld [vmem:[#allocation4] sm:$0x1] }
 0x21c   : > { %5380 = vst [vmem:[%s9580_s9 + $0xd8] sm:$0xff] %v5364_v22  ;;  %v6744_v42 = vpack.c.bf16 %v5364_v22, %v5363_v20  ;;  %v5362_v44 = vadd.f32 %v5325_v39, %v5105_v16  ;;  %v5338_v50 = vpop.f32.mrf.mxu1  ;;  %v5393_v29 = vadd.f32 %v5392_v15, %v5361_v13  ;;  %v5110_v8 = vadd.f32 %v7332_v24, %v4725_v57 }
 0x21d   : > { %v5432_v21 = vadd.f32 %v5431_v58, %v5417_v59  ;;  %v5081_v34 = vpop.f32.mrf.mxu0  ;;  %v5421_v27 = vmul.f32 %v5364_v22, %v5364_v22  ;;  %v5385_v59 = vld [vmem:[#allocation3] sm:$0x1] }
 0x21e   : > { %6848 = vst [vmem:[%s7571_s29 + $0x68] sm:$0xff] %v6744_v42   ;;  %5378 = vst [vmem:[%s9580_s9 + $0xc8] sm:$0xff] %v5362_v44  ;;  %v5419_v25 = vmul.f32 %v5362_v44, %v5362_v44  ;;  %v6739_v52 = vpack.c.bf16 %v5362_v44, %v5361_v13  ;;  %v5394_v19 = vadd.f32 %v5393_v29, %v5362_v44  ;;  %v7351_v38 = vpop.f32.mrf.mxu1 }
 0x21f   : > { %v5433_v4 = vadd.f32 %v5432_v21, %v5418_v2  ;;  %v5367_v54 = vadd.f32 %v7350_v62, %v5110_v8  ;;  %v5108_v14 = vadd.f32 %v5081_v34, %v4723_v61  ;;  %v7333_v47 = vpop.f32.mrf.mxu0 }
 0x220   : > { %6847 = vst [vmem:[%s7571_s29 + $0x60] sm:$0xff] %v6739_v52   ;;  %v5395_v10 = vadd.f32 %v5394_v19, %v5363_v20  ;;  %v5111_v12 = vadd.f32 %v7333_v47, %v4726_v56  ;;  %v5341_v37 = vpop.f32.mrf.mxu1 }
 0x221   : > { %v5434_v6 = vadd.f32 %v5433_v4, %v5419_v25  ;;  %5383 = vst [vmem:[%s9580_s9 + $0xf0] sm:$0xff] %v5367_v54  ;;  %v5365_v53 = vadd.f32 %v5338_v50, %v5108_v14  ;;  %v5084_v30 = vpop.f32.mrf.mxu0  ;;  %v5424_v39 = vmul.f32 %v5367_v54, %v5367_v54 }
 0x222   : > { %v5396_v40 = vadd.f32 %v5395_v10, %v5364_v22  ;;  %v5109_v35 = vadd.f32 %v5084_v30, %v4724_v23  ;;  %v5368_v11 = vadd.f32 %v7351_v38, %v5111_v12 }
 0x223   : > { %v5435_v26 = vadd.f32 %v5434_v6, %v5420_v43  ;;  %5381 = vst [vmem:[%s9580_s9 + $0xe0] sm:$0xff] %v5365_v53  ;;  %v5422_v5 = vmul.f32 %v5365_v53, %v5365_v53 }
 0x224   : > { %v5397_v49 = vadd.f32 %v5396_v40, %v5365_v53  ;;  %v5366_v7 = vadd.f32 %v5341_v37, %v5109_v35  ;;  %5384 = vst [vmem:[%s9580_s9 + $0xf8] sm:$0xff] %v5368_v11  ;;  %v6754_v31 = vpack.c.bf16 %v5368_v11, %v5367_v54  ;;  %v5425_v48 = vmul.f32 %v5368_v11, %v5368_v11 }
 0x225   : > { %v5436_v0 = vadd.f32 %v5435_v26, %v5421_v27 }
 0x226   : > { %5382 = vst [vmem:[%s9580_s9 + $0xe8] sm:$0xff] %v5366_v7  ;;  %v5398_v28 = vadd.f32 %v5397_v49, %v5366_v7  ;;  %v5423_v51 = vmul.f32 %v5366_v7, %v5366_v7  ;;  %v6749_v13 = vpack.c.bf16 %v5366_v7, %v5365_v53  ;;  %6850 = vst [vmem:[%s7571_s29 + $0x78] sm:$0xff] %v6754_v31  }
 0x227   : > { %v5437_v20 = vadd.f32 %v5436_v0, %v5422_v5 }
 0x228   : > { %v5399_v36 = vadd.f32 %v5398_v28, %v5367_v54  ;;  %6849 = vst [vmem:[%s7571_s29 + $0x70] sm:$0xff] %v6749_v13  }
 0x229   : > { %v5438_v17 = vadd.f32 %v5437_v20, %v5423_v51 }
 0x22a   : > { %v5400_v1 = vadd.f32 %v5399_v36, %v5368_v11 }
 0x22b   : > { %v5439_v9 = vadd.f32 %v5438_v17, %v5424_v39 }
 0x22c   : > { %v5401_v63 = vrot.slane %v5400_v1, 4 }
 0x22d   : > { %v5440_v46 = vadd.f32 %v5439_v9, %v5425_v48 }
 0x22e   : > { %v5402_v3 = vadd.f32 %v5401_v63, %v5400_v1 }
 0x22f   : > { %v5441_v32 = vrot.slane %v5440_v46, 4 }
 0x230   : > { %v5403_v41 = vrot.slane %v5402_v3, 2 }
 0x231   : > { %v5442_v55 = vadd.f32 %v5441_v32, %v5440_v46 }
 0x232   : > { %v5404_v22 = vadd.f32 %v5403_v41, %v5402_v3 }
 0x233   : > { %v5443_v62 = vrot.slane %v5442_v55, 2 }
 0x234   : > { %v5405_v16 = vrot.slane %v5404_v22, 1 }
 0x235   : > { %v5444_v45 = vadd.f32 %v5443_v62, %v5442_v55 }
 0x236   : > { %v5406_v57 = vadd.f32 %v5405_v16, %v5404_v22 }
 0x237   : > { %v5445_v18 = vrot.slane %v5444_v45, 1 }
 0x238   : > { %v5407_v58 = vadd.f32 %v5406_v57, %v5385_v59 }
 0x239   : > { %v5446_v15 = vadd.f32 %v5445_v18, %v5444_v45 }
 0x23a   : > { %5408 = vst [vmem:[#allocation3] sm:$0x1] %v5407_v58 }
 0x23b   : > { %v5447_v42 = vadd.f32 %v5446_v15, %v5409_v60 }
 0x23d   : > { %5448 = vst [vmem:[#allocation4] sm:$0x1] %v5447_v42 }
 0x23e PF: > { %p6575_p11 = scmp.ne.s32.totalorder %s7488_s16, 1 }
 0x23f   : > { %s6576_s10 = sshll.u32 (!%p6575_p11), %s7484_s15, 8 }
 0x240   : > { %5532 = sbr.rel (%p6575_p11) target bundleno = 644 (0x284), region = 48  ;;  %s9927_s14 = scalar_lea.vmem (!%p6575_p11), [#allocation2], %s6576_s10 }
 0x245   : > { %v5533_v44 = vld [vmem:[#allocation3] sm:$0x1]  ;;  %v5535_v50 = vld [vmem:[#allocation4] sm:$0x1]  ;;  %v5566_v8 = vlaneseq  ;;  %v5550_v38 = vld [vmem:[%s9927_s14 + $0x8] sm:$0xff] }
 0x246   : > { %v5534_v24 = vmul.f32 0.001953125, %v5533_v44  ;;  %v5536_v33 = vmul.f32 0.001953125, %v5535_v50  ;;  %v5540_v52 = vld [vmem:[%s10062_s2] sm:$0x1]  ;;  %v5551_v56 = vld [vmem:[%s9927_s14 + $0x10] sm:$0xff]  ;;  %v5552_v47 = vld [vmem:[%s9927_s14 + $0x18] sm:$0xff] }
 0x247   : > { %v5567_v25 = vshrl.u32 %v5566_v8, 7  ;;  %v5544_v54 = vld [vmem:[%s10063_s3] sm:$0x1]  ;;  %v5554_v6 = vld [vmem:[%s9927_s14 + $0x28] sm:$0xff]  ;;  %v5555_v53 = vld [vmem:[%s9927_s14 + $0x30] sm:$0xff] }
 0x248   : > { %v5537_v61 = vmul.f32 %v5534_v24, %v5534_v24  ;;  %v5549_v14 = vld [vmem:[%s9927_s14] sm:$0xff]  ;;  %v5556_v12 = vld [vmem:[%s9927_s14 + $0x38] sm:$0xff]  ;;  %v5558_v27 = vld [vmem:[%s9927_s14 + $0x48] sm:$0xff] }
 0x249   : > { %v5568_v34 = vsub.s32 0, %v5567_v25  ;;  %v5553_v23 = vld [vmem:[%s9927_s14 + $0x20] sm:$0xff]  ;;  %v5559_v26 = vld [vmem:[%s9927_s14 + $0x50] sm:$0xff]  ;;  %v5560_v49 = vld [vmem:[%s9927_s14 + $0x58] sm:$0xff] }
 0x24a   : > { %v5538_v29 = vsub.f32 %v5536_v33, %v5537_v61  ;;  %v5557_v30 = vld [vmem:[%s9927_s14 + $0x40] sm:$0xff]  ;;  %v5562_v0 = vld [vmem:[%s9927_s14 + $0x68] sm:$0xff]  ;;  %v5563_v33 = vld [vmem:[%s9927_s14 + $0x70] sm:$0xff] }
 0x24b   : > { %v5561_v5 = vld [vmem:[%s9927_s14 + $0x60] sm:$0xff]  ;;  %v5564_v61 = vld [vmem:[%s9927_s14 + $0x78] sm:$0xff] }
 0x24c   : > { %v5539_v2 = vmax.f32 %v5538_v29, 0.0  ;;  %v5705_v25 = vld [vmem:[%s9927_s14 + $0x80] sm:$0xff] }
 0x24e   : > { %v5541_v21 = vadd.f32 1e-05, %v5539_v2 }
 0x250   : > { %7460 = vrsqrt.f32 %v5541_v21 }
 0x25d   : > { %v7461_v4 = vpop.eup %7460 }
 0x25e   : > { %v5543_v19 = vmul.f32 %v7461_v4, %v5540_v52 }
 0x260   : > { %v5545_v43 = vmul.f32 %v5543_v19, %v5534_v24  ;;  %v9934_v10 = vrot.slane %v5543_v19, %v5568_v34 }
 0x262   : > { %v5546_v40 = vsub.f32 %v5544_v54, %v5545_v43  ;;  %v5571_v35 = vmul.f32 %v9934_v10, %v5549_v14  ;;  %v5572_v37 = vmul.f32 %v9934_v10, %v5550_v38  ;;  %v5573_v11 = vmul.f32 %v9934_v10, %v5551_v56  ;;  %v5706_v54 = vld [vmem:[%s9927_s14 + $0x88] sm:$0xff]  ;;  %v5708_v43 = vld [vmem:[%s9927_s14 + $0x98] sm:$0xff] }
 0x263   : > { %v5574_v7 = vmul.f32 %v9934_v10, %v5552_v47  ;;  %v5575_v31 = vmul.f32 %v9934_v10, %v5553_v23  ;;  %v5576_v20 = vmul.f32 %v9934_v10, %v5554_v6  ;;  %v5577_v28 = vmul.f32 %v9934_v10, %v5555_v53  ;;  %v5707_v23 = vld [vmem:[%s9927_s14 + $0x90] sm:$0xff] }
 0x264   : > { %v9952_v51 = vrot.slane %v5546_v40, %v5568_v34  ;;  %v5578_v13 = vmul.f32 %v9934_v10, %v5556_v12  ;;  %v5579_v39 = vmul.f32 %v9934_v10, %v5557_v30  ;;  %v5580_v36 = vmul.f32 %v9934_v10, %v5558_v27  ;;  %v5709_v27 = vld [vmem:[%s9927_s14 + $0xa0] sm:$0xff] }
 0x265   : > { %v5581_v17 = vmul.f32 %v9934_v10, %v5559_v26  ;;  %v5582_v48 = vmul.f32 %v9934_v10, %v5560_v49  ;;  %v5583_v1 = vmul.f32 %v9934_v10, %v5561_v5  ;;  %v5584_v9 = vmul.f32 %v9934_v10, %v5562_v0 }
 0x266   : > { %v5593_v63 = vadd.f32 %v9952_v51, %v5571_v35  ;;  %v5594_v46 = vadd.f32 %v9952_v51, %v5572_v37  ;;  %v5595_v3 = vadd.f32 %v9952_v51, %v5573_v11  ;;  %v5596_v32 = vadd.f32 %v9952_v51, %v5574_v7  ;;  %v5710_v11 = vld [vmem:[%s9927_s14 + $0xa8] sm:$0xff] }
 0x267   : > { %v5597_v41 = vadd.f32 %v9952_v51, %v5575_v31  ;;  %v5598_v55 = vadd.f32 %v9952_v51, %v5576_v20  ;;  %v5599_v22 = vadd.f32 %v9952_v51, %v5577_v28  ;;  %v5600_v62 = vadd.f32 %v9952_v51, %v5578_v13  ;;  %v5711_v31 = vld [vmem:[%s9927_s14 + $0xb0] sm:$0xff] }
 0x268   : > { %v5609_v16 = vmax.f32 %v5593_v63, 0.0  ;;  %v5610_v45 = vmax.f32 %v5594_v46, 0.0  ;;  %v5611_v57 = vmax.f32 %v5595_v3, 0.0  ;;  %v5612_v18 = vmax.f32 %v5596_v32, 0.0  ;;  %v5713_v63 = vld [vmem:[%s9927_s14 + $0xc0] sm:$0xff] }
 0x269   : > { %v5613_v59 = vmax.f32 %v5597_v41, 0.0  ;;  %v5614_v58 = vmax.f32 %v5598_v55, 0.0  ;;  %v5615_v15 = vmax.f32 %v5599_v22, 0.0  ;;  %v5616_v60 = vmax.f32 %v5600_v62, 0.0  ;;  %v5714_v55 = vld [vmem:[%s9927_s14 + $0xc8] sm:$0xff] }
 0x26a   : > { %v6759_v42 = vpack.c.bf16 %v5610_v45, %v5609_v16  ;;  %v6764_v44 = vpack.c.bf16 %v5612_v18, %v5611_v57  ;;  %v5601_v50 = vadd.f32 %v9952_v51, %v5579_v39  ;;  %v5602_v24 = vadd.f32 %v9952_v51, %v5580_v36  ;;  %v5712_v36 = vld [vmem:[%s9927_s14 + $0xb8] sm:$0xff]  ;;  %v5715_v57 = vld [vmem:[%s9927_s14 + $0xd0] sm:$0xff] }
 0x26b   : > { %v6769_v29 = vpack.c.bf16 %v5614_v58, %v5613_v59  ;;  %v6774_v2 = vpack.c.bf16 %v5616_v60, %v5615_v15  ;;  %v5603_v21 = vadd.f32 %v9952_v51, %v5581_v17  ;;  %v5604_v8 = vadd.f32 %v9952_v51, %v5582_v48  ;;  %v5716_v18 = vld [vmem:[%s9927_s14 + $0xd8] sm:$0xff] }
 0x26c   : > { %6760 = vst [vmem:[%s7571_s29] sm:$0xff] %v6759_v42   ;;  %6851 = vst [vmem:[%s7571_s29 + $0x8] sm:$0xff] %v6764_v44   ;;  %v5617_v52 = vmax.f32 %v5601_v50, 0.0  ;;  %v5618_v34 = vmax.f32 %v5602_v24, 0.0  ;;  %v5605_v4 = vadd.f32 %v9952_v51, %v5583_v1  ;;  %v5606_v19 = vadd.f32 %v9952_v51, %v5584_v9  ;;  %v5717_v42 = vld [vmem:[%s9927_s14 + $0xe0] sm:$0xff] }
 0x26d   : > { %6852 = vst [vmem:[%s7571_s29 + $0x10] sm:$0xff] %v6769_v29   ;;  %6853 = vst [vmem:[%s7571_s29 + $0x18] sm:$0xff] %v6774_v2   ;;  %v5619_v14 = vmax.f32 %v5603_v21, 0.0  ;;  %v5620_v38 = vmax.f32 %v5604_v8, 0.0  ;;  %v5585_v56 = vmul.f32 %v9934_v10, %v5563_v33  ;;  %v5586_v47 = vmul.f32 %v9934_v10, %v5564_v61  ;;  %v5718_v61 = vld [vmem:[%s9927_s14 + $0xe8] sm:$0xff] }
 0x26e   : > { %v6779_v6 = vpack.c.bf16 %v5618_v34, %v5617_v52  ;;  %v5621_v53 = vmax.f32 %v5605_v4, 0.0  ;;  %v5622_v12 = vmax.f32 %v5606_v19, 0.0  ;;  %v5721_v30 = vmul.f32 %v5705_v25, %v9934_v10  ;;  %v5719_v25 = vld [vmem:[%s9927_s14 + $0xf0] sm:$0xff] }
 0x26f   : > { %v6784_v26 = vpack.c.bf16 %v5620_v38, %v5619_v14  ;;  %v5607_v40 = vadd.f32 %v9952_v51, %v5585_v56  ;;  %v5608_v35 = vadd.f32 %v9952_v51, %v5586_v47  ;;  %v5722_v37 = vmul.f32 %v5706_v54, %v9934_v10  ;;  %v5720_v54 = vld [vmem:[%s9927_s14 + $0xf8] sm:$0xff] }
 0x270   : > { %6854 = vst [vmem:[%s7571_s29 + $0x20] sm:$0xff] %v6779_v6   ;;  %v6789_v49 = vpack.c.bf16 %v5622_v12, %v5621_v53  ;;  %v5737_v5 = vadd.f32 %v5721_v30, %v9952_v51  ;;  %v5723_v0 = vmul.f32 %v5707_v23, %v9934_v10  ;;  %v5724_v7 = vmul.f32 %v5708_v43, %v9934_v10 }
 0x271   : > { %6855 = vst [vmem:[%s7571_s29 + $0x28] sm:$0xff] %v6784_v26   ;;  %v5623_v20 = vmax.f32 %v5607_v40, 0.0  ;;  %v5624_v28 = vmax.f32 %v5608_v35, 0.0  ;;  %v5738_v13 = vadd.f32 %v5722_v37, %v9952_v51  ;;  %v5725_v39 = vmul.f32 %v5709_v27, %v9934_v10 }
 0x272   : > { %6856 = vst [vmem:[%s7571_s29 + $0x30] sm:$0xff] %v6789_v49   ;;  %v5753_v17 = vmax.f32 %v5737_v5, 0.0  ;;  %v5739_v48 = vadd.f32 %v5723_v0, %v9952_v51  ;;  %v5740_v1 = vadd.f32 %v5724_v7, %v9952_v51  ;;  %v5726_v9 = vmul.f32 %v5710_v11, %v9934_v10 }
 0x273   : > { %v6794_v46 = vpack.c.bf16 %v5624_v28, %v5623_v20  ;;  %v5754_v3 = vmax.f32 %v5738_v13, 0.0  ;;  %v5741_v32 = vadd.f32 %v5725_v39, %v9952_v51  ;;  %v5727_v41 = vmul.f32 %v5711_v31, %v9934_v10 }
 0x274   : > { %v5755_v22 = vmax.f32 %v5739_v48, 0.0  ;;  %v5756_v62 = vmax.f32 %v5740_v1, 0.0  ;;  %v5742_v16 = vadd.f32 %v5726_v9, %v9952_v51  ;;  %v5728_v45 = vmul.f32 %v5712_v36, %v9934_v10 }
 0x275   : > { %6857 = vst [vmem:[%s7571_s29 + $0x38] sm:$0xff] %v6794_v46   ;;  %v6799_v59 = vpack.c.bf16 %v5754_v3, %v5753_v17  ;;  %v5757_v58 = vmax.f32 %v5741_v32, 0.0  ;;  %v5743_v15 = vadd.f32 %v5727_v41, %v9952_v51  ;;  %v5729_v60 = vmul.f32 %v5713_v63, %v9934_v10 }
 0x276   : > { %v6804_v44 = vpack.c.bf16 %v5756_v62, %v5755_v22  ;;  %v5758_v50 = vmax.f32 %v5742_v16, 0.0  ;;  %v5744_v24 = vadd.f32 %v5728_v45, %v9952_v51  ;;  %v5730_v33 = vmul.f32 %v5714_v55, %v9934_v10 }
 0x277   : > { %6858 = vst [vmem:[%s7571_s29 + $0x40] sm:$0xff] %v6799_v59   ;;  %v5759_v29 = vmax.f32 %v5743_v15, 0.0  ;;  %v5745_v2 = vadd.f32 %v5729_v60, %v9952_v51  ;;  %v5731_v21 = vmul.f32 %v5715_v57, %v9934_v10  ;;  %v5732_v8 = vmul.f32 %v5716_v18, %v9934_v10 }
 0x278   : > { %6859 = vst [vmem:[%s7571_s29 + $0x48] sm:$0xff] %v6804_v44   ;;  %v6809_v52 = vpack.c.bf16 %v5758_v50, %v5757_v58  ;;  %v5760_v34 = vmax.f32 %v5744_v24, 0.0  ;;  %v5746_v4 = vadd.f32 %v5730_v33, %v9952_v51  ;;  %v5733_v19 = vmul.f32 %v5717_v42, %v9934_v10 }
 0x279   : > { %v5761_v14 = vmax.f32 %v5745_v2, 0.0  ;;  %v5747_v38 = vadd.f32 %v5731_v21, %v9952_v51  ;;  %v5748_v56 = vadd.f32 %v5732_v8, %v9952_v51  ;;  %v5734_v47 = vmul.f32 %v5718_v61, %v9934_v10 }
 0x27a   : > { %6860 = vst [vmem:[%s7571_s29 + $0x50] sm:$0xff] %v6809_v52   ;;  %v6814_v23 = vpack.c.bf16 %v5760_v34, %v5759_v29  ;;  %v5762_v43 = vmax.f32 %v5746_v4, 0.0  ;;  %v5749_v6 = vadd.f32 %v5733_v19, %v9952_v51  ;;  %v5735_v53 = vmul.f32 %v5719_v25, %v9934_v10 }
 0x27b   : > { %v5763_v12 = vmax.f32 %v5747_v38, 0.0  ;;  %v5764_v30 = vmax.f32 %v5748_v56, 0.0  ;;  %v5750_v27 = vadd.f32 %v5734_v47, %v9952_v51  ;;  %v5736_v26 = vmul.f32 %v5720_v54, %v9934_v10 }
 0x27c   : > { %6861 = vst [vmem:[%s7571_s29 + $0x58] sm:$0xff] %v6814_v23   ;;  %v6819_v40 = vpack.c.bf16 %v5762_v43, %v5761_v14  ;;  %v5765_v35 = vmax.f32 %v5749_v6, 0.0  ;;  %v5751_v37 = vadd.f32 %v5735_v53, %v9952_v51 }
 0x27d   : > { %v6824_v11 = vpack.c.bf16 %v5764_v30, %v5763_v12  ;;  %v5766_v49 = vmax.f32 %v5750_v27, 0.0  ;;  %v5752_v5 = vadd.f32 %v5736_v26, %v9952_v51 }
 0x27e   : > { %6862 = vst [vmem:[%s7571_s29 + $0x60] sm:$0xff] %v6819_v40   ;;  %v5767_v0 = vmax.f32 %v5751_v37, 0.0 }
 0x27f   : > { %6863 = vst [vmem:[%s7571_s29 + $0x68] sm:$0xff] %v6824_v11   ;;  %v6829_v7 = vpack.c.bf16 %v5766_v49, %v5765_v35  ;;  %v5768_v31 = vmax.f32 %v5752_v5, 0.0 }
 0x281   : > { %6864 = vst [vmem:[%s7571_s29 + $0x70] sm:$0xff] %v6829_v7   ;;  %v6834_v20 = vpack.c.bf16 %v5768_v31, %v5767_v0 }
 0x283   : > { %6865 = vst [vmem:[%s7571_s29 + $0x78] sm:$0xff] %v6834_v20  }
 0x284 PF: > { %s14_s19 = sadd.s32 1, %s7500_s19   ;;  %s10181_s15 = smov %s7492_s17 }
 0x285   : > { %p11_p12 = scmp.ge.s32.totalorder %s14_s19, 6   ;;  %s10182_s16 = smov %s7496_s18 }
 0x286   : > { %s10183_s17 = smov %s10186_s20  ;;  %s10184_s18 = smov %s10190_s21 }
 0x287   :  { %13 = sbr.rel (!%p11_p12) target bundleno = 3 (0x3), region = 93 }

// kernel: up_forward.3
= control target key start
LH: loop header
LB: loop body
LE: loop exit
PB: predicated region body
PF: predicated region fallthrough
CT: control target
= control target key end

     0   :  { %s8385_s15 = smov 0   ;;  %s8387_s16 = smov 0   ;;  %s10919_s0 = inlined_call_operand.vmem [shape: bf16[2,18,18,128], index: 0, kind: input, shape index: {}]   ;;  %s10920_s1 = inlined_call_operand.vmem [shape: bf16[9,128,128], index: 1, kind: input, shape index: {}]   ;;  %s10921_s2 = inlined_call_operand.vmem [shape: f32[1,128], index: 2, kind: input, shape index: {}]   ;;  %s10922_s3 = inlined_call_operand.vmem [shape: f32[1,128], index: 3, kind: input, shape index: {}]   ;;  %s10923_s4 = inlined_call_operand.vmem [shape: f32[2,256,8], index: 4, kind: output, shape index: {}]  }
   0x1   :  { %s8389_s17 = smov 0   ;;  %s8391_s18 = smov 0  }
   0x2   :  { %s8393_s19 = smov 0  }
   0x3 LB: > { %s23_s20 = sadd.s32 1, %s8349_s17  ;;  %s26_s21 = sadd.s32 1, %s8353_s18  ;;  %s8357_s19 = sphi %s8393_s19, %s14_s19   ;;  %s8353_s18 = sphi %s8391_s18, %s11008_s18   ;;  %s8349_s17 = sphi %s8389_s17, %s11007_s17   ;;  %s8345_s16 = sphi %s8387_s16, %s11006_s16   ;;  %s8341_s15 = sphi %s8385_s15, %s11005_s15  }
   0x4   : > { %p24_p0 = scmp.ge.s32.totalorder %s23_s20, 2  ;;  %p6392_p1 = scmp.ge.s32.totalorder %s8357_s19, 1 }
   0x5   : > { %p184_p2 = scmp.lt.s32.totalorder %s8357_s19, 5 }
   0x6   : > { %s11010_s20 = smov (%p24_p0, %s23_s20), 0  ;;  %s11012_s21 = smov (!%p24_p0, %s26_s21), %s8353_s18 }
   0x7   : > { %p185_p3 = pnand %p6392_p1, %p184_p2  ;;  %p28_p4 = scmp.ge.s32.totalorder %s11012_s21, 2 }
   0x8   : > { %s213_s22 = ssub.s32 (!%p185_p3), 1, %s8345_s16  ;;  %s222_s23 = smul.u32 (!%p185_p3), %s8341_s15, %s8345_s16 }
   0x9   : > { %s11014_s21 = smov (%p28_p4, %s11012_s21), 0  ;;  %188 = sbr.rel (%p185_p3) target bundleno = 677 (0x2a5), region = 36 }
   0xa   : > { %s214_s24 = smul.u32 (!%p185_p3), %s8341_s15, %s213_s22  ;;  %p230_p5 = scmp.eq.s32.totalorder (!%p185_p3), %s8345_s16, 0 }
   0xb   : > { %p223_p6 = scmp.lt.s32.totalorder (!%p185_p3), %s222_s23, 1  ;;  %p231_p7 = scmp.eq.s32.totalorder (!%p185_p3), %s8341_s15, 0 }
   0xc   : > { %p215_p8 = scmp.lt.s32.totalorder (!%p185_p3), %s214_s24, 1 }
   0xd   : > { %p232_p9 = pnand (!%p185_p3), %p231_p7, %p230_p5 }
   0xe   : > { %s11016_s23 = smov (!%p223_p6, %s222_s23), 1  ;;  %s11018_s24 = smov (!%p215_p8, %s214_s24), 1 }
   0xf   : > { %s7218_s25 = sshll.u32 %s11016_s23, 8  ;;  %s8083_s26 = smul.u32 216, %s11018_s24 }
  0x10   : > { %s8428_s29 = scalar_lea.vmem %s10923_s4, %s7218_s25  ;;  %235 = sbr.rel (%p232_p9) target bundleno = 23 (0x17), region = 40 }
  0x11   : > { %s8433_s6 = scalar_lea.vmem %s10919_s0, %s8083_s26 }
  0x15   : > { %v8359_v0 = vmov 0.0  }
  0x16   : > { %236 = vst [vmem:[#allocation3] sm:$0x1] %v8359_v0  ;;  %237 = vst [vmem:[#allocation4] sm:$0x1] %v8359_v0 }
  0x17 PF: > { %p6396_p10 = scmp.ne.s32.totalorder %s8345_s16, 0 }
  0x19   : > { %240 = sbr.rel (%p6396_p10) target bundleno = 611 (0x263), region = 44 }
  0x1e   : > { %v8125_v1 = vld [vmem:[%s10920_s1 + $0x78] sm:$0xff]   ;;  %v8127_v3 = vld [vmem:[%s10920_s1 + $0x70] sm:$0xff]   ;;  %v8129_v5 = vld [vmem:[%s10920_s1 + $0x68] sm:$0xff]   ;;  %vm281_vm0 = vsmask.f32 3328  ;;  %vm887_vm3 = vcmask 1042432  }
  0x1f   : > { %v8126_v2 = vld [vmem:[%s10920_s1 + $0x38] sm:$0xff]   ;;  %7507 = vmatprep.subr.bf16.mxu0 %v8125_v1  ;;  %v8128_v4 = vld [vmem:[%s10920_s1 + $0x30] sm:$0xff]   ;;  %v8130_v6 = vld [vmem:[%s10920_s1 + $0x28] sm:$0xff]   ;;  %vm282_vm1 = vsmask.f32 7440  ;;  %vm888_vm4 = vcmask 1046532  }
  0x20   : > { %7539 = vmatprep.subr.bf16.mxu1 %v8126_v2  ;;  %7508 = vmatpush3.bf16.msra.mxu0 %v8125_v1  ;;  %v8131_v7 = vld [vmem:[%s10920_s1 + $0x60] sm:$0xff]   ;;  %v8133_v9 = vld [vmem:[%s10920_s1 + $0x58] sm:$0xff]   ;;  %v8135_v11 = vld [vmem:[%s10920_s1 + $0x50] sm:$0xff]   ;;  %vm3172_vm6 = vcmask 64512  }
  0x21   : > { %7540 = vmatpush3.bf16.msra.mxu1 %v8126_v2  ;;  %7509 = vmatprep.subr.bf16.mxu0 %v8127_v3  ;;  %v8132_v8 = vld [vmem:[%s10920_s1 + $0x20] sm:$0xff]   ;;  %v8134_v10 = vld [vmem:[%s10920_s1 + $0x18] sm:$0xff]   ;;  %v8136_v12 = vld [vmem:[%s10920_s1 + $0x10] sm:$0xff]  }
  0x22   : > { %7541 = vmatprep.subr.bf16.mxu1 %v8128_v4  ;;  %v241_v13 = vld [vmem:[%s8433_s6] sm:$0xf]  ;;  %v8474_v14 = vld [vmem:[%s8433_s6 + $0x4] sm:$0xf]  ;;  %v8477_v15 = vld [vmem:[%s8433_s6 + $0x8] sm:$0x1] }
  0x23   : > { %v285_v16 = vshrl.u32 %v241_v13, 16  ;;  %v288_v17 = vshll.u32 %v241_v13, 16  ;;  %v294_v18 = vshll.u32 %v8474_v14, 16  ;;  %v298_v19 = vshrl.u32 %v8474_v14, 16  ;;  %v8483_v21 = vld [vmem:[%s8433_s6 + $0xc] sm:$0xf]  ;;  %vm8507_vm2 = vmor %vm281_vm0, %vm282_vm1 }
  0x24   : > { %7510 = vmatpush3.bf16.msra.mxu0 %v8127_v3  ;;  %v304_v20 = vshll.u32 %v8477_v15, 16  ;;  %v6429_v24 = vcombine.low %v241_v13, %v8474_v14  ;;  %v8487_v25 = vld [vmem:[%s8433_s6 + $0x10] sm:$0xf]  ;;  %v8490_v26 = vld [vmem:[%s8433_s6 + $0x14] sm:$0x1]  ;;  %v8137_v27 = vld [vmem:[%s10920_s1 + $0x48] sm:$0xff]  }
  0x25   : > { %7542 = vmatpush3.bf16.msra.mxu1 %v8128_v4  ;;  %7511 = vmatprep.subr.bf16.mxu0 %v8129_v5  ;;  %v287_v22 = vrot.slane %v285_v16, 4  ;;  %v290_v23 = vrot.slane %v288_v17, 5  ;;  %v296_v28 = vrot.slane %v294_v18, 5  ;;  %v300_v29 = vrot.slane %v298_v19, 4  ;;  %v8138_v31 = vld [vmem:[%s10920_s1 + $0x8] sm:$0xff]   ;;  %v8139_v36 = vld [vmem:[%s10920_s1 + $0x40] sm:$0xff]   ;;  %vm8680_vm5 = vmor %vm887_vm3, %vm888_vm4 }
  0x26   : > { %7543 = vmatprep.subr.bf16.mxu1 %v8130_v6  ;;  %v309_v30 = vshrl.u32 %v8483_v21, 16  ;;  %7555 = vmatprep.mubr.bf16.mxu1 %v6429_v24  ;;  %v312_v33 = vshll.u32 %v8483_v21, 16  ;;  %v318_v34 = vshll.u32 %v8487_v25, 16  ;;  %v322_v35 = vshrl.u32 %v8487_v25, 16  ;;  %v8140_v48 = vld [vmem:[%s10920_s1] sm:$0xff]   ;;  %v8143_v56 = vld [vmem:[%s10920_s1 + $0xb8] sm:$0xff]  }
  0x27   : > { %v291_v32 = vor.u32 %v290_v23, %v287_v22  ;;  %v301_v38 = vor.u32 %v300_v29, %v296_v28  ;;  %v306_v39 = vrot.slane %v304_v20, 5  ;;  %v328_v41 = vshll.u32 %v8490_v26, 16  ;;  %v8527_v57 = vld [vmem:[%s8433_s6 + $0x18] sm:$0xf]  ;;  %v8530_v58 = vld [vmem:[%s8433_s6 + $0x1c] sm:$0xf] }
  0x28   : > { %7512 = vmatpush3.bf16.msra.mxu0 %v8129_v5  ;;  %v311_v40 = vrot.slane %v309_v30, 4  ;;  %v314_v43 = vrot.slane %v312_v33, 5  ;;  %v320_v44 = vrot.slane %v318_v34, 5  ;;  %v324_v45 = vrot.slane %v322_v35, 4  ;;  %v8144_v62 = vld [vmem:[%s10920_s1 + $0xf8] sm:$0xff]   ;;  %v8145_v13 = vld [vmem:[%s10920_s1 + $0xb0] sm:$0xff]  }
  0x29   : > { %7544 = vmatpush3.bf16.msra.mxu1 %v8130_v6  ;;  %7513 = vmatprep.subr.bf16.mxu0 %v8131_v7  ;;  %v292_v42 = vrot.slane %v291_v32, 4  ;;  %v302_v46 = vrot.slane %v301_v38, 4  ;;  %v895_v47 = vrot.slane %v8477_v15, 5  ;;  %v330_v52 = vrot.slane %v328_v41, 5  ;;  %v8536_v63 = vld [vmem:[%s8433_s6 + $0x20] sm:$0x1] }
  0x2a   : > { %7545 = vmatprep.subr.bf16.mxu1 %v8132_v8  ;;  %v315_v50 = vor.u32 %v314_v43, %v311_v40  ;;  %v325_v51 = vor.u32 %v324_v45, %v320_v44  ;;  %v902_v54 = vrot.slane %v8490_v26, 5  ;;  %v6430_v55 = vcombine.low %v8483_v21, %v8487_v25  ;;  %v8544_v5 = vld [vmem:[%s8433_s6 + $0x24] sm:$0xf]  ;;  %v8146_v29 = vld [vmem:[%s10920_s1 + $0xf0] sm:$0xff]   ;;  %v8149_v45 = vld [vmem:[%s10920_s1 + $0xa8] sm:$0xff]  }
  0x2b   : > { %v297_v49 = vsel %vm8507_vm2, %v292_v42, %v296_v28  ;;  %v307_v53 = vsel %vm8507_vm2, %v302_v46, %v306_v39  ;;  %v333_v0 = vshrl.u32 %v8527_v57, 16  ;;  %v336_v1 = vshll.u32 %v8527_v57, 16  ;;  %v8573_v41 = vld [vmem:[%s8433_s6 + $0x30] sm:$0xf]  ;;  %v8583_v46 = vld [vmem:[%s8433_s6 + $0x34] sm:$0xf] }
  0x2c   : > { %7514 = vmatpush3.bf16.msra.mxu0 %v8131_v7  ;;  %v6413_v59 = vcombine.low %v297_v49, %v307_v53  ;;  %v316_v60 = vrot.slane %v315_v50, 4  ;;  %v326_v61 = vrot.slane %v325_v51, 4  ;;  %v342_v2 = vshll.u32 %v8530_v58, 16 }
  0x2d   : > { %7546 = vmatpush3.bf16.msra.mxu1 %v8132_v8  ;;  %7515 = vmatprep.subr.bf16.mxu0 %v8133_v9  ;;  %v346_v3 = vshrl.u32 %v8530_v58, 16  ;;  %v352_v4 = vshll.u32 %v8536_v63, 16  ;;  %v335_v8 = vrot.slane %v333_v0, 4  ;;  %v338_v16 = vrot.slane %v336_v1, 5  ;;  %v8151_v1 = vld [vmem:[%s10920_s1 + $0xa0] sm:$0xff]  }
  0x2e   : > { %7547 = vmatprep.subr.bf16.mxu1 %v8134_v10  ;;  %7523 = vmatprep.mubr.bf16.mxu0 %v6413_v59  ;;  %v321_v6 = vsel %vm8507_vm2, %v316_v60, %v320_v44  ;;  %v331_v7 = vsel %vm8507_vm2, %v326_v61, %v330_v52  ;;  %v344_v17 = vrot.slane %v342_v2, 5  ;;  %v357_v20 = vshrl.u32 %v8544_v5, 16  ;;  %v8150_v52 = vld [vmem:[%s10920_s1 + $0xe8] sm:$0xff]  }
  0x2f   : > { %v348_v18 = vrot.slane %v346_v3, 4  ;;  %v354_v19 = vrot.slane %v352_v4, 5  ;;  %v360_v21 = vshll.u32 %v8544_v5, 16  ;;  %v339_v23 = vor.u32 %v338_v16, %v335_v8 }
  0x30   : > { %7516 = vmatpush3.bf16.msra.mxu0 %v8133_v9  ;;  %v8551_v9 = vld [vmem:[%s8433_s6 + $0x28] sm:$0xf]  ;;  %v6431_v30 = vcombine.low %v8527_v57, %v8530_v58  ;;  %v381_v49 = vshrl.u32 %v8573_v41, 16  ;;  %v384_v53 = vshll.u32 %v8573_v41, 16  ;;  %v394_v60 = vshrl.u32 %v8583_v46, 16 }
  0x31   : > { %7548 = vmatpush3.bf16.msra.mxu1 %v8134_v10  ;;  %7517 = vmatprep.subr.bf16.mxu0 %v8135_v11  ;;  %v8554_v10 = vld [vmem:[%s8433_s6 + $0x2c] sm:$0x1]  ;;  %v366_v22 = vshll.u32 %v8551_v9, 16  ;;  %v349_v24 = vor.u32 %v348_v18, %v344_v17  ;;  %v362_v32 = vrot.slane %v360_v21, 5  ;;  %v340_v34 = vrot.slane %v339_v23, 4 }
  0x32   : > { %7549 = vmatprep.subr.bf16.mxu1 %v8136_v12  ;;  %v376_v28 = vshll.u32 %v8554_v10, 16  ;;  %v6432_v40 = vcombine.low %v8544_v5, %v8551_v9  ;;  %v383_v59 = vrot.slane %v381_v49, 4  ;;  %v386_v2 = vrot.slane %v384_v53, 5  ;;  %v8610_v5 = vld [vmem:[%s8433_s6 + $0x44] sm:$0x1] }
  0x33   : > { %v368_v33 = vrot.slane %v366_v22, 5  ;;  %v350_v35 = vrot.slane %v349_v24, 4  ;;  %v345_v42 = vsel %vm8507_vm2, %v340_v34, %v344_v17  ;;  %v6433_v4 = vcombine.low %v8573_v41, %v8583_v46 }
  0x34   : > { %7518 = vmatpush3.bf16.msra.mxu0 %v8135_v11  ;;  %v892_v11 = vrot.slane %v8474_v14, 5  ;;  %v378_v38 = vrot.slane %v376_v28, 5  ;;  %v396_v8 = vrot.slane %v394_v60, 4  ;;  %v387_v17 = vor.u32 %v386_v2, %v383_v59 }
  0x35   : > { %7550 = vmatpush3.bf16.msra.mxu1 %v8136_v12  ;;  %7519 = vmatprep.subr.bf16.mxu0 %v8137_v27  ;;  %v6414_v12 = vcombine.low %v321_v6, %v331_v7  ;;  %v355_v43 = vsel %vm8507_vm2, %v350_v35, %v354_v19  ;;  %v8152_v7 = vld [vmem:[%s10920_s1 + $0xe0] sm:$0xff]   ;;  %v424_v23 = vshll.u32 %v8610_v5, 16  ;;  %v920_v26 = vrot.slane %v8583_v46, 5 }
  0x36   : > { %7551 = vmatprep.subr.bf16.mxu1 %v8138_v31  ;;  %v6415_v50 = vcombine.low %v345_v42, %v355_v43  ;;  %v388_v24 = vrot.slane %v387_v17, 4  ;;  %v8639_v42 = vld [vmem:[%s8433_s6 + $0x50] sm:$0x1] }
  0x38   : > { %7520 = vmatpush3.bf16.msra.mxu0 %v8137_v27  ;;  %v370_v27 = vshrl.u32 %v8551_v9, 16 }
  0x39   : > { %7552 = vmatpush3.bf16.msra.mxu1 %v8138_v31  ;;  %7521 = vmatprep.subr.bf16.mxu0 %v8139_v36  ;;  %v359_v31 = vrot.slane %v357_v20, 4 }
  0x3a   : > { %7553 = vmatprep.subr.bf16.mxu1 %v8140_v48 }
  0x3b   : > { %v363_v39 = vor.u32 %v362_v32, %v359_v31  ;;  %v426_v32 = vrot.slane %v424_v23, 5 }
  0x3c   : > { %7522 = vmatpush3.bf16.msra.mxu0 %v8139_v36  ;;  %v372_v36 = vrot.slane %v370_v27, 4 }
  0x3d   : > { %7554 = vmatpush3.bf16.msra.mxu1 %v8140_v48  ;;  %7571 = vmatprep.subr.bf16.mxu0 %v8143_v56  ;;  %v8586_v48 = vld [vmem:[%s8433_s6 + $0x38] sm:$0x1]  ;;  %v364_v51 = vrot.slane %v363_v39, 4  ;;  %v8634_v39 = vld [vmem:[%s8433_s6 + $0x4c] sm:$0xf] }
  0x3e   : > { %7603 = vmatprep.subr.bf16.mxu1 %v8144_v62  ;;  %v373_v44 = vor.u32 %v372_v36, %v368_v33  ;;  %v400_v61 = vshll.u32 %v8586_v48, 16  ;;  %v442_v53 = vshrl.u32 %v8634_v39, 16 }
  0x3f   : > { %7524 = vmatmul.mubr.bf16.vlgmr.msra.gmra.mxu0 %v6414_v12  ;;  %v369_v0 = vsel %vm8507_vm2, %v364_v51, %v368_v33  ;;  %v8156_v33 = vld [vmem:[%s10920_s1 + $0xd8] sm:$0xff]   ;;  %v8157_v51 = vld [vmem:[%s10920_s1 + $0x90] sm:$0xff]  }
  0x40   : > { %7556 = vmatmul.mubr.bf16.vlgmr.msra.gmra.mxu1 %v6430_v55  ;;  %7572 = vmatpush3.bf16.msra.mxu0 %v8143_v56  ;;  %v390_v55 = vshll.u32 %v8583_v46, 16  ;;  %v8595_v56 = vld [vmem:[%s8433_s6 + $0x3c] sm:$0xf]  ;;  %v374_v57 = vrot.slane %v373_v44, 4  ;;  %v402_v12 = vrot.slane %v400_v61, 5  ;;  %v448_v61 = vshll.u32 %v8639_v42, 16 }
  0x41   : > { %7604 = vmatpush3.bf16.msra.mxu1 %v8144_v62  ;;  %7573 = vmatprep.subr.bf16.mxu0 %v8145_v13  ;;  %v8600_v62 = vld [vmem:[%s8433_s6 + $0x40] sm:$0xf]  ;;  %v408_v18 = vshll.u32 %v8595_v56, 16 }
  0x42   : > { %7605 = vmatprep.subr.bf16.mxu1 %v8146_v29  ;;  %7559 = vmatprep.mubr.bf16.mxu1 %v6431_v30  ;;  %v392_v3 = vrot.slane %v390_v55, 5  ;;  %v379_v6 = vsel %vm8507_vm2, %v374_v57, %v378_v38  ;;  %v414_v19 = vshll.u32 %v8600_v62, 16  ;;  %v418_v22 = vshrl.u32 %v8600_v62, 16  ;;  %v253_v38 = vld [vmem:[%s8433_s6 + $0x48] sm:$0xf]  ;;  %v8158_v57 = vld [vmem:[%s10920_s1 + $0xd0] sm:$0xff]  }
  0x43   : > { %7527 = vmatprep.mubr.bf16.mxu0 %v6415_v50  ;;  %v6416_v16 = vcombine.low %v369_v0, %v379_v6  ;;  %v410_v27 = vrot.slane %v408_v18, 5  ;;  %v6434_v36 = vcombine.low %v8595_v56, %v8600_v62  ;;  %v429_v43 = vshrl.u32 %v253_v38, 16  ;;  %v8650_v55 = vld [vmem:[%s8433_s6 + $0x58] sm:$0xf]  ;;  %v8657_v0 = vld [vmem:[%s8433_s6 + $0x5c] sm:$0x1] }
  0x44   : > { %7574 = vmatpush3.bf16.msra.mxu0 %v8145_v13  ;;  %v405_v13 = vshrl.u32 %v8595_v56, 16  ;;  %v397_v20 = vor.u32 %v396_v8, %v392_v3  ;;  %v416_v28 = vrot.slane %v414_v19, 5  ;;  %v420_v31 = vrot.slane %v418_v22, 4  ;;  %v8161_v19 = vld [vmem:[%s10920_s1 + $0x88] sm:$0xff]  }
  0x45   : > { %7606 = vmatpush3.bf16.msra.mxu1 %v8146_v29  ;;  %7575 = vmatprep.subr.bf16.mxu0 %v8149_v45  ;;  %v8155_v29 = vld [vmem:[%s10920_s1 + $0x98] sm:$0xff]   ;;  %v393_v34 = vsel %vm8507_vm2, %v388_v24, %v392_v3  ;;  %v432_v44 = vshll.u32 %v253_v38, 16  ;;  %v431_v59 = vrot.slane %v429_v43, 4  ;;  %v450_v8 = vrot.slane %v448_v61, 5 }
  0x46   : > { %7607 = vmatprep.subr.bf16.mxu1 %v8150_v52  ;;  %v407_v21 = vrot.slane %v405_v13, 4  ;;  %v398_v30 = vrot.slane %v397_v20, 4  ;;  %v421_v41 = vor.u32 %v420_v31, %v416_v28  ;;  %v462_v18 = vshll.u32 %v8650_v55, 16 }
  0x47   : > { %7528 = vmatmul.mubr.bf16.gmra.mxu0 %v6416_v16  ;;  %v434_v60 = vrot.slane %v432_v44, 5  ;;  %v466_v22 = vshrl.u32 %v8650_v55, 16  ;;  %v472_v23 = vshll.u32 %v8657_v0, 16  ;;  %v927_v46 = vrot.slane %v8600_v62, 5 }
  0x48   : > { %7560 = vmatmul.mubr.bf16.gmra.mxu1 %v6432_v40  ;;  %7576 = vmatpush3.bf16.msra.mxu0 %v8149_v45  ;;  %v411_v35 = vor.u32 %v410_v27, %v407_v21  ;;  %v403_v40 = vsel %vm8507_vm2, %v398_v30, %v402_v12  ;;  %v8642_v45 = vld [vmem:[%s8433_s6 + $0x54] sm:$0xf]  ;;  %v422_v56 = vrot.slane %v421_v41, 4  ;;  %v8162_v30 = vld [vmem:[%s10920_s1 + $0xc8] sm:$0xff]   ;;  %v8163_v41 = vld [vmem:[%s10920_s1 + $0x80] sm:$0xff]  }
  0x49   : > { %7608 = vmatpush3.bf16.msra.mxu1 %v8150_v52  ;;  %7577 = vmatprep.subr.bf16.mxu0 %v8151_v1  ;;  %v6417_v49 = vcombine.low %v393_v34, %v403_v40  ;;  %v438_v52 = vshll.u32 %v8634_v39, 16  ;;  %v453_v12 = vshrl.u32 %v8642_v45, 16  ;;  %v456_v17 = vshll.u32 %v8642_v45, 16 }
  0x4a   : > { %7609 = vmatprep.subr.bf16.mxu1 %v8152_v7  ;;  %7563 = vmatprep.mubr.bf16.mxu1 %v6433_v4  ;;  %v412_v50 = vrot.slane %v411_v35, 4  ;;  %v444_v4 = vrot.slane %v442_v53, 4  ;;  %v427_v6 = vsel %vm8507_vm2, %v422_v56, %v426_v32  ;;  %v468_v31 = vrot.slane %v466_v22, 4  ;;  %v863_v32 = vld [vmem:[%s8433_s6] sm:$0xe]  ;;  %v8165_v53 = vld [vmem:[%s8433_s6 + $0xc] sm:$0xff]  }
  0x4b   : > { %7531 = vmatprep.mubr.bf16.mxu0 %v6417_v49  ;;  %v440_v3 = vrot.slane %v438_v52, 5  ;;  %v455_v21 = vrot.slane %v453_v12, 4  ;;  %v458_v27 = vrot.slane %v456_v17, 5  ;;  %v894_v34 = vrot.slane %v892_v11, 4  ;;  %v864_v56 = vld [vmem:[%s8433_s6 + $0xc] sm:$0xe] }
  0x4c   : > { %7578 = vmatpush3.bf16.msra.mxu0 %v8151_v1  ;;  %v417_v2 = vsel %vm8507_vm2, %v412_v50, %v416_v28  ;;  %v6435_v1 = vcombine.low %v253_v38, %v8634_v39  ;;  %v464_v28 = vrot.slane %v462_v18, 5  ;;  %v899_v35 = vrot.slane %v8487_v25, 5  ;;  %v8164_v25 = vld [vmem:[%s10920_s1 + $0xc0] sm:$0xff]  }
  0x4d   : > { %7610 = vmatpush3.bf16.msra.mxu1 %v8152_v7  ;;  %7579 = vmatprep.subr.bf16.mxu0 %v8155_v29  ;;  %v435_v7 = vor.u32 %v434_v60, %v431_v59  ;;  %v6418_v13 = vcombine.low %v417_v2, %v427_v6  ;;  %v445_v16 = vor.u32 %v444_v4, %v440_v3  ;;  %v6445_v43 = vrot.slane %v863_v32, 9  ;;  %v8168_v4 = vld [vmem:[%s10920_s1 + $0x178] sm:$0xff]   ;;  %v8176_v32 = vld [vmem:[%s10920_s1 + $0x160] sm:$0xff]  }
  0x4e   : > { %7611 = vmatprep.subr.bf16.mxu1 %v8156_v33  ;;  %v459_v38 = vor.u32 %v458_v27, %v455_v21  ;;  %v6436_v40 = vcombine.low %v8642_v45, %v8650_v55  ;;  %v469_v49 = vor.u32 %v468_v31, %v464_v28  ;;  %v474_v50 = vrot.slane %v472_v23, 5  ;;  %v867_v23 = vld [vmem:[%s8433_s6 + $0x30] sm:$0xe]  ;;  %v8173_v31 = vld [vmem:[%s10920_s1 + $0x128] sm:$0xff]  }
  0x4f   : > { %v436_v20 = vrot.slane %v435_v7, 4  ;;  %7532 = vmatmul.mubr.bf16.gmra.mxu0 %v6418_v13  ;;  %v446_v24 = vrot.slane %v445_v16, 4  ;;  %v901_v59 = vrot.slane %v899_v35, 4  ;;  %v6446_v14 = vrot.slane %v864_v56, 9  ;;  %v8166_v7 = vld [vmem:[%s8433_s6 + $0x18] sm:$0xff]   ;;  %v8171_v16 = vld [vmem:[%s8433_s6 + $0x24] sm:$0xff]  }
  0x50   : > { %7564 = vmatmul.mubr.bf16.gmra.mxu1 %v6434_v36  ;;  %7580 = vmatpush3.bf16.msra.mxu0 %v8155_v29  ;;  %v460_v52 = vrot.slane %v459_v38, 4  ;;  %v470_v45 = vrot.slane %v469_v49, 4  ;;  %v906_v2 = vrot.slane %v8530_v58, 5  ;;  %v909_v58 = vrot.slane %v8536_v63, 5  ;;  %v866_v63 = vld [vmem:[%s8433_s6 + $0x24] sm:$0xe] }
  0x51   : > { %7612 = vmatpush3.bf16.msra.mxu1 %v8156_v33  ;;  %7581 = vmatprep.subr.bf16.mxu0 %v8157_v51  ;;  %v441_v29 = vsel %vm8507_vm2, %v436_v20, %v440_v3  ;;  %v451_v36 = vsel %vm8507_vm2, %v446_v24, %v450_v8  ;;  %v865_v3 = vld [vmem:[%s8433_s6 + $0x18] sm:$0xe]  ;;  %v8170_v8 = vld [vmem:[%s10920_s1 + $0x170] sm:$0xff]   ;;  %v900_v12 = vsel %vm8680_vm5, %v6446_v14, %v899_v35  ;;  %v913_v17 = vrot.slane %v8551_v9, 5 }
  0x52   : > { %7613 = vmatprep.subr.bf16.mxu1 %v8158_v57  ;;  %7567 = vmatprep.mubr.bf16.mxu1 %v6435_v1  ;;  %v6419_v44 = vcombine.low %v441_v29, %v451_v36  ;;  %v465_v60 = vsel %vm8507_vm2, %v460_v52, %v464_v28  ;;  %v475_v61 = vsel %vm8507_vm2, %v470_v45, %v474_v50  ;;  %v6447_v1 = vrot.slane %v865_v3, 9  ;;  %v8172_v27 = vld [vmem:[%s8433_s6 + $0x30] sm:$0xff]   ;;  %v8174_v28 = vld [vmem:[%s10920_s1 + $0x168] sm:$0xff]  }
  0x53   : > { %v908_v6 = vrot.slane %v906_v2, 4  ;;  %v903_v13 = vsel %vm8680_vm5, %v901_v59, %v902_v54  ;;  %v8169_v54 = vld [vmem:[%s10920_s1 + $0x130] sm:$0xff]   ;;  %v916_v9 = vrot.slane %v8554_v10, 5  ;;  %v6448_v21 = vrot.slane %v866_v63, 9 }
  0x54   : > { %7582 = vmatpush3.bf16.msra.mxu0 %v8157_v51  ;;  %7535 = vmatprep.mubr.bf16.mxu0 %v6419_v44  ;;  %v893_v51 = vsel %vm8680_vm5, %v6445_v43, %v892_v11  ;;  %v6420_v11 = vcombine.low %v465_v60, %v475_v61  ;;  %v907_v18 = vsel %vm8680_vm5, %v6447_v1, %v906_v2  ;;  %v915_v22 = vrot.slane %v913_v17, 4  ;;  %v870_v45 = vld [vmem:[%s8433_s6 + $0x54] sm:$0xe]  ;;  %v8178_v61 = vld [vmem:[%s8433_s6 + $0x48] sm:$0xff]  }
  0x55   : > { %7614 = vmatpush3.bf16.msra.mxu1 %v8158_v57  ;;  %7583 = vmatprep.subr.bf16.mxu0 %v8161_v19  ;;  %v896_v57 = vsel %vm8680_vm5, %v894_v34, %v895_v47  ;;  %v8167_v47 = vld [vmem:[%s10920_s1 + $0x138] sm:$0xff]   ;;  %v6470_v20 = vcombine.low %v900_v12, %v903_v13  ;;  %v922_v29 = vrot.slane %v920_v26, 4  ;;  %v923_v10 = vrot.slane %v8586_v48, 5  ;;  %v6533_v1 = vld [vmem:[%s8433_s6 + $0xc] sm:$0xf] }
  0x56   : > { %7615 = vmatprep.subr.bf16.mxu1 %v8162_v30  ;;  %v6469_v15 = vcombine.low %v893_v51, %v896_v57  ;;  %v868_v34 = vld [vmem:[%s8433_s6 + $0x3c] sm:$0xe]  ;;  %v914_v62 = vsel %vm8680_vm5, %v6448_v21, %v913_v17  ;;  %v917_v35 = vsel %vm8680_vm5, %v915_v22, %v916_v9  ;;  %v934_v36 = vrot.slane %v8634_v39, 5  ;;  %v6535_v12 = vld [vmem:[%s8433_s6 + $0x14] sm:$0x1]  ;;  %v8186_v17 = vld [vmem:[%s10920_s1 + $0x148] sm:$0xff]  }
  0x57   : > { %7536 = vmatmul.mubr.bf16.gmra.mxu0 %v6420_v11  ;;  %v8177_v48 = vld [vmem:[%s8433_s6 + $0x3c] sm:$0xff]   ;;  %v929_v38 = vrot.slane %v927_v46, 4  ;;  %v924_v43 = vsel %vm8680_vm5, %v922_v29, %v923_v10  ;;  %v6450_v44 = vrot.slane %v868_v34, 9  ;;  %v937_v49 = vrot.slane %v8639_v42, 5  ;;  %v8185_v10 = vld [vmem:[%s10920_s1 + $0x108] sm:$0xff]  }
  0x58   : > { %7568 = vmatmul.mubr.bf16.gmra.mxu1 %v6436_v40  ;;  %7584 = vmatpush3.bf16.msra.mxu0 %v8161_v19  ;;  %v910_v19 = vsel %vm8680_vm5, %v908_v6, %v909_v58  ;;  %v930_v40 = vrot.slane %v8610_v5, 5  ;;  %v6472_v50 = vcombine.low %v914_v62, %v917_v35  ;;  %v936_v39 = vrot.slane %v934_v36, 4  ;;  %v8175_v5 = vld [vmem:[%s10920_s1 + $0x120] sm:$0xff]   ;;  %v8181_v6 = vld [vmem:[%s10920_s1 + $0x110] sm:$0xff]   ;;  %v6537_v29 = vld [vmem:[%s8433_s6 + $0x1c] sm:$0xf] }
  0x59   : > { %7616 = vmatpush3.bf16.msra.mxu1 %v8162_v30  ;;  %7585 = vmatprep.subr.bf16.mxu0 %v8163_v41  ;;  %v6471_v24 = vcombine.low %v907_v18, %v910_v19  ;;  %v6449_v30 = vrot.slane %v867_v23, 9  ;;  %v941_v52 = vrot.slane %v8650_v55, 5  ;;  %v944_v42 = vrot.slane %v8657_v0, 5  ;;  %v8180_v55 = vld [vmem:[%s10920_s1 + $0x158] sm:$0xff]   ;;  %v6538_v34 = vld [vmem:[%s8433_s6 + $0x20] sm:$0x1] }
  0x5a   : > { %7617 = vmatprep.subr.bf16.mxu1 %v8164_v25  ;;  %7619 = vmatprep.mubr.bf16.mxu1 %v8165_v53  ;;  %v6452_v57 = vrot.slane %v870_v45, 9  ;;  %v928_v59 = vsel %vm8680_vm5, %v6450_v44, %v927_v46  ;;  %v931_v60 = vsel %vm8680_vm5, %v929_v38, %v930_v40  ;;  %v938_v14 = vsel %vm8680_vm5, %v936_v39, %v937_v49  ;;  %v8179_v0 = vld [vmem:[%s10920_s1 + $0x118] sm:$0xff]  }
  0x5b   : > { %7587 = vmatprep.mubr.bf16.mxu0 %v6469_v15  ;;  %v943_v51 = vrot.slane %v941_v52, 4  ;;  %v6474_v3 = vcombine.low %v928_v59, %v931_v60  ;;  %v1424_v13 = vshrl.u32 %v6533_v1, 16  ;;  %v1443_v19 = vshll.u32 %v6535_v12, 16 }
  0x5c   : > { %7586 = vmatpush3.bf16.msra.mxu0 %v8163_v41  ;;  %v921_v41 = vsel %vm8680_vm5, %v6449_v30, %v920_v26  ;;  %v8792_v11 = vsel %vm8680_vm5, %v6452_v57, %v941_v52  ;;  %v6589_v26 = vld [vmem:[%s8433_s6 + $0xc] sm:$0xe]  ;;  %v1862_v23 = vrot.slane %v6535_v12, 5  ;;  %v1457_v40 = vshll.u32 %v6537_v29, 16  ;;  %v6541_v12 = vld [vmem:[%s8433_s6 + $0x2c] sm:$0x1] }
  0x5d   : > { %7618 = vmatpush3.bf16.msra.mxu1 %v8164_v25  ;;  %7635 = vmatprep.subr.bf16.mxu0 %v8167_v47  ;;  %v869_v25 = vld [vmem:[%s8433_s6 + $0x48] sm:$0xe]  ;;  %v6473_v56 = vcombine.low %v921_v41, %v924_v43  ;;  %v8796_v15 = vsel %vm8680_vm5, %v943_v51, %v944_v42  ;;  %v1426_v9 = vrot.slane %v1424_v13, 4  ;;  %v6597_v22 = vrot.slane %v6589_v26, 9  ;;  %v8188_v43 = vld [vmem:[%s10920_s1 + $0x140] sm:$0xff]  }
  0x5e   : > { %7667 = vmatprep.subr.bf16.mxu1 %v8168_v4  ;;  %v6451_v53 = vrot.slane %v869_v25, 9  ;;  %v1461_v41 = vshrl.u32 %v6537_v29, 16  ;;  %v1459_v52 = vrot.slane %v1457_v40, 5  ;;  %v1866_v42 = vrot.slane %v6537_v29, 5 }
  0x5f   : > { %7588 = vmatmul.mubr.bf16.vlgmr.msra.gmra.mxu0 %v6470_v20  ;;  %v1869_v60 = vrot.slane %v6538_v34, 5 }
  0x60   : > { %7620 = vmatmul.mubr.bf16.vlgmr.msra.gmra.mxu1 %v8166_v7  ;;  %7636 = vmatpush3.bf16.msra.mxu0 %v8167_v47  ;;  %v935_v2 = vsel %vm8680_vm5, %v6451_v53, %v934_v36  ;;  %v8182_v47 = vld [vmem:[%s10920_s1 + $0x150] sm:$0xff]   ;;  %v6476_v7 = vcombine.low %v8792_v11, %v8796_v15  ;;  %v1467_v53 = vshll.u32 %v6538_v34, 16  ;;  %v8189_v11 = vld [vmem:[%s10920_s1 + $0x1b8] sm:$0xff]  }
  0x61   : > { %7668 = vmatpush3.bf16.msra.mxu1 %v8168_v4  ;;  %7623 = vmatprep.mubr.bf16.mxu1 %v8171_v16  ;;  %v8183_v4 = vld [vmem:[%s8433_s6 + $0x54] sm:$0xff]   ;;  %v6475_v58 = vcombine.low %v935_v2, %v938_v14  ;;  %v1427_v16 = vshll.u32 %v6533_v1, 16  ;;  %v6539_v1 = vld [vmem:[%s8433_s6 + $0x24] sm:$0xf]  ;;  %v6592_v34 = vld [vmem:[%s8433_s6 + $0x30] sm:$0xe] }
  0x62   : > { %7669 = vmatprep.subr.bf16.mxu1 %v8170_v8  ;;  %7637 = vmatprep.subr.bf16.mxu0 %v8169_v54  ;;  %v1469_v59 = vrot.slane %v1467_v53, 5  ;;  %v1472_v13 = vshrl.u32 %v6539_v1, 16 }
  0x63   : > { %7591 = vmatprep.mubr.bf16.mxu0 %v6471_v24  ;;  %v1429_v21 = vrot.slane %v1427_v16, 5  ;;  %v6536_v24 = vld [vmem:[%s8433_s6 + $0x18] sm:$0xf]  ;;  %v1475_v16 = vshll.u32 %v6539_v1, 16 }
  0x64   : > { %7638 = vmatpush3.bf16.msra.mxu0 %v8169_v54  ;;  %v8184_v54 = vld [vmem:[%s8433_s6 + $0x60] sm:$0xff]   ;;  %v1448_v62 = vshrl.u32 %v6536_v24, 16  ;;  %v1451_v35 = vshll.u32 %v6536_v24, 16 }
  0x65   : > { %7670 = vmatpush3.bf16.msra.mxu1 %v8170_v8  ;;  %7639 = vmatprep.subr.bf16.mxu0 %v8173_v31  ;;  %v6534_v8 = vld [vmem:[%s8433_s6 + $0x10] sm:$0xf] }
  0x66   : > { %7671 = vmatprep.subr.bf16.mxu1 %v8174_v28  ;;  %v1433_v63 = vshll.u32 %v6534_v8, 16  ;;  %v1437_v18 = vshrl.u32 %v6534_v8, 16  ;;  %v1859_v20 = vrot.slane %v6534_v8, 5  ;;  %v1453_v25 = vrot.slane %v1451_v35, 5 }
  0x67   : > { %7592 = vmatmul.mubr.bf16.gmra.mxu0 %v6472_v50  ;;  %v1450_v50 = vrot.slane %v1448_v62, 4 }
  0x68   : > { %7624 = vmatmul.mubr.bf16.gmra.mxu1 %v8172_v27  ;;  %7640 = vmatpush3.bf16.msra.mxu0 %v8173_v31  ;;  %v1435_v27 = vrot.slane %v1433_v63, 5  ;;  %v1439_v46 = vrot.slane %v1437_v18, 4  ;;  %v1861_v30 = vrot.slane %v1859_v20, 4  ;;  %v1430_v31 = vor.u32 %v1429_v21, %v1426_v9 }
  0x69   : > { %7672 = vmatpush3.bf16.msra.mxu1 %v8174_v28  ;;  %7627 = vmatprep.mubr.bf16.mxu1 %v8177_v48  ;;  %v1445_v28 = vrot.slane %v1443_v19, 5  ;;  %v6590_v48 = vld [vmem:[%s8433_s6 + $0x18] sm:$0xe]  ;;  %v1454_v45 = vor.u32 %v1453_v25, %v1450_v50  ;;  %v6542_v19 = vld [vmem:[%s8433_s6 + $0x30] sm:$0xf]  ;;  %v1477_v9 = vrot.slane %v1475_v16, 5 }
  0x6a   : > { %7673 = vmatprep.subr.bf16.mxu1 %v8176_v32  ;;  %7641 = vmatprep.subr.bf16.mxu0 %v8175_v5  ;;  %v1440_v36 = vor.u32 %v1439_v46, %v1435_v27  ;;  %v1863_v38 = vsel %vm8680_vm5, %v1861_v30, %v1862_v23  ;;  %v1431_v44 = vrot.slane %v1430_v31, 4  ;;  %v6598_v51 = vrot.slane %v6590_v48, 9  ;;  %v8191_v30 = vld [vmem:[%s10920_s1 + $0x1b0] sm:$0xff]  }
  0x6b   : > { %7595 = vmatprep.mubr.bf16.mxu0 %v6473_v56  ;;  %v1491_v21 = vshll.u32 %v6541_v12, 16  ;;  %v1876_v31 = vrot.slane %v6541_v12, 5 }
  0x6c   : > { %7642 = vmatpush3.bf16.msra.mxu0 %v8175_v5  ;;  %v1441_v39 = vrot.slane %v1440_v36, 4  ;;  %v1463_v5 = vrot.slane %v1461_v41, 4  ;;  %v1436_v56 = vsel %vm8507_vm2, %v1431_v44, %v1435_v27  ;;  %v1867_v2 = vsel %vm8680_vm5, %v6598_v51, %v1866_v42 }
  0x6d   : > { %7674 = vmatpush3.bf16.msra.mxu1 %v8176_v32  ;;  %7643 = vmatprep.subr.bf16.mxu0 %v8179_v0  ;;  %v1860_v32 = vsel %vm8680_vm5, %v6597_v22, %v1859_v20  ;;  %v8192_v20 = vld [vmem:[%s10920_s1 + $0x1f0] sm:$0xff]   ;;  %v1499_v36 = vshll.u32 %v6542_v19, 16 }
  0x6e   : > { %7675 = vmatprep.subr.bf16.mxu1 %v8180_v55  ;;  %v6621_v49 = vcombine.low %v1860_v32, %v1863_v38  ;;  %v1464_v57 = vor.u32 %v1463_v5, %v1459_v52  ;;  %v6543_v22 = vld [vmem:[%s8433_s6 + $0x34] sm:$0xf]  ;;  %v1496_v32 = vshrl.u32 %v6542_v19, 16 }
  0x6f   : > { %7596 = vmatmul.mubr.bf16.gmra.mxu0 %v6474_v3  ;;  %v1505_v41 = vshll.u32 %v6543_v22, 16  ;;  %v1501_v50 = vrot.slane %v1499_v36, 5 }
  0x70   : > { %7628 = vmatmul.mubr.bf16.gmra.mxu1 %v8178_v61  ;;  %7644 = vmatpush3.bf16.msra.mxu0 %v8179_v0  ;;  %v8187_v61 = vld [vmem:[%s10920_s1 + $0x100] sm:$0xff]   ;;  %v1455_v0 = vrot.slane %v1454_v45, 4  ;;  %v1465_v3 = vrot.slane %v1464_v57, 4  ;;  %v1498_v40 = vrot.slane %v1496_v32, 4  ;;  %v6545_v57 = vld [vmem:[%s8433_s6 + $0x3c] sm:$0xf] }
  0x71   : > { %7676 = vmatpush3.bf16.msra.mxu1 %v8180_v55  ;;  %7631 = vmatprep.mubr.bf16.mxu1 %v8183_v4  ;;  %v1446_v55 = vsel %vm8507_vm2, %v1441_v39, %v1445_v28  ;;  %v8190_v4 = vld [vmem:[%s10920_s1 + $0x1f8] sm:$0xff]   ;;  %v8194_v39 = vld [vmem:[%s10920_s1 + $0x1e8] sm:$0xff]   ;;  %v1507_v53 = vrot.slane %v1505_v41, 5  ;;  %v1520_v1 = vshrl.u32 %v6545_v57, 16 }
  0x72   : > { %7677 = vmatprep.subr.bf16.mxu1 %v8182_v47  ;;  %7645 = vmatprep.subr.bf16.mxu0 %v8181_v6  ;;  %v6573_v14 = vcombine.low %v1436_v56, %v1446_v55  ;;  %v1470_v63 = vsel %vm8507_vm2, %v1465_v3, %v1469_v59  ;;  %v8863_v28 = vld [vmem:[%s8433_s6 + $0x38] sm:$0x1]  ;;  %v1502_v51 = vor.u32 %v1501_v50, %v1498_v40  ;;  %v6600_v55 = vrot.slane %v6592_v34, 9  ;;  %v6594_v32 = vld [vmem:[%s8433_s6 + $0x48] sm:$0xe] }
  0x73   : > { %7599 = vmatprep.mubr.bf16.mxu0 %v6475_v58  ;;  %v1460_v58 = vsel %vm8507_vm2, %v1455_v0, %v1459_v52  ;;  %v1515_v25 = vshll.u32 %v8863_v28, 16  ;;  %v8193_v0 = vld [vmem:[%s10920_s1 + $0x1a8] sm:$0xff]  }
  0x74   : > { %7646 = vmatpush3.bf16.msra.mxu0 %v8181_v6  ;;  %v6540_v6 = vld [vmem:[%s8433_s6 + $0x28] sm:$0xf]  ;;  %v6574_v26 = vcombine.low %v1460_v58, %v1470_v63  ;;  %v1503_v3 = vrot.slane %v1502_v51, 4 }
  0x75   : > { %7678 = vmatpush3.bf16.msra.mxu1 %v8182_v47  ;;  %7647 = vmatprep.subr.bf16.mxu0 %v8185_v10  ;;  %v1868_v47 = vrot.slane %v1866_v42, 4  ;;  %v1481_v15 = vshll.u32 %v6540_v6, 16  ;;  %v1873_v46 = vrot.slane %v6540_v6, 5  ;;  %v1517_v42 = vrot.slane %v1515_v25, 5 }
  0x76   : > { %7679 = vmatprep.subr.bf16.mxu1 %v8186_v17  ;;  %v1508_v63 = vsel %vm8507_vm2, %v1503_v3, %v1507_v53 }
  0x77   : > { %7600 = vmatmul.mubr.bf16.gmra.mxu0 %v6476_v7  ;;  %v1870_v8 = vsel %vm8680_vm5, %v1868_v47, %v1869_v60  ;;  %v1485_v7 = vshrl.u32 %v6540_v6, 16  ;;  %v1483_v23 = vrot.slane %v1481_v15, 5  ;;  %v1875_v48 = vrot.slane %v1873_v46, 4  ;;  %v6546_v47 = vld [vmem:[%s8433_s6 + $0x40] sm:$0xf] }
  0x78   : > { %7632 = vmatmul.mubr.bf16.gmra.mxu1 %v8184_v54  ;;  %7648 = vmatpush3.bf16.msra.mxu0 %v8185_v10  ;;  %v6622_v18 = vcombine.low %v1867_v2, %v1870_v8  ;;  %v1474_v54 = vrot.slane %v1472_v13, 4  ;;  %v1493_v10 = vrot.slane %v1491_v21, 5  ;;  %v8196_v2 = vld [vmem:[%s10920_s1 + $0x1e0] sm:$0xff]   ;;  %v1523_v6 = vshll.u32 %v6545_v57, 16  ;;  %v6549_v21 = vld [vmem:[%s8433_s6 + $0x4c] sm:$0xf] }
  0x79   : > { %7680 = vmatpush3.bf16.msra.mxu1 %v8186_v17  ;;  %7683 = vmatprep.mubr.bf16.mxu1 %v6621_v49  ;;  %v6591_v17 = vld [vmem:[%s8433_s6 + $0x24] sm:$0xe]  ;;  %v1487_v24 = vrot.slane %v1485_v7, 4  ;;  %v1877_v49 = vsel %vm8680_vm5, %v1875_v48, %v1876_v31  ;;  %v1529_v58 = vshll.u32 %v6546_v47, 16  ;;  %v1533_v16 = vshrl.u32 %v6546_v47, 16 }
  0x7a   : > { %7681 = vmatprep.subr.bf16.mxu1 %v8188_v43  ;;  %7649 = vmatprep.subr.bf16.mxu0 %v8187_v61  ;;  %v6599_v27 = vrot.slane %v6591_v17, 9  ;;  %v1478_v29 = vor.u32 %v1477_v9, %v1474_v54  ;;  %v6593_v17 = vld [vmem:[%s8433_s6 + $0x3c] sm:$0xe]  ;;  %v1525_v15 = vrot.slane %v1523_v6, 5  ;;  %v6548_v9 = vld [vmem:[%s8433_s6 + $0x48] sm:$0xf] }
  0x7b   : > { %7651 = vmatprep.mubr.bf16.mxu0 %v6573_v14  ;;  %v1488_v62 = vor.u32 %v1487_v24, %v1483_v23  ;;  %v1883_v14 = vrot.slane %v8863_v28, 5  ;;  %v1531_v7 = vrot.slane %v1529_v58, 5  ;;  %v8198_v28 = vld [vmem:[%s10920_s1 + $0x1d8] sm:$0xff]   ;;  %v1553_v48 = vshll.u32 %v6549_v21, 16  ;;  %v6551_v57 = vld [vmem:[%s8433_s6 + $0x54] sm:$0xf] }
  0x7c   : > { %7650 = vmatpush3.bf16.msra.mxu0 %v8187_v61  ;;  %v1874_v35 = vsel %vm8680_vm5, %v6599_v27, %v1873_v46  ;;  %v1479_v38 = vrot.slane %v1478_v29, 4  ;;  %v1880_v61 = vrot.slane %v6543_v22, 5  ;;  %v6601_v27 = vrot.slane %v6593_v17, 9  ;;  %v8906_v46 = vld [vmem:[%s8433_s6 + $0x50] sm:$0x1] }
  0x7d   : > { %7682 = vmatpush3.bf16.msra.mxu1 %v8188_v43  ;;  %7699 = vmatprep.subr.bf16.mxu0 %v8189_v11  ;;  %v1509_v43 = vshrl.u32 %v6543_v22, 16  ;;  %v1489_v44 = vrot.slane %v1488_v62, 4  ;;  %v6623_v5 = vcombine.low %v1874_v35, %v1877_v49  ;;  %v1544_v62 = vshrl.u32 %v6548_v9, 16  ;;  %v6595_v17 = vld [vmem:[%s8433_s6 + $0x54] sm:$0xe] }
  0x7e   : > { %7731 = vmatprep.subr.bf16.mxu1 %v8190_v4  ;;  %v1484_v52 = vsel %vm8507_vm2, %v1479_v38, %v1483_v23  ;;  %v1881_v12 = vsel %vm8680_vm5, %v6600_v55, %v1880_v61  ;;  %v1882_v13 = vrot.slane %v1880_v61, 4  ;;  %v1547_v35 = vshll.u32 %v6548_v9, 16  ;;  %v6554_v9 = vld [vmem:[%s8433_s6 + $0x60] sm:$0xf] }
  0x7f   : > { %7652 = vmatmul.mubr.bf16.vlgmr.msra.gmra.mxu0 %v6574_v26  ;;  %v1511_v56 = vrot.slane %v1509_v43, 4  ;;  %v1494_v45 = vsel %vm8507_vm2, %v1489_v44, %v1493_v10  ;;  %v1887_v10 = vrot.slane %v6546_v47, 5  ;;  %v1557_v41 = vshrl.u32 %v6549_v21, 16  ;;  %v8197_v43 = vld [vmem:[%s10920_s1 + $0x198] sm:$0xff]   ;;  %v8202_v47 = vld [vmem:[%s10920_s1 + $0x1c8] sm:$0xff]  }
  0x80   : > { %7684 = vmatmul.mubr.bf16.vlgmr.msra.gmra.mxu1 %v6622_v18  ;;  %7700 = vmatpush3.bf16.msra.mxu0 %v8189_v11  ;;  %v6575_v59 = vcombine.low %v1484_v52, %v1494_v45  ;;  %v8195_v18 = vld [vmem:[%s10920_s1 + $0x1a0] sm:$0xff]   ;;  %v1522_v11 = vrot.slane %v1520_v1, 4  ;;  %v1884_v26 = vsel %vm8680_vm5, %v1882_v13, %v1883_v14  ;;  %v1546_v49 = vrot.slane %v1544_v62, 4 }
  0x81   : > { %7732 = vmatpush3.bf16.msra.mxu1 %v8190_v4  ;;  %7701 = vmatprep.subr.bf16.mxu0 %v8191_v30  ;;  %v1512_v60 = vor.u32 %v1511_v56, %v1507_v53  ;;  %v6547_v4 = vld [vmem:[%s8433_s6 + $0x44] sm:$0x1]  ;;  %v6624_v23 = vcombine.low %v1881_v12, %v1884_v26  ;;  %v1888_v38 = vsel %vm8680_vm5, %v6601_v27, %v1887_v10  ;;  %v1889_v40 = vrot.slane %v1887_v10, 4 }
  0x82   : > { %7733 = vmatprep.subr.bf16.mxu1 %v8192_v20  ;;  %7687 = vmatprep.mubr.bf16.mxu1 %v6623_v5  ;;  %v1539_v54 = vshll.u32 %v6547_v4, 16  ;;  %v1526_v24 = vor.u32 %v1525_v15, %v1522_v11  ;;  %v1890_v31 = vrot.slane %v6547_v4, 5  ;;  %v1549_v50 = vrot.slane %v1547_v35, 5  ;;  %v6553_v4 = vld [vmem:[%s8433_s6 + $0x5c] sm:$0x1] }
  0x83   : > { %7655 = vmatprep.mubr.bf16.mxu0 %v6575_v59  ;;  %v1513_v8 = vrot.slane %v1512_v60, 4  ;;  %v1555_v25 = vrot.slane %v1553_v48, 5  ;;  %v1559_v53 = vrot.slane %v1557_v41, 4  ;;  %v1563_v56 = vshll.u32 %v8906_v46, 16  ;;  %v6552_v59 = vld [vmem:[%s8433_s6 + $0x58] sm:$0xf] }
  0x84   : > { %7702 = vmatpush3.bf16.msra.mxu0 %v8191_v30  ;;  %v1541_v29 = vrot.slane %v1539_v54, 5  ;;  %v1527_v34 = vrot.slane %v1526_v24, 4  ;;  %v1891_v5 = vsel %vm8680_vm5, %v1889_v40, %v1890_v31  ;;  %v6602_v55 = vrot.slane %v6594_v32, 9  ;;  %v6596_v32 = vld [vmem:[%s8433_s6 + $0x60] sm:$0xe] }
  0x85   : > { %7734 = vmatpush3.bf16.msra.mxu1 %v8192_v20  ;;  %v1518_v19 = vsel %vm8507_vm2, %v1513_v8, %v1517_v42  ;;  %7703 = vmatprep.subr.bf16.mxu0 %v8193_v0  ;;  %v1535_v20 = vrot.slane %v1533_v16, 4  ;;  %v6625_v51 = vcombine.low %v1888_v38, %v1891_v5  ;;  %v1550_v42 = vor.u32 %v1549_v50, %v1546_v49 }
  0x86   : > { %7735 = vmatprep.subr.bf16.mxu1 %v8194_v39  ;;  %v6576_v22 = vcombine.low %v1508_v63, %v1518_v19  ;;  %v1532_v44 = vsel %vm8507_vm2, %v1527_v34, %v1531_v7  ;;  %v1560_v60 = vor.u32 %v1559_v53, %v1555_v25  ;;  %v1565_v61 = vrot.slane %v1563_v56, 5 }
  0x87   : > { %v1536_v30 = vor.u32 %v1535_v20, %v1531_v7  ;;  %v1894_v14 = vrot.slane %v6549_v21, 5  ;;  %v1551_v3 = vrot.slane %v1550_v42, 4  ;;  %v1568_v1 = vshrl.u32 %v6551_v57, 16  ;;  %v8201_v7 = vld [vmem:[%s10920_s1 + $0x188] sm:$0xff]   ;;  %v6555_v21 = vld [vmem:[%s8433_s6 + $0x64] sm:$0xf] }
  0x88   : > { %7656 = vmatmul.mubr.bf16.gmra.mxu0 %v6576_v22  ;;  %7688 = vmatmul.mubr.bf16.gmra.mxu1 %v6624_v23  ;;  %v1571_v6 = vshll.u32 %v6551_v57, 16  ;;  %v1577_v58 = vshll.u32 %v6552_v59, 16  ;;  %v1561_v8 = vrot.slane %v1560_v60, 4  ;;  %v1581_v16 = vshrl.u32 %v6552_v59, 16 }
  0x89   : > { %7736 = vmatpush3.bf16.msra.mxu1 %v8194_v39  ;;  %7704 = vmatpush3.bf16.msra.mxu0 %v8193_v0  ;;  %v1537_v36 = vrot.slane %v1536_v30, 4  ;;  %v8200_v39 = vld [vmem:[%s10920_s1 + $0x1d0] sm:$0xff]   ;;  %v1897_v0 = vrot.slane %v8906_v46, 5  ;;  %v1895_v12 = vsel %vm8680_vm5, %v6602_v55, %v1894_v14  ;;  %v1896_v13 = vrot.slane %v1894_v14, 4  ;;  %v8952_v46 = vld [vmem:[%s8433_s6 + $0x68] sm:$0x1] }
  0x8a   : > { %7737 = vmatprep.subr.bf16.mxu1 %v8196_v2  ;;  %7705 = vmatprep.subr.bf16.mxu0 %v8195_v18  ;;  %v1556_v63 = vsel %vm8507_vm2, %v1551_v3, %v1555_v25  ;;  %v1573_v11 = vrot.slane %v1571_v6, 5  ;;  %v1579_v15 = vrot.slane %v1577_v58, 5  ;;  %v1566_v19 = vsel %vm8507_vm2, %v1561_v8, %v1565_v61  ;;  %v6685_v14 = vld [vmem:[%s8433_s6 + $0x18] sm:$0xf]  ;;  %v8986_v3 = vld [vmem:[%s8433_s6 + $0x20] sm:$0x1] }
  0x8b   : > { %v1542_v52 = vsel %vm8507_vm2, %v1537_v36, %v1541_v29  ;;  %7691 = vmatprep.mubr.bf16.mxu1 %v6625_v51  ;;  %v1898_v26 = vsel %vm8680_vm5, %v1896_v13, %v1897_v0  ;;  %v1583_v20 = vrot.slane %v1581_v16, 4  ;;  %v1587_v54 = vshll.u32 %v6553_v4, 16  ;;  %v8980_v0 = vld [vmem:[%s10920_s1 + $0x238] sm:$0xff]  }
  0x8c   : > { %v6577_v45 = vcombine.low %v1532_v44, %v1542_v52  ;;  %v6578_v22 = vcombine.low %v1556_v63, %v1566_v19  ;;  %v6626_v23 = vcombine.low %v1895_v12, %v1898_v26  ;;  %v6603_v27 = vrot.slane %v6595_v17, 9  ;;  %v8205_v13 = vld [vmem:[%s8433_s6 + $0x18] sm:$0xff]   ;;  %v6688_v19 = vld [vmem:[%s8433_s6 + $0x24] sm:$0xf]  ;;  %v9003_v26 = vld [vmem:[%s8433_s6 + $0x28] sm:$0xf] }
  0x8d   : > { %7738 = vmatpush3.bf16.msra.mxu1 %v8196_v2  ;;  %7706 = vmatpush3.bf16.msra.mxu0 %v8195_v18  ;;  %v8199_v2 = vld [vmem:[%s10920_s1 + $0x190] sm:$0xff]   ;;  %v1570_v18 = vrot.slane %v1568_v1, 4  ;;  %v1584_v30 = vor.u32 %v1583_v20, %v1579_v15  ;;  %v1589_v29 = vrot.slane %v1587_v54, 5  ;;  %v1901_v10 = vrot.slane %v6552_v59, 5 }
  0x8e   : > { %7739 = vmatprep.subr.bf16.mxu1 %v8198_v28  ;;  %7659 = vmatprep.mubr.bf16.mxu0 %v6577_v45  ;;  %v1904_v31 = vrot.slane %v6553_v4, 5  ;;  %v1592_v62 = vshrl.u32 %v6554_v9, 16  ;;  %v1595_v35 = vshll.u32 %v6554_v9, 16  ;;  %v1601_v48 = vshll.u32 %v6555_v21, 16 }
  0x8f   : > { %7707 = vmatprep.subr.bf16.mxu0 %v8197_v43  ;;  %v1574_v24 = vor.u32 %v1573_v11, %v1570_v18  ;;  %v1585_v36 = vrot.slane %v1584_v30, 4  ;;  %v1902_v38 = vsel %vm8680_vm5, %v6603_v27, %v1901_v10  ;;  %v1903_v40 = vrot.slane %v1901_v10, 4 }
  0x90   : > { %7660 = vmatmul.mubr.bf16.gmra.mxu0 %v6578_v22  ;;  %7692 = vmatmul.mubr.bf16.gmra.mxu1 %v6626_v23  ;;  %v1605_v41 = vshrl.u32 %v6555_v21, 16  ;;  %v1594_v49 = vrot.slane %v1592_v62, 4  ;;  %v1597_v50 = vrot.slane %v1595_v35, 5  ;;  %v1603_v25 = vrot.slane %v1601_v48, 5  ;;  %v9006_v22 = vld [vmem:[%s8433_s6 + $0x2c] sm:$0x1] }
  0x91   : > { %7740 = vmatpush3.bf16.msra.mxu1 %v8198_v28  ;;  %7708 = vmatpush3.bf16.msra.mxu0 %v8197_v43  ;;  %v8204_v28 = vld [vmem:[%s10920_s1 + $0x1c0] sm:$0xff]   ;;  %v1575_v34 = vrot.slane %v1574_v24, 4  ;;  %v1590_v52 = vsel %vm8507_vm2, %v1585_v36, %v1589_v29  ;;  %v1905_v5 = vsel %vm8680_vm5, %v1903_v40, %v1904_v31  ;;  %v1611_v56 = vshll.u32 %v8952_v46, 16 }
  0x92   : > { %7741 = vmatprep.subr.bf16.mxu1 %v8200_v39  ;;  %7709 = vmatprep.subr.bf16.mxu0 %v8199_v2  ;;  %v8203_v43 = vld [vmem:[%s10920_s1 + $0x180] sm:$0xff]   ;;  %v1607_v53 = vrot.slane %v1605_v41, 4  ;;  %v6627_v51 = vcombine.low %v1902_v38, %v1905_v5  ;;  %v1598_v42 = vor.u32 %v1597_v50, %v1594_v49  ;;  %v6604_v55 = vrot.slane %v6596_v32, 9  ;;  %v8209_v50 = vld [vmem:[%s10920_s1 + $0x230] sm:$0xff]  }
  0x93   : > { %v1580_v44 = vsel %vm8507_vm2, %v1575_v34, %v1579_v15  ;;  %v1613_v59 = vrot.slane %v1611_v56, 5  ;;  %v1908_v60 = vrot.slane %v6555_v21, 5  ;;  %v1911_v61 = vrot.slane %v8952_v46, 5  ;;  %v8206_v35 = vld [vmem:[%s8433_s6 + $0x24] sm:$0xff]   ;;  %v9026_v56 = vld [vmem:[%s8433_s6 + $0x38] sm:$0x1] }
  0x94   : > { %v6579_v45 = vcombine.low %v1580_v44, %v1590_v52  ;;  %v1608_v57 = vor.u32 %v1607_v53, %v1603_v25  ;;  %7695 = vmatprep.mubr.bf16.mxu1 %v6627_v51  ;;  %v2391_v4 = vshrl.u32 %v6685_v14, 16  ;;  %v2394_v8 = vshll.u32 %v6685_v14, 16  ;;  %v9023_v53 = vld [vmem:[%s8433_s6 + $0x34] sm:$0xf]  ;;  %v6694_v14 = vld [vmem:[%s8433_s6 + $0x3c] sm:$0xf] }
  0x95   : > { %7742 = vmatpush3.bf16.msra.mxu1 %v8200_v39  ;;  %7710 = vmatpush3.bf16.msra.mxu0 %v8199_v2  ;;  %v8968_v39 = vld [vmem:[%s10920_s1 + $0x78] sm:$0xff]   ;;  %v1599_v2 = vrot.slane %v1598_v42, 4  ;;  %v1909_v6 = vsel %vm8680_vm5, %v6604_v55, %v1908_v60  ;;  %v1910_v58 = vrot.slane %v1908_v60, 4  ;;  %v2415_v27 = vshrl.u32 %v6688_v19, 16 }
  0x96   : > { %7743 = vmatprep.subr.bf16.mxu1 %v8202_v47  ;;  %7711 = vmatprep.subr.bf16.mxu0 %v8201_v7  ;;  %v1609_v1 = vrot.slane %v1608_v57, 4  ;;  %v2393_v16 = vrot.slane %v2391_v4, 4  ;;  %v2396_v15 = vrot.slane %v2394_v8, 5  ;;  %v2418_v46 = vshll.u32 %v6688_v19, 16  ;;  %v8210_v4 = vld [vmem:[%s10920_s1 + $0x70] sm:$0xff]  }
  0x97   : > { %7663 = vmatprep.mubr.bf16.mxu0 %v6579_v45  ;;  %v1604_v12 = vsel %vm8507_vm2, %v1599_v2, %v1603_v25  ;;  %v1912_v11 = vsel %vm8680_vm5, %v1910_v58, %v1911_v61  ;;  %v2424_v30 = vshll.u32 %v9003_v26, 16  ;;  %v2428_v29 = vshrl.u32 %v9003_v26, 16  ;;  %v6691_v25 = vld [vmem:[%s8433_s6 + $0x30] sm:$0xf]  ;;  %v9040_v8 = vld [vmem:[%s8433_s6 + $0x40] sm:$0xf] }
  0x98   : > { %v1614_v18 = vsel %vm8507_vm2, %v1609_v1, %v1613_v59  ;;  %v6628_v54 = vcombine.low %v1909_v6, %v1912_v11  ;;  %v2397_v23 = vor.u32 %v2396_v15, %v2393_v16  ;;  %v2434_v10 = vshll.u32 %v9006_v22, 16  ;;  %v9044_v16 = vld [vmem:[%s8433_s6 + $0x44] sm:$0x1] }
  0x99   : > { %7744 = vmatpush3.bf16.msra.mxu1 %v8202_v47  ;;  %7712 = vmatpush3.bf16.msra.mxu0 %v8201_v7  ;;  %v8983_v47 = vld [vmem:[%s8433_s6 + $0x1c] sm:$0xf]  ;;  %v2410_v7 = vshll.u32 %v8986_v3, 16  ;;  %v6580_v20 = vcombine.low %v1604_v12, %v1614_v18  ;;  %v2417_v32 = vrot.slane %v2415_v27, 4  ;;  %v2420_v34 = vrot.slane %v2418_v46, 5  ;;  %v8213_v18 = vld [vmem:[%s10920_s1 + $0x228] sm:$0xff]  }
  0x9a   : > { %7745 = vmatprep.subr.bf16.mxu1 %v8204_v28  ;;  %7713 = vmatprep.subr.bf16.mxu0 %v8203_v43  ;;  %v2400_v17 = vshll.u32 %v8983_v47, 16  ;;  %v2404_v63 = vshrl.u32 %v8983_v47, 16  ;;  %v2398_v31 = vrot.slane %v2397_v23, 4  ;;  %v2426_v48 = vrot.slane %v2424_v30, 5 }
  0x9b   : > { %v2412_v24 = vrot.slane %v2410_v7, 5  ;;  %7664 = vmatmul.mubr.bf16.gmra.mxu0 %v6580_v20  ;;  %7696 = vmatmul.mubr.bf16.gmra.mxu1 %v6628_v54  ;;  %v2430_v36 = vrot.slane %v2428_v29, 4  ;;  %v2436_v38 = vrot.slane %v2434_v10, 5  ;;  %v2421_v41 = vor.u32 %v2420_v34, %v2417_v32  ;;  %v8212_v7 = vld [vmem:[%s8433_s6 + $0x3c] sm:$0xff]   ;;  %v8217_v10 = vld [vmem:[%s8433_s6 + $0x48] sm:$0xff]  }
  0x9c   : > { %v2402_v9 = vrot.slane %v2400_v17, 5  ;;  %v2406_v21 = vrot.slane %v2404_v63, 4  ;;  %7715 = vmatprep.mubr.bf16.mxu0 %v8205_v13  ;;  %v2439_v45 = vshrl.u32 %v6691_v25, 16  ;;  %v2442_v42 = vshll.u32 %v6691_v25, 16  ;;  %v8215_v29 = vld [vmem:[%s10920_s1 + $0x220] sm:$0xff]   ;;  %v8219_v25 = vld [vmem:[%s10920_s1 + $0x218] sm:$0xff]  }
  0x9d   : > { %7746 = vmatpush3.bf16.msra.mxu1 %v8204_v28  ;;  %7714 = vmatpush3.bf16.msra.mxu0 %v8203_v43  ;;  %v8211_v43 = vld [vmem:[%s8433_s6 + $0x30] sm:$0xff]   ;;  %v2431_v49 = vor.u32 %v2430_v36, %v2426_v48  ;;  %v2422_v5 = vrot.slane %v2421_v41, 4  ;;  %v2448_v55 = vshll.u32 %v9023_v53, 16  ;;  %v2452_v57 = vshrl.u32 %v9023_v53, 16 }
  0x9e   : > { %7795 = vmatprep.subr.bf16.mxu1 %v8968_v39  ;;  %7763 = vmatprep.subr.bf16.mxu0 %v8980_v0  ;;  %v2407_v28 = vor.u32 %v2406_v21, %v2402_v9  ;;  %v2403_v40 = vsel %vm8507_vm2, %v2398_v31, %v2402_v9  ;;  %v2441_v60 = vrot.slane %v2439_v45, 4  ;;  %v2458_v61 = vshll.u32 %v9026_v56, 16  ;;  %v8214_v21 = vld [vmem:[%s10920_s1 + $0x68] sm:$0xff]  }
  0x9f   : > { %v2432_v51 = vrot.slane %v2431_v49, 4  ;;  %v2427_v59 = vsel %vm8507_vm2, %v2422_v5, %v2426_v48  ;;  %v2444_v1 = vrot.slane %v2442_v42, 5  ;;  %v2450_v6 = vrot.slane %v2448_v55, 5  ;;  %v6697_v48 = vld [vmem:[%s8433_s6 + $0x48] sm:$0xf] }
  0xa0   : > { %v2408_v62 = vrot.slane %v2407_v28, 4  ;;  %v2454_v58 = vrot.slane %v2452_v57, 4  ;;  %v2460_v13 = vrot.slane %v2458_v61, 5  ;;  %v2463_v17 = vshrl.u32 %v6694_v14, 16  ;;  %v6700_v42 = vld [vmem:[%s8433_s6 + $0x54] sm:$0xf] }
  0xa1   : > { %v2437_v2 = vsel %vm8507_vm2, %v2432_v51, %v2436_v38  ;;  %v2466_v63 = vshll.u32 %v6694_v14, 16  ;;  %v2445_v11 = vor.u32 %v2444_v1, %v2441_v60  ;;  %v2472_v19 = vshll.u32 %v9040_v8, 16  ;;  %v9070_v38 = vld [vmem:[%s8433_s6 + $0x4c] sm:$0xf]  ;;  %v8218_v51 = vld [vmem:[%s8433_s6 + $0x54] sm:$0xff]  }
  0xa2   : > { %v2413_v44 = vsel %vm8507_vm2, %v2408_v62, %v2412_v24  ;;  %v6726_v12 = vcombine.low %v2427_v59, %v2437_v2  ;;  %v2455_v15 = vor.u32 %v2454_v58, %v2450_v6  ;;  %v2476_v20 = vshrl.u32 %v9040_v8, 16  ;;  %v9088_v61 = vld [vmem:[%s8433_s6 + $0x58] sm:$0xf]  ;;  %v8223_v2 = vld [vmem:[%s8433_s6 + $0x60] sm:$0xff]   ;;  %v9095_v1 = vld [vmem:[%s8433_s6 + $0x5c] sm:$0x1] }
  0xa3   : > { %v6725_v52 = vcombine.low %v2403_v40, %v2413_v44  ;;  %7716 = vmatmul.mubr.bf16.vlgmr.msra.gmra.mxu0 %v8206_v35  ;;  %v2468_v54 = vrot.slane %v2466_v63, 5  ;;  %v2482_v9 = vshll.u32 %v9044_v16, 16  ;;  %v2446_v23 = vrot.slane %v2445_v11, 4  ;;  %v8216_v35 = vld [vmem:[%s10920_s1 + $0x60] sm:$0xff]   ;;  %v9073_v40 = vld [vmem:[%s8433_s6 + $0x50] sm:$0x1] }
  0xa4   : > { %7764 = vmatpush3.bf16.msra.mxu0 %v8980_v0  ;;  %7719 = vmatprep.mubr.bf16.mxu0 %v8211_v43  ;;  %v2465_v0 = vrot.slane %v2463_v17, 4  ;;  %v2456_v24 = vrot.slane %v2455_v15, 4  ;;  %v2474_v27 = vrot.slane %v2472_v19, 5  ;;  %v2478_v46 = vrot.slane %v2476_v20, 4  ;;  %v8220_v14 = vld [vmem:[%s10920_s1 + $0x58] sm:$0xff]   ;;  %v8221_v19 = vld [vmem:[%s10920_s1 + $0x210] sm:$0xff]  }
  0xa5   : > { %7747 = vmatprep.mubr.bf16.mxu1 %v6725_v52  ;;  %7765 = vmatprep.subr.bf16.mxu0 %v8209_v50  ;;  %v2484_v30 = vrot.slane %v2482_v9, 5  ;;  %v2451_v31 = vsel %vm8507_vm2, %v2446_v23, %v2450_v6  ;;  %v2487_v41 = vshrl.u32 %v6697_v48, 16  ;;  %v2490_v44 = vshll.u32 %v6697_v48, 16 }
  0xa6   : > { %7748 = vmatmul.mubr.bf16.vlgmr.msra.gmra.mxu1 %v6726_v12  ;;  %v2469_v28 = vor.u32 %v2468_v54, %v2465_v0  ;;  %v2479_v32 = vor.u32 %v2478_v46, %v2474_v27  ;;  %v2496_v49 = vshll.u32 %v9070_v38, 16  ;;  %v2506_v45 = vshll.u32 %v9073_v40, 16 }
  0xa7   : > { %7796 = vmatpush3.bf16.msra.mxu1 %v8968_v39  ;;  %v2461_v39 = vsel %vm8507_vm2, %v2456_v24, %v2460_v13  ;;  %v2489_v5 = vrot.slane %v2487_v41, 4  ;;  %v2492_v57 = vrot.slane %v2490_v44, 5  ;;  %v2511_v6 = vshrl.u32 %v6700_v42, 16 }
  0xa8   : > { %7797 = vmatprep.subr.bf16.mxu1 %v8210_v4  ;;  %7766 = vmatpush3.bf16.msra.mxu0 %v8209_v50  ;;  %v6727_v34 = vcombine.low %v2451_v31, %v2461_v39  ;;  %v2470_v62 = vrot.slane %v2469_v28, 4  ;;  %v2480_v36 = vrot.slane %v2479_v32, 4  ;;  %v2500_v50 = vshrl.u32 %v9070_v38, 16  ;;  %v8224_v31 = vld [vmem:[%s8433_s6 + $0x6c] sm:$0xff]  }
  0xa9   : > { %7767 = vmatprep.subr.bf16.mxu0 %v8213_v18  ;;  %v2498_v59 = vrot.slane %v2496_v49, 5  ;;  %v2514_v58 = vshll.u32 %v6700_v42, 16  ;;  %v2520_v12 = vshll.u32 %v9088_v61, 16  ;;  %v2493_v13 = vor.u32 %v2492_v57, %v2489_v5  ;;  %v8225_v39 = vld [vmem:[%s10920_s1 + $0x208] sm:$0xff]   ;;  %v9136_v57 = vld [vmem:[%s8433_s6 + $0x74] sm:$0x1] }
  0xaa   : > { %7751 = vmatprep.mubr.bf16.mxu1 %v6727_v34  ;;  %v2475_v43 = vsel %vm8507_vm2, %v2470_v62, %v2474_v27  ;;  %v2485_v52 = vsel %vm8507_vm2, %v2480_v36, %v2484_v30  ;;  %v2502_v60 = vrot.slane %v2500_v50, 4  ;;  %v2524_v63 = vshrl.u32 %v9088_v61, 16  ;;  %v9119_v34 = vld [vmem:[%s8433_s6 + $0x68] sm:$0x1] }
  0xab   : > { %7798 = vmatpush3.bf16.msra.mxu1 %v8210_v4  ;;  %7720 = vmatmul.mubr.bf16.gmra.mxu0 %v8212_v7  ;;  %v6728_v55 = vcombine.low %v2475_v43, %v2485_v52  ;;  %v2508_v4 = vrot.slane %v2506_v45, 5  ;;  %v2513_v11 = vrot.slane %v2511_v6, 4  ;;  %v2516_v15 = vrot.slane %v2514_v58, 5  ;;  %v6706_v52 = vld [vmem:[%s8433_s6 + $0x6c] sm:$0xf] }
  0xac   : > { %7799 = vmatprep.subr.bf16.mxu1 %v8214_v21  ;;  %7768 = vmatpush3.bf16.msra.mxu0 %v8213_v18  ;;  %v2503_v17 = vor.u32 %v2502_v60, %v2498_v59  ;;  %v2530_v18 = vshll.u32 %v9095_v1, 16  ;;  %v2522_v7 = vrot.slane %v2520_v12, 5  ;;  %v2494_v20 = vrot.slane %v2493_v13, 4  ;;  %v8226_v5 = vld [vmem:[%s10920_s1 + $0x48] sm:$0xff]   ;;  %v8228_v13 = vld [vmem:[%s10920_s1 + $0x40] sm:$0xff]  }
  0xad   : > { %7723 = vmatprep.mubr.bf16.mxu0 %v8217_v10  ;;  %7769 = vmatprep.subr.bf16.mxu0 %v8215_v29  ;;  %v2526_v54 = vrot.slane %v2524_v63, 4  ;;  %v2517_v23 = vor.u32 %v2516_v15, %v2513_v11  ;;  %v9112_v10 = vld [vmem:[%s8433_s6 + $0x64] sm:$0xf]  ;;  %v2554_v43 = vshll.u32 %v9119_v34, 16  ;;  %v2559_v60 = vshrl.u32 %v6706_v52, 16  ;;  %v9150_v15 = vld [vmem:[%s10920_s1 + $0x38] sm:$0xff]  }
  0xae   : > { %7752 = vmatmul.mubr.bf16.gmra.mxu1 %v6728_v55  ;;  %v2504_v0 = vrot.slane %v2503_v17, 4  ;;  %v2532_v9 = vrot.slane %v2530_v18, 5  ;;  %v2499_v24 = vsel %vm8507_vm2, %v2494_v20, %v2498_v59  ;;  %v2544_v48 = vshll.u32 %v9112_v10, 16  ;;  %v9133_v55 = vld [vmem:[%s8433_s6 + $0x70] sm:$0xf] }
  0xaf   : > { %7800 = vmatpush3.bf16.msra.mxu1 %v8214_v21  ;;  %v8222_v21 = vld [vmem:[%s10920_s1 + $0x50] sm:$0xff]   ;;  %v2527_v46 = vor.u32 %v2526_v54, %v2522_v7  ;;  %v2518_v30 = vrot.slane %v2517_v23, 4  ;;  %v2548_v41 = vshrl.u32 %v9112_v10, 16  ;;  %v2556_v42 = vrot.slane %v2554_v43, 5 }
  0xb0   : > { %7801 = vmatprep.subr.bf16.mxu1 %v8216_v35  ;;  %7770 = vmatpush3.bf16.msra.mxu0 %v8215_v29  ;;  %v2509_v27 = vsel %vm8507_vm2, %v2504_v0, %v2508_v4  ;;  %v6703_v29 = vld [vmem:[%s8433_s6 + $0x60] sm:$0xf]  ;;  %v2572_v58 = vshrl.u32 %v9133_v55, 16  ;;  %v2578_v12 = vshll.u32 %v9136_v57, 16  ;;  %v2561_v63 = vrot.slane %v2559_v60, 4 }
  0xb1   : > { %7771 = vmatprep.subr.bf16.mxu0 %v8219_v25  ;;  %v6729_v28 = vcombine.low %v2499_v24, %v2509_v27  ;;  %v2528_v32 = vrot.slane %v2527_v46, 4  ;;  %v2535_v62 = vshrl.u32 %v6703_v29, 16  ;;  %v2523_v36 = vsel %vm8507_vm2, %v2518_v30, %v2522_v7  ;;  %v8227_v4 = vld [vmem:[%s10920_s1 + $0x200] sm:$0xff]   ;;  %v6741_v24 = vld [vmem:[%s8433_s6 + $0x18] sm:$0xe] }
  0xb2   : > { %v2580_v20 = vrot.slane %v2578_v12, 5  ;;  %v2826_v0 = vrot.slane %v8983_v47, 5  ;;  %v2829_v46 = vrot.slane %v8986_v3, 5  ;;  %v6749_v47 = vrot.slane %v6741_v24, 9 }
  0xb3   : > { %7802 = vmatpush3.bf16.msra.mxu1 %v8216_v35  ;;  %7724 = vmatmul.mubr.bf16.gmra.mxu0 %v8218_v51  ;;  %v2538_v35 = vshll.u32 %v6703_v29, 16  ;;  %v2533_v44 = vsel %vm8507_vm2, %v2528_v32, %v2532_v9  ;;  %v2537_v49 = vrot.slane %v2535_v62, 4  ;;  %v2550_v51 = vrot.slane %v2548_v41, 4  ;;  %v9168_v62 = vld [vmem:[%s8433_s6 + $0x68] sm:$0x1] }
  0xb4   : > { %7803 = vmatprep.subr.bf16.mxu1 %v8220_v14  ;;  %7727 = vmatprep.mubr.bf16.mxu0 %v8223_v2  ;;  %v6730_v45 = vcombine.low %v2523_v36, %v2533_v44  ;;  %v2568_v2 = vshll.u32 %v9133_v55, 16  ;;  %v2828_v27 = vrot.slane %v2826_v0, 4  ;;  %v2827_v41 = vsel %vm8680_vm5, %v6749_v47, %v2826_v0  ;;  %v8231_v47 = vld [vmem:[%s10920_s1 + $0x30] sm:$0xff]  }
  0xb5   : > { %7772 = vmatpush3.bf16.msra.mxu0 %v8219_v25  ;;  %7755 = vmatprep.mubr.bf16.mxu1 %v6729_v28  ;;  %v2540_v50 = vrot.slane %v2538_v35, 5  ;;  %v2546_v25 = vrot.slane %v2544_v48, 5  ;;  %v9160_v28 = vld [vmem:[%s8433_s6 + $0x60] sm:$0xf]  ;;  %v9175_v48 = vld [vmem:[%s10920_s1 + $0xb8] sm:$0xff]   ;;  %v2836_v12 = vrot.slane %v9006_v22, 5 }
  0xb6   : > { %7773 = vmatprep.subr.bf16.mxu0 %v8221_v19  ;;  %7756 = vmatmul.mubr.bf16.gmra.mxu1 %v6730_v45  ;;  %v2570_v11 = vrot.slane %v2568_v2, 5  ;;  %v2830_v32 = vsel %vm8680_vm5, %v2828_v27, %v2829_v46  ;;  %v3231_v3 = vshrl.u32 %v9160_v28, 16  ;;  %v3234_v35 = vshll.u32 %v9160_v28, 16  ;;  %v9195_v2 = vld [vmem:[%s8433_s6 + $0x74] sm:$0x1] }
  0xb7   : > { %7804 = vmatpush3.bf16.msra.mxu1 %v8220_v14  ;;  %v2541_v59 = vor.u32 %v2540_v50, %v2537_v49  ;;  %v2562_v14 = vshll.u32 %v6706_v52, 16  ;;  %v2551_v6 = vor.u32 %v2550_v51, %v2546_v25  ;;  %v6742_v49 = vld [vmem:[%s8433_s6 + $0x24] sm:$0xe]  ;;  %v9185_v50 = vld [vmem:[%s8433_s6 + $0x6c] sm:$0xf]  ;;  %v6773_v52 = vcombine.low %v2827_v41, %v2830_v32 }
  0xb8   : > { %7805 = vmatprep.subr.bf16.mxu1 %v8222_v21  ;;  %v3236_v45 = vrot.slane %v3234_v35, 5  ;;  %v9191_v51 = vld [vmem:[%s8433_s6 + $0x70] sm:$0xf]  ;;  %v3274_v24 = vshll.u32 %v9195_v2, 16  ;;  %v9218_v32 = vld [vmem:[%s8433_s6 + $0x78] sm:$0xf] }
  0xb9   : > { %7774 = vmatpush3.bf16.msra.mxu0 %v8221_v19  ;;  %v2542_v17 = vrot.slane %v2541_v59, 4  ;;  %v2564_v18 = vrot.slane %v2562_v14, 5  ;;  %v2552_v7 = vrot.slane %v2551_v6, 4  ;;  %v2574_v19 = vrot.slane %v2572_v58, 4 }
  0xba   : > { %7775 = vmatprep.subr.bf16.mxu0 %v8225_v39  ;;  %v3250_v14 = vshll.u32 %v9168_v62, 16  ;;  %v6750_v6 = vrot.slane %v6742_v49, 9  ;;  %v2833_v58 = vrot.slane %v9003_v26, 5  ;;  %v3264_v26 = vshll.u32 %v9191_v51, 16 }
  0xbb   : > { %7728 = vmatmul.mubr.bf16.gmra.mxu0 %v8224_v31  ;;  %7806 = vmatpush3.bf16.msra.mxu1 %v8222_v21  ;;  %v2547_v54 = vsel %vm8507_vm2, %v2542_v17, %v2546_v25  ;;  %v2565_v9 = vor.u32 %v2564_v18, %v2561_v63  ;;  %v2557_v21 = vsel %vm8507_vm2, %v2552_v7, %v2556_v42  ;;  %v9163_v31 = vld [vmem:[%s8433_s6 + $0x64] sm:$0xf]  ;;  %v3258_v18 = vshll.u32 %v9185_v50, 16 }
  0xbc   : > { %7807 = vmatprep.subr.bf16.mxu1 %v8226_v5  ;;  %v2575_v23 = vor.u32 %v2574_v19, %v2570_v11  ;;  %v6731_v30 = vcombine.low %v2547_v54, %v2557_v21  ;;  %v3240_v43 = vshll.u32 %v9163_v31, 16  ;;  %v3244_v44 = vshrl.u32 %v9163_v31, 16  ;;  %7779 = vmatprep.mubr.bf16.mxu0 %v6773_v52  ;;  %v9226_v52 = vld [vmem:[%s8433_s6 + $0x80] sm:$0x1] }
  0xbd   : > { %7776 = vmatpush3.bf16.msra.mxu0 %v8225_v39  ;;  %v2566_v29 = vrot.slane %v2565_v9, 4  ;;  %v3252_v63 = vrot.slane %v3250_v14, 5  ;;  %v2834_v7 = vsel %vm8680_vm5, %v6750_v6, %v2833_v58  ;;  %v2835_v19 = vrot.slane %v2833_v58, 4  ;;  %v8233_v58 = vld [vmem:[%s10920_s1 + $0x28] sm:$0xff]  }
  0xbe   : > { %7777 = vmatprep.subr.bf16.mxu0 %v8227_v4  ;;  %v2576_v39 = vrot.slane %v2575_v23, 4  ;;  %7759 = vmatprep.mubr.bf16.mxu1 %v6731_v30  ;;  %v3242_v59 = vrot.slane %v3240_v43, 5  ;;  %v3246_v60 = vrot.slane %v3244_v44, 4  ;;  %v3260_v0 = vrot.slane %v3258_v18, 5  ;;  %v9222_v43 = vld [vmem:[%s8433_s6 + $0x7c] sm:$0xf] }
  0xbf   : > { %7808 = vmatpush3.bf16.msra.mxu1 %v8226_v5  ;;  %v2571_v36 = vsel %vm8507_vm2, %v2566_v29, %v2570_v11  ;;  %v3233_v5 = vrot.slane %v3231_v3, 4  ;;  %v3268_v54 = vshrl.u32 %v9191_v51, 16  ;;  %v2837_v21 = vsel %vm8680_vm5, %v2835_v19, %v2836_v12  ;;  %v8232_v12 = vld [vmem:[%s10920_s1 + $0xb0] sm:$0xff]  }
  0xc0   : > { %7809 = vmatprep.subr.bf16.mxu1 %v8228_v13  ;;  %v2581_v25 = vsel %vm8507_vm2, %v2576_v39, %v2580_v20  ;;  %v3247_v17 = vor.u32 %v3246_v60, %v3242_v59  ;;  %v3266_v23 = vrot.slane %v3264_v26, 5  ;;  %v6774_v46 = vcombine.low %v2834_v7, %v2837_v21  ;;  %v6743_v39 = vld [vmem:[%s8433_s6 + $0x30] sm:$0xe]  ;;  %v6744_v60 = vld [vmem:[%s8433_s6 + $0x3c] sm:$0xe] }
  0xc1   : > { %7778 = vmatpush3.bf16.msra.mxu0 %v8227_v4  ;;  %v6732_v42 = vcombine.low %v2571_v36, %v2581_v25  ;;  %v3237_v4 = vor.u32 %v3236_v45, %v3233_v5  ;;  %v3270_v29 = vrot.slane %v3268_v54, 4  ;;  %v3276_v35 = vrot.slane %v3274_v24, 5 }
  0xc2   : > { %7827 = vmatprep.subr.bf16.mxu0 %v9150_v15  ;;  %v3248_v20 = vrot.slane %v3247_v17, 4  ;;  %v6751_v36 = vrot.slane %v6743_v39, 9  ;;  %v2840_v41 = vrot.slane %v9023_v53, 5  ;;  %v2843_v25 = vrot.slane %v9026_v56, 5 }
  0xc3   : > { %7810 = vmatpush3.bf16.msra.mxu1 %v8228_v13  ;;  %v3255_v13 = vshrl.u32 %v9185_v50, 16  ;;  %v3238_v11 = vrot.slane %v3237_v4, 4  ;;  %v3271_v49 = vor.u32 %v3270_v29, %v3266_v23  ;;  %v3279_v5 = vshrl.u32 %v9218_v32, 16 }
  0xc4   : > { %7859 = vmatprep.subr.bf16.mxu1 %v9175_v48  ;;  %7760 = vmatmul.mubr.bf16.gmra.mxu1 %v6732_v42  ;;  %v3253_v27 = vsel %vm8507_vm2, %v3248_v20, %v3252_v63  ;;  %v2841_v45 = vsel %vm8680_vm5, %v6751_v36, %v2840_v41  ;;  %v2842_v42 = vrot.slane %v2840_v41, 4  ;;  %v3282_v53 = vshll.u32 %v9218_v32, 16 }
  0xc5   : > { %v3257_v22 = vrot.slane %v3255_v13, 4  ;;  %v3243_v9 = vsel %vm8507_vm2, %v3238_v11, %v3242_v59  ;;  %7780 = vmatmul.mubr.bf16.vlgmr.msra.gmra.mxu0 %v6774_v46  ;;  %v3288_v59 = vshll.u32 %v9222_v43, 16  ;;  %v3272_v14 = vrot.slane %v3271_v49, 4  ;;  %v9251_v11 = vld [vmem:[%s8433_s6 + $0x88] sm:$0xf] }
  0xc6   : > { %v6830_v3 = vcombine.low %v3243_v9, %v3253_v27  ;;  %7828 = vmatpush3.bf16.msra.mxu0 %v9150_v15  ;;  %v3281_v4 = vrot.slane %v3279_v5, 4  ;;  %v3292_v6 = vshrl.u32 %v9222_v43, 16  ;;  %v9239_v15 = vld [vmem:[%s8433_s6 + $0x84] sm:$0xf]  ;;  %v2844_v17 = vsel %vm8680_vm5, %v2842_v42, %v2843_v25 }
  0xc7   : > { %v3261_v30 = vor.u32 %v3260_v0, %v3257_v22  ;;  %7829 = vmatprep.subr.bf16.mxu0 %v8231_v47  ;;  %v3284_v63 = vrot.slane %v3282_v53, 5  ;;  %v3290_v13 = vrot.slane %v3288_v59, 5  ;;  %v3298_v18 = vshll.u32 %v9226_v52, 16  ;;  %v9256_v22 = vld [vmem:[%s8433_s6 + $0x8c] sm:$0x1] }
  0xc8   : > { %7811 = vmatprep.mubr.bf16.mxu1 %v6830_v3  ;;  %v3277_v7 = vsel %vm8507_vm2, %v3272_v14, %v3276_v35  ;;  %v6775_v19 = vcombine.low %v2841_v45, %v2844_v17  ;;  %v3294_v26 = vrot.slane %v3292_v6, 4  ;;  %v6752_v20 = vrot.slane %v6744_v60, 9  ;;  %v6745_v59 = vld [vmem:[%s8433_s6 + $0x48] sm:$0xe]  ;;  %v9282_v60 = vld [vmem:[%s8433_s6 + $0x90] sm:$0xf] }
  0xc9   : > { %v3262_v44 = vrot.slane %v3261_v30, 4  ;;  %v3285_v54 = vor.u32 %v3284_v63, %v3281_v4  ;;  %v3300_v9 = vrot.slane %v3298_v18, 5  ;;  %v2847_v21 = vrot.slane %v9040_v8, 5  ;;  %v8235_v30 = vld [vmem:[%s10920_s1 + $0x20] sm:$0xff]   ;;  %v9286_v17 = vld [vmem:[%s8433_s6 + $0x94] sm:$0xf] }
  0xca   : > { %7830 = vmatpush3.bf16.msra.mxu0 %v8231_v47  ;;  %7783 = vmatprep.mubr.bf16.mxu0 %v6775_v19  ;;  %v2850_v24 = vrot.slane %v9044_v16, 5  ;;  %v3303_v27 = vshrl.u32 %v9239_v15, 16  ;;  %v3306_v46 = vshll.u32 %v9239_v15, 16  ;;  %v3312_v8 = vshll.u32 %v9251_v11, 16  ;;  %v8234_v16 = vld [vmem:[%s10920_s1 + $0xa8] sm:$0xff]  }
  0xcb   : > { %v3267_v56 = vsel %vm8507_vm2, %v3262_v44, %v3266_v23  ;;  %v3295_v23 = vor.u32 %v3294_v26, %v3290_v13  ;;  %7831 = vmatprep.subr.bf16.mxu0 %v8233_v58  ;;  %v3286_v29 = vrot.slane %v3285_v54, 4  ;;  %v2848_v47 = vsel %vm8680_vm5, %v6752_v20, %v2847_v21 }
  0xcc   : > { %v6831_v0 = vcombine.low %v3267_v56, %v3277_v7  ;;  %v2849_v39 = vrot.slane %v2847_v21, 4  ;;  %v3305_v35 = vrot.slane %v3303_v27, 4  ;;  %v3308_v36 = vrot.slane %v3306_v46, 5  ;;  %v9293_v7 = vld [vmem:[%s8433_s6 + $0x98] sm:$0x1] }
  0xcd   : > { %v3296_v3 = vrot.slane %v3295_v23, 4  ;;  %v3316_v41 = vshrl.u32 %v9251_v11, 16  ;;  %v3291_v44 = vsel %vm8507_vm2, %v3286_v29, %v3290_v13  ;;  %v3314_v25 = vrot.slane %v3312_v8, 5  ;;  %v8239_v8 = vld [vmem:[%s10920_s1 + $0x10] sm:$0xff]  }
  0xce   : > { %7812 = vmatmul.mubr.bf16.vlgmr.msra.gmra.mxu1 %v6831_v0  ;;  %v2851_v49 = vsel %vm8680_vm5, %v2849_v39, %v2850_v24  ;;  %v3322_v5 = vshll.u32 %v9256_v22, 16  ;;  %7832 = vmatpush3.bf16.msra.mxu0 %v8233_v58  ;;  %v3309_v42 = vor.u32 %v3308_v36, %v3305_v35  ;;  %v6753_v4 = vrot.slane %v6745_v59, 9  ;;  %v8237_v58 = vld [vmem:[%s10920_s1 + $0x18] sm:$0xff]   ;;  %v6746_v0 = vld [vmem:[%s8433_s6 + $0x54] sm:$0xe] }
  0xcf   : > { %7860 = vmatpush3.bf16.msra.mxu1 %v9175_v48  ;;  %v3301_v48 = vsel %vm8507_vm2, %v3296_v3, %v3300_v9  ;;  %v6776_v45 = vcombine.low %v2848_v47, %v2851_v49  ;;  %v3318_v53 = vrot.slane %v3316_v41, 4  ;;  %7833 = vmatprep.subr.bf16.mxu0 %v8235_v30  ;;  %v2854_v6 = vrot.slane %v9070_v38, 5  ;;  %v8236_v38 = vld [vmem:[%s10920_s1 + $0xa0] sm:$0xff]   ;;  %v9308_v24 = vld [vmem:[%s8433_s6 + $0x9c] sm:$0xf] }
  0xd0   : > { %7861 = vmatprep.subr.bf16.mxu1 %v8232_v12  ;;  %v6832_v56 = vcombine.low %v3291_v44, %v3301_v48  ;;  %v3324_v14 = vrot.slane %v3322_v5, 5  ;;  %v3310_v63 = vrot.slane %v3309_v42, 4  ;;  %v2857_v18 = vrot.slane %v9073_v40, 5  ;;  %v9314_v39 = vld [vmem:[%s8433_s6 + $0xa0] sm:$0xf] }
  0xd1   : > { %7784 = vmatmul.mubr.bf16.gmra.mxu0 %v6776_v45  ;;  %v3319_v13 = vor.u32 %v3318_v53, %v3314_v25  ;;  %v3327_v19 = vshrl.u32 %v9282_v60, 16  ;;  %v2856_v26 = vrot.slane %v2854_v6, 4  ;;  %v3330_v20 = vshll.u32 %v9282_v60, 16  ;;  %v9325_v44 = vld [vmem:[%s8433_s6 + $0xa4] sm:$0x1] }
  0xd2   : > { %7815 = vmatprep.mubr.bf16.mxu1 %v6832_v56  ;;  %v3336_v40 = vshll.u32 %v9286_v17, 16  ;;  %v3315_v54 = vsel %vm8507_vm2, %v3310_v63, %v3314_v25  ;;  %7834 = vmatpush3.bf16.msra.mxu0 %v8235_v30  ;;  %v3340_v23 = vshrl.u32 %v9286_v17, 16  ;;  %v3346_v47 = vshll.u32 %v9293_v7, 16  ;;  %v8238_v30 = vld [vmem:[%s10920_s1 + $0x98] sm:$0xff]  }
  0xd3   : > { %7862 = vmatpush3.bf16.msra.mxu1 %v8232_v12  ;;  %v2855_v12 = vsel %vm8680_vm5, %v6753_v4, %v2854_v6  ;;  %v3320_v9 = vrot.slane %v3319_v13, 4  ;;  %v3329_v21 = vrot.slane %v3327_v19, 4  ;;  %v2858_v27 = vsel %vm8680_vm5, %v2856_v26, %v2857_v18  ;;  %7835 = vmatprep.subr.bf16.mxu0 %v8237_v58 }
  0xd4   : > { %7863 = vmatprep.subr.bf16.mxu1 %v8234_v16  ;;  %v3332_v46 = vrot.slane %v3330_v20, 5  ;;  %v3338_v29 = vrot.slane %v3336_v40, 5  ;;  %v6777_v35 = vcombine.low %v2855_v12, %v2858_v27  ;;  %v3342_v36 = vrot.slane %v3340_v23, 4 }
  0xd5   : > { %v3325_v3 = vsel %vm8507_vm2, %v3320_v9, %v3324_v14  ;;  %v6754_v41 = vrot.slane %v6746_v0, 9  ;;  %v3348_v5 = vrot.slane %v3346_v47, 5  ;;  %v2861_v48 = vrot.slane %v9088_v61, 5  ;;  %v8240_v61 = vld [vmem:[%s10920_s1 + $0x90] sm:$0xff]   ;;  %v9350_v9 = vld [vmem:[%s8433_s6 + $0xa8] sm:$0xf] }
  0xd6   : > { %v6833_v49 = vcombine.low %v3315_v54, %v3325_v3  ;;  %v3333_v25 = vor.u32 %v3332_v46, %v3329_v21  ;;  %7787 = vmatprep.mubr.bf16.mxu0 %v6777_v35  ;;  %v3343_v45 = vor.u32 %v3342_v36, %v3338_v29  ;;  %v2864_v42 = vrot.slane %v9095_v1, 5  ;;  %7836 = vmatpush3.bf16.msra.mxu0 %v8237_v58  ;;  %v8241_v1 = vld [vmem:[%s10920_s1 + $0x8] sm:$0xff]   ;;  %v6747_v54 = vld [vmem:[%s8433_s6 + $0x60] sm:$0xe]  ;;  %v9361_v36 = vld [vmem:[%s8433_s6 + $0xb0] sm:$0x1] }
  0xd7   : > { %7864 = vmatpush3.bf16.msra.mxu1 %v8234_v16  ;;  %v3351_v53 = vshrl.u32 %v9308_v24, 16  ;;  %v3354_v59 = vshll.u32 %v9308_v24, 16  ;;  %v2862_v56 = vsel %vm8680_vm5, %v6754_v41, %v2861_v48  ;;  %v2863_v14 = vrot.slane %v2861_v48, 4  ;;  %7837 = vmatprep.subr.bf16.mxu0 %v8239_v8  ;;  %v8243_v47 = vld [vmem:[%s10920_s1] sm:$0xff]   ;;  %v6748_v48 = vld [vmem:[%s8433_s6 + $0x6c] sm:$0xe] }
  0xd8   : > { %7865 = vmatprep.subr.bf16.mxu1 %v8236_v38  ;;  %7816 = vmatmul.mubr.bf16.gmra.mxu1 %v6833_v49  ;;  %v3334_v16 = vrot.slane %v3333_v25, 4  ;;  %v3360_v4 = vshll.u32 %v9314_v39, 16  ;;  %v3344_v6 = vrot.slane %v3343_v45, 4  ;;  %v3364_v13 = vshrl.u32 %v9314_v39, 16 }
  0xd9   : > { %v3353_v58 = vrot.slane %v3351_v53, 4  ;;  %v3356_v63 = vrot.slane %v3354_v59, 5  ;;  %v2865_v19 = vsel %vm8680_vm5, %v2863_v14, %v2864_v42  ;;  %v3370_v26 = vshll.u32 %v9325_v44, 16  ;;  %v9376_v59 = vld [vmem:[%s8433_s6 + $0xb4] sm:$0xf] }
  0xda   : > { %v3339_v18 = vsel %vm8507_vm2, %v3334_v16, %v3338_v29  ;;  %v3362_v12 = vrot.slane %v3360_v4, 5  ;;  %v6778_v20 = vcombine.low %v2862_v56, %v2865_v19  ;;  %v3366_v0 = vrot.slane %v3364_v13, 4  ;;  %7838 = vmatpush3.bf16.msra.mxu0 %v8239_v8  ;;  %v9354_v29 = vld [vmem:[%s8433_s6 + $0xac] sm:$0xf] }
  0xdb   : > { %7866 = vmatpush3.bf16.msra.mxu1 %v8236_v38  ;;  %v3349_v38 = vsel %vm8507_vm2, %v3344_v6, %v3348_v5  ;;  %v3357_v40 = vor.u32 %v3356_v63, %v3353_v58  ;;  %v3372_v23 = vrot.slane %v3370_v26, 5  ;;  %v6755_v27 = vrot.slane %v6747_v54, 9  ;;  %7839 = vmatprep.subr.bf16.mxu0 %v8241_v1  ;;  %v9382_v6 = vld [vmem:[%s8433_s6 + $0xb8] sm:$0xf]  ;;  %v8244_v58 = vld [vmem:[%s10920_s1 + $0x80] sm:$0xff]  }
  0xdc   : > { %7867 = vmatprep.subr.bf16.mxu1 %v8238_v30  ;;  %v6834_v21 = vcombine.low %v3339_v18, %v3349_v38  ;;  %v2868_v46 = vrot.slane %v9112_v10, 5  ;;  %7788 = vmatmul.mubr.bf16.gmra.mxu0 %v6778_v20  ;;  %v3367_v35 = vor.u32 %v3366_v0, %v3362_v12  ;;  %v2871_v8 = vrot.slane %v9119_v34, 5  ;;  %v8242_v34 = vld [vmem:[%s10920_s1 + $0x88] sm:$0xff]   ;;  %v9390_v63 = vld [vmem:[%s10920_s1 + $0xf8] sm:$0xff]  }
  0xdd   : > { %v3358_v3 = vrot.slane %v3357_v40, 4  ;;  %v3375_v41 = vshrl.u32 %v9350_v9, 16  ;;  %v3378_v25 = vshll.u32 %v9350_v9, 16  ;;  %v3384_v5 = vshll.u32 %v9354_v29, 16 }
  0xde   : > { %7819 = vmatprep.mubr.bf16.mxu1 %v6834_v21  ;;  %v2869_v10 = vsel %vm8680_vm5, %v6755_v27, %v2868_v46  ;;  %v2870_v49 = vrot.slane %v2868_v46, 4  ;;  %v3368_v45 = vrot.slane %v3367_v35, 4  ;;  %v3388_v53 = vshrl.u32 %v9354_v29, 16  ;;  %7840 = vmatpush3.bf16.msra.mxu0 %v8241_v1 }
  0xdf   : > { %7868 = vmatpush3.bf16.msra.mxu1 %v8238_v30  ;;  %v3363_v30 = vsel %vm8507_vm2, %v3358_v3, %v3362_v12  ;;  %v3377_v42 = vrot.slane %v3375_v41, 4  ;;  %v3380_v56 = vrot.slane %v3378_v25, 5  ;;  %v3386_v14 = vrot.slane %v3384_v5, 5  ;;  %7841 = vmatprep.subr.bf16.mxu0 %v8243_v47  ;;  %v9395_v12 = vld [vmem:[%s8433_s6 + $0xbc] sm:$0x1] }
  0xe0   : > { %7869 = vmatprep.subr.bf16.mxu1 %v8240_v61  ;;  %v2872_v16 = vsel %vm8680_vm5, %v2870_v49, %v2871_v8  ;;  %v3394_v4 = vshll.u32 %v9361_v36, 16  ;;  %v3373_v1 = vsel %vm8507_vm2, %v3368_v45, %v3372_v23  ;;  %v3390_v18 = vrot.slane %v3388_v53, 4  ;;  %v6862_v45 = vld [vmem:[%s8433_s6 + $0x60] sm:$0xe] }
  0xe1   : > { %v6779_v13 = vcombine.low %v2869_v10, %v2872_v16  ;;  %v6756_v19 = vrot.slane %v6748_v48, 9  ;;  %v6835_v26 = vcombine.low %v3363_v30, %v3373_v1  ;;  %v3381_v38 = vor.u32 %v3380_v56, %v3377_v42  ;;  %v6863_v42 = vld [vmem:[%s8433_s6 + $0x6c] sm:$0xe] }
  0xe2   : > { %v3396_v20 = vrot.slane %v3394_v4, 5  ;;  %v2875_v40 = vrot.slane %v9133_v55, 5  ;;  %v3391_v0 = vor.u32 %v3390_v18, %v3386_v14  ;;  %v2878_v54 = vrot.slane %v9136_v57, 5  ;;  %7842 = vmatpush3.bf16.msra.mxu0 %v8243_v47 }
  0xe3   : > { %7870 = vmatpush3.bf16.msra.mxu1 %v8240_v61  ;;  %7791 = vmatprep.mubr.bf16.mxu0 %v6779_v13  ;;  %v3399_v21 = vshrl.u32 %v9376_v59, 16  ;;  %v3402_v23 = vshll.u32 %v9376_v59, 16  ;;  %v3382_v61 = vrot.slane %v3381_v38, 4  ;;  %v3408_v3 = vshll.u32 %v9382_v6, 16 }
  0xe4   : > { %7871 = vmatprep.subr.bf16.mxu1 %v8242_v34  ;;  %7820 = vmatmul.mubr.bf16.gmra.mxu1 %v6835_v26  ;;  %v2876_v27 = vsel %vm8680_vm5, %v6756_v19, %v2875_v40  ;;  %v2877_v46 = vrot.slane %v2875_v40, 4  ;;  %v3392_v55 = vrot.slane %v3391_v0, 4  ;;  %v3412_v8 = vshrl.u32 %v9382_v6, 16 }
  0xe5   : > { %7891 = vmatprep.subr.bf16.mxu0 %v9390_v63  ;;  %v3401_v35 = vrot.slane %v3399_v21, 4  ;;  %v3404_v57 = vrot.slane %v3402_v23, 5  ;;  %v3387_v47 = vsel %vm8507_vm2, %v3382_v61, %v3386_v14  ;;  %v3410_v10 = vrot.slane %v3408_v3, 5  ;;  %v6864_v61 = vld [vmem:[%s8433_s6 + $0x78] sm:$0xe] }
  0xe6   : > { %v2879_v41 = vsel %vm8680_vm5, %v2877_v46, %v2878_v54  ;;  %v3418_v49 = vshll.u32 %v9395_v12, 16  ;;  %v3397_v25 = vsel %vm8507_vm2, %v3392_v55, %v3396_v20  ;;  %v3414_v30 = vrot.slane %v3412_v8, 4 }
  0xe7   : > { %7872 = vmatpush3.bf16.msra.mxu1 %v8242_v34  ;;  %v6780_v5 = vcombine.low %v2876_v27, %v2879_v41  ;;  %v3405_v48 = vor.u32 %v3404_v57, %v3401_v35  ;;  %v9418_v34 = vld [vmem:[%s10920_s1 + $0x138] sm:$0xff]   ;;  %v6836_v53 = vcombine.low %v3387_v47, %v3397_v25  ;;  %v6846_v56 = vcombine.low %v9160_v28, %v9163_v31  ;;  %v6865_v27 = vld [vmem:[%s8433_s6 + $0x84] sm:$0xe] }
  0xe8   : > { %7873 = vmatprep.subr.bf16.mxu1 %v8244_v58  ;;  %v3420_v16 = vrot.slane %v3418_v49, 5  ;;  %v6870_v14 = vrot.slane %v6862_v45, 9  ;;  %v3415_v1 = vor.u32 %v3414_v30, %v3410_v10  ;;  %v3834_v13 = vrot.slane %v9163_v31, 5  ;;  %v6866_v45 = vld [vmem:[%s8433_s6 + $0x90] sm:$0xe] }
  0xe9   : > { %7792 = vmatmul.mubr.bf16.gmra.mxu0 %v6780_v5  ;;  %v3406_v4 = vrot.slane %v3405_v48, 4  ;;  %v3837_v18 = vrot.slane %v9168_v62, 5  ;;  %7823 = vmatprep.mubr.bf16.mxu1 %v6836_v53  ;;  %v6871_v19 = vrot.slane %v6863_v42, 9  ;;  %v3841_v26 = vrot.slane %v9191_v51, 5 }
  0xea   : > { %7843 = vmatprep.mubr.bf16.mxu0 %v6846_v56  ;;  %v3416_v28 = vrot.slane %v3415_v1, 4  ;;  %v3835_v20 = vsel %vm8680_vm5, %v6870_v14, %v3834_v13  ;;  %v3836_v40 = vrot.slane %v3834_v13, 4  ;;  %v6847_v31 = vcombine.low %v9185_v50, %v9191_v51  ;;  %v8250_v1 = vld [vmem:[%s10920_s1 + $0x130] sm:$0xff]   ;;  %v6867_v13 = vld [vmem:[%s8433_s6 + $0x9c] sm:$0xe] }
  0xeb   : > { %7874 = vmatpush3.bf16.msra.mxu1 %v8244_v58  ;;  %v3411_v38 = vsel %vm8507_vm2, %v3406_v4, %v3410_v10  ;;  %v3844_v62 = vrot.slane %v9195_v2, 5  ;;  %v3848_v58 = vrot.slane %v9222_v43, 5  ;;  %v3843_v21 = vrot.slane %v3841_v26, 4  ;;  %v8249_v2 = vld [vmem:[%s10920_s1 + $0xf0] sm:$0xff]   ;;  %v8253_v10 = vld [vmem:[%s10920_s1 + $0xe8] sm:$0xff]  }
  0xec   : > { %7923 = vmatprep.subr.bf16.mxu1 %v9418_v34  ;;  %v3421_v0 = vsel %vm8507_vm2, %v3416_v28, %v3420_v16  ;;  %v3838_v54 = vsel %vm8680_vm5, %v3836_v40, %v3837_v18  ;;  %v6848_v23 = vcombine.low %v9218_v32, %v9222_v43  ;;  %v6872_v55 = vrot.slane %v6864_v61, 9 }
  0xed   : > { %v6837_v46 = vcombine.low %v3411_v38, %v3421_v0  ;;  %v6894_v3 = vcombine.low %v3835_v20, %v3838_v54  ;;  %v3851_v50 = vrot.slane %v9226_v52, 5  ;;  %v3850_v35 = vrot.slane %v3848_v58, 4  ;;  %v6868_v20 = vld [vmem:[%s8433_s6 + $0xa8] sm:$0xe] }
  0xee   : > { %v3855_v57 = vrot.slane %v9251_v11, 5  ;;  %v3862_v32 = vrot.slane %v9286_v17, 5  ;;  %v3842_v47 = vsel %vm8680_vm5, %v6871_v19, %v3841_v26  ;;  %v3845_v52 = vsel %vm8680_vm5, %v3843_v21, %v3844_v62  ;;  %v8254_v54 = vld [vmem:[%s10920_s1 + $0x128] sm:$0xff]  }
  0xef   : > { %7824 = vmatmul.mubr.bf16.gmra.mxu1 %v6837_v46  ;;  %v6873_v41 = vrot.slane %v6865_v27, 9  ;;  %v3849_v25 = vsel %vm8680_vm5, %v6872_v55, %v3848_v58  ;;  %v3852_v5 = vsel %vm8680_vm5, %v3850_v35, %v3851_v50  ;;  %v3858_v30 = vrot.slane %v9256_v22, 5  ;;  %v8255_v58 = vld [vmem:[%s10920_s1 + $0xe0] sm:$0xff]  }
  0xf0   : > { %7875 = vmatprep.mubr.bf16.mxu1 %v6894_v3  ;;  %v3857_v48 = vrot.slane %v3855_v57, 4  ;;  %v6874_v53 = vrot.slane %v6866_v45, 9  ;;  %v3864_v16 = vrot.slane %v3862_v32, 4  ;;  %v3865_v56 = vrot.slane %v9293_v7, 5 }
  0xf1   : > { %7844 = vmatmul.mubr.bf16.vlgmr.msra.gmra.mxu0 %v6847_v31  ;;  %v6895_v4 = vcombine.low %v3842_v47, %v3845_v52  ;;  %v6896_v22 = vcombine.low %v3849_v25, %v3852_v5  ;;  %v6849_v7 = vcombine.low %v9239_v15, %v9251_v11  ;;  %v6850_v28 = vcombine.low %v9282_v60, %v9286_v17  ;;  %v9495_v60 = vld [vmem:[%s8433_s6 + $0xb4] sm:$0xe]  ;;  %v9522_v52 = vld [vmem:[%s10920_s1 + $0x120] sm:$0xff]   ;;  %v9538_v5 = vld [vmem:[%s8433_s6 + $0x70] sm:$0xf] }
  0xf2   : > { %7892 = vmatpush3.bf16.msra.mxu0 %v9390_v63  ;;  %7847 = vmatprep.mubr.bf16.mxu0 %v6848_v23  ;;  %v3869_v63 = vrot.slane %v9314_v39, 5  ;;  %v9485_v31 = vsel %vm8680_vm5, %v6873_v41, %v3855_v57  ;;  %v3859_v62 = vsel %vm8680_vm5, %v3857_v48, %v3858_v30  ;;  %v3872_v15 = vrot.slane %v9325_v44, 5  ;;  %v9541_v48 = vld [vmem:[%s8433_s6 + $0x74] sm:$0x1] }
  0xf3   : > { %7893 = vmatprep.subr.bf16.mxu0 %v8249_v2  ;;  %v3876_v11 = vrot.slane %v9354_v29, 5  ;;  %v6875_v21 = vrot.slane %v6867_v13, 9  ;;  %v6876_v61 = vrot.slane %v6868_v20, 9  ;;  %v3879_v27 = vrot.slane %v9361_v36, 5  ;;  %v6961_v13 = vld [vmem:[%s8433_s6 + $0x78] sm:$0xf] }
  0xf4   : > { %v3871_v23 = vrot.slane %v3869_v63, 4  ;;  %v3866_v44 = vsel %vm8680_vm5, %v3864_v16, %v3865_v56  ;;  %v6877_v46 = vrot.slane %v9495_v60, 9  ;;  %v3883_v3 = vrot.slane %v9382_v6, 5 }
  0xf5   : > { %v3863_v36 = vsel %vm8680_vm5, %v6874_v53, %v3862_v32  ;;  %v3886_v35 = vrot.slane %v9395_v12, 5  ;;  %v6897_v32 = vcombine.low %v9485_v31, %v3859_v62  ;;  %v9526_v41 = vsel %vm8680_vm5, %v6875_v21, %v3869_v63  ;;  %v9569_v62 = vld [vmem:[%s8433_s6 + $0x7c] sm:$0xf] }
  0xf6   : > { %7894 = vmatpush3.bf16.msra.mxu0 %v8249_v2  ;;  %v3878_v2 = vrot.slane %v3876_v11, 4  ;;  %v6852_v25 = vcombine.low %v9350_v9, %v9354_v29  ;;  %v3885_v16 = vrot.slane %v3883_v3, 4  ;;  %v4373_v56 = vshll.u32 %v9538_v5, 16 }
  0xf7   : > { %7895 = vmatprep.subr.bf16.mxu0 %v8253_v10  ;;  %7876 = vmatmul.mubr.bf16.vlgmr.msra.gmra.mxu1 %v6895_v4  ;;  %v4377_v9 = vshrl.u32 %v9538_v5, 16  ;;  %v4383_v29 = vshll.u32 %v9541_v48, 16  ;;  %v4401_v21 = vshrl.u32 %v9569_v62, 16 }
  0xf8   : > { %7924 = vmatpush3.bf16.msra.mxu1 %v9418_v34  ;;  %7879 = vmatprep.mubr.bf16.mxu1 %v6896_v22  ;;  %v8259_v34 = vld [vmem:[%s10920_s1 + $0xd8] sm:$0xff]   ;;  %v9566_v20 = vrot.slane %v4373_v56, 5 }
  0xf9   : > { %7925 = vmatprep.subr.bf16.mxu1 %v8250_v1  ;;  %7848 = vmatmul.mubr.bf16.gmra.mxu0 %v6849_v7  ;;  %v8261_v7 = vld [vmem:[%s10920_s1 + $0xd0] sm:$0xff]   ;;  %v4379_v31 = vrot.slane %v4377_v9, 4  ;;  %v6853_v9 = vcombine.low %v9376_v59, %v9382_v6  ;;  %v9621_v59 = vsel %vm8680_vm5, %v3885_v16, %v3886_v35  ;;  %v9645_v16 = vld [vmem:[%s10920_s1 + $0x108] sm:$0xff]  }
  0xfa   : > { %7896 = vmatpush3.bf16.msra.mxu0 %v8253_v10  ;;  %7851 = vmatprep.mubr.bf16.mxu0 %v6850_v28  ;;  %v9530_v10 = vsel %vm8680_vm5, %v3871_v23, %v3872_v15  ;;  %v9564_v28 = vsel %vm8680_vm5, %v3878_v2, %v3879_v27  ;;  %v8260_v27 = vld [vmem:[%s10920_s1 + $0x118] sm:$0xff]  }
  0xfb   : > { %7897 = vmatprep.subr.bf16.mxu0 %v8255_v58  ;;  %v6899_v63 = vcombine.low %v9526_v41, %v9530_v10 }
  0xfc   : > { %7926 = vmatpush3.bf16.msra.mxu1 %v8250_v1 }
  0xfd   : > { %7927 = vmatprep.subr.bf16.mxu1 %v8254_v54 }
  0xfe   : > { %7898 = vmatpush3.bf16.msra.mxu0 %v8255_v58  ;;  %v4388_v58 = vshrl.u32 %v6961_v13, 16 }
  0xff   : > { %v7525_v51 = vpop.f32.mrf.mxu0  ;;  %7880 = vmatmul.mubr.bf16.gmra.mxu1 %v6897_v32  ;;  %7899 = vmatprep.subr.bf16.mxu0 %v8259_v34 }
 0x100   : > { %v7557_v8 = vpop.f32.mrf.mxu1  ;;  %7928 = vmatpush3.bf16.msra.mxu1 %v8254_v54  ;;  %v4380_v54 = vor.u32 %v4379_v31, %v9566_v20 }
 0x101   : > { %v607_v43 = vpop.f32.mrf.mxu0  ;;  %v9470_v19 = vadd.f32 %v7557_v8, %v7525_v51  ;;  %v6851_v8 = vcombine.low %v9308_v24, %v9314_v39  ;;  %v6898_v39 = vcombine.low %v3863_v36, %v3866_v44  ;;  %7929 = vmatprep.subr.bf16.mxu1 %v9522_v52  ;;  %v9581_v44 = vrot.slane %v4383_v29, 5  ;;  %v8269_v29 = vld [vmem:[%s8433_s6 + $0x6c] sm:$0xff]  }
 0x102   : > { %v800_v49 = vpop.f32.mrf.mxu1  ;;  %7900 = vmatpush3.bf16.msra.mxu0 %v8259_v34  ;;  %v8265_v34 = vld [vmem:[%s10920_s1 + $0xc8] sm:$0xff]  }
 0x103   : > { %v7526_v42 = vpop.f32.mrf.mxu0  ;;  %v9472_v26 = vadd.f32 %v800_v49, %v607_v43  ;;  %v6958_v49 = vld [vmem:[%s8433_s6 + $0x6c] sm:$0xf]  ;;  %7883 = vmatprep.mubr.bf16.mxu1 %v6898_v39  ;;  %7852 = vmatmul.mubr.bf16.gmra.mxu0 %v6851_v8 }
 0x104   : > { %v7558_v14 = vpop.f32.mrf.mxu1  ;;  %v4364_v30 = vshrl.u32 %v6958_v49, 16  ;;  %v4367_v45 = vshll.u32 %v6958_v49, 16  ;;  %7855 = vmatprep.mubr.bf16.mxu0 %v6852_v25  ;;  %7901 = vmatprep.subr.bf16.mxu0 %v8261_v7  ;;  %v9590_v49 = vld [vmem:[%s10920_s1 + $0x110] sm:$0xff]   ;;  %v4381_v25 = vrot.slane %v4380_v54, 4 }
 0x105   : > { %v9468_v18 = vpop.f32.mrf.mxu0  ;;  %v9481_v40 = vadd.f32 %v7558_v14, %v7526_v42  ;;  %v9556_v14 = vsel %vm8680_vm5, %v6876_v61, %v3876_v11  ;;  %v9572_v11 = vld [vmem:[%s8433_s6 + $0x80] sm:$0x1]  ;;  %7930 = vmatpush3.bf16.msra.mxu1 %v9522_v52  ;;  %v9615_v52 = vsel %vm8680_vm5, %v6877_v46, %v3883_v3  ;;  %v6964_v3 = vld [vmem:[%s8433_s6 + $0x84] sm:$0xf] }
 0x106   : > { %v9474_v38 = vpop.f32.mrf.mxu1  ;;  %v4366_v4 = vrot.slane %v4364_v30, 4  ;;  %v4369_v1 = vrot.slane %v4367_v45, 5  ;;  %v6900_v56 = vcombine.low %v9556_v14, %v9564_v28  ;;  %7931 = vmatprep.subr.bf16.mxu1 %v8260_v27  ;;  %v9626_v14 = vld [vmem:[%s10920_s1 + $0xc0] sm:$0xff]   ;;  %7902 = vmatpush3.bf16.msra.mxu0 %v8261_v7  ;;  %v4386_v28 = vsel %vm8507_vm2, %v4381_v25, %v9581_v44  ;;  %v6967_v44 = vld [vmem:[%s8433_s6 + $0x90] sm:$0xf] }
 0x107   : > { %v7529_v17 = vpop.f32.mrf.mxu0  ;;  %7884 = vmatmul.mubr.bf16.gmra.mxu1 %v6899_v63  ;;  %7903 = vmatprep.subr.bf16.mxu0 %v8265_v34  ;;  %v4412_v41 = vshrl.u32 %v6964_v3, 16  ;;  %v4415_v10 = vshll.u32 %v6964_v3, 16  ;;  %v6901_v63 = vcombine.low %v9615_v52, %v9621_v59 }
 0x108   : > { %v7561_v0 = vpop.f32.mrf.mxu1  ;;  %v4370_v15 = vor.u32 %v4369_v1, %v4366_v4  ;;  %7887 = vmatprep.mubr.bf16.mxu1 %v6900_v56  ;;  %v4436_v56 = vshrl.u32 %v6967_v44, 16 }
 0x109   : > { %v9506_v55 = vadd.f32 %v7561_v0, %v7529_v17  ;;  %v623_v50 = vpop.f32.mrf.mxu0  ;;  %v4391_v17 = vshll.u32 %v6961_v13, 16  ;;  %v4397_v0 = vshll.u32 %v9569_v62, 16  ;;  %7932 = vmatpush3.bf16.msra.mxu1 %v8260_v27  ;;  %v4417_v27 = vrot.slane %v4415_v10, 5 }
 0x10a   : > { %v816_v51 = vpop.f32.mrf.mxu1  ;;  %v4371_v39 = vrot.slane %v4370_v15, 4  ;;  %v9657_v15 = vld [vmem:[%s8433_s6 + $0x8c] sm:$0x1]  ;;  %7933 = vmatprep.subr.bf16.mxu1 %v9590_v49  ;;  %7904 = vmatpush3.bf16.msra.mxu0 %v8265_v34  ;;  %v9684_v34 = vld [vmem:[%s10920_s1 + $0x100] sm:$0xff]  }
 0x10b   : > { %v9514_v57 = vadd.f32 %v816_v51, %v623_v50  ;;  %v7530_v43 = vpop.f32.mrf.mxu0  ;;  %v4390_v50 = vrot.slane %v4388_v58, 4  ;;  %v4407_v51 = vshll.u32 %v9572_v11, 16  ;;  %v4393_v36 = vrot.slane %v4391_v17, 5  ;;  %v9654_v58 = vld [vmem:[%s8433_s6 + $0x88] sm:$0xf]  ;;  %7856 = vmatmul.mubr.bf16.gmra.mxu0 %v6853_v9  ;;  %7905 = vmatprep.subr.bf16.mxu0 %v9626_v14 }
 0x10c   : > { %v7562_v47 = vpop.f32.mrf.mxu1  ;;  %v9584_v2 = vrot.slane %v4397_v0, 5  ;;  %v4376_v7 = vsel %vm8507_vm2, %v4371_v39, %v9566_v20  ;;  %v9663_v17 = vadd.f32 %v9474_v38, %v9468_v18  ;;  %v4421_v20 = vshll.u32 %v9654_v58, 16  ;;  %7907 = vmatprep.mubr.bf16.mxu0 %v8269_v29  ;;  %v8271_v39 = vld [vmem:[%s10920_s1 + $0x178] sm:$0xff]  }
 0x10d   : > { %v9533_v24 = vadd.f32 %v7562_v47, %v7530_v43  ;;  %v9543_v42 = vpop.f32.mrf.mxu0  ;;  %v4403_v43 = vrot.slane %v4401_v21, 4  ;;  %v9595_v30 = vrot.slane %v4407_v51, 5  ;;  %v4394_v4 = vor.u32 %v4393_v36, %v4390_v50  ;;  %v9675_v36 = vld [vmem:[%s8433_s6 + $0x94] sm:$0xf]  ;;  %7934 = vmatpush3.bf16.msra.mxu1 %v9590_v49  ;;  %v8270_v29 = vld [vmem:[%s8433_s6 + $0x78] sm:$0xff]  }
 0x10e   : > { %v9545_v53 = vpop.f32.mrf.mxu1  ;;  %v4425_v0 = vshrl.u32 %v9654_v58, 16  ;;  %v4431_v54 = vshll.u32 %v9657_v15, 16  ;;  %v6998_v18 = vcombine.low %v4376_v7, %v4386_v28  ;;  %v4423_v50 = vrot.slane %v4421_v20, 5  ;;  %7935 = vmatprep.subr.bf16.mxu1 %v9645_v16  ;;  %v9703_v49 = vld [vmem:[%s10920_s1 + $0x170] sm:$0xff]   ;;  %v8275_v7 = vld [vmem:[%s8433_s6 + $0x84] sm:$0xff]   ;;  %7906 = vmatpush3.bf16.msra.mxu0 %v9626_v14 }
 0x10f   : > { %v7533_v23 = vpop.f32.mrf.mxu0  ;;  %v4404_v6 = vor.u32 %v4403_v43, %v9584_v2  ;;  %v9631_v46 = vrot.slane %v4394_v4, 4  ;;  %v9678_v43 = vld [vmem:[%s8433_s6 + $0x98] sm:$0x1]  ;;  %v4439_v9 = vshll.u32 %v6967_v44, 16  ;;  %v4449_v52 = vshrl.u32 %v9675_v36, 16  ;;  %7888 = vmatmul.mubr.bf16.gmra.mxu1 %v6901_v63  ;;  %7955 = vmatprep.subr.bf16.mxu0 %v8271_v39 }
 0x110   : > { %v7565_v22 = vpop.f32.mrf.mxu1  ;;  %v4427_v51 = vrot.slane %v4425_v0, 4  ;;  %v4433_v25 = vrot.slane %v4431_v54, 5  ;;  %v4455_v59 = vshll.u32 %v9678_v43, 16  ;;  %7939 = vmatprep.mubr.bf16.mxu1 %v6998_v18  ;;  %v6970_v18 = vld [vmem:[%s8433_s6 + $0x9c] sm:$0xf] }
 0x111   : > { %v639_v47 = vpop.f32.mrf.mxu0  ;;  %v9597_v45 = vadd.f32 %v7565_v22, %v7533_v23  ;;  %v4405_v23 = vrot.slane %v4404_v6, 4  ;;  %v4400_v38 = vsel %vm8507_vm2, %v9631_v46, %v9584_v2  ;;  %v4441_v10 = vrot.slane %v4439_v9, 5  ;;  %7936 = vmatpush3.bf16.msra.mxu1 %v9645_v16  ;;  %v9730_v16 = vld [vmem:[%s10920_s1 + $0x168] sm:$0xff]  }
 0x112   : > { %v832_v61 = vpop.f32.mrf.mxu1  ;;  %v4428_v4 = vor.u32 %v4427_v51, %v4423_v50  ;;  %7937 = vmatprep.subr.bf16.mxu1 %v9684_v34 }
 0x113   : > { %v9605_v1 = vadd.f32 %v832_v61, %v639_v47  ;;  %v7534_v13 = vpop.f32.mrf.mxu0  ;;  %v4414_v61 = vrot.slane %v4412_v41, 4  ;;  %v4410_v3 = vsel %vm8507_vm2, %v4405_v23, %v9595_v30  ;;  %v4438_v41 = vrot.slane %v4436_v56, 4  ;;  %v9710_v30 = vld [vmem:[%s10920_s1 + $0x1b8] sm:$0xff]   ;;  %7908 = vmatmul.mubr.bf16.vlgmr.msra.gmra.mxu0 %v8270_v29 }
 0x114   : > { %v7566_v32 = vpop.f32.mrf.mxu1  ;;  %v4429_v20 = vrot.slane %v4428_v4, 4  ;;  %7956 = vmatpush3.bf16.msra.mxu0 %v8271_v39  ;;  %7911 = vmatprep.mubr.bf16.mxu0 %v8275_v7  ;;  %v4460_v29 = vshrl.u32 %v6970_v18, 16 }
 0x115   : > { %v9629_v60 = vadd.f32 %v7566_v32, %v7534_v13  ;;  %v9635_v22 = vpop.f32.mrf.mxu0  ;;  %v4418_v2 = vor.u32 %v4417_v27, %v4414_v61  ;;  %v4445_v13 = vshll.u32 %v9675_v36, 16  ;;  %v4451_v61 = vrot.slane %v4449_v52, 4  ;;  %v9739_v52 = vld [vmem:[%s8433_s6 + $0xa4] sm:$0x1]  ;;  %7957 = vmatprep.subr.bf16.mxu0 %v9703_v49  ;;  %7938 = vmatpush3.bf16.msra.mxu1 %v9684_v34  ;;  %v9767_v34 = vld [vmem:[%s8433_s6 + $0xac] sm:$0xf] }
 0x116   : > { %v9607_v31 = vpop.f32.mrf.mxu1  ;;  %v4457_v27 = vrot.slane %v4455_v59, 5  ;;  %v4442_v51 = vor.u32 %v4441_v10, %v4438_v41  ;;  %v4434_v63 = vsel %vm8507_vm2, %v4429_v20, %v4433_v25  ;;  %v9734_v25 = vld [vmem:[%s8433_s6 + $0xa0] sm:$0xf]  ;;  %v8276_v10 = vld [vmem:[%s8433_s6 + $0x90] sm:$0xff]   ;;  %7987 = vmatprep.subr.bf16.mxu1 %v9710_v30 }
 0x117   : > { %10928 = vst [vmem:[#allocation5_spill] sm:$0xff] %v9607_v31  ;;  %v7537_v47 = vpop.f32.mrf.mxu0  ;;  %v4419_v28 = vrot.slane %v4418_v2, 4  ;;  %v4447_v0 = vrot.slane %v4445_v13, 5  ;;  %v4469_v59 = vshll.u32 %v9734_v25, 16  ;;  %v4473_v7 = vshrl.u32 %v9734_v25, 16 }
 0x118   : > { %v9637_v35 = vpop.f32.mrf.mxu1  ;;  %7958 = vmatpush3.bf16.msra.mxu0 %v9703_v49  ;;  %v8279_v49 = vld [vmem:[%s10920_s1 + $0x160] sm:$0xff]  }
 0x119   : > { %v655_v6 = vpop.f32.mrf.mxu0  ;;  %v4424_v23 = vsel %vm8507_vm2, %v4419_v28, %v4423_v50  ;;  %v9715_v14 = vadd.f32 %v9637_v35, %v7537_v47  ;;  %v4452_v2 = vor.u32 %v4451_v61, %v4447_v0  ;;  %v6999_v50 = vcombine.low %v4400_v38, %v4410_v3  ;;  %7959 = vmatprep.subr.bf16.mxu0 %v9730_v16 }
 0x11a   : > { %v848_v21 = vpop.f32.mrf.mxu1  ;;  %v7000_v35 = vcombine.low %v4424_v23, %v4434_v63  ;;  %v4443_v47 = vrot.slane %v4442_v51, 4  ;;  %v4463_v38 = vshll.u32 %v6970_v18, 16  ;;  %v4479_v28 = vshll.u32 %v9739_v52, 16  ;;  %v6973_v51 = vld [vmem:[%s8433_s6 + $0xa8] sm:$0xf] }
 0x11b   : > { %v7538_v54 = vpop.f32.mrf.mxu0  ;;  %v9720_v56 = vadd.f32 %v848_v21, %v655_v6  ;;  %v4453_v13 = vrot.slane %v4452_v2, 4  ;;  %v4462_v61 = vrot.slane %v4460_v29, 4  ;;  %v4471_v23 = vrot.slane %v4469_v59, 5  ;;  %v9770_v18 = vld [vmem:[%s8433_s6 + $0xb0] sm:$0x1]  ;;  %7940 = vmatmul.mubr.bf16.vlgmr.msra.gmra.mxu1 %v6999_v50  ;;  %7912 = vmatmul.mubr.bf16.gmra.mxu0 %v8276_v10 }
 0x11c   : > { %v7570_v32 = vpop.f32.mrf.mxu1  ;;  %v4448_v39 = vsel %vm8507_vm2, %v4443_v47, %v4447_v0  ;;  %v4475_v47 = vrot.slane %v4473_v7, 4  ;;  %v4484_v29 = vshrl.u32 %v6973_v51, 16  ;;  %v4493_v59 = vshll.u32 %v9767_v34, 16  ;;  %v9783_v7 = vld [vmem:[%s10920_s1 + $0x1a8] sm:$0xff]   ;;  %7988 = vmatpush3.bf16.msra.mxu1 %v9710_v30  ;;  %7943 = vmatprep.mubr.bf16.mxu1 %v7000_v35 }
 0x11d   : > { %v9722_v9 = vpop.f32.mrf.mxu0  ;;  %v9736_v21 = vadd.f32 %v7570_v32, %v7538_v54  ;;  %v9748_v32 = vld [vmem:[%s10920_s1 + $0x1b0] sm:$0xff]   ;;  %v4458_v20 = vsel %vm8507_vm2, %v4453_v13, %v4457_v27  ;;  %v4465_v54 = vrot.slane %v4463_v38, 5  ;;  %v8281_v27 = vld [vmem:[%s8433_s6 + $0x9c] sm:$0xff]   ;;  %v4487_v38 = vshll.u32 %v6973_v51, 16  ;;  %7960 = vmatpush3.bf16.msra.mxu0 %v9730_v16 }
 0x11e   : > { %v9694_v46 = vpop.f32.mrf.mxu1  ;;  %10930 = vst [vmem:[#allocation7_spill] sm:$0xff] %v9722_v9  ;;  %v9763_v2 = vcombine.low %v4448_v39, %v4458_v20  ;;  %v4497_v20 = vshrl.u32 %v9767_v34, 16  ;;  %7989 = vmatprep.subr.bf16.mxu1 %v9748_v32  ;;  %7915 = vmatprep.mubr.bf16.mxu0 %v8281_v27 }
 0x11f   : > { %10929 = vst [vmem:[#allocation6_spill] sm:$0xff] %v9694_v46  ;;  %v7589_v6 = vpop.f32.mrf.mxu0  ;;  %v4466_v13 = vor.u32 %v4465_v54, %v4462_v61  ;;  %v4503_v61 = vshll.u32 %v9770_v18, 16  ;;  %v4486_v54 = vrot.slane %v4484_v29, 4  ;;  %v4489_v51 = vrot.slane %v4487_v38, 5  ;;  %v9797_v46 = vld [vmem:[%s10920_s1 + $0x158] sm:$0xff]   ;;  %7961 = vmatprep.subr.bf16.mxu0 %v8279_v49 }
 0x120   : > { %v7621_v44 = vpop.f32.mrf.mxu1  ;;  %v1142_v41 = vadd.f32 %v7589_v6, %v9470_v19  ;;  %v4495_v19 = vrot.slane %v4493_v59, 5  ;;  %7990 = vmatpush3.bf16.msra.mxu1 %v9748_v32 }
 0x121   : > { %v1077_v0 = vpop.f32.mrf.mxu0  ;;  %v4467_v50 = vrot.slane %v4466_v13, 4  ;;  %v4490_v10 = vor.u32 %v4489_v51, %v4486_v54  ;;  %7991 = vmatprep.subr.bf16.mxu1 %v9783_v7  ;;  %7962 = vmatpush3.bf16.msra.mxu0 %v8279_v49 }
 0x122   : > { %v9724_v4 = vpop.f32.mrf.mxu1  ;;  %v9772_v6 = vadd.f32 %v7621_v44, %v1142_v41  ;;  %v4476_v44 = vor.u32 %v4475_v47, %v4471_v23  ;;  %v4481_v41 = vrot.slane %v4479_v28, 5  ;;  %v4499_v28 = vrot.slane %v4497_v20, 4  ;;  %v6976_v20 = vld [vmem:[%s8433_s6 + $0xb4] sm:$0xf]  ;;  %7963 = vmatprep.subr.bf16.mxu0 %v9797_v46 }
 0x123   : > { %v7590_v12 = vpop.f32.mrf.mxu0  ;;  %v1140_v30 = vadd.f32 %v1077_v0, %v9472_v26  ;;  %v4472_v35 = vsel %vm8507_vm2, %v4467_v50, %v4471_v23  ;;  %v9809_v26 = vld [vmem:[%s10920_s1 + $0x1a0] sm:$0xff]   ;;  %v8282_v0 = vld [vmem:[%s8433_s6 + $0xa8] sm:$0xff]   ;;  %v4491_v59 = vrot.slane %v4490_v10, 4  ;;  %v4508_v32 = vshrl.u32 %v6976_v20, 16  ;;  %7944 = vmatmul.mubr.bf16.gmra.mxu1 %v9763_v2 }
 0x124   : > { %v9742_v3 = vpop.f32.mrf.mxu1  ;;  %10932 = vst [vmem:[#allocation9_spill] sm:$0xff] %v9772_v6  ;;  %v4477_v47 = vrot.slane %v4476_v44, 4  ;;  %v4505_v6 = vrot.slane %v4503_v61, 5  ;;  %v1143_v13 = vadd.f32 %v7590_v12, %v9481_v40  ;;  %v4500_v23 = vor.u32 %v4499_v28, %v4495_v19  ;;  %v8287_v44 = vld [vmem:[%s8433_s6 + $0xb4] sm:$0xff]   ;;  %7992 = vmatpush3.bf16.msra.mxu1 %v9783_v7  ;;  %7916 = vmatmul.mubr.bf16.gmra.mxu0 %v8282_v0  ;;  %v8289_v0 = vld [vmem:[%s10920_s1 + $0x148] sm:$0xff]  }
 0x125   : > { %v1080_v8 = vpop.f32.mrf.mxu0  ;;  %v9815_v27 = vadd.f32 %v9724_v4, %v1140_v30  ;;  %v9824_v61 = vld [vmem:[%s8433_s6 + $0xb8] sm:$0xf]  ;;  %v4511_v51 = vshll.u32 %v6976_v20, 16  ;;  %7993 = vmatprep.subr.bf16.mxu1 %v9809_v26  ;;  %7964 = vmatpush3.bf16.msra.mxu0 %v9797_v46  ;;  %v8286_v46 = vld [vmem:[%s10920_s1 + $0x190] sm:$0xff]  }
 0x126   : > { %v9760_v63 = vpop.f32.mrf.mxu1  ;;  %v4482_v16 = vsel %vm8507_vm2, %v4477_v47, %v4481_v41  ;;  %v9818_v40 = vadd.f32 %v1080_v8, %v9663_v17  ;;  %v9827_v50 = vadd.f32 %v9742_v3, %v1143_v13  ;;  %v4501_v8 = vrot.slane %v4500_v23, 4  ;;  %v9836_v17 = vld [vmem:[%s8433_s6 + $0xbc] sm:$0x1]  ;;  %7919 = vmatprep.mubr.bf16.mxu0 %v8287_v44 }
 0x127   : > { %10931 = vst [vmem:[#allocation8_spill] sm:$0xff] %v9760_v63  ;;  %v7593_v29 = vpop.f32.mrf.mxu0  ;;  %10933 = vst [vmem:[#allocation10_spill] sm:$0xff] %v9815_v27  ;;  %v7002_v12 = vcombine.low %v4472_v35, %v4482_v16  ;;  %v4517_v47 = vshll.u32 %v9824_v61, 16  ;;  %v9841_v3 = vadd.f32 %v9545_v53, %v9543_v42  ;;  %v4521_v28 = vshrl.u32 %v9824_v61, 16  ;;  %v8285_v42 = vld [vmem:[%s10920_s1 + $0x150] sm:$0xff]   ;;  %v8284_v7 = vld [vmem:[%s10920_s1 + $0x198] sm:$0xff]  }
 0x128   : > { %v9777_v39 = vpop.f32.mrf.mxu1  ;;  %10934 = vst [vmem:[#allocation11_spill] sm:$0xff] %v9818_v40  ;;  %10935 = vst [vmem:[#allocation12_spill] sm:$0xff] %v9827_v50  ;;  %v1146_v41 = vadd.f32 %v7593_v29, %v9506_v55  ;;  %v4496_v55 = vsel %vm8507_vm2, %v4491_v59, %v4495_v19  ;;  %v4527_v30 = vshll.u32 %v9836_v17, 16  ;;  %v4506_v49 = vsel %vm8507_vm2, %v4501_v8, %v4505_v6  ;;  %v6979_v29 = vld [vmem:[%s8433_s6 + $0xc0] sm:$0xf] }
 0x129   : > { %v9830_v54 = vpop.f32.mrf.mxu0  ;;  %v4510_v53 = vrot.slane %v4508_v32, 4  ;;  %v4513_v19 = vrot.slane %v4511_v51, 5  ;;  %v4519_v13 = vrot.slane %v4517_v47, 5  ;;  %7947 = vmatprep.mubr.bf16.mxu1 %v7002_v12  ;;  %v7003_v16 = vcombine.low %v4496_v55, %v4506_v49  ;;  %v9860_v59 = vld [vmem:[%s8433_s6 + $0xc4] sm:$0xf]  ;;  %7965 = vmatprep.subr.bf16.mxu0 %v8285_v42 }
 0x12a   : > { %v9791_v63 = vpop.f32.mrf.mxu1  ;;  %v4523_v2 = vrot.slane %v4521_v28, 4  ;;  %v9863_v6 = vld [vmem:[%s8433_s6 + $0xc8] sm:$0x1]  ;;  %v9866_v20 = vadd.f32 %v9777_v39, %v1146_v41  ;;  %v4532_v51 = vshrl.u32 %v6979_v29, 16  ;;  %v4535_v47 = vshll.u32 %v6979_v29, 16  ;;  %7994 = vmatpush3.bf16.msra.mxu1 %v9809_v26  ;;  %7966 = vmatpush3.bf16.msra.mxu0 %v8285_v42 }
 0x12b   : > { %v7594_v35 = vpop.f32.mrf.mxu0  ;;  %v4514_v12 = vor.u32 %v4513_v19, %v4510_v53  ;;  %v4541_v55 = vshll.u32 %v9860_v59, 16  ;;  %v4529_v41 = vrot.slane %v4527_v30, 5  ;;  %v4545_v28 = vshrl.u32 %v9860_v59, 16  ;;  %7995 = vmatprep.subr.bf16.mxu1 %v8284_v7  ;;  %7948 = vmatmul.mubr.bf16.gmra.mxu1 %v7003_v16  ;;  %v7015_v42 = vld [vmem:[%s8433_s6 + $0x78] sm:$0xe] }
 0x12c   : > { %v9804_v38 = vpop.f32.mrf.mxu1  ;;  %10937 = vst [vmem:[#allocation14_spill] sm:$0xff] %v9866_v20  ;;  %v4524_v39 = vor.u32 %v4523_v2, %v4519_v13  ;;  %v4551_v49 = vshll.u32 %v9863_v6, 16  ;;  %v4534_v19 = vrot.slane %v4532_v51, 4  ;;  %v4537_v29 = vrot.slane %v4535_v47, 5  ;;  %7967 = vmatprep.subr.bf16.mxu0 %v8289_v0 }
 0x12d   : > { %v9868_v8 = vpop.f32.mrf.mxu0  ;;  %v4515_v44 = vrot.slane %v4514_v12, 4  ;;  %v4543_v30 = vrot.slane %v4541_v55, 5  ;;  %v4547_v20 = vrot.slane %v4545_v28, 4  ;;  %v4798_v40 = vrot.slane %v9538_v5, 5  ;;  %v7014_v5 = vld [vmem:[%s8433_s6 + $0x6c] sm:$0xe] }
 0x12e   : > { %v9832_v4 = vpop.f32.mrf.mxu1  ;;  %v4525_v2 = vrot.slane %v4524_v39, 4  ;;  %v4553_v50 = vrot.slane %v4551_v49, 5  ;;  %v4538_v12 = vor.u32 %v4537_v29, %v4534_v19  ;;  %v1144_v51 = vadd.f32 %v9830_v54, %v9514_v57  ;;  %7996 = vmatpush3.bf16.msra.mxu1 %v8284_v7  ;;  %v8290_v19 = vld [vmem:[%s10920_s1 + $0x188] sm:$0xff]   ;;  %7968 = vmatpush3.bf16.msra.mxu0 %v8289_v0 }
 0x12f   : > { %10936 = vst [vmem:[#allocation13_spill] sm:$0xff] %v9832_v4  ;;  %v7597_v23 = vpop.f32.mrf.mxu0  ;;  %v8288_v4 = vld [vmem:[%s8433_s6 + $0xc0] sm:$0xff]   ;;  %v4520_v31 = vsel %vm8507_vm2, %v4515_v44, %v4519_v13  ;;  %v1147_v26 = vadd.f32 %v7594_v35, %v9533_v24  ;;  %v4548_v55 = vor.u32 %v4547_v20, %v4543_v30  ;;  %v4800_v39 = vrot.slane %v4798_v40, 4  ;;  %7997 = vmatprep.subr.bf16.mxu1 %v8286_v46  ;;  %v10973_v37 = vld [vmem:[#allocation11_spill] sm:$0xff] }
 0x130   : > { %v9847_v10 = vpop.f32.mrf.mxu1  ;;  %v4530_v47 = vsel %vm8507_vm2, %v4525_v2, %v4529_v41  ;;  %v4801_v28 = vrot.slane %v9541_v48, 5  ;;  %v4539_v44 = vrot.slane %v4538_v12, 4  ;;  %v7022_v57 = vrot.slane %v7014_v5, 9  ;;  %v8291_v35 = vld [vmem:[%s10920_s1 + $0x140] sm:$0xff]   ;;  %7920 = vmatmul.mubr.bf16.gmra.mxu0 %v8288_v4 }
 0x131   : > { %v1109_v27 = vpop.f32.mrf.mxu0  ;;  %v7004_v13 = vcombine.low %v4520_v31, %v4530_v47  ;;  %v9905_v24 = vadd.f32 %v9791_v63, %v1144_v51  ;;  %v4549_v54 = vrot.slane %v4548_v55, 4  ;;  %v10939_v20 = vrot.slane %v9569_v62, 5  ;;  %7969 = vmatprep.subr.bf16.mxu0 %v8291_v35 }
 0x132   : > { %v9870_v32 = vpop.f32.mrf.mxu1  ;;  %v4802_v48 = vsel %vm8680_vm5, %v4800_v39, %v4801_v28  ;;  %v9916_v31 = vadd.f32 %v9804_v38, %v1147_v26  ;;  %v4544_v7 = vsel %vm8507_vm2, %v4539_v44, %v4543_v30  ;;  %v4799_v29 = vsel %vm8680_vm5, %v7022_v57, %v4798_v40  ;;  %v8292_v40 = vld [vmem:[%s10920_s1 + $0x180] sm:$0xff]   ;;  %7998 = vmatpush3.bf16.msra.mxu1 %v8286_v46 }
 0x133   : > { %v7598_v49 = vpop.f32.mrf.mxu0  ;;  %v4807_v16 = vrot.slane %v10939_v20, 4  ;;  %7951 = vmatprep.mubr.bf16.mxu1 %v7004_v13  ;;  %v7023_v2 = vrot.slane %v7015_v42, 9  ;;  %v9929_v38 = vadd.f32 %v9868_v8, %v9841_v3  ;;  %v4554_v12 = vsel %vm8507_vm2, %v4549_v54, %v4553_v50  ;;  %7999 = vmatprep.subr.bf16.mxu1 %v8290_v19 }
 0x134   : > { %v9883_v53 = vpop.f32.mrf.mxu1  ;;  %v7046_v51 = vcombine.low %v4799_v29, %v4802_v48  ;;  %v1150_v30 = vadd.f32 %v7597_v23, %v9597_v45  ;;  %v7005_v55 = vcombine.low %v4544_v7, %v4554_v12  ;;  %v10940_v5 = vmov %v10939_v20  ;;  %v8293_v23 = vld [vmem:[%s8433_s6 + $0x78] sm:$0xff]   ;;  %7970 = vmatpush3.bf16.msra.mxu0 %v8291_v35  ;;  %v8298_v12 = vld [vmem:[%s10920_s1 + $0x230] sm:$0xff]  }
 0x135   : > { %v9918_v41 = vpop.f32.mrf.mxu0  ;;  %v4806_v4 = vsel %vm8680_vm5, %v7023_v2, %v10940_v5  ;;  %v10941_v3 = vrot.slane %v9572_v11, 5  ;;  %v4812_v45 = vrot.slane %v9654_v58, 5  ;;  %v4815_v8 = vrot.slane %v9657_v15, 5  ;;  %v8295_v11 = vld [vmem:[%s10920_s1 + $0x1f8] sm:$0xff]   ;;  %v7016_v58 = vld [vmem:[%s8433_s6 + $0x84] sm:$0xe] }
 0x136   : > { %v9891_v9 = vpop.f32.mrf.mxu1  ;;  %v9949_v0 = vadd.f32 %v9847_v10, %v1150_v30  ;;  %v1148_v62 = vadd.f32 %v1109_v27, %v9605_v1  ;;  %7971 = vmatprep.mubr.bf16.mxu0 %v7046_v51  ;;  %v1151_v13 = vadd.f32 %v7598_v49, %v9629_v60  ;;  %v7024_v44 = vrot.slane %v7016_v58, 9  ;;  %7952 = vmatmul.mubr.bf16.gmra.mxu1 %v7005_v55  ;;  %v7017_v49 = vld [vmem:[%s8433_s6 + $0x90] sm:$0xe] }
 0x137   : > { %10938 = vst [vmem:[#allocation15_spill] sm:$0xff] %v9891_v9  ;;  %v7601_v26 = vpop.f32.mrf.mxu0  ;;  %v4809_v50 = vsel %vm8680_vm5, %v4807_v16, %v10941_v3  ;;  %v4814_v46 = vrot.slane %v4812_v45, 4  ;;  %v4850_v48 = vrot.slane %v9863_v6, 5  ;;  %8000 = vmatpush3.bf16.msra.mxu1 %v8290_v19  ;;  %8003 = vmatprep.mubr.bf16.mxu1 %v8293_v23  ;;  %v7025_v20 = vrot.slane %v7017_v49, 9  ;;  %v8296_v19 = vld [vmem:[%s10920_s1 + $0x238] sm:$0xff]   ;;  %v8305_v49 = vld [vmem:[%s8433_s6 + $0xa8] sm:$0xff]  }
 0x138   : > { %v9902_v9 = vpop.f32.mrf.mxu1  ;;  %v1154_v15 = vadd.f32 %v7601_v26, %v9715_v14  ;;  %v7047_v10 = vcombine.low %v4806_v4, %v4809_v50  ;;  %v9961_v1 = vadd.f32 %v9870_v32, %v1148_v62  ;;  %v4819_v14 = vrot.slane %v9675_v36, 5  ;;  %8001 = vmatprep.subr.bf16.mxu1 %v8292_v40  ;;  %8019 = vmatprep.subr.bf16.mxu0 %v8295_v11  ;;  %v8299_v4 = vld [vmem:[%s8433_s6 + $0x90] sm:$0xff]   ;;  %v7018_v3 = vld [vmem:[%s8433_s6 + $0x9c] sm:$0xe]  ;;  %v7019_v62 = vld [vmem:[%s8433_s6 + $0xa8] sm:$0xe] }
 0x139   : > { %v1125_v39 = vpop.f32.mrf.mxu0  ;;  %v4816_v60 = vsel %vm8680_vm5, %v4814_v46, %v4815_v8  ;;  %v9972_v42 = vadd.f32 %v9883_v53, %v1151_v13  ;;  %v4813_v32 = vsel %vm8680_vm5, %v7024_v44, %v4812_v45  ;;  %v8294_v53 = vld [vmem:[%s8433_s6 + $0x84] sm:$0xff]   ;;  %v10942_v30 = vrot.slane %v9678_v43, 5  ;;  %v10100_v6 = vld [vmem:[%s10920_s1 + $0x210] sm:$0xff]  }
 0x13a   : > { %v1368_v63 = vpop.f32.mrf.mxu1  ;;  %v1152_v27 = vadd.f32 %v1125_v39, %v9720_v56  ;;  %v8297_v56 = vld [vmem:[%s10920_s1 + $0x1f0] sm:$0xff]   ;;  %v9980_v35 = vadd.f32 %v9902_v9, %v1154_v15  ;;  %v7048_v29 = vcombine.low %v4813_v32, %v4816_v60  ;;  %v4821_v2 = vrot.slane %v4819_v14, 4  ;;  %7972 = vmatmul.mubr.bf16.vlgmr.msra.gmra.mxu0 %v7047_v10  ;;  %v8301_v43 = vld [vmem:[%s10920_s1 + $0x1e8] sm:$0xff]   ;;  %v8304_v60 = vld [vmem:[%s10920_s1 + $0x220] sm:$0xff]  }
 0x13b   : > { %v7602_v57 = vpop.f32.mrf.mxu0  ;;  %8020 = vmatpush3.bf16.msra.mxu0 %v8295_v11  ;;  %v4820_v51 = vsel %vm8680_vm5, %v7025_v20, %v4819_v14  ;;  %8002 = vmatpush3.bf16.msra.mxu1 %v8292_v40  ;;  %v4829_v50 = vrot.slane %v9739_v52, 5  ;;  %v7026_v23 = vrot.slane %v7018_v3, 9  ;;  %v8303_v52 = vld [vmem:[%s10920_s1 + $0x1e0] sm:$0xff]   ;;  %v7027_v58 = vrot.slane %v7019_v62, 9  ;;  %v8302_v10 = vld [vmem:[%s10920_s1 + $0x228] sm:$0xff]  }
 0x13c   : > { %v7634_v47 = vpop.f32.mrf.mxu1  ;;  %v9982_v16 = vadd.f32 %v1368_v63, %v1152_v27  ;;  %v1155_v9 = vadd.f32 %v7602_v57, %v9736_v21  ;;  %7975 = vmatprep.mubr.bf16.mxu0 %v7048_v29  ;;  %v4823_v26 = vsel %vm8680_vm5, %v4821_v2, %v10942_v30  ;;  %v4826_v21 = vrot.slane %v9734_v25, 5  ;;  %8021 = vmatprep.subr.bf16.mxu0 %v8297_v56  ;;  %v8300_v27 = vld [vmem:[%s8433_s6 + $0x9c] sm:$0xff]   ;;  %v7020_v32 = vld [vmem:[%s8433_s6 + $0xb4] sm:$0xe] }
 0x13d   : > { %v9984_v7 = vpop.f32.mrf.mxu0  ;;  %8051 = vmatprep.subr.bf16.mxu1 %v8296_v19  ;;  %v4833_v25 = vrot.slane %v9767_v34, 5  ;;  %v4840_v44 = vrot.slane %v9824_v61, 5  ;;  %v4843_v57 = vrot.slane %v9836_v17, 5  ;;  %v7028_v29 = vrot.slane %v7020_v32, 9  ;;  %v7021_v2 = vld [vmem:[%s8433_s6 + $0xc0] sm:$0xe] }
 0x13e   : > { %v9952_v28 = vpop.f32.mrf.mxu1  ;;  %v10005_v55 = vadd.f32 %v7634_v47, %v1155_v9  ;;  %v4828_v8 = vrot.slane %v4826_v21, 4  ;;  %v7049_v47 = vcombine.low %v4820_v51, %v4823_v26  ;;  %8004 = vmatmul.mubr.bf16.vlgmr.msra.gmra.mxu1 %v8294_v53  ;;  %v4827_v40 = vsel %vm8680_vm5, %v7026_v23, %v4826_v21 }
 0x13f   : > { %v9993_v63 = vpop.f32.mrf.mxu0  ;;  %8022 = vmatpush3.bf16.msra.mxu0 %v8297_v56  ;;  %v4835_v46 = vrot.slane %v4833_v25, 4  ;;  %8052 = vmatpush3.bf16.msra.mxu1 %v8296_v19  ;;  %v4834_v14 = vsel %vm8680_vm5, %v7027_v58, %v4833_v25  ;;  %v10943_v56 = vrot.slane %v9770_v18, 5  ;;  %v4842_v20 = vrot.slane %v4840_v44, 4  ;;  %v8307_v19 = vld [vmem:[%s10920_s1 + $0x1d8] sm:$0xff]  }
 0x140   : > { %v9964_v54 = vpop.f32.mrf.mxu1  ;;  %v4830_v11 = vsel %vm8680_vm5, %v4828_v8, %v4829_v50  ;;  %8007 = vmatprep.mubr.bf16.mxu1 %v8299_v4  ;;  %8053 = vmatprep.subr.bf16.mxu1 %v8298_v12  ;;  %v7029_v9 = vrot.slane %v7021_v2, 9  ;;  %v4847_v51 = vrot.slane %v9860_v59, 5  ;;  %v4841_v21 = vsel %vm8680_vm5, %v7028_v29, %v4840_v44  ;;  %v10947_v59 = vld [vmem:[#allocation5_spill] sm:$0xff]  ;;  %v8309_v8 = vld [vmem:[%s10920_s1 + $0x1d0] sm:$0xff]  }
 0x141   : > { %v10012_v45 = vpop.f32.mrf.mxu0  ;;  %v7050_v13 = vcombine.low %v4827_v40, %v4830_v11  ;;  %8023 = vmatprep.subr.bf16.mxu0 %v8301_v43  ;;  %v4837_v61 = vsel %vm8680_vm5, %v4835_v46, %v10943_v56  ;;  %v4844_v18 = vsel %vm8680_vm5, %v4842_v20, %v4843_v57  ;;  %v836_v23 = vadd.f32 %v10947_v59, %v9635_v22  ;;  %v8306_v25 = vld [vmem:[%s8433_s6 + $0xb4] sm:$0xff]   ;;  %v10949_v40 = vld [vmem:[#allocation6_spill] sm:$0xff]  ;;  %v8311_v46 = vld [vmem:[%s8433_s6 + $0xc0] sm:$0xff]  }
 0x142   : > { %v9986_v36 = vpop.f32.mrf.mxu1  ;;  %7976 = vmatmul.mubr.bf16.gmra.mxu0 %v7049_v47  ;;  %v7052_v4 = vcombine.low %v4841_v21, %v4844_v18  ;;  %v4849_v3 = vrot.slane %v4847_v51, 4  ;;  %v8308_v47 = vld [vmem:[%s10920_s1 + $0x218] sm:$0xff]   ;;  %v10081_v62 = vsel %vm8680_vm5, %v7029_v9, %v4847_v51 }
 0x143   : > { %v10019_v39 = vpop.f32.mrf.mxu0  ;;  %8024 = vmatpush3.bf16.msra.mxu0 %v8301_v43  ;;  %7979 = vmatprep.mubr.bf16.mxu0 %v7050_v13  ;;  %v10092_v58 = vadd.f32 %v9918_v41, %v836_v23  ;;  %v7110_v13 = vld [vmem:[%s8433_s6 + $0x78] sm:$0xf] }
 0x144   : > { %v10007_v5 = vpop.f32.mrf.mxu1  ;;  %8054 = vmatpush3.bf16.msra.mxu1 %v8298_v12  ;;  %8025 = vmatprep.subr.bf16.mxu0 %v8303_v52  ;;  %v7051_v12 = vcombine.low %v4834_v14, %v4837_v61  ;;  %v4851_v22 = vsel %vm8680_vm5, %v4849_v3, %v4850_v48  ;;  %v7112_v48 = vld [vmem:[%s8433_s6 + $0x80] sm:$0x1]  ;;  %v5328_v44 = vshrl.u32 %v7110_v13, 16  ;;  %v8313_v61 = vld [vmem:[%s10920_s1 + $0x1c8] sm:$0xff]   ;;  %v7166_v20 = vld [vmem:[%s8433_s6 + $0x78] sm:$0xe] }
 0x145   : > { %v10030_v15 = vpop.f32.mrf.mxu0  ;;  %8055 = vmatprep.subr.bf16.mxu1 %v8302_v10  ;;  %v7053_v56 = vcombine.low %v10081_v62, %v4851_v22  ;;  %v5347_v32 = vshll.u32 %v7112_v48, 16  ;;  %v5765_v29 = vrot.slane %v7112_v48, 5  ;;  %v7174_v21 = vrot.slane %v7166_v20, 9  ;;  %v7114_v3 = vld [vmem:[%s8433_s6 + $0x88] sm:$0xf] }
 0x146   : > { %v10028_v34 = vpop.f32.mrf.mxu1  ;;  %8008 = vmatmul.mubr.bf16.gmra.mxu1 %v8300_v27  ;;  %v5331_v27 = vshll.u32 %v7110_v13, 16  ;;  %v5330_v2 = vrot.slane %v5328_v44, 4  ;;  %v7115_v22 = vld [vmem:[%s8433_s6 + $0x8c] sm:$0x1]  ;;  %v7167_v13 = vld [vmem:[%s8433_s6 + $0x84] sm:$0xe] }
 0x147   : > { %8026 = vmatpush3.bf16.msra.mxu0 %v8303_v52  ;;  %8011 = vmatprep.mubr.bf16.mxu1 %v8305_v49  ;;  %v10948_v52 = vld [vmem:[#allocation7_spill] sm:$0xff]  ;;  %v8315_v44 = vld [vmem:[%s10920_s1 + $0x1c0] sm:$0xff]  }
 0x148   : > { %v10049_v53 = vpop.f32.mrf.mxu0  ;;  %v10051_v17 = vpop.f32.mrf.mxu1  ;;  %8056 = vmatpush3.bf16.msra.mxu1 %v8302_v10  ;;  %8027 = vmatprep.subr.bf16.mxu0 %v8307_v19  ;;  %v10089_v11 = vadd.f32 %v10949_v40, %v10948_v52  ;;  %v7111_v10 = vld [vmem:[%s8433_s6 + $0x7c] sm:$0xf]  ;;  %v5333_v18 = vrot.slane %v5331_v27, 5  ;;  %v5361_v40 = vshll.u32 %v7114_v3, 16 }
 0x149   : > { %10944 = vst [vmem:[#allocation16_spill] sm:$0xff] %v10051_v17  ;;  %8057 = vmatprep.subr.bf16.mxu1 %v8304_v60  ;;  %v5337_v57 = vshll.u32 %v7111_v10, 16  ;;  %v5341_v49 = vshrl.u32 %v7111_v10, 16 }
 0x14a   : > { %v10060_v30 = vpop.f32.mrf.mxu0  ;;  %v10062_v26 = vpop.f32.mrf.mxu1  ;;  %7980 = vmatmul.mubr.bf16.gmra.mxu0 %v7051_v12  ;;  %v5349_v12 = vrot.slane %v5347_v32, 5  ;;  %v5334_v23 = vor.u32 %v5333_v18, %v5330_v2 }
 0x14b   : > { %10945 = vst [vmem:[#allocation17_spill] sm:$0xff] %v10062_v26  ;;  %8028 = vmatpush3.bf16.msra.mxu0 %v8307_v19  ;;  %7983 = vmatprep.mubr.bf16.mxu0 %v7052_v4  ;;  %v5762_v19 = vrot.slane %v7111_v10, 5  ;;  %v5339_v9 = vrot.slane %v5337_v57, 5  ;;  %v5343_v51 = vrot.slane %v5341_v49, 4  ;;  %v5365_v57 = vshrl.u32 %v7114_v3, 16 }
 0x14c   : > { %v10066_v50 = vpop.f32.mrf.mxu0  ;;  %v10068_v43 = vpop.f32.mrf.mxu1  ;;  %8058 = vmatpush3.bf16.msra.mxu1 %v8304_v60  ;;  %8029 = vmatprep.subr.bf16.mxu0 %v8309_v8  ;;  %v7113_v60 = vld [vmem:[%s8433_s6 + $0x84] sm:$0xf] }
 0x14d   : > { %10946 = vst [vmem:[#allocation18_spill] sm:$0xff] %v10068_v43  ;;  %8059 = vmatprep.subr.bf16.mxu1 %v8308_v47  ;;  %v5764_v4 = vrot.slane %v5762_v19, 4  ;;  %v5352_v59 = vshrl.u32 %v7113_v60, 16  ;;  %v5344_v62 = vor.u32 %v5343_v51, %v5339_v9  ;;  %v5355_v52 = vshll.u32 %v7113_v60, 16 }
 0x14e   : > { %v10103_v14 = vpop.f32.mrf.mxu0  ;;  %v10105_v41 = vpop.f32.mrf.mxu1  ;;  %8012 = vmatmul.mubr.bf16.gmra.mxu1 %v8306_v25  ;;  %v5763_v25 = vsel %vm8680_vm5, %v7174_v21, %v5762_v19  ;;  %v5367_v18 = vrot.slane %v5365_v57, 4  ;;  %v5371_v51 = vshll.u32 %v7115_v22, 16  ;;  %v7175_v60 = vrot.slane %v7167_v13, 9  ;;  %v7116_v21 = vld [vmem:[%s8433_s6 + $0x90] sm:$0xf] }
 0x14f   : > { %10950 = vst [vmem:[#allocation5_spill] sm:$0xff] %v10103_v14  ;;  %10951 = vst [vmem:[#allocation7_spill] sm:$0xff] %v10105_v41  ;;  %8030 = vmatpush3.bf16.msra.mxu0 %v8309_v8  ;;  %8015 = vmatprep.mubr.bf16.mxu1 %v8311_v46  ;;  %v5766_v8 = vsel %vm8680_vm5, %v5764_v4, %v5765_v29  ;;  %v5354_v27 = vrot.slane %v5352_v59, 4  ;;  %v5335_v46 = vrot.slane %v5334_v23, 4  ;;  %v5345_v49 = vrot.slane %v5344_v62, 4  ;;  %v8312_v4 = vld [vmem:[%s8433_s6 + $0xcc] sm:$0xff]  }
 0x150   : > { %v10116_v10 = vpop.f32.mrf.mxu0  ;;  %v10118_v48 = vpop.f32.mrf.mxu1  ;;  %8060 = vmatpush3.bf16.msra.mxu1 %v8308_v47  ;;  %8031 = vmatprep.subr.bf16.mxu0 %v8313_v61  ;;  %v8314_v47 = vld [vmem:[%s10920_s1 + $0x208] sm:$0xff]   ;;  %v7198_v32 = vcombine.low %v5763_v25, %v5766_v8  ;;  %v5357_v20 = vrot.slane %v5355_v52, 5  ;;  %v5363_v29 = vrot.slane %v5361_v40, 5  ;;  %v5769_v52 = vrot.slane %v7114_v3, 5  ;;  %v7117_v25 = vld [vmem:[%s8433_s6 + $0x94] sm:$0xf] }
 0x151   : > { %10952 = vst [vmem:[#allocation6_spill] sm:$0xff] %v10118_v48  ;;  %8061 = vmatprep.subr.bf16.mxu1 %v10100_v6  ;;  %v5340_v59 = vsel %vm8507_vm2, %v5335_v46, %v5339_v9  ;;  %v5350_v23 = vsel %vm8507_vm2, %v5345_v49, %v5349_v12  ;;  %v5772_v57 = vrot.slane %v7115_v22, 5  ;;  %v8316_v9 = vld [vmem:[%s10920_s1 + $0x200] sm:$0xff]   ;;  %v5376_v46 = vshrl.u32 %v7116_v21, 16 }
 0x152   : > { %v10131_v19 = vpop.f32.mrf.mxu0  ;;  %v10133_v2 = vpop.f32.mrf.mxu1  ;;  %7984 = vmatmul.mubr.bf16.gmra.mxu0 %v7053_v56  ;;  %v5358_v62 = vor.u32 %v5357_v20, %v5354_v27  ;;  %v7150_v40 = vcombine.low %v5340_v59, %v5350_v23  ;;  %v5368_v13 = vor.u32 %v5367_v18, %v5363_v29  ;;  %v5770_v3 = vsel %vm8680_vm5, %v7175_v60, %v5769_v52  ;;  %v7119_v60 = vld [vmem:[%s8433_s6 + $0x9c] sm:$0xf] }
 0x153   : > { %10953 = vst [vmem:[#allocation19_spill] sm:$0xff] %v10133_v2  ;;  %8032 = vmatpush3.bf16.msra.mxu0 %v8313_v61  ;;  %v5373_v61 = vrot.slane %v5371_v51, 5  ;;  %v7118_v2 = vld [vmem:[%s8433_s6 + $0x98] sm:$0x1]  ;;  %v5771_v27 = vrot.slane %v5769_v52, 4  ;;  %v5379_v49 = vshll.u32 %v7116_v21, 16 }
 0x154   : > { %v10142_v8 = vpop.f32.mrf.mxu0  ;;  %v10144_v56 = vpop.f32.mrf.mxu1  ;;  %8062 = vmatpush3.bf16.msra.mxu1 %v10100_v6  ;;  %8033 = vmatprep.subr.bf16.mxu0 %v8315_v44  ;;  %v5359_v12 = vrot.slane %v5358_v62, 4  ;;  %v5369_v6 = vrot.slane %v5368_v13, 4  ;;  %v5385_v20 = vshll.u32 %v7117_v25, 16  ;;  %v5389_v18 = vshrl.u32 %v7117_v25, 16  ;;  %v7168_v51 = vld [vmem:[%s8433_s6 + $0x90] sm:$0xe] }
 0x155   : > { %10954 = vst [vmem:[#allocation20_spill] sm:$0xff] %v10144_v56  ;;  %8063 = vmatprep.subr.bf16.mxu1 %v8314_v47  ;;  %8035 = vmatprep.mubr.bf16.mxu0 %v7150_v40  ;;  %v5773_v59 = vsel %vm8680_vm5, %v5771_v27, %v5772_v57  ;;  %v5378_v23 = vrot.slane %v5376_v46, 4  ;;  %v5395_v62 = vshll.u32 %v7118_v2, 16  ;;  %v7176_v46 = vrot.slane %v7168_v51, 9 }
 0x156   : > { %8016 = vmatmul.mubr.bf16.gmra.mxu1 %v8312_v4  ;;  %v5364_v22 = vsel %vm8507_vm2, %v5359_v12, %v5363_v29  ;;  %v10159_v52 = vpop.f32.mrf.mxu0  ;;  %v10161_v40 = vpop.f32.mrf.mxu1  ;;  %v5374_v21 = vsel %vm8507_vm2, %v5369_v6, %v5373_v61  ;;  %v5381_v4 = vrot.slane %v5379_v49, 5  ;;  %v5387_v13 = vrot.slane %v5385_v20, 5  ;;  %v7120_v29 = vld [vmem:[%s8433_s6 + $0xa0] sm:$0xf] }
 0x157   : > { %8034 = vmatpush3.bf16.msra.mxu0 %v8315_v44  ;;  %10955 = vst [vmem:[#allocation21_spill] sm:$0xff] %v10161_v40  ;;  %8067 = vmatprep.mubr.bf16.mxu1 %v7198_v32  ;;  %v7199_v44 = vcombine.low %v5770_v3, %v5773_v59  ;;  %v7151_v57 = vcombine.low %v5364_v22, %v5374_v21  ;;  %v5391_v12 = vrot.slane %v5389_v18, 4  ;;  %v5397_v27 = vrot.slane %v5395_v62, 5  ;;  %v7121_v40 = vld [vmem:[%s8433_s6 + $0xa4] sm:$0x1] }
 0x158   : > { %8064 = vmatpush3.bf16.msra.mxu1 %v8314_v47  ;;  %v5382_v56 = vor.u32 %v5381_v4, %v5378_v23  ;;  %v5776_v48 = vrot.slane %v7117_v25, 5  ;;  %v5779_v41 = vrot.slane %v7118_v2, 5  ;;  %v5400_v43 = vshrl.u32 %v7119_v60, 16  ;;  %v7169_v3 = vld [vmem:[%s8433_s6 + $0x9c] sm:$0xe] }
 0x159   : > { %8065 = vmatprep.subr.bf16.mxu1 %v8316_v9  ;;  %v5392_v47 = vor.u32 %v5391_v12, %v5387_v13  ;;  %v5403_v32 = vshll.u32 %v7119_v60, 16  ;;  %v5409_v14 = vshll.u32 %v7120_v29, 16  ;;  %v5413_v61 = vshrl.u32 %v7120_v29, 16 }
 0x15a   : > { %8036 = vmatmul.mubr.bf16.vlgmr.msra.gmra.mxu0 %v7151_v57  ;;  %v5383_v20 = vrot.slane %v5382_v56, 4  ;;  %v5777_v18 = vsel %vm8680_vm5, %v7176_v46, %v5776_v48  ;;  %v5778_v25 = vrot.slane %v5776_v48, 4  ;;  %v5402_v2 = vrot.slane %v5400_v43, 4  ;;  %v7122_v57 = vld [vmem:[%s8433_s6 + $0xa8] sm:$0xf] }
 0x15b   : > { %v10168_v6 = vpop.f32.mrf.mxu0  ;;  %v10170_v49 = vpop.f32.mrf.mxu1  ;;  %v5393_v51 = vrot.slane %v5392_v47, 4  ;;  %v5405_v22 = vrot.slane %v5403_v32, 5  ;;  %v5411_v59 = vrot.slane %v5409_v14, 5  ;;  %v5415_v23 = vrot.slane %v5413_v61, 4  ;;  %v7123_v46 = vld [vmem:[%s8433_s6 + $0xac] sm:$0xf] }
 0x15c   : > { %10956 = vst [vmem:[#allocation22_spill] sm:$0xff] %v10170_v49  ;;  %8066 = vmatpush3.bf16.msra.mxu1 %v8316_v9  ;;  %v5388_v21 = vsel %vm8507_vm2, %v5383_v20, %v5387_v13  ;;  %v5780_v56 = vsel %vm8680_vm5, %v5778_v25, %v5779_v41  ;;  %v5419_v9 = vshll.u32 %v7121_v40, 16  ;;  %v7177_v4 = vrot.slane %v7169_v3, 9 }
 0x15d   : > { %v10174_v62 = vpop.f32.mrf.mxu0  ;;  %v10176_v60 = vpop.f32.mrf.mxu1  ;;  %v5398_v43 = vsel %vm8507_vm2, %v5393_v51, %v5397_v27  ;;  %v7200_v14 = vcombine.low %v5777_v18, %v5780_v56  ;;  %v5406_v48 = vor.u32 %v5405_v22, %v5402_v2  ;;  %v5416_v12 = vor.u32 %v5415_v23, %v5411_v59  ;;  %v7170_v23 = vld [vmem:[%s8433_s6 + $0xa8] sm:$0xe] }
 0x15e   : > { %10957 = vst [vmem:[#allocation23_spill] sm:$0xff] %v10176_v60  ;;  %v7152_v13 = vcombine.low %v5388_v21, %v5398_v43  ;;  %v5421_v61 = vrot.slane %v5419_v9, 5  ;;  %v5783_v41 = vrot.slane %v7120_v29, 5  ;;  %v5786_v20 = vrot.slane %v7121_v40, 5 }
 0x15f   : > { %8068 = vmatmul.mubr.bf16.vlgmr.msra.gmra.mxu1 %v7199_v44  ;;  %v10186_v47 = vpop.f32.mrf.mxu0  ;;  %v10188_v32 = vpop.f32.mrf.mxu1  ;;  %v5407_v3 = vrot.slane %v5406_v48, 4  ;;  %v5417_v25 = vrot.slane %v5416_v12, 4  ;;  %v7124_v44 = vld [vmem:[%s8433_s6 + $0xb0] sm:$0x1]  ;;  %v5424_v60 = vshrl.u32 %v7122_v57, 16  ;;  %v5427_v49 = vshll.u32 %v7122_v57, 16 }
 0x160   : > { %10958 = vst [vmem:[#allocation24_spill] sm:$0xff] %v10188_v32  ;;  %8071 = vmatprep.mubr.bf16.mxu1 %v7200_v14  ;;  %8039 = vmatprep.mubr.bf16.mxu0 %v7152_v13  ;;  %v5784_v18 = vsel %vm8680_vm5, %v7177_v4, %v5783_v41  ;;  %v5785_v2 = vrot.slane %v5783_v41, 4  ;;  %v5433_v51 = vshll.u32 %v7123_v46, 16  ;;  %v5437_v22 = vshrl.u32 %v7123_v46, 16  ;;  %v7125_v12 = vld [vmem:[%s8433_s6 + $0xb4] sm:$0xf] }
 0x161   : > { %v10191_v27 = vpop.f32.mrf.mxu0  ;;  %v10196_v21 = vpop.f32.mrf.mxu1  ;;  %v5412_v40 = vsel %vm8507_vm2, %v5407_v3, %v5411_v59  ;;  %v5422_v29 = vsel %vm8507_vm2, %v5417_v25, %v5421_v61  ;;  %v5426_v56 = vrot.slane %v5424_v60, 4  ;;  %v5429_v9 = vrot.slane %v5427_v49, 5 }
 0x162   : > { %10959 = vst [vmem:[#allocation25_spill] sm:$0xff] %v10196_v21  ;;  %v7153_v43 = vcombine.low %v5412_v40, %v5422_v29  ;;  %v5787_v4 = vsel %vm8680_vm5, %v5785_v2, %v5786_v20  ;;  %v5435_v14 = vrot.slane %v5433_v51, 5  ;;  %v5439_v48 = vrot.slane %v5437_v22, 4  ;;  %v7126_v40 = vld [vmem:[%s8433_s6 + $0xb8] sm:$0xf] }
 0x163   : > { %v10202_v57 = vpop.f32.mrf.mxu0  ;;  %v7201_v13 = vcombine.low %v5784_v18, %v5787_v4  ;;  %v5430_v41 = vor.u32 %v5429_v9, %v5426_v56  ;;  %v5443_v21 = vshll.u32 %v7124_v44, 16  ;;  %v7178_v59 = vrot.slane %v7170_v23, 9  ;;  %v7127_v51 = vld [vmem:[%s8433_s6 + $0xbc] sm:$0x1]  ;;  %v10961_v56 = vld [vmem:[#allocation15_spill] sm:$0xff] }
 0x164   : > { %8040 = vmatmul.mubr.bf16.gmra.mxu0 %v7153_v43  ;;  %v5440_v60 = vor.u32 %v5439_v48, %v5435_v14  ;;  %v5790_v49 = vrot.slane %v7123_v46, 5  ;;  %v5793_v61 = vrot.slane %v7124_v44, 5  ;;  %v10211_v25 = vadd.f32 %v10116_v10, %v9949_v0 }
 0x165   : > { %v10207_v3 = vpop.f32.mrf.mxu0  ;;  %v5431_v2 = vrot.slane %v5430_v41, 4  ;;  %v5445_v18 = vrot.slane %v5443_v21, 5  ;;  %v5448_v22 = vshrl.u32 %v7125_v12, 16  ;;  %v5451_v23 = vshll.u32 %v7125_v12, 16 }
 0x166   : > { %10960 = vst [vmem:[#allocation26_spill] sm:$0xff] %v10211_v25  ;;  %v10214_v20 = vpop.f32.mrf.mxu1  ;;  %v1392_v46 = vadd.f32 %v10961_v56, %v10092_v58  ;;  %v5441_v44 = vrot.slane %v5440_v60, 4  ;;  %v5791_v0 = vsel %vm8680_vm5, %v7178_v59, %v5790_v49  ;;  %v5792_v10 = vrot.slane %v5790_v49, 4 }
 0x167   : > { %8072 = vmatmul.mubr.bf16.gmra.mxu1 %v7201_v13  ;;  %v10217_v29 = vpop.f32.mrf.mxu0  ;;  %v5436_v43 = vsel %vm8507_vm2, %v5431_v2, %v5435_v14  ;;  %v5450_v4 = vrot.slane %v5448_v22, 4  ;;  %v5453_v21 = vrot.slane %v5451_v23, 5  ;;  %v5457_v48 = vshll.u32 %v7126_v40, 16  ;;  %v7171_v13 = vld [vmem:[%s8433_s6 + $0xb4] sm:$0xe] }
 0x168   : > { %v10223_v9 = vpop.f32.mrf.mxu1  ;;  %v5446_v58 = vsel %vm8507_vm2, %v5441_v44, %v5445_v18  ;;  %v5794_v41 = vsel %vm8680_vm5, %v5792_v10, %v5793_v61  ;;  %v5461_v59 = vshrl.u32 %v7126_v40, 16  ;;  %v5467_v60 = vshll.u32 %v7127_v51, 16  ;;  %v7128_v18 = vld [vmem:[%s8433_s6 + $0xc0] sm:$0xf] }
 0x169   : > { %v10228_v12 = vpop.f32.mrf.mxu0  ;;  %v7154_v56 = vcombine.low %v5436_v43, %v5446_v58  ;;  %v7202_v32 = vcombine.low %v5791_v0, %v5794_v41  ;;  %v5454_v14 = vor.u32 %v5453_v21, %v5450_v4  ;;  %v5459_v2 = vrot.slane %v5457_v48, 5  ;;  %v7172_v58 = vld [vmem:[%s8433_s6 + $0xc0] sm:$0xe] }
 0x16a   : > { %v10234_v49 = vpop.f32.mrf.mxu1  ;;  %v5463_v23 = vrot.slane %v5461_v59, 4  ;;  %v5469_v25 = vrot.slane %v5467_v60, 5  ;;  %v7179_v26 = vrot.slane %v7171_v13, 9  ;;  %v5797_v17 = vrot.slane %v7126_v40, 5 }
 0x16b   : > { %v10236_v22 = vpop.f32.mrf.mxu0  ;;  %8043 = vmatprep.mubr.bf16.mxu0 %v7154_v56  ;;  %8075 = vmatprep.mubr.bf16.mxu1 %v7202_v32  ;;  %v5455_v61 = vrot.slane %v5454_v14, 4  ;;  %v5800_v10 = vrot.slane %v7127_v51, 5  ;;  %v10243_v0 = vadd.f32 %v10131_v19, %v9961_v1  ;;  %v10247_v43 = vadd.f32 %v10142_v8, %v9972_v42  ;;  %v7129_v32 = vld [vmem:[%s8433_s6 + $0xc4] sm:$0xf]  ;;  %v7130_v1 = vld [vmem:[%s8433_s6 + $0xc8] sm:$0x1] }
 0x16c   : > { %v10239_v44 = vpop.f32.mrf.mxu1  ;;  %v5464_v40 = vor.u32 %v5463_v23, %v5459_v2  ;;  %v5798_v21 = vsel %vm8680_vm5, %v7179_v26, %v5797_v17  ;;  %v5799_v48 = vrot.slane %v5797_v17, 4  ;;  %v10254_v13 = vadd.f32 %v10159_v52, %v1392_v46 }
 0x16d   : > { %10962 = vst [vmem:[#allocation15_spill] sm:$0xff] %v10243_v0  ;;  %10963 = vst [vmem:[#allocation27_spill] sm:$0xff] %v10247_v43  ;;  %v10249_v4 = vpop.f32.mrf.mxu0  ;;  %v1153_v51 = vadd.f32 %v9984_v7, %v10089_v11  ;;  %v5472_v19 = vshrl.u32 %v7128_v18, 16  ;;  %v5460_v8 = vsel %vm8507_vm2, %v5455_v61, %v5459_v2  ;;  %v5475_v26 = vshll.u32 %v7128_v18, 16  ;;  %v7131_v61 = vld [vmem:[%s8433_s6 + $0xcc] sm:$0xf] }
 0x16e   : > { %10964 = vst [vmem:[#allocation28_spill] sm:$0xff] %v10254_v13  ;;  %v5465_v41 = vrot.slane %v5464_v40, 4  ;;  %v5801_v17 = vsel %vm8680_vm5, %v5799_v48, %v5800_v10  ;;  %v10267_v52 = vpop.f32.mrf.mxu1  ;;  %v5481_v7 = vshll.u32 %v7129_v32, 16  ;;  %v5485_v11 = vshrl.u32 %v7129_v32, 16 }
 0x16f   : > { %v10261_v42 = vpop.f32.mrf.mxu0  ;;  %v7203_v46 = vcombine.low %v5798_v21, %v5801_v17  ;;  %v5474_v59 = vrot.slane %v5472_v19, 4  ;;  %v5477_v14 = vrot.slane %v5475_v26, 5  ;;  %v5491_v23 = vshll.u32 %v7130_v1, 16  ;;  %v7132_v19 = vld [vmem:[%s8433_s6 + $0xd0] sm:$0xf] }
 0x170   : > { %v5470_v56 = vsel %vm8507_vm2, %v5465_v41, %v5469_v25  ;;  %v7180_v2 = vrot.slane %v7172_v58, 9  ;;  %v10274_v40 = vpop.f32.mrf.mxu1  ;;  %v5483_v18 = vrot.slane %v5481_v7, 5  ;;  %v5487_v21 = vrot.slane %v5485_v11, 4 }
 0x171   : > { %v10269_v60 = vpop.f32.mrf.mxu0  ;;  %v7155_v10 = vcombine.low %v5460_v8, %v5470_v56  ;;  %8076 = vmatmul.mubr.bf16.gmra.mxu1 %v7203_v46  ;;  %v5804_v48 = vrot.slane %v7129_v32, 5  ;;  %v5478_v13 = vor.u32 %v5477_v14, %v5474_v59  ;;  %v5493_v43 = vrot.slane %v5491_v23, 5  ;;  %v7133_v32 = vld [vmem:[%s8433_s6 + $0xd4] sm:$0x1]  ;;  %v7173_v14 = vld [vmem:[%s8433_s6 + $0xcc] sm:$0xe] }
 0x172   : > { %v5807_v0 = vrot.slane %v7130_v1, 5  ;;  %v10281_v25 = vadd.f32 %v10168_v6, %v9980_v35  ;;  %v10283_v58 = vpop.f32.mrf.mxu1  ;;  %v5488_v8 = vor.u32 %v5487_v21, %v5483_v18  ;;  %v5496_v46 = vshrl.u32 %v7131_v61, 16  ;;  %s6789_s6 = sshll.u32 %s8341_s15, 8 }
 0x173   : > { %v10277_v17 = vpop.f32.mrf.mxu0  ;;  %10967 = vst [vmem:[#allocation31_spill] sm:$0xff] %v10283_v58  ;;  %8044 = vmatmul.mubr.bf16.gmra.mxu0 %v7155_v10  ;;  %v5805_v41 = vsel %vm8680_vm5, %v7180_v2, %v5804_v48  ;;  %v5806_v26 = vrot.slane %v5804_v48, 4  ;;  %v1396_v59 = vadd.f32 %v9952_v28, %v1153_v51  ;;  %v5479_v11 = vrot.slane %v5478_v13, 4  ;;  %s10372_s5 = scalar_lea.vmem [#allocation2], %s6789_s6 }
 0x174   : > { %10965 = vst [vmem:[#allocation29_spill] sm:$0xff] %v10277_v17  ;;  %10966 = vst [vmem:[#allocation30_spill] sm:$0xff] %v10281_v25  ;;  %v5499_v1 = vshll.u32 %v7131_v61, 16  ;;  %v5505_v56 = vshll.u32 %v7132_v19, 16  ;;  %v5489_v35 = vrot.slane %v5488_v8, 4  ;;  %v5498_v23 = vrot.slane %v5496_v46, 4  ;;  %v10294_v21 = vpop.f32.mrf.mxu1 }
 0x175   : > { %v10288_v7 = vpop.f32.mrf.mxu0  ;;  %v5808_v6 = vsel %vm8680_vm5, %v5806_v26, %v5807_v0  ;;  %v5509_v10 = vshrl.u32 %v7132_v19, 16  ;;  %10969 = vst [vmem:[#allocation33_spill] sm:$0xff] %v10294_v21  ;;  %v5484_v48 = vsel %vm8507_vm2, %v5479_v11, %v5483_v18  ;;  %v5515_v61 = vshll.u32 %v7133_v32, 16 }
 0x176   : > { %10968 = vst [vmem:[#allocation32_spill] sm:$0xff] %v10288_v7  ;;  %v7204_v25 = vcombine.low %v5805_v41, %v5808_v6  ;;  %v5501_v7 = vrot.slane %v5499_v1, 5  ;;  %v5507_v28 = vrot.slane %v5505_v56, 5  ;;  %v5494_v13 = vsel %vm8507_vm2, %v5489_v35, %v5493_v43  ;;  %v10312_v43 = vpop.f32.mrf.mxu1 }
 0x177   : > { %v10296_v2 = vpop.f32.mrf.mxu0  ;;  %v5511_v51 = vrot.slane %v5509_v10, 4  ;;  %v7181_v8 = vrot.slane %v7173_v14, 9  ;;  %v7156_v0 = vcombine.low %v5484_v48, %v5494_v13  ;;  %v5811_v46 = vrot.slane %v7132_v19, 5  ;;  %v10972_v10 = vld [vmem:[#allocation10_spill] sm:$0xff] }
 0x178   : > { %10970 = vst [vmem:[#allocation34_spill] sm:$0xff] %v10296_v2  ;;  %8079 = vmatprep.mubr.bf16.mxu1 %v7204_v25  ;;  %v5502_v26 = vor.u32 %v5501_v7, %v5498_v23  ;;  %v5814_v21 = vrot.slane %v7133_v32, 5  ;;  %v5517_v58 = vrot.slane %v5515_v61, 5  ;;  %v10306_v18 = vadd.f32 %v10174_v62, %v9982_v16  ;;  %v10321_v16 = vpop.f32.mrf.mxu1 }
 0x179   : > { %v10302_v17 = vpop.f32.mrf.mxu0  ;;  %v5512_v2 = vor.u32 %v5511_v51, %v5507_v28  ;;  %v10310_v41 = vadd.f32 %v10186_v47, %v10005_v55  ;;  %8047 = vmatprep.mubr.bf16.mxu0 %v7156_v0  ;;  %v5812_v25 = vsel %vm8680_vm5, %v7181_v8, %v5811_v46  ;;  %v5813_v7 = vrot.slane %v5811_v46, 4 }
 0x17a   : > { %v5503_v11 = vrot.slane %v5502_v26, 4  ;;  %v10317_v19 = vadd.f32 %v10191_v27, %v1396_v59  ;;  %v10329_v14 = vpop.f32.mrf.mxu1  ;;  %v10971_v59 = vld [vmem:[#allocation9_spill] sm:$0xff]  ;;  %v1809_v33 = vadd.f32 %v10012_v45, %v10972_v10 }
 0x17b   : > { %v10319_v32 = vpop.f32.mrf.mxu0  ;;  %v5513_v1 = vrot.slane %v5512_v2, 4  ;;  %v5815_v62 = vsel %vm8680_vm5, %v5813_v7, %v5814_v21  ;;  %v1811_v6 = vadd.f32 %v9993_v63, %v10971_v59  ;;  %v10980_v59 = vld [vmem:[#allocation5_spill] sm:$0xff] }
 0x17c   : > { %v5508_v55 = vsel %vm8507_vm2, %v5503_v11, %v5507_v28  ;;  %v7205_v56 = vcombine.low %v5812_v25, %v5815_v62  ;;  %v10335_v23 = vpop.f32.mrf.mxu1  ;;  %v10975_v28 = vld [vmem:[#allocation12_spill] sm:$0xff]  ;;  %v2107_v63 = vadd.f32 %v9986_v36, %v1809_v33 }
 0x17d   : > { %v5518_v47 = vsel %vm8507_vm2, %v5513_v1, %v5517_v58  ;;  %v10331_v27 = vpop.f32.mrf.mxu0  ;;  %v10974_v58 = vld [vmem:[#allocation8_spill] sm:$0xff]  ;;  %v2109_v48 = vadd.f32 %v9964_v54, %v1811_v6  ;;  %v1812_v13 = vadd.f32 %v10019_v39, %v10975_v28 }
 0x17e   : > { %v7157_v35 = vcombine.low %v5508_v55, %v5518_v47  ;;  %8080 = vmatmul.mubr.bf16.gmra.mxu1 %v7205_v56  ;;  %v1384_v2 = vadd.f32 %v10974_v58, %v10973_v37  ;;  %v2350_v46 = vadd.f32 %v10207_v3, %v2107_v63  ;;  %v10979_v56 = vld [vmem:[#allocation17_spill] sm:$0xff] }
 0x17f   : > { %v10339_v21 = vpop.f32.mrf.mxu0  ;;  %v2352_v8 = vadd.f32 %v10202_v57, %v2109_v48  ;;  %v2110_v26 = vadd.f32 %v10007_v5, %v1812_v13  ;;  %v10976_v57 = vld [vmem:[#allocation14_spill] sm:$0xff]  ;;  %v10982_v13 = vld [vmem:[#allocation7_spill] sm:$0xff] }
 0x180   : > { %8048 = vmatmul.mubr.bf16.gmra.mxu0 %v7157_v35  ;;  %v1810_v61 = vadd.f32 %v10030_v15, %v1384_v2  ;;  %v1815_v25 = vadd.f32 %v10049_v53, %v10976_v57  ;;  %v2776_v7 = vadd.f32 %v10223_v9, %v2350_v46  ;;  %v10977_v9 = vld [vmem:[#allocation13_spill] sm:$0xff] }
 0x181   : > { %v10353_v45 = vpop.f32.mrf.mxu0  ;;  %v2778_v39 = vadd.f32 %v10214_v20, %v2352_v8  ;;  %v2353_v36 = vadd.f32 %v10217_v29, %v2110_v26 }
 0x182   : > { %v2108_v54 = vadd.f32 %v10028_v34, %v1810_v61  ;;  %v1813_v34 = vadd.f32 %v10060_v30, %v9905_v24  ;;  %v1816_v24 = vadd.f32 %v10066_v50, %v9916_v31  ;;  %v10981_v50 = vld [vmem:[#allocation18_spill] sm:$0xff] }
 0x183   : > { %v2779_v20 = vadd.f32 %v10234_v49, %v2353_v36  ;;  %v10978_v49 = vld [vmem:[#allocation16_spill] sm:$0xff] }
 0x184   : > { %v10346_v51 = vpop.f32.mrf.mxu1  ;;  %v2351_v5 = vadd.f32 %v10228_v12, %v2108_v54  ;;  %v1388_v12 = vadd.f32 %v10977_v9, %v9929_v38  ;;  %v2113_v55 = vadd.f32 %v10978_v49, %v1815_v25  ;;  %v2111_v35 = vadd.f32 %v10979_v56, %v1813_v34  ;;  %v10986_v9 = vld [vmem:[#allocation33_spill] sm:$0xff] }
 0x185   : > { %v7781_v15 = vpop.f32.mrf.mxu0 }
 0x186   : > { %v10351_v0 = vpop.f32.mrf.mxu1  ;;  %v3076_v3 = vadd.f32 %v7781_v15, %v2778_v39  ;;  %v2777_v62 = vadd.f32 %v10239_v44, %v2351_v5  ;;  %v1814_v6 = vadd.f32 %v10980_v59, %v1388_v12  ;;  %v2356_v38 = vadd.f32 %v10236_v22, %v2113_v55  ;;  %v10983_v5 = vld [vmem:[#allocation31_spill] sm:$0xff] }
 0x187   : > { %v3011_v1 = vpop.f32.mrf.mxu0  ;;  %v2114_v44 = vadd.f32 %v10981_v50, %v1816_v24  ;;  %v2354_v37 = vadd.f32 %v10249_v4, %v2111_v35  ;;  %v10987_v55 = vld [vmem:[#allocation15_spill] sm:$0xff]  ;;  %v10989_v35 = vld [vmem:[#allocation29_spill] sm:$0xff]  ;;  %v10991_v50 = vld [vmem:[#allocation20_spill] sm:$0xff] }
 0x188   : > { %v10361_v11 = vpop.f32.mrf.mxu1  ;;  %3094 = vst [vmem:[%s10372_s5 + $0x10] sm:$0xff] %v3076_v3  ;;  %3175 = vst.msk [vmem:[%s8428_s29 + $0x10] sm:$0xff] %vm3172_vm6, %v3076_v3  ;;  %v3074_v53 = vadd.f32 %v3011_v1, %v2776_v7  ;;  %v2112_v22 = vadd.f32 %v10982_v13, %v1814_v6  ;;  %v2782_v61 = vadd.f32 %v10267_v52, %v2356_v38  ;;  %v10985_v1 = vld [vmem:[#allocation6_spill] sm:$0xff] }
 0x189   : > { %v7782_v30 = vpop.f32.mrf.mxu0  ;;  %v2357_v63 = vadd.f32 %v10261_v42, %v2114_v44  ;;  %v3135_v8 = vmul.f32 %v3076_v3, %v3076_v3  ;;  %v2780_v54 = vadd.f32 %v10274_v40, %v2354_v37  ;;  %v10992_v37 = vld [vmem:[#allocation32_spill] sm:$0xff] }
 0x18a   : > { %v10370_v29 = vpop.f32.mrf.mxu1  ;;  %3092 = vst [vmem:[%s10372_s5] sm:$0xff] %v3074_v53  ;;  %3173 = vst.msk [vmem:[%s8428_s29] sm:$0xff] %vm3172_vm6, %v3074_v53  ;;  %v3077_v47 = vadd.f32 %v7782_v30, %v2779_v20  ;;  %v3133_v58 = vmul.f32 %v3074_v53, %v3074_v53  ;;  %v2355_v39 = vadd.f32 %v10269_v60, %v2112_v22  ;;  %v10984_v60 = vld [vmem:[#allocation26_spill] sm:$0xff]  ;;  %v10993_v22 = vld [vmem:[#allocation28_spill] sm:$0xff] }
 0x18b   : > { %v3014_v10 = vpop.f32.mrf.mxu0  ;;  %v2783_v52 = vadd.f32 %v10983_v5, %v2357_v63  ;;  %v2117_v20 = vadd.f32 %v10985_v1, %v10984_v60  ;;  %v10994_v63 = vld [vmem:[#allocation21_spill] sm:$0xff] }
 0x18c   : > { %3095 = vst [vmem:[%s10372_s5 + $0x18] sm:$0xff] %v3077_v47  ;;  %3176 = vst.msk [vmem:[%s8428_s29 + $0x18] sm:$0xff] %vm3172_vm6, %v3077_v47  ;;  %v3075_v31 = vadd.f32 %v3014_v10, %v2777_v62  ;;  %v3136_v15 = vmul.f32 %v3077_v47, %v3077_v47  ;;  %v2781_v12 = vadd.f32 %v10986_v9, %v2355_v39  ;;  %v10988_v62 = vld [vmem:[#allocation19_spill] sm:$0xff] }
 0x18d   : > { %v2360_v59 = vadd.f32 %v10989_v35, %v2117_v20  ;;  %v10997_v20 = vld [vmem:[#allocation22_spill] sm:$0xff] }
 0x18e   : > { %v10389_v33 = vpop.f32.mrf.mxu1  ;;  %3093 = vst [vmem:[%s10372_s5 + $0x8] sm:$0xff] %v3075_v31  ;;  %v3109_v48 = vadd.f32 %v3075_v31, %v3074_v53  ;;  %v3134_v28 = vmul.f32 %v3075_v31, %v3075_v31  ;;  %3174 = vst.msk [vmem:[%s8428_s29 + $0x8] sm:$0xff] %vm3172_vm6, %v3075_v31  ;;  %v10990_v31 = vld [vmem:[#allocation27_spill] sm:$0xff] }
 0x18f   : > { %v2118_v44 = vadd.f32 %v10991_v50, %v10990_v31 }
 0x190   : > { %v10396_v2 = vpop.f32.mrf.mxu1  ;;  %v3110_v4 = vadd.f32 %v3109_v48, %v3076_v3  ;;  %v3149_v46 = vadd.f32 %v3134_v28, %v3133_v58 }
 0x191   : > { %v7785_v36 = vpop.f32.mrf.mxu0 }
 0x192   : > { %v10404_v26 = vpop.f32.mrf.mxu1  ;;  %v3150_v57 = vadd.f32 %v3149_v46, %v3135_v8  ;;  %v3080_v25 = vadd.f32 %v7785_v36, %v2782_v61  ;;  %v3111_v42 = vadd.f32 %v3110_v4, %v3077_v47  ;;  %v2115_v47 = vadd.f32 %v10988_v62, %v10987_v55  ;;  %v10995_v8 = vld [vmem:[#allocation34_spill] sm:$0xff] }
 0x193   : > { %v3027_v7 = vpop.f32.mrf.mxu0  ;;  %v2116_v61 = vadd.f32 %v10994_v63, %v10993_v22  ;;  %v2361_v4 = vadd.f32 %v10995_v8, %v2118_v44  ;;  %v2786_v46 = vadd.f32 %v10312_v43, %v2360_v59  ;;  %v10999_v59 = vld [vmem:[#allocation24_spill] sm:$0xff] }
 0x194   : > { %v10409_v34 = vpop.f32.mrf.mxu1  ;;  %3098 = vst [vmem:[%s10372_s5 + $0x30] sm:$0xff] %v3080_v25  ;;  %3179 = vst.msk [vmem:[%s8428_s29 + $0x30] sm:$0xff] %vm3172_vm6, %v3080_v25  ;;  %v3078_v3 = vadd.f32 %v3027_v7, %v2780_v54  ;;  %v3151_v40 = vadd.f32 %v3150_v57, %v3136_v15  ;;  %v2358_v58 = vadd.f32 %v10992_v37, %v2115_v47 }
 0x195   : > { %v7786_v53 = vpop.f32.mrf.mxu0  ;;  %v3139_v54 = vmul.f32 %v3080_v25, %v3080_v25  ;;  %v2787_v43 = vadd.f32 %v10329_v14, %v2361_v4 }
 0x196   : > { %3096 = vst [vmem:[%s10372_s5 + $0x20] sm:$0xff] %v3078_v3  ;;  %v3112_v24 = vadd.f32 %v3111_v42, %v3078_v3  ;;  %v3137_v30 = vmul.f32 %v3078_v3, %v3078_v3  ;;  %3177 = vst.msk [vmem:[%s8428_s29 + $0x20] sm:$0xff] %vm3172_vm6, %v3078_v3  ;;  %v3081_v49 = vadd.f32 %v7786_v53, %v2783_v52 }
 0x197   : > { %v3030_v56 = vpop.f32.mrf.mxu0  ;;  %v2784_v57 = vadd.f32 %v10321_v16, %v2358_v58  ;;  %v2359_v42 = vadd.f32 %v10302_v17, %v2116_v61  ;;  %v10996_v17 = vld [vmem:[#allocation30_spill] sm:$0xff] }
 0x198   : > { %v10423_v6 = vpop.f32.mrf.mxu1  ;;  %v3152_v10 = vadd.f32 %v3151_v40, %v3137_v30  ;;  %3099 = vst [vmem:[%s10372_s5 + $0x38] sm:$0xff] %v3081_v49  ;;  %3180 = vst.msk [vmem:[%s8428_s29 + $0x38] sm:$0xff] %vm3172_vm6, %v3081_v49  ;;  %v3079_v38 = vadd.f32 %v3030_v56, %v2781_v12  ;;  %v3140_v5 = vmul.f32 %v3081_v49, %v3081_v49 }
 0x199   : > { %v2121_v53 = vadd.f32 %v10997_v20, %v10996_v17  ;;  %v2785_v12 = vadd.f32 %v10335_v23, %v2359_v42 }
 0x19a   : > { %v10431_v48 = vpop.f32.mrf.mxu1  ;;  %3097 = vst [vmem:[%s10372_s5 + $0x28] sm:$0xff] %v3079_v38  ;;  %v3113_v28 = vadd.f32 %v3112_v24, %v3079_v38  ;;  %v3138_v13 = vmul.f32 %v3079_v38, %v3079_v38  ;;  %3178 = vst.msk [vmem:[%s8428_s29 + $0x28] sm:$0xff] %vm3172_vm6, %v3079_v38 }
 0x19b   : > { %v2364_v47 = vadd.f32 %v10319_v32, %v2121_v53  ;;  %v11000_v32 = vld [vmem:[#allocation25_spill] sm:$0xff] }
 0x19c   : > { %v10440_v39 = vpop.f32.mrf.mxu1  ;;  %v3114_v36 = vadd.f32 %v3113_v28, %v3080_v25  ;;  %v3153_v15 = vadd.f32 %v3152_v10, %v3138_v13  ;;  %v7789_v7 = vpop.f32.mrf.mxu0  ;;  %v2122_v10 = vadd.f32 %v10999_v59, %v10310_v41  ;;  %v2120_v44 = vadd.f32 %v11000_v32, %v10317_v19 }
 0x19d   : > { %v3084_v3 = vadd.f32 %v7789_v7, %v2786_v46  ;;  %v2790_v58 = vadd.f32 %v10346_v51, %v2364_v47 }
 0x19e   : > { %v3154_v52 = vadd.f32 %v3153_v15, %v3139_v54  ;;  %v3115_v40 = vadd.f32 %v3114_v36, %v3081_v49  ;;  %v3043_v60 = vpop.f32.mrf.mxu0  ;;  %v10445_v1 = vpop.f32.mrf.mxu1  ;;  %v10998_v49 = vld [vmem:[#allocation23_spill] sm:$0xff]  ;;  %v2365_v37 = vadd.f32 %v10339_v21, %v2122_v10  ;;  %v2363_v63 = vadd.f32 %v10353_v45, %v2120_v44 }
 0x19f   : > { %3102 = vst [vmem:[%s10372_s5 + $0x50] sm:$0xff] %v3084_v3  ;;  %3183 = vst.msk [vmem:[%s8428_s29 + $0x50] sm:$0xff] %vm3172_vm6, %v3084_v3  ;;  %v3082_v25 = vadd.f32 %v3043_v60, %v2784_v57  ;;  %v2119_v55 = vadd.f32 %v10998_v49, %v10306_v18  ;;  %v3143_v28 = vmul.f32 %v3084_v3, %v3084_v3 }
 0x1a0   : > { %v3155_v16 = vadd.f32 %v3154_v52, %v3140_v5  ;;  %v7790_v9 = vpop.f32.mrf.mxu0  ;;  %v2791_v51 = vadd.f32 %v10361_v11, %v2365_v37  ;;  %v2789_v15 = vadd.f32 %v10370_v29, %v2363_v63 }
 0x1a1   : > { %3100 = vst [vmem:[%s10372_s5 + $0x40] sm:$0xff] %v3082_v25  ;;  %v3116_v24 = vadd.f32 %v3115_v40, %v3082_v25  ;;  %v3141_v30 = vmul.f32 %v3082_v25, %v3082_v25  ;;  %3181 = vst.msk [vmem:[%s8428_s29 + $0x40] sm:$0xff] %vm3172_vm6, %v3082_v25  ;;  %v3085_v14 = vadd.f32 %v7790_v9, %v2787_v43 }
 0x1a2   : > { %v3046_v62 = vpop.f32.mrf.mxu0  ;;  %v2362_v38 = vadd.f32 %v10331_v27, %v2119_v55 }
 0x1a3   : > { %v3156_v35 = vadd.f32 %v3155_v16, %v3141_v30  ;;  %3103 = vst [vmem:[%s10372_s5 + $0x58] sm:$0xff] %v3085_v14  ;;  %3184 = vst.msk [vmem:[%s8428_s29 + $0x58] sm:$0xff] %vm3172_vm6, %v3085_v14  ;;  %v3083_v23 = vadd.f32 %v3046_v62, %v2785_v12  ;;  %v3144_v8 = vmul.f32 %v3085_v14, %v3085_v14 }
 0x1a4   : > { %v10459_v56 = vpop.f32.mrf.mxu1  ;;  %v2788_v22 = vadd.f32 %v10351_v0, %v2362_v38 }
 0x1a5   : > { %3101 = vst [vmem:[%s10372_s5 + $0x48] sm:$0xff] %v3083_v23  ;;  %v3117_v50 = vadd.f32 %v3116_v24, %v3083_v23  ;;  %v3142_v18 = vmul.f32 %v3083_v23, %v3083_v23  ;;  %3182 = vst.msk [vmem:[%s8428_s29 + $0x48] sm:$0xff] %vm3172_vm6, %v3083_v23 }
 0x1a6   : > { %v10467_v31 = vpop.f32.mrf.mxu1 }
 0x1a7   : > { %v3118_v27 = vadd.f32 %v3117_v50, %v3084_v3  ;;  %v3157_v13 = vadd.f32 %v3156_v35, %v3142_v18 }
 0x1a8   : > { %v10476_v41 = vpop.f32.mrf.mxu1 }
 0x1a9   : > { %v7793_v61 = vpop.f32.mrf.mxu0  ;;  %v3158_v19 = vadd.f32 %v3157_v13, %v3143_v28  ;;  %v3119_v21 = vadd.f32 %v3118_v27, %v3085_v14 }
 0x1aa   : > { %v3088_v4 = vadd.f32 %v7793_v61, %v2790_v58  ;;  %v10481_v54 = vpop.f32.mrf.mxu1 }
 0x1ab   : > { %v3059_v46 = vpop.f32.mrf.mxu0  ;;  %v3159_v36 = vadd.f32 %v3158_v19, %v3144_v8 }
 0x1ac   : > { %3106 = vst [vmem:[%s10372_s5 + $0x70] sm:$0xff] %v3088_v4  ;;  %3187 = vst.msk [vmem:[%s8428_s29 + $0x70] sm:$0xff] %vm3172_vm6, %v3088_v4  ;;  %v3086_v0 = vadd.f32 %v3059_v46, %v2788_v22  ;;  %v3147_v17 = vmul.f32 %v3088_v4, %v3088_v4 }
 0x1ad   : > { %v7794_v45 = vpop.f32.mrf.mxu0 }
 0x1ae   : > { %3104 = vst [vmem:[%s10372_s5 + $0x60] sm:$0xff] %v3086_v0  ;;  %v3120_v57 = vadd.f32 %v3119_v21, %v3086_v0  ;;  %v3145_v42 = vmul.f32 %v3086_v0, %v3086_v0  ;;  %3185 = vst.msk [vmem:[%s8428_s29 + $0x60] sm:$0xff] %vm3172_vm6, %v3086_v0  ;;  %v3089_v11 = vadd.f32 %v7794_v45, %v2791_v51  ;;  %v3108_v51 = vld [vmem:[#allocation3] sm:$0x1] }
 0x1af   : > { %v3062_v7 = vpop.f32.mrf.mxu0  ;;  %v10490_v5 = vpop.f32.mrf.mxu1 }
 0x1b0   : > { %v3160_v52 = vadd.f32 %v3159_v36, %v3145_v42  ;;  %3107 = vst [vmem:[%s10372_s5 + $0x78] sm:$0xff] %v3089_v11  ;;  %3188 = vst.msk [vmem:[%s8428_s29 + $0x78] sm:$0xff] %vm3172_vm6, %v3089_v11  ;;  %v3087_v3 = vadd.f32 %v3062_v7, %v2789_v15  ;;  %v3148_v30 = vmul.f32 %v3089_v11, %v3089_v11  ;;  %v3132_v42 = vld [vmem:[#allocation4] sm:$0x1] }
 0x1b1   : > { %v7845_v40 = vpop.f32.mrf.mxu0  ;;  %v10495_v60 = vpop.f32.mrf.mxu1 }
 0x1b2   : > { %3105 = vst [vmem:[%s10372_s5 + $0x68] sm:$0xff] %v3087_v3  ;;  %v3121_v29 = vadd.f32 %v3120_v57, %v3087_v3  ;;  %v3146_v43 = vmul.f32 %v3087_v3, %v3087_v3  ;;  %3186 = vst.msk [vmem:[%s8428_s29 + $0x68] sm:$0xff] %vm3172_vm6, %v3087_v3  ;;  %v3754_v25 = vadd.f32 %v7845_v40, %v10389_v33 }
 0x1b3   : > { %v3745_v16 = vpop.f32.mrf.mxu0  ;;  %v10501_v20 = vpop.f32.mrf.mxu1 }
 0x1b4   : > { %v3122_v53 = vadd.f32 %v3121_v29, %v3088_v4  ;;  %v3161_v9 = vadd.f32 %v3160_v52, %v3146_v43  ;;  %v3746_v12 = vadd.f32 %v3745_v16, %v10396_v2 }
 0x1b5   : > { %v7846_v24 = vpop.f32.mrf.mxu0  ;;  %v10504_v55 = vpop.f32.mrf.mxu1 }
 0x1b6   : > { %v3123_v14 = vadd.f32 %v3122_v53, %v3089_v11  ;;  %v3162_v49 = vadd.f32 %v3161_v9, %v3147_v17  ;;  %v3757_v62 = vadd.f32 %v7846_v24, %v10404_v26 }
 0x1b7   : > { %v3748_v47 = vpop.f32.mrf.mxu0  ;;  %v7877_v33 = vpop.f32.mrf.mxu1 }
 0x1b8   : > { %v3124_v35 = vrot.slane %v3123_v14, 4  ;;  %v3163_v23 = vadd.f32 %v3162_v49, %v3148_v30  ;;  %v3749_v59 = vadd.f32 %v3748_v47, %v10409_v34  ;;  %v10508_v10 = vadd.f32 %v7877_v33, %v3754_v25 }
 0x1b9   : > { %v4018_v18 = vpop.f32.mrf.mxu1  ;;  %v7849_v2 = vpop.f32.mrf.mxu0 }
 0x1ba   : > { %v3125_v38 = vadd.f32 %v3124_v35, %v3123_v14  ;;  %v3164_v50 = vrot.slane %v3163_v23, 4  ;;  %v10510_v32 = vadd.f32 %v4018_v18, %v3746_v12  ;;  %v3770_v44 = vadd.f32 %v7849_v2, %v10423_v6 }
 0x1bb   : > { %v7878_v28 = vpop.f32.mrf.mxu1  ;;  %v3761_v26 = vpop.f32.mrf.mxu0 }
 0x1bc   : > { %v3126_v37 = vrot.slane %v3125_v38, 2  ;;  %v3165_v58 = vadd.f32 %v3164_v50, %v3163_v23  ;;  %v10513_v27 = vadd.f32 %v7878_v28, %v3757_v62  ;;  %v3762_v13 = vadd.f32 %v3761_v26, %v10431_v48 }
 0x1bd   : > { %v4021_v63 = vpop.f32.mrf.mxu1  ;;  %v7850_v61 = vpop.f32.mrf.mxu0 }
 0x1be   : > { %v3127_v22 = vadd.f32 %v3126_v37, %v3125_v38  ;;  %v3166_v34 = vrot.slane %v3165_v58, 2  ;;  %v10516_v8 = vadd.f32 %v4021_v63, %v3749_v59  ;;  %v3773_v19 = vadd.f32 %v7850_v61, %v10440_v39 }
 0x1bf   : > { %v7881_v46 = vpop.f32.mrf.mxu1  ;;  %v3764_v6 = vpop.f32.mrf.mxu0 }
 0x1c0   : > { %v3128_v4 = vrot.slane %v3127_v22, 1  ;;  %v3167_v21 = vadd.f32 %v3166_v34, %v3165_v58  ;;  %v10519_v0 = vadd.f32 %v7881_v46, %v3770_v44  ;;  %v3765_v36 = vadd.f32 %v3764_v6, %v10445_v1 }
 0x1c1   : > { %v4034_v48 = vpop.f32.mrf.mxu1 }
 0x1c2   : > { %v3129_v45 = vadd.f32 %v3128_v4, %v3127_v22  ;;  %v3168_v15 = vrot.slane %v3167_v21, 1  ;;  %v10522_v11 = vadd.f32 %v4034_v48, %v3762_v13 }
 0x1c3   : > { %v7853_v57 = vpop.f32.mrf.mxu0  ;;  %v7882_v3 = vpop.f32.mrf.mxu1 }
 0x1c4   : > { %v3786_v7 = vadd.f32 %v7853_v57, %v10459_v56  ;;  %v3130_v52 = vadd.f32 %v3129_v45, %v3108_v51  ;;  %v3169_v39 = vadd.f32 %v3168_v15, %v3167_v21  ;;  %v10525_v29 = vadd.f32 %v7882_v3, %v3773_v19 }
 0x1c5   : > { %v3777_v40 = vpop.f32.mrf.mxu0  ;;  %v4037_v1 = vpop.f32.mrf.mxu1 }
 0x1c6   : > { %v3778_v43 = vadd.f32 %v3777_v40, %v10467_v31  ;;  %3131 = vst [vmem:[#allocation3] sm:$0x1] %v3130_v52  ;;  %v3170_v25 = vadd.f32 %v3169_v39, %v3132_v42  ;;  %v10528_v17 = vadd.f32 %v4037_v1, %v3765_v36 }
 0x1c7   : > { %v7854_v16 = vpop.f32.mrf.mxu0  ;;  %v7885_v9 = vpop.f32.mrf.mxu1 }
 0x1c8   : > { %v3789_v53 = vadd.f32 %v7854_v16, %v10476_v41  ;;  %3171 = vst [vmem:[#allocation4] sm:$0x1] %v3170_v25  ;;  %v4091_v56 = vadd.f32 %v7885_v9, %v3786_v7 }
 0x1c9   : > { %v3780_v12 = vpop.f32.mrf.mxu0  ;;  %v4050_v30 = vpop.f32.mrf.mxu1 }
 0x1ca   : > { %v3781_v24 = vadd.f32 %v3780_v12, %v10481_v54  ;;  %v4089_v49 = vadd.f32 %v4050_v30, %v3778_v43 }
 0x1cb   : > { %v7857_v14 = vpop.f32.mrf.mxu0  ;;  %v7886_v31 = vpop.f32.mrf.mxu1 }
 0x1cc   : > { %v3802_v62 = vadd.f32 %v7857_v14, %v10490_v5  ;;  %v4092_v35 = vadd.f32 %v7886_v31, %v3789_v53 }
 0x1cd   : > { %v3793_v47 = vpop.f32.mrf.mxu0  ;;  %v4053_v33 = vpop.f32.mrf.mxu1 }
 0x1ce   : > { %v3794_v23 = vadd.f32 %v3793_v47, %v10495_v60  ;;  %v4090_v38 = vadd.f32 %v4053_v33, %v3781_v24 }
 0x1cf   : > { %v7858_v59 = vpop.f32.mrf.mxu0  ;;  %v7889_v50 = vpop.f32.mrf.mxu1 }
 0x1d0   : > { %v3805_v41 = vadd.f32 %v7858_v59, %v10501_v20  ;;  %v4095_v2 = vadd.f32 %v7889_v50, %v3802_v62 }
 0x1d1   : > { %v3796_v18 = vpop.f32.mrf.mxu0  ;;  %v4066_v44 = vpop.f32.mrf.mxu1 }
 0x1d2   : > { %v3797_v54 = vadd.f32 %v3796_v18, %v10504_v55  ;;  %v4093_v58 = vadd.f32 %v4066_v44, %v3794_v23 }
 0x1d3   : > { %v10536_v37 = vpop.f32.mrf.mxu0  ;;  %v7890_v5 = vpop.f32.mrf.mxu1 }
 0x1d4   : > { %v4096_v26 = vadd.f32 %v7890_v5, %v3805_v41 }
 0x1d5   : > { %v10538_v28 = vpop.f32.mrf.mxu0  ;;  %v4069_v13 = vpop.f32.mrf.mxu1 }
 0x1d6   : > { %v4094_v22 = vadd.f32 %v4069_v13, %v3797_v54 }
 0x1d7   : > { %v10540_v60 = vpop.f32.mrf.mxu0 }
 0x1d9   : > { %v10544_v20 = vpop.f32.mrf.mxu0 }
 0x1db   : > { %v10542_v34 = vpop.f32.mrf.mxu1  ;;  %v10548_v61 = vpop.f32.mrf.mxu0 }
 0x1dd   : > { %v10546_v63 = vpop.f32.mrf.mxu1  ;;  %v10552_v19 = vpop.f32.mrf.mxu0 }
 0x1df   : > { %v10550_v55 = vpop.f32.mrf.mxu1  ;;  %v10556_v21 = vpop.f32.mrf.mxu0 }
 0x1e1   : > { %v10554_v4 = vpop.f32.mrf.mxu1  ;;  %v10560_v6 = vpop.f32.mrf.mxu0 }
 0x1e3   : > { %v10558_v46 = vpop.f32.mrf.mxu1 }
 0x1e4   : > { %v7917_v36 = vpop.f32.mrf.mxu0 }
 0x1e5   : > { %v10562_v51 = vpop.f32.mrf.mxu1  ;;  %v4333_v45 = vadd.f32 %v7917_v36, %v4091_v56 }
 0x1e6   : > { %v4292_v48 = vpop.f32.mrf.mxu0 }
 0x1e7   : > { %v10564_v15 = vpop.f32.mrf.mxu1  ;;  %v4331_v57 = vadd.f32 %v4292_v48, %v4089_v49 }
 0x1e8   : > { %v7918_v7 = vpop.f32.mrf.mxu0 }
 0x1e9   : > { %v10566_v42 = vpop.f32.mrf.mxu1  ;;  %v4334_v52 = vadd.f32 %v7918_v7, %v4092_v35 }
 0x1ea   : > { %v4295_v3 = vpop.f32.mrf.mxu0 }
 0x1eb   : > { %v7949_v39 = vpop.f32.mrf.mxu1  ;;  %v4332_v43 = vadd.f32 %v4295_v3, %v4090_v38 }
 0x1ec   : > { %v10568_v40 = vadd.f32 %v7949_v39, %v4333_v45 }
 0x1ed   : > { %v4717_v25 = vpop.f32.mrf.mxu1 }
 0x1ee   : > { %v10570_v1 = vadd.f32 %v4717_v25, %v4331_v57 }
 0x1ef   : > { %v7950_v53 = vpop.f32.mrf.mxu1 }
 0x1f0   : > { %v7921_v16 = vpop.f32.mrf.mxu0  ;;  %v10572_v12 = vadd.f32 %v7950_v53, %v4334_v52 }
 0x1f1   : > { %v4337_v9 = vadd.f32 %v7921_v16, %v4095_v2  ;;  %v4720_v24 = vpop.f32.mrf.mxu1 }
 0x1f2   : > { %v4308_v56 = vpop.f32.mrf.mxu0  ;;  %v10574_v14 = vadd.f32 %v4720_v24, %v4332_v43 }
 0x1f3   : > { %v4335_v30 = vadd.f32 %v4308_v56, %v4093_v58 }
 0x1f4   : > { %v7922_v49 = vpop.f32.mrf.mxu0 }
 0x1f5   : > { %v4338_v31 = vadd.f32 %v7922_v49, %v4096_v26 }
 0x1f6   : > { %v7953_v62 = vpop.f32.mrf.mxu1  ;;  %v4311_v35 = vpop.f32.mrf.mxu0 }
 0x1f7   : > { %v10576_v47 = vadd.f32 %v7953_v62, %v4337_v9  ;;  %v4336_v33 = vadd.f32 %v4311_v35, %v4094_v22  ;;  %v4325_v9 = vadd.f32 %v10536_v37, %v10508_v10  ;;  %v4326_v35 = vadd.f32 %v10540_v60, %v10513_v27 }
 0x1f8   : > { %v4733_v23 = vpop.f32.mrf.mxu1  ;;  %v4324_v37 = vadd.f32 %v10544_v20, %v10516_v8 }
 0x1f9   : > { %v10578_v59 = vadd.f32 %v4733_v23, %v4335_v30  ;;  %v4323_v30 = vadd.f32 %v10538_v28, %v10510_v32 }
 0x1fa   : > { %v7973_v38 = vpop.f32.mrf.mxu0  ;;  %v7954_v41 = vpop.f32.mrf.mxu1  ;;  %v4749_v60 = vadd.f32 %v10554_v4, %v4324_v37 }
 0x1fb   : > { %v10580_v50 = vadd.f32 %v7954_v41, %v4338_v31  ;;  %v4750_v31 = vadd.f32 %v10542_v34, %v4325_v9  ;;  %v4748_v10 = vadd.f32 %v10546_v63, %v4323_v30  ;;  %v4329_v63 = vadd.f32 %v10548_v61, %v10519_v0 }
 0x1fc   : > { %v4982_v18 = vpop.f32.mrf.mxu0  ;;  %v4736_v2 = vpop.f32.mrf.mxu1  ;;  %v4330_v0 = vadd.f32 %v10556_v21, %v10525_v29 }
 0x1fd   : > { %11001 = vst [vmem:[#allocation9_spill] sm:$0xff] %v10580_v50  ;;  %v10582_v54 = vadd.f32 %v4736_v2, %v4336_v33  ;;  %v5047_v41 = vadd.f32 %v7973_v38, %v4750_v31  ;;  %v4751_v2 = vadd.f32 %v10550_v55, %v4326_v35  ;;  %v5045_v34 = vadd.f32 %v4982_v18, %v4748_v10 }
 0x1fe   : > { %v7974_v44 = vpop.f32.mrf.mxu0  ;;  %v8005_v58 = vpop.f32.mrf.mxu1  ;;  %v4327_v55 = vadd.f32 %v10552_v19, %v10522_v11  ;;  %v4328_v19 = vadd.f32 %v10560_v6, %v10528_v17 }
 0x1ff   : > { %11002 = vst [vmem:[#allocation10_spill] sm:$0xff] %v10582_v54  ;;  %v5289_v54 = vadd.f32 %v8005_v58, %v5047_v41  ;;  %v5048_v50 = vadd.f32 %v7974_v44, %v4751_v2  ;;  %v4754_v44 = vadd.f32 %v10558_v46, %v4329_v63  ;;  %v4755_v46 = vadd.f32 %v10564_v15, %v4330_v0 }
 0x200   : > { %v4985_v5 = vpop.f32.mrf.mxu0  ;;  %v5224_v13 = vpop.f32.mrf.mxu1  ;;  %v4752_v11 = vadd.f32 %v10562_v51, %v4327_v55  ;;  %v4753_v17 = vadd.f32 %v10566_v42, %v4328_v19 }
 0x201   : > { %v5287_v38 = vadd.f32 %v5224_v13, %v5045_v34  ;;  %v5046_v30 = vadd.f32 %v4985_v5, %v4749_v60 }
 0x202   : > { %v7977_v26 = vpop.f32.mrf.mxu0  ;;  %v8006_v36 = vpop.f32.mrf.mxu1 }
 0x203   : > { %v5290_v4 = vadd.f32 %v8006_v36, %v5048_v50  ;;  %v5051_v37 = vadd.f32 %v7977_v26, %v4754_v44 }
 0x204   : > { %v4998_v45 = vpop.f32.mrf.mxu0  ;;  %v5227_v48 = vpop.f32.mrf.mxu1 }
 0x205   : > { %v5288_v5 = vadd.f32 %v5227_v48, %v5046_v30  ;;  %v5049_v48 = vadd.f32 %v4998_v45, %v4752_v11 }
 0x206   : > { %v10584_v57 = vpop.f32.mrf.mxu0  ;;  %v10586_v22 = vpop.f32.mrf.mxu1 }
 0x207   : > { %v5293_v6 = vadd.f32 %v10586_v22, %v5051_v37  ;;  %v5052_v26 = vadd.f32 %v10584_v57, %v4755_v46 }
 0x208   : > { %v10588_v7 = vpop.f32.mrf.mxu0  ;;  %v10590_v52 = vpop.f32.mrf.mxu1 }
 0x209   : > { %v5291_v45 = vadd.f32 %v10590_v52, %v5049_v48  ;;  %v5050_v60 = vadd.f32 %v10588_v7, %v4753_v17 }
 0x20a   : > { %v10592_v39 = vpop.f32.mrf.mxu0  ;;  %v10594_v3 = vpop.f32.mrf.mxu1 }
 0x20b   : > { %v5294_v30 = vadd.f32 %v10594_v3, %v5052_v26 }
 0x20c   : > { %v10596_v43 = vpop.f32.mrf.mxu0  ;;  %v10598_v25 = vpop.f32.mrf.mxu1 }
 0x20d   : > { %v5292_v44 = vadd.f32 %v10598_v25, %v5050_v60 }
 0x20e   : > { %v10600_v16 = vpop.f32.mrf.mxu0  ;;  %v10602_v53 = vpop.f32.mrf.mxu1 }
 0x210   : > { %v10606_v56 = vpop.f32.mrf.mxu0  ;;  %v10608_v24 = vpop.f32.mrf.mxu1 }
 0x212   : > { %v10612_v49 = vpop.f32.mrf.mxu0  ;;  %v10614_v62 = vpop.f32.mrf.mxu1 }
 0x214   : > { %v10619_v23 = vpop.f32.mrf.mxu0  ;;  %v10621_v33 = vpop.f32.mrf.mxu1 }
 0x216   : > { %v10626_v32 = vpop.f32.mrf.mxu0  ;;  %v10628_v28 = vpop.f32.mrf.mxu1 }
 0x218   : > { %v10631_v9 = vpop.f32.mrf.mxu0  ;;  %v10633_v27 = vpop.f32.mrf.mxu1 }
 0x21a   : > { %v10638_v8 = vpop.f32.mrf.mxu1  ;;  %v8037_v20 = vpop.f32.mrf.mxu0 }
 0x21b   : > { %v5714_v31 = vadd.f32 %v8037_v20, %v5289_v54 }
 0x21c   : > { %v10642_v18 = vpop.f32.mrf.mxu1  ;;  %v5649_v35 = vpop.f32.mrf.mxu0 }
 0x21d   : > { %v5712_v58 = vadd.f32 %v5649_v35, %v5287_v38 }
 0x21e   : > { %v8038_v10 = vpop.f32.mrf.mxu0 }
 0x21f   : > { %v8069_v61 = vpop.f32.mrf.mxu1  ;;  %v5715_v13 = vadd.f32 %v8038_v10, %v5290_v4 }
 0x220   : > { %v6011_v54 = vadd.f32 %v8069_v61, %v5714_v31  ;;  %v5652_v36 = vpop.f32.mrf.mxu0 }
 0x221   : > { %v5946_v50 = vpop.f32.mrf.mxu1  ;;  %v5713_v21 = vadd.f32 %v5652_v36, %v5288_v5 }
 0x222   : > { %6027 = vst [vmem:[%s10372_s5 + $0x90] sm:$0xff] %v6011_v54  ;;  %6107 = vst.msk [vmem:[%s8428_s29 + $0x90] sm:$0xff] %vm3172_vm6, %v6011_v54  ;;  %v6009_v29 = vadd.f32 %v5946_v50, %v5712_v58  ;;  %v6068_v52 = vmul.f32 %v6011_v54, %v6011_v54 }
 0x223   : > { %v8070_v41 = vpop.f32.mrf.mxu1 }
 0x224   : > { %6025 = vst [vmem:[%s10372_s5 + $0x80] sm:$0xff] %v6009_v29  ;;  %6105 = vst.msk [vmem:[%s8428_s29 + $0x80] sm:$0xff] %vm3172_vm6, %v6009_v29  ;;  %v6012_v51 = vadd.f32 %v8070_v41, %v5715_v13  ;;  %v8041_v15 = vpop.f32.mrf.mxu0  ;;  %v6066_v38 = vmul.f32 %v6009_v29, %v6009_v29 }
 0x225   : > { %v5949_v2 = vpop.f32.mrf.mxu1  ;;  %v5718_v63 = vadd.f32 %v8041_v15, %v5293_v6  ;;  %v5056_v15 = vadd.f32 %v10600_v16, %v10572_v12 }
 0x226   : > { %6028 = vst [vmem:[%s10372_s5 + $0x98] sm:$0xff] %v6012_v51  ;;  %6108 = vst.msk [vmem:[%s8428_s29 + $0x98] sm:$0xff] %vm3172_vm6, %v6012_v51  ;;  %v6010_v34 = vadd.f32 %v5949_v2, %v5713_v21  ;;  %v5665_v57 = vpop.f32.mrf.mxu0  ;;  %v6069_v3 = vmul.f32 %v6012_v51, %v6012_v51  ;;  %v5055_v21 = vadd.f32 %v10592_v39, %v10568_v40 }
 0x227   : > { %v8073_v20 = vpop.f32.mrf.mxu1  ;;  %v5716_v55 = vadd.f32 %v5665_v57, %v5291_v45 }
 0x228   : > { %6026 = vst [vmem:[%s10372_s5 + $0x88] sm:$0xff] %v6010_v34  ;;  %v6042_v42 = vadd.f32 %v6010_v34, %v6009_v29  ;;  %v6067_v22 = vmul.f32 %v6010_v34, %v6010_v34  ;;  %6106 = vst.msk [vmem:[%s8428_s29 + $0x88] sm:$0xff] %vm3172_vm6, %v6010_v34  ;;  %v6015_v31 = vadd.f32 %v8073_v20, %v5718_v63  ;;  %v8042_v58 = vpop.f32.mrf.mxu0 }
 0x229   : > { %v5962_v35 = vpop.f32.mrf.mxu1  ;;  %v5719_v61 = vadd.f32 %v8042_v58, %v5294_v30  ;;  %v5297_v34 = vadd.f32 %v10602_v53, %v5055_v21  ;;  %v5057_v58 = vadd.f32 %v10619_v23, %v10578_v59 }
 0x22a   : > { %v6043_v7 = vadd.f32 %v6042_v42, %v6011_v54  ;;  %v6082_v4 = vadd.f32 %v6067_v22, %v6066_v38  ;;  %6031 = vst [vmem:[%s10372_s5 + $0xb0] sm:$0xff] %v6015_v31  ;;  %6111 = vst.msk [vmem:[%s8428_s29 + $0xb0] sm:$0xff] %vm3172_vm6, %v6015_v31  ;;  %v6013_v0 = vadd.f32 %v5962_v35, %v5716_v55  ;;  %v5668_v11 = vpop.f32.mrf.mxu0 }
 0x22b   : > { %v8074_v10 = vpop.f32.mrf.mxu1  ;;  %v5717_v19 = vadd.f32 %v5668_v11, %v5292_v44  ;;  %v6072_v17 = vmul.f32 %v6015_v31, %v6015_v31  ;;  %v5298_v42 = vadd.f32 %v10614_v62, %v5056_v15 }
 0x22c   : > { %v6083_v5 = vadd.f32 %v6082_v4, %v6068_v52  ;;  %v6044_v13 = vadd.f32 %v6043_v7, %v6012_v51  ;;  %6029 = vst [vmem:[%s10372_s5 + $0xa0] sm:$0xff] %v6013_v0  ;;  %6109 = vst.msk [vmem:[%s8428_s29 + $0xa0] sm:$0xff] %vm3172_vm6, %v6013_v0  ;;  %v6016_v54 = vadd.f32 %v8074_v10, %v5719_v61  ;;  %v11003_v10 = vld [vmem:[#allocation9_spill] sm:$0xff] }
 0x22d   : > { %v6070_v37 = vmul.f32 %v6013_v0, %v6013_v0  ;;  %v5965_v36 = vpop.f32.mrf.mxu1  ;;  %v5053_v51 = vadd.f32 %v10596_v43, %v10570_v1  ;;  %v5054_v1 = vadd.f32 %v10606_v56, %v10574_v14  ;;  %v5059_v52 = vadd.f32 %v10612_v49, %v10576_v47 }
 0x22e   : > { %v6045_v25 = vadd.f32 %v6044_v13, %v6013_v0  ;;  %v6084_v50 = vadd.f32 %v6083_v5, %v6069_v3  ;;  %6032 = vst [vmem:[%s10372_s5 + $0xb8] sm:$0xff] %v6016_v54  ;;  %6112 = vst.msk [vmem:[%s8428_s29 + $0xb8] sm:$0xff] %vm3172_vm6, %v6016_v54  ;;  %v6014_v29 = vadd.f32 %v5965_v36, %v5717_v19  ;;  %v11004_v19 = vld [vmem:[#allocation10_spill] sm:$0xff] }
 0x22f   : > { %v6073_v45 = vmul.f32 %v6016_v54, %v6016_v54  ;;  %v5295_v20 = vadd.f32 %v10608_v24, %v5053_v51  ;;  %v5296_v30 = vadd.f32 %v10621_v33, %v5054_v1  ;;  %v5301_v61 = vadd.f32 %v10628_v28, %v5059_v52  ;;  %v6065_v52 = vld [vmem:[#allocation4] sm:$0x1] }
 0x230   : > { %v6085_v46 = vadd.f32 %v6084_v50, %v6070_v37  ;;  %6030 = vst [vmem:[%s10372_s5 + $0xa8] sm:$0xff] %v6014_v29  ;;  %v6046_v48 = vadd.f32 %v6045_v25, %v6014_v29  ;;  %v6071_v41 = vmul.f32 %v6014_v29, %v6014_v29  ;;  %6110 = vst.msk [vmem:[%s8428_s29 + $0xa8] sm:$0xff] %vm3172_vm6, %v6014_v29 }
 0x231   : > { %v8077_v2 = vpop.f32.mrf.mxu1  ;;  %v5060_v3 = vadd.f32 %v10626_v32, %v11003_v10  ;;  %v5058_v59 = vadd.f32 %v10631_v9, %v11004_v19 }
 0x232   : > { %v6047_v6 = vadd.f32 %v6046_v48, %v6015_v31  ;;  %v6086_v26 = vadd.f32 %v6085_v46, %v6071_v41 }
 0x233   : > { %v8045_v39 = vpop.f32.mrf.mxu0  ;;  %v5978_v60 = vpop.f32.mrf.mxu1  ;;  %v5302_v32 = vadd.f32 %v10638_v8, %v5060_v3  ;;  %v5300_v41 = vadd.f32 %v10642_v18, %v5058_v59 }
 0x234   : > { %v6087_v40 = vadd.f32 %v6086_v26, %v6072_v17  ;;  %v6048_v63 = vadd.f32 %v6047_v6, %v6016_v54  ;;  %v5722_v43 = vadd.f32 %v8045_v39, %v5297_v34  ;;  %v5299_v54 = vadd.f32 %v10633_v27, %v5057_v58 }
 0x235   : > { %v5681_v38 = vpop.f32.mrf.mxu0  ;;  %v8078_v57 = vpop.f32.mrf.mxu1 }
 0x236   : > { %v6088_v53 = vadd.f32 %v6087_v40, %v6073_v45  ;;  %v6019_v12 = vadd.f32 %v8077_v2, %v5722_v43  ;;  %v5720_v16 = vadd.f32 %v5681_v38, %v5295_v20 }
 0x237   : > { %v8046_v22 = vpop.f32.mrf.mxu0  ;;  %v5981_v33 = vpop.f32.mrf.mxu1 }
 0x238   : > { %6035 = vst [vmem:[%s10372_s5 + $0xd0] sm:$0xff] %v6019_v12  ;;  %6115 = vst.msk [vmem:[%s8428_s29 + $0xd0] sm:$0xff] %vm3172_vm6, %v6019_v12  ;;  %v6017_v24 = vadd.f32 %v5978_v60, %v5720_v16  ;;  %v5723_v14 = vadd.f32 %v8046_v22, %v5298_v42  ;;  %v6076_v49 = vmul.f32 %v6019_v12, %v6019_v12 }
 0x239   : > { %v5684_v56 = vpop.f32.mrf.mxu0 }
 0x23a   : > { %6033 = vst [vmem:[%s10372_s5 + $0xc0] sm:$0xff] %v6017_v24  ;;  %v6049_v31 = vadd.f32 %v6048_v63, %v6017_v24  ;;  %v6074_v55 = vmul.f32 %v6017_v24, %v6017_v24  ;;  %6113 = vst.msk [vmem:[%s8428_s29 + $0xc0] sm:$0xff] %vm3172_vm6, %v6017_v24  ;;  %v6020_v62 = vadd.f32 %v8078_v57, %v5723_v14 }
 0x23b   : > { %v5721_v35 = vadd.f32 %v5684_v56, %v5296_v30 }
 0x23c   : > { %v6089_v7 = vadd.f32 %v6088_v53, %v6074_v55  ;;  %6036 = vst [vmem:[%s10372_s5 + $0xd8] sm:$0xff] %v6020_v62  ;;  %6116 = vst.msk [vmem:[%s8428_s29 + $0xd8] sm:$0xff] %vm3172_vm6, %v6020_v62  ;;  %v6077_v37 = vmul.f32 %v6020_v62, %v6020_v62  ;;  %v6041_v55 = vld [vmem:[#allocation3] sm:$0x1] }
 0x23d   : > { %v6018_v4 = vadd.f32 %v5981_v33, %v5721_v35 }
 0x23e   : > { %v8081_v47 = vpop.f32.mrf.mxu1 }
 0x23f   : > { %6034 = vst [vmem:[%s10372_s5 + $0xc8] sm:$0xff] %v6018_v4  ;;  %v6050_v44 = vadd.f32 %v6049_v31, %v6018_v4  ;;  %v6075_v0 = vmul.f32 %v6018_v4, %v6018_v4  ;;  %6114 = vst.msk [vmem:[%s8428_s29 + $0xc8] sm:$0xff] %vm3172_vm6, %v6018_v4 }
 0x240   : > { %v8049_v11 = vpop.f32.mrf.mxu0  ;;  %v5994_v25 = vpop.f32.mrf.mxu1 }
 0x241   : > { %v6051_v5 = vadd.f32 %v6050_v44, %v6019_v12  ;;  %v6090_v13 = vadd.f32 %v6089_v7, %v6075_v0  ;;  %v5726_v23 = vadd.f32 %v8049_v11, %v5301_v61 }
 0x242   : > { %v5697_v50 = vpop.f32.mrf.mxu0  ;;  %v8082_v27 = vpop.f32.mrf.mxu1 }
 0x243   : > { %v6091_v28 = vadd.f32 %v6090_v13, %v6076_v49  ;;  %v6052_v36 = vadd.f32 %v6051_v5, %v6020_v62  ;;  %v6023_v29 = vadd.f32 %v8081_v47, %v5726_v23  ;;  %v5724_v21 = vadd.f32 %v5697_v50, %v5299_v54 }
 0x244   : > { %v8050_v48 = vpop.f32.mrf.mxu0  ;;  %v5997_v34 = vpop.f32.mrf.mxu1 }
 0x245   : > { %v6092_v46 = vadd.f32 %v6091_v28, %v6077_v37  ;;  %6039 = vst [vmem:[%s10372_s5 + $0xf0] sm:$0xff] %v6023_v29  ;;  %6119 = vst.msk [vmem:[%s8428_s29 + $0xf0] sm:$0xff] %vm3172_vm6, %v6023_v29  ;;  %v6021_v9 = vadd.f32 %v5994_v25, %v5724_v21  ;;  %v5727_v51 = vadd.f32 %v8050_v48, %v5302_v32 }
 0x246   : > { %v5700_v17 = vpop.f32.mrf.mxu0  ;;  %v6080_v39 = vmul.f32 %v6023_v29, %v6023_v29 }
 0x247   : > { %6037 = vst [vmem:[%s10372_s5 + $0xe0] sm:$0xff] %v6021_v9  ;;  %v6053_v6 = vadd.f32 %v6052_v36, %v6021_v9  ;;  %v6078_v8 = vmul.f32 %v6021_v9, %v6021_v9  ;;  %6117 = vst.msk [vmem:[%s8428_s29 + $0xe0] sm:$0xff] %vm3172_vm6, %v6021_v9  ;;  %v6024_v26 = vadd.f32 %v8082_v27, %v5727_v51 }
 0x248   : > { %v5725_v2 = vadd.f32 %v5700_v17, %v5300_v41 }
 0x249   : > { %v6093_v15 = vadd.f32 %v6092_v46, %v6078_v8  ;;  %6040 = vst [vmem:[%s10372_s5 + $0xf8] sm:$0xff] %v6024_v26  ;;  %6120 = vst.msk [vmem:[%s8428_s29 + $0xf8] sm:$0xff] %vm3172_vm6, %v6024_v26  ;;  %v6081_v20 = vmul.f32 %v6024_v26, %v6024_v26 }
 0x24a   : > { %v6022_v18 = vadd.f32 %v5997_v34, %v5725_v2 }
 0x24c   : > { %6038 = vst [vmem:[%s10372_s5 + $0xe8] sm:$0xff] %v6022_v18  ;;  %v6054_v45 = vadd.f32 %v6053_v6, %v6022_v18  ;;  %v6079_v40 = vmul.f32 %v6022_v18, %v6022_v18  ;;  %6118 = vst.msk [vmem:[%s8428_s29 + $0xe8] sm:$0xff] %vm3172_vm6, %v6022_v18 }
 0x24e   : > { %v6055_v60 = vadd.f32 %v6054_v45, %v6023_v29  ;;  %v6094_v63 = vadd.f32 %v6093_v15, %v6079_v40 }
 0x250   : > { %v6056_v1 = vadd.f32 %v6055_v60, %v6024_v26  ;;  %v6095_v43 = vadd.f32 %v6094_v63, %v6080_v39 }
 0x252   : > { %v6057_v38 = vrot.slane %v6056_v1, 4  ;;  %v6096_v53 = vadd.f32 %v6095_v43, %v6081_v20 }
 0x254   : > { %v6058_v42 = vadd.f32 %v6057_v38, %v6056_v1  ;;  %v6097_v12 = vrot.slane %v6096_v53, 4 }
 0x256   : > { %v6059_v16 = vrot.slane %v6058_v42, 2  ;;  %v6098_v22 = vadd.f32 %v6097_v12, %v6096_v53 }
 0x258   : > { %v6060_v57 = vadd.f32 %v6059_v16, %v6058_v42  ;;  %v6099_v30 = vrot.slane %v6098_v22, 2 }
 0x25a   : > { %v6061_v24 = vrot.slane %v6060_v57, 1  ;;  %v6100_v14 = vadd.f32 %v6099_v30, %v6098_v22 }
 0x25c   : > { %v6062_v56 = vadd.f32 %v6061_v24, %v6060_v57  ;;  %v6101_v31 = vrot.slane %v6100_v14, 1 }
 0x25e   : > { %v6063_v62 = vadd.f32 %v6062_v56, %v6041_v55  ;;  %v6102_v35 = vadd.f32 %v6101_v31, %v6100_v14 }
 0x260   : > { %6064 = vst [vmem:[#allocation3] sm:$0x1] %v6063_v62  ;;  %v6103_v33 = vadd.f32 %v6102_v35, %v6065_v52 }
 0x262   : > { %6104 = vst [vmem:[#allocation4] sm:$0x1] %v6103_v33 }
 0x263 PF: > { %p7214_p11 = scmp.ne.s32.totalorder %s8345_s16, 1 }
 0x264   : > { %s7215_s7 = sshll.u32 (!%p7214_p11), %s8341_s15, 8 }
 0x265   : > { %6124 = sbr.rel (%p7214_p11) target bundleno = 677 (0x2a5), region = 48  ;;  %s10738_s11 = scalar_lea.vmem (!%p7214_p11), [#allocation2], %s7215_s7 }
 0x26a   : > { %v6125_v7 = vld [vmem:[#allocation3] sm:$0x1]  ;;  %v6127_v4 = vld [vmem:[#allocation4] sm:$0x1]  ;;  %v6158_v47 = vlaneseq  ;;  %v6142_v23 = vld [vmem:[%s10738_s11 + $0x8] sm:$0xff]  ;;  %vm6217_vm7 = vcmask 64512  }
 0x26b   : > { %v6126_v58 = vmul.f32 0.001953125, %v6125_v7  ;;  %v6128_v44 = vmul.f32 0.001953125, %v6127_v4  ;;  %v6132_v5 = vld [vmem:[%s10921_s2] sm:$0x1]  ;;  %v6143_v25 = vld [vmem:[%s10738_s11 + $0x10] sm:$0xff]  ;;  %v6144_v37 = vld [vmem:[%s10738_s11 + $0x18] sm:$0xff] }
 0x26c   : > { %v6159_v49 = vshrl.u32 %v6158_v47, 7  ;;  %v6136_v19 = vld [vmem:[%s10922_s3] sm:$0x1]  ;;  %v6146_v32 = vld [vmem:[%s10738_s11 + $0x28] sm:$0xff]  ;;  %v6147_v29 = vld [vmem:[%s10738_s11 + $0x30] sm:$0xff] }
 0x26d   : > { %v6129_v0 = vmul.f32 %v6126_v58, %v6126_v58  ;;  %v6141_v59 = vld [vmem:[%s10738_s11] sm:$0xff]  ;;  %v6148_v21 = vld [vmem:[%s10738_s11 + $0x38] sm:$0xff]  ;;  %v6150_v48 = vld [vmem:[%s10738_s11 + $0x48] sm:$0xff] }
 0x26e   : > { %v6160_v13 = vsub.s32 0, %v6159_v49  ;;  %v6145_v28 = vld [vmem:[%s10738_s11 + $0x20] sm:$0xff]  ;;  %v6151_v27 = vld [vmem:[%s10738_s11 + $0x50] sm:$0xff]  ;;  %v6152_v6 = vld [vmem:[%s10738_s11 + $0x58] sm:$0xff] }
 0x26f   : > { %v6130_v61 = vsub.f32 %v6128_v44, %v6129_v0  ;;  %v6149_v46 = vld [vmem:[%s10738_s11 + $0x40] sm:$0xff]  ;;  %v6154_v26 = vld [vmem:[%s10738_s11 + $0x68] sm:$0xff]  ;;  %v6155_v55 = vld [vmem:[%s10738_s11 + $0x70] sm:$0xff] }
 0x270   : > { %v6153_v8 = vld [vmem:[%s10738_s11 + $0x60] sm:$0xff]  ;;  %v6156_v62 = vld [vmem:[%s10738_s11 + $0x78] sm:$0xff] }
 0x271   : > { %v6131_v10 = vmax.f32 %v6130_v61, 0.0  ;;  %v6234_v61 = vld [vmem:[%s10738_s11 + $0x80] sm:$0xff] }
 0x273   : > { %v6133_v3 = vadd.f32 1e-05, %v6131_v10 }
 0x275   : > { %8317 = vrsqrt.f32 %v6133_v3 }
 0x282   : > { %v8318_v11 = vpop.eup %8317 }
 0x283   : > { %v6135_v54 = vmul.f32 %v8318_v11, %v6132_v5  ;;  %v6235_v5 = vld [vmem:[%s10738_s11 + $0x88] sm:$0xff]  ;;  %v6237_v11 = vld [vmem:[%s10738_s11 + $0x98] sm:$0xff] }
 0x285   : > { %v6137_v50 = vmul.f32 %v6135_v54, %v6126_v58  ;;  %v10745_v36 = vrot.slane %v6135_v54, %v6160_v13 }
 0x287   : > { %v6138_v41 = vsub.f32 %v6136_v19, %v6137_v50  ;;  %v6163_v9 = vmul.f32 %v10745_v36, %v6141_v59  ;;  %v6164_v51 = vmul.f32 %v10745_v36, %v6142_v23  ;;  %v6165_v17 = vmul.f32 %v10745_v36, %v6143_v25  ;;  %v6238_v25 = vld [vmem:[%s10738_s11 + $0xa0] sm:$0xff] }
 0x288   : > { %v6166_v2 = vmul.f32 %v10745_v36, %v6144_v37  ;;  %v6167_v34 = vmul.f32 %v10745_v36, %v6145_v28  ;;  %v6168_v15 = vmul.f32 %v10745_v36, %v6146_v32  ;;  %v6169_v18 = vmul.f32 %v10745_v36, %v6147_v29  ;;  %v6239_v37 = vld [vmem:[%s10738_s11 + $0xa8] sm:$0xff] }
 0x289   : > { %v10763_v45 = vrot.slane %v6138_v41, %v6160_v13  ;;  %v6170_v40 = vmul.f32 %v10745_v36, %v6148_v21  ;;  %v6171_v39 = vmul.f32 %v10745_v36, %v6149_v46  ;;  %v6172_v60 = vmul.f32 %v10745_v36, %v6150_v48  ;;  %v6236_v13 = vld [vmem:[%s10738_s11 + $0x90] sm:$0xff] }
 0x28a   : > { %v6173_v63 = vmul.f32 %v10745_v36, %v6151_v27  ;;  %v6174_v20 = vmul.f32 %v10745_v36, %v6152_v6  ;;  %v6175_v1 = vmul.f32 %v10745_v36, %v6153_v8  ;;  %v6176_v43 = vmul.f32 %v10745_v36, %v6154_v26  ;;  %v6240_v41 = vld [vmem:[%s10738_s11 + $0xb0] sm:$0xff] }
 0x28b   : > { %v6185_v38 = vadd.f32 %v10763_v45, %v6163_v9  ;;  %v6186_v53 = vadd.f32 %v10763_v45, %v6164_v51  ;;  %v6187_v42 = vadd.f32 %v10763_v45, %v6165_v17  ;;  %v6188_v12 = vadd.f32 %v10763_v45, %v6166_v2  ;;  %v6241_v9 = vld [vmem:[%s10738_s11 + $0xb8] sm:$0xff] }
 0x28c   : > { %v6189_v16 = vadd.f32 %v10763_v45, %v6167_v34  ;;  %v6190_v22 = vadd.f32 %v10763_v45, %v6168_v15  ;;  %v6191_v57 = vadd.f32 %v10763_v45, %v6169_v18  ;;  %v6192_v30 = vadd.f32 %v10763_v45, %v6170_v40  ;;  %v6242_v18 = vld [vmem:[%s10738_s11 + $0xc0] sm:$0xff] }
 0x28d   : > { %v6201_v24 = vmax.f32 %v6185_v38, 0.0  ;;  %v6202_v14 = vmax.f32 %v6186_v53, 0.0  ;;  %v6203_v56 = vmax.f32 %v6187_v42, 0.0  ;;  %v6204_v31 = vmax.f32 %v6188_v12, 0.0 }
 0x28e   : > { %v6205_v35 = vmax.f32 %v6189_v16, 0.0  ;;  %v6206_v52 = vmax.f32 %v6190_v22, 0.0  ;;  %v6207_v33 = vmax.f32 %v6191_v57, 0.0  ;;  %v6208_v7 = vmax.f32 %v6192_v30, 0.0  ;;  %v6246_v16 = vld [vmem:[%s10738_s11 + $0xe0] sm:$0xff]  ;;  %v6247_v22 = vld [vmem:[%s10738_s11 + $0xe8] sm:$0xff] }
 0x28f   : > { %6218 = vst.msk [vmem:[%s8428_s29] sm:$0xff] %vm6217_vm7, %v6201_v24  ;;  %6219 = vst.msk [vmem:[%s8428_s29 + $0x8] sm:$0xff] %vm6217_vm7, %v6202_v14  ;;  %v6193_v4 = vadd.f32 %v10763_v45, %v6171_v39  ;;  %v6194_v58 = vadd.f32 %v10763_v45, %v6172_v60  ;;  %v6195_v44 = vadd.f32 %v10763_v45, %v6173_v63 }
 0x290   : > { %6220 = vst.msk [vmem:[%s8428_s29 + $0x10] sm:$0xff] %vm6217_vm7, %v6203_v56  ;;  %6221 = vst.msk [vmem:[%s8428_s29 + $0x18] sm:$0xff] %vm6217_vm7, %v6204_v31  ;;  %v6196_v0 = vadd.f32 %v10763_v45, %v6174_v20  ;;  %v6197_v10 = vadd.f32 %v10763_v45, %v6175_v1  ;;  %v6198_v3 = vadd.f32 %v10763_v45, %v6176_v43  ;;  %v6243_v20 = vld [vmem:[%s10738_s11 + $0xc8] sm:$0xff]  ;;  %v6244_v1 = vld [vmem:[%s10738_s11 + $0xd0] sm:$0xff] }
 0x291   : > { %6222 = vst.msk [vmem:[%s8428_s29 + $0x20] sm:$0xff] %vm6217_vm7, %v6205_v35  ;;  %6223 = vst.msk [vmem:[%s8428_s29 + $0x28] sm:$0xff] %vm6217_vm7, %v6206_v52  ;;  %v6177_v47 = vmul.f32 %v10745_v36, %v6155_v55  ;;  %v6178_v49 = vmul.f32 %v10745_v36, %v6156_v62  ;;  %v6209_v54 = vmax.f32 %v6193_v4, 0.0  ;;  %v6210_v19 = vmax.f32 %v6194_v58, 0.0  ;;  %v6245_v43 = vld [vmem:[%s10738_s11 + $0xd8] sm:$0xff]  ;;  %v6248_v35 = vld [vmem:[%s10738_s11 + $0xf0] sm:$0xff] }
 0x292   : > { %6224 = vst.msk [vmem:[%s8428_s29 + $0x30] sm:$0xff] %vm6217_vm7, %v6207_v33  ;;  %6225 = vst.msk [vmem:[%s8428_s29 + $0x38] sm:$0xff] %vm6217_vm7, %v6208_v7  ;;  %v6211_v59 = vmax.f32 %v6195_v44, 0.0  ;;  %v6212_v23 = vmax.f32 %v6196_v0, 0.0  ;;  %v6213_v28 = vmax.f32 %v6197_v10, 0.0  ;;  %v6214_v50 = vmax.f32 %v6198_v3, 0.0 }
 0x293   : > { %v6199_v32 = vadd.f32 %v10763_v45, %v6177_v47  ;;  %v6200_v29 = vadd.f32 %v10763_v45, %v6178_v49  ;;  %6226 = vst.msk [vmem:[%s8428_s29 + $0x40] sm:$0xff] %vm6217_vm7, %v6209_v54  ;;  %6227 = vst.msk [vmem:[%s8428_s29 + $0x48] sm:$0xff] %vm6217_vm7, %v6210_v19  ;;  %v6250_v21 = vmul.f32 %v6234_v61, %v10745_v36  ;;  %v6249_v52 = vld [vmem:[%s10738_s11 + $0xf8] sm:$0xff] }
 0x294   : > { %6228 = vst.msk [vmem:[%s8428_s29 + $0x50] sm:$0xff] %vm6217_vm7, %v6211_v59  ;;  %6229 = vst.msk [vmem:[%s8428_s29 + $0x58] sm:$0xff] %vm6217_vm7, %v6212_v23  ;;  %v6251_v46 = vmul.f32 %v6235_v5, %v10745_v36  ;;  %v6252_v48 = vmul.f32 %v6236_v13, %v10745_v36  ;;  %v6253_v27 = vmul.f32 %v6237_v11, %v10745_v36 }
 0x295   : > { %6230 = vst.msk [vmem:[%s8428_s29 + $0x60] sm:$0xff] %vm6217_vm7, %v6213_v28  ;;  %6231 = vst.msk [vmem:[%s8428_s29 + $0x68] sm:$0xff] %vm6217_vm7, %v6214_v50  ;;  %v6215_v51 = vmax.f32 %v6199_v32, 0.0  ;;  %v6216_v17 = vmax.f32 %v6200_v29, 0.0  ;;  %v6254_v6 = vmul.f32 %v6238_v25, %v10745_v36  ;;  %v6255_v8 = vmul.f32 %v6239_v37, %v10745_v36 }
 0x296   : > { %v6266_v26 = vadd.f32 %v6250_v21, %v10763_v45  ;;  %v6267_v2 = vadd.f32 %v6251_v46, %v10763_v45  ;;  %v6268_v34 = vadd.f32 %v6252_v48, %v10763_v45  ;;  %v6269_v15 = vadd.f32 %v6253_v27, %v10763_v45 }
 0x297   : > { %6232 = vst.msk [vmem:[%s8428_s29 + $0x70] sm:$0xff] %vm6217_vm7, %v6215_v51  ;;  %6233 = vst.msk [vmem:[%s8428_s29 + $0x78] sm:$0xff] %vm6217_vm7, %v6216_v17  ;;  %v6270_v40 = vadd.f32 %v6254_v6, %v10763_v45  ;;  %v6271_v39 = vadd.f32 %v6255_v8, %v10763_v45  ;;  %v6256_v60 = vmul.f32 %v6240_v41, %v10745_v36 }
 0x298   : > { %v6257_v63 = vmul.f32 %v6241_v9, %v10745_v36  ;;  %v6282_v38 = vmax.f32 %v6266_v26, 0.0  ;;  %v6283_v53 = vmax.f32 %v6267_v2, 0.0  ;;  %v6284_v42 = vmax.f32 %v6268_v34, 0.0 }
 0x299   : > { %v6285_v12 = vmax.f32 %v6269_v15, 0.0  ;;  %v6286_v57 = vmax.f32 %v6270_v40, 0.0  ;;  %v6287_v30 = vmax.f32 %v6271_v39, 0.0  ;;  %v6272_v24 = vadd.f32 %v6256_v60, %v10763_v45 }
 0x29a   : > { %v6273_v14 = vadd.f32 %v6257_v63, %v10763_v45  ;;  %6298 = vst.msk [vmem:[%s8428_s29 + $0x80] sm:$0xff] %vm6217_vm7, %v6282_v38  ;;  %6299 = vst.msk [vmem:[%s8428_s29 + $0x88] sm:$0xff] %vm6217_vm7, %v6283_v53  ;;  %v6258_v56 = vmul.f32 %v6242_v18, %v10745_v36  ;;  %v6259_v31 = vmul.f32 %v6243_v20, %v10745_v36 }
 0x29b   : > { %6300 = vst.msk [vmem:[%s8428_s29 + $0x90] sm:$0xff] %vm6217_vm7, %v6284_v42  ;;  %6301 = vst.msk [vmem:[%s8428_s29 + $0x98] sm:$0xff] %vm6217_vm7, %v6285_v12  ;;  %v6260_v55 = vmul.f32 %v6244_v1, %v10745_v36  ;;  %v6261_v62 = vmul.f32 %v6245_v43, %v10745_v36  ;;  %v6288_v33 = vmax.f32 %v6272_v24, 0.0  ;;  %v6262_v4 = vmul.f32 %v6246_v16, %v10745_v36 }
 0x29c   : > { %6302 = vst.msk [vmem:[%s8428_s29 + $0xa0] sm:$0xff] %vm6217_vm7, %v6286_v57  ;;  %6303 = vst.msk [vmem:[%s8428_s29 + $0xa8] sm:$0xff] %vm6217_vm7, %v6287_v30  ;;  %v6289_v7 = vmax.f32 %v6273_v14, 0.0  ;;  %v6263_v58 = vmul.f32 %v6247_v22, %v10745_v36  ;;  %v6274_v44 = vadd.f32 %v6258_v56, %v10763_v45  ;;  %v6275_v0 = vadd.f32 %v6259_v31, %v10763_v45 }
 0x29d   : > { %v6276_v61 = vadd.f32 %v6260_v55, %v10763_v45  ;;  %v6277_v10 = vadd.f32 %v6261_v62, %v10763_v45  ;;  %6304 = vst.msk [vmem:[%s8428_s29 + $0xb0] sm:$0xff] %vm6217_vm7, %v6288_v33  ;;  %v6278_v3 = vadd.f32 %v6262_v4, %v10763_v45  ;;  %v6264_v49 = vmul.f32 %v6248_v35, %v10745_v36 }
 0x29e   : > { %6305 = vst.msk [vmem:[%s8428_s29 + $0xb8] sm:$0xff] %vm6217_vm7, %v6289_v7  ;;  %v6279_v47 = vadd.f32 %v6263_v58, %v10763_v45  ;;  %v6265_v5 = vmul.f32 %v6249_v52, %v10745_v36  ;;  %v6290_v13 = vmax.f32 %v6274_v44, 0.0  ;;  %v6291_v11 = vmax.f32 %v6275_v0, 0.0 }
 0x29f   : > { %v6292_v54 = vmax.f32 %v6276_v61, 0.0  ;;  %v6293_v19 = vmax.f32 %v6277_v10, 0.0  ;;  %v6294_v59 = vmax.f32 %v6278_v3, 0.0  ;;  %v6280_v25 = vadd.f32 %v6264_v49, %v10763_v45 }
 0x2a0   : > { %v6295_v23 = vmax.f32 %v6279_v47, 0.0  ;;  %v6281_v37 = vadd.f32 %v6265_v5, %v10763_v45  ;;  %6306 = vst.msk [vmem:[%s8428_s29 + $0xc0] sm:$0xff] %vm6217_vm7, %v6290_v13  ;;  %6307 = vst.msk [vmem:[%s8428_s29 + $0xc8] sm:$0xff] %vm6217_vm7, %v6291_v11 }
 0x2a1   : > { %6308 = vst.msk [vmem:[%s8428_s29 + $0xd0] sm:$0xff] %vm6217_vm7, %v6292_v54  ;;  %6309 = vst.msk [vmem:[%s8428_s29 + $0xd8] sm:$0xff] %vm6217_vm7, %v6293_v19  ;;  %v6296_v36 = vmax.f32 %v6280_v25, 0.0 }
 0x2a2   : > { %6310 = vst.msk [vmem:[%s8428_s29 + $0xe0] sm:$0xff] %vm6217_vm7, %v6294_v59  ;;  %6311 = vst.msk [vmem:[%s8428_s29 + $0xe8] sm:$0xff] %vm6217_vm7, %v6295_v23  ;;  %v6297_v28 = vmax.f32 %v6281_v37, 0.0 }
 0x2a3   : > { %6312 = vst.msk [vmem:[%s8428_s29 + $0xf0] sm:$0xff] %vm6217_vm7, %v6296_v36 }
 0x2a4   : > { %6313 = vst.msk [vmem:[%s8428_s29 + $0xf8] sm:$0xff] %vm6217_vm7, %v6297_v28 }
 0x2a5 PF: > { %s14_s19 = sadd.s32 1, %s8357_s19   ;;  %s11005_s15 = smov %s8349_s17 }
 0x2a6   : > { %p11_p12 = scmp.ge.s32.totalorder %s14_s19, 6   ;;  %s11006_s16 = smov %s8353_s18 }
 0x2a7   : > { %s11007_s17 = smov %s11010_s20  ;;  %s11008_s18 = smov %s11014_s21 }
 0x2a8   :  { %13 = sbr.rel (!%p11_p12) target bundleno = 3 (0x3), region = 93 }

</bundles_post_ra>
